<compile_context>
chip_gen: v6e
topology: v6e:2x2x1
jax: 0.10.0
libtpu: 0.0.40
codegen_flags: <defaults>
</compile_context>

<pallas_src>
import functools

import jax
import jax.numpy as jnp
from jax.experimental import pallas as pl
from jax.experimental.pallas import tpu as pltpu


def _round_up(x, m):
    return ((x + m - 1) // m) * m


def _resblock_kernel(xs_ref, xr_ref, w1_ref, w2_ref, s1_ref, b1_ref, s2_ref,
                     b2_ref, o_ref, h1_ref, slab_ref, acc_ref,
                     *, th, w_img, wp, c1p):
    # xs_ref  : (1, TH+4, Wx, Cp)  bf16  input strip (2-row / 2-col zero halo)
    # xr_ref  : (1, TH, Wp, Cp)    bf16  residual rows (aligned, no halo)
    # w*_ref  : (9, Cp, Cp)        bf16  conv taps, t = dy*3+dx, (Cin, Cout)
    # s*/b*   : (1, Cp)            f32   folded BN scale / bias
    # o_ref   : (1, TH, Wp, Cp)    bf16  output strip
    # h1_ref  : (TH+2, C1p, Cp)    bf16  VMEM: hidden_1 strip + conv2 halo
    # slab_ref: (TH+4, C1p, Cp)    bf16  VMEM: dx-shifted slab staging
    # acc_ref : (TH+2, C1p, Cp)    f32   VMEM: matmul accumulator
    cp = o_ref.shape[3]
    r1 = th + 2
    s = pl.program_id(1)

    # ---- conv1 over the strip plus its 1-row halo.  dx hoisted: one
    #      column-realign slab copy per dx; dy row shifts are free
    #      leading-dim slices off the slab; f32 accumulation in VMEM.
    first = True
    for dx in range(3):
        slab_ref[...] = xs_ref[0, :, dx:dx + c1p, :]
        for dy in range(3):
            patch = slab_ref[dy:dy + r1, :, :]
            contrib = jnp.einsum('hwc,cd->hwd', patch, w1_ref[dy * 3 + dx],
                                 preferred_element_type=jnp.float32)
            if first:
                acc_ref[...] = contrib
                first = False
            else:
                acc_ref[...] += contrib

    # ---- bn1 (folded, f32) + relu; one aligned full-extent store.
    h1_ref[...] = jnp.maximum(acc_ref[...] * s1_ref[0] + b1_ref[0],
                              0.0).astype(jnp.bfloat16)

    # conv2 zero-pads hidden_1: zero only the halo rows / cols that fall
    # outside the image (border-only stores; interior stays as written).
    zc = jnp.zeros((r1, 1, cp), jnp.bfloat16)
    h1_ref[:, 0:1, :] = zc                              # image col -1
    h1_ref[:, w_img + 1:w_img + 2, :] = zc              # image col W
    zr = jnp.zeros((1, c1p, cp), jnp.bfloat16)

    @pl.when(s == 0)
    def _():
        h1_ref[0:1, :, :] = zr                          # image row -1

    @pl.when(s == pl.num_programs(1) - 1)
    def _():
        h1_ref[r1 - 1:r1, :, :] = zr                    # image row H

    # ---- conv2: same dx-hoisted structure, reusing the slab / acc scratch.
    first = True
    for dx in range(3):
        slab_ref[0:r1, 0:wp, :] = h1_ref[:, dx:dx + wp, :]
        for dy in range(3):
            patch = slab_ref[dy:dy + th, 0:wp, :]
            contrib = jnp.einsum('hwc,cd->hwd', patch, w2_ref[dy * 3 + dx],
                                 preferred_element_type=jnp.float32)
            if first:
                acc_ref[0:th, 0:wp, :] = contrib
                first = False
            else:
                acc_ref[0:th, 0:wp, :] += contrib

    # ---- bn2 (folded) + residual add + relu, f32 on the VPU; bf16 lane-dense store.
    h2 = acc_ref[0:th, 0:wp, :] * s2_ref[0] + b2_ref[0]
    res = xr_ref[0].astype(jnp.float32)
    o_ref[0] = jnp.maximum(res + h2, 0.0).astype(o_ref.dtype)


def residual_block(x_nchw, w1, w2, bn1, bn2, eps=2e-5, out_dtype=jnp.bfloat16):
    """x_nchw: (N, C, H, W) f32.  w1, w2: (C, C, 3, 3) (PyTorch OIHW).
    bn1/bn2: dicts with gamma, beta, running_mean, running_var, each (C,)."""
    N, C, H, W = x_nchw.shape

    Cp = max(128, _round_up(C, 128))        # lane-dense channel padding
    Wp = _round_up(W, 8)                    # output / residual width (sublane)
    C1p = _round_up(Wp + 2, 8)              # hidden_1 scratch width
    Wx = _round_up(C1p + 2, 8)              # input-strip width (incl. col halo)

    # Per-generation VMEM capacity (v5e/v6e: 128 MiB, v7x: 64 MiB).
    try:
        vmem_cap = int(pltpu.get_tpu_info().vmem_capacity_bytes)
    except Exception:
        vmem_cap = 64 << 20

    def vmem_bytes(th):
        xin = (th + 4) * Wx * Cp * 2            # bf16 input strip (x2 buffers)
        res = th * Wp * Cp * 2                  # bf16 residual strip (x2)
        out = th * Wp * Cp * 2                  # bf16 output strip (x2)
        h1 = (th + 2) * C1p * Cp * 2            # scratch
        slab = (th + 4) * C1p * Cp * 2          # scratch
        acc = (th + 2) * C1p * Cp * 4           # scratch
        wts = 2 * 9 * Cp * Cp * 2               # single-buffered taps
        bnv = 4 * Cp * 4
        return 2 * (xin + res + out) + h1 + slab + acc + wts + bnv

    # TH must divide H (so the image top/bottom land exactly on the first /
    # last strip's halo rows).  Prefer multiples of 8, keep the per-strip
    # blocks within ~60% of this generation's VMEM, and keep M = TH*W fed.
    budget = int(vmem_cap * 0.6)
    divisors = [d for d in range(1, H + 1) if H % d == 0]
    fitting = [d for d in divisors if vmem_bytes(d) <= budget] or [divisors[0]]
    mult8 = [d for d in fitting if d % 8 == 0]
    pool = mult8 if mult8 else fitting
    fed = [d for d in sorted(pool) if d * W >= 512]
    TH = fed[0] if fed else max(pool)
    S = H // TH

    vmem_limit = int(min(vmem_bytes(TH) + (8 << 20), vmem_cap))

    # NCHW -> NHWC.  Residual copy padded to (Wp, Cp); conv source zero-padded
    # by 2 rows / 2+ cols and unfolded into per-strip halo blocks so the
    # BlockSpec streams non-overlapping (TH+4)-row strips (the 4 halo rows per
    # strip are duplicated in HBM -- the price for strip-local, pipelined DMA).
    x = jnp.transpose(x_nchw, (0, 2, 3, 1))
    x_res = jnp.pad(x, ((0, 0), (0, 0), (0, Wp - W),
                        (0, Cp - C))).astype(jnp.bfloat16)
    x_pad = jnp.pad(x, ((0, 0), (2, 2), (2, Wx - W - 2),
                        (0, Cp - C))).astype(jnp.bfloat16)
    xs = jnp.stack([x_pad[:, s * TH:s * TH + TH + 4] for s in range(S)],
                   axis=1).reshape(N * S, TH + 4, Wx, Cp)

    # Conv weights (Cout, Cin, 3, 3) -> tap-major (9, Cp_in, Cp_out), bf16.
    def taps(w):
        wt = jnp.transpose(w, (2, 3, 1, 0)).reshape(9, C, C)
        return jnp.pad(wt, ((0, 0), (0, Cp - C), (0, Cp - C))).astype(jnp.bfloat16)

    w1t, w2t = taps(w1), taps(w2)

    # Fold eval-mode BN into per-channel f32 scale / bias (padded lanes -> 0).
    def fold(bn):
        scale = bn["gamma"] / jnp.sqrt(bn["running_var"] + eps)
        bias = bn["beta"] - bn["running_mean"] * scale
        scale = jnp.pad(scale, (0, Cp - C)).reshape(1, Cp).astype(jnp.float32)
        bias = jnp.pad(bias, (0, Cp - C)).reshape(1, Cp).astype(jnp.float32)
        return scale, bias

    s1, b1 = fold(bn1)
    s2, b2 = fold(bn2)

    # Constant-index blocks (weights / BN): fetch once, single buffer if the
    # installed Pallas supports pipeline_mode.
    buf1 = {}
    if hasattr(pl, "Buffered"):
        try:
            pl.BlockSpec((1, Cp), lambda n, s: (0, 0),
                         pipeline_mode=pl.Buffered(1))
            buf1 = {"pipeline_mode": pl.Buffered(1)}
        except TypeError:
            buf1 = {}

    kernel = functools.partial(_resblock_kernel, th=TH, w_img=W, wp=Wp, c1p=C1p)

    out = pl.pallas_call(
        kernel,
        out_shape=jax.ShapeDtypeStruct((N, H, Wp, Cp), out_dtype),
        grid_spec=pltpu.PrefetchScalarGridSpec(
            num_scalar_prefetch=0,
            grid=(N, S),
            in_specs=[
                # per-strip input block with its own halo (non-overlapping).
                pl.BlockSpec((1, TH + 4, Wx, Cp),
                             lambda n, s: (n * S + s, 0, 0, 0)),
                # residual rows, aligned, no halo.
                pl.BlockSpec((1, TH, Wp, Cp), lambda n, s: (n, s, 0, 0)),
                pl.BlockSpec((9, Cp, Cp), lambda n, s: (0, 0, 0), **buf1),
                pl.BlockSpec((9, Cp, Cp), lambda n, s: (0, 0, 0), **buf1),
                pl.BlockSpec((1, Cp), lambda n, s: (0, 0), **buf1),
                pl.BlockSpec((1, Cp), lambda n, s: (0, 0), **buf1),
                pl.BlockSpec((1, Cp), lambda n, s: (0, 0), **buf1),
                pl.BlockSpec((1, Cp), lambda n, s: (0, 0), **buf1),
            ],
            out_specs=pl.BlockSpec((1, TH, Wp, Cp), lambda n, s: (n, s, 0, 0)),
            scratch_shapes=[
                pltpu.VMEM((TH + 2, C1p, Cp), jnp.bfloat16),   # hidden_1
                pltpu.VMEM((TH + 4, C1p, Cp), jnp.bfloat16),   # dx slab
                pltpu.VMEM((TH + 2, C1p, Cp), jnp.float32),    # accumulator
            ]),
        compiler_params=pltpu.CompilerParams(
            dimension_semantics=("parallel", "parallel"),
            vmem_limit_bytes=vmem_limit),
    )(xs, x_res, w1t, w2t, s1, b1, s2, b2)

    # Drop padding; NHWC -> NCHW to match the PyTorch module's layout.
    return jnp.transpose(out[:, :, :W, :C], (0, 3, 1, 2))


def _reference(x, w1, w2, bn1, bn2, eps=2e-5):
    """Pure-JAX f32 reference of the PyTorch forward (eval-mode BN)."""
    def conv(a, w):
        return jax.lax.conv_general_dilated(
            a, w, window_strides=(1, 1), padding=((1, 1), (1, 1)),
            dimension_numbers=('NCHW', 'OIHW', 'NCHW'),
            precision=jax.lax.Precision.HIGHEST)

    def bn(a, p):
        scale = p["gamma"] / jnp.sqrt(p["running_var"] + eps)
        bias = p["beta"] - p["running_mean"] * scale
        return a * scale[None, :, None, None] + bias[None, :, None, None]

    h1 = jax.nn.relu(bn(conv(x, w1), bn1))
    h2 = bn(conv(h1, w2), bn2)
    return jax.nn.relu(x + h2)


if __name__ == "__main__":
    N, C, H, W = 2, 4, 16, 16
    key = jax.random.PRNGKey(0)
    kx, kw1, kw2, kg1, kb1, kg2, kb2 = jax.random.split(key, 7)

    x = jax.random.normal(kx, (N, C, H, W), dtype=jnp.float32)

    # Synthetic params; shapes match nn.Conv2d(C, C, 3, padding=1, bias=False).
    fan_in = C * 3 * 3
    bound = 1.0 / (fan_in ** 0.5)
    w1 = jax.random.uniform(kw1, (C, C, 3, 3), jnp.float32, -bound, bound)
    w2 = jax.random.uniform(kw2, (C, C, 3, 3), jnp.float32, -bound, bound)

    bn1 = dict(gamma=1.0 + 0.1 * jax.random.normal(kg1, (C,), jnp.float32),
               beta=0.1 * jax.random.normal(kb1, (C,), jnp.float32),
               running_mean=jnp.zeros((C,), jnp.float32),
               running_var=jnp.ones((C,), jnp.float32))
    bn2 = dict(gamma=1.0 + 0.1 * jax.random.normal(kg2, (C,), jnp.float32),
               beta=0.1 * jax.random.normal(kb2, (C,), jnp.float32),
               running_mean=jnp.zeros((C,), jnp.float32),
               running_var=jnp.ones((C,), jnp.float32))

    out = residual_block(x, w1, w2, bn1, bn2)
    jax.block_until_ready(out)
    assert out.shape == (N, C, H, W), out.shape

    # Correctness vs f32 reference (loose tolerance: bf16 MXU inputs + bf16 out).
    ref = _reference(x, w1, w2, bn1, bn2)
    err = float(jnp.max(jnp.abs(out.astype(jnp.float32) - ref)))
    assert err < 1e-1, f"max abs err {err}"

    print("KERNEL_OK")
</pallas_src>

<mosaic_0001>
module attributes {stable_mosaic.version = 11 : i64} {
  func.func @_resblock_kernel(%arg0: i32, %arg1: i32, %arg2: memref<1x20x32x128xbf16, #tpu.memory_space<vmem>>, %arg3: memref<1x16x16x128xbf16, #tpu.memory_space<vmem>>, %arg4: memref<9x128x128xbf16, #tpu.memory_space<vmem>>, %arg5: memref<9x128x128xbf16, #tpu.memory_space<vmem>>, %arg6: memref<1x128xf32, #tpu.memory_space<vmem>>, %arg7: memref<1x128xf32, #tpu.memory_space<vmem>>, %arg8: memref<1x128xf32, #tpu.memory_space<vmem>>, %arg9: memref<1x128xf32, #tpu.memory_space<vmem>>, %arg10: memref<1x16x16x128xbf16, #tpu.memory_space<vmem>>, %arg11: memref<18x24x128xbf16, #tpu.memory_space<vmem>>, %arg12: memref<20x24x128xbf16, #tpu.memory_space<vmem>>, %arg13: memref<18x24x128xf32, #tpu.memory_space<vmem>>) attributes {dimension_semantics = [#tpu.dimension_semantics<parallel>, #tpu.dimension_semantics<parallel>], iteration_bounds = array<i64: 2, 1>, scalar_prefetch = 0 : i64, scratch_operands = 3 : i64, tpu.core_type = #tpu.core_type<tc>, window_params = [{transform_indices = @transform_0, window_bounds = array<i64: 1, 20, 32, 128>}, {transform_indices = @transform_1, window_bounds = array<i64: 1, 16, 16, 128>}, {pipeline_mode = #tpu.pipeline_mode<synchronous>, transform_indices = @transform_2, window_bounds = array<i64: 9, 128, 128>}, {pipeline_mode = #tpu.pipeline_mode<synchronous>, transform_indices = @transform_3, window_bounds = array<i64: 9, 128, 128>}, {pipeline_mode = #tpu.pipeline_mode<synchronous>, transform_indices = @transform_4, window_bounds = array<i64: 1, 128>}, {pipeline_mode = #tpu.pipeline_mode<synchronous>, transform_indices = @transform_5, window_bounds = array<i64: 1, 128>}, {pipeline_mode = #tpu.pipeline_mode<synchronous>, transform_indices = @transform_6, window_bounds = array<i64: 1, 128>}, {pipeline_mode = #tpu.pipeline_mode<synchronous>, transform_indices = @transform_7, window_bounds = array<i64: 1, 128>}, {transform_indices = @transform_8, window_bounds = array<i64: 1, 16, 16, 128>}]} {
    %c0 = arith.constant 0 : index
    %c0_0 = arith.constant 0 : index
    %c0_1 = arith.constant 0 : index
    %c0_2 = arith.constant 0 : index
    %0 = vector.load %arg2[%c0, %c0_0, %c0_1, %c0_2] : memref<1x20x32x128xbf16, #tpu.memory_space<vmem>>, vector<1x20x24x128xbf16>
    %1 = vector.shape_cast %0 : vector<1x20x24x128xbf16> to vector<20x24x128xbf16>
    %c0_3 = arith.constant 0 : index
    %c0_4 = arith.constant 0 : index
    %c0_5 = arith.constant 0 : index
    %2 = vector.load %arg12[%c0_3, %c0_4, %c0_5] : memref<20x24x128xbf16, #tpu.memory_space<vmem>>, vector<20x24x128xbf16>
    tpu.vector_store %arg12[%c0_3, %c0_4, %c0_5], %1 {strides = array<i32>} : memref<20x24x128xbf16, #tpu.memory_space<vmem>>, vector<20x24x128xbf16>,
    %c0_6 = arith.constant 0 : index
    %c0_7 = arith.constant 0 : index
    %c0_8 = arith.constant 0 : index
    %3 = vector.load %arg12[%c0_6, %c0_7, %c0_8] : memref<20x24x128xbf16, #tpu.memory_space<vmem>>, vector<18x24x128xbf16>
    %c0_9 = arith.constant 0 : index
    %c0_10 = arith.constant 0 : index
    %c0_11 = arith.constant 0 : index
    %4 = vector.load %arg4[%c0_9, %c0_10, %c0_11] : memref<9x128x128xbf16, #tpu.memory_space<vmem>>, vector<1x128x128xbf16>
    %5 = vector.shape_cast %4 : vector<1x128x128xbf16> to vector<128x128xbf16>
    "tpu.trace_start"() <{level = 10 : i32, message = "hwc,cd->hwd"}> : () -> ()
    %cst = arith.constant dense<0.000000e+00> : vector<18x24x128xf32>
    %6 = tpu.matmul %3, %5, %cst {dimension_numbers = #tpu.dot_dimension_numbers<[2], [0], [0, 1], [1], [0, 0, 0, 1, 1, 1], [], []>} : vector<18x24x128xbf16>, vector<128x128xbf16>, vector<18x24x128xf32> -> vector<18x24x128xf32>
    "tpu.trace_stop"() : () -> ()
    %c0_12 = arith.constant 0 : index
    %c0_13 = arith.constant 0 : index
    %c0_14 = arith.constant 0 : index
    %7 = vector.load %arg13[%c0_12, %c0_13, %c0_14] : memref<18x24x128xf32, #tpu.memory_space<vmem>>, vector<18x24x128xf32>
    tpu.vector_store %arg13[%c0_12, %c0_13, %c0_14], %6 {strides = array<i32>} : memref<18x24x128xf32, #tpu.memory_space<vmem>>, vector<18x24x128xf32>,
    %c1 = arith.constant 1 : index
    %c0_15 = arith.constant 0 : index
    %c0_16 = arith.constant 0 : index
    %8 = vector.load %arg12[%c1, %c0_15, %c0_16] : memref<20x24x128xbf16, #tpu.memory_space<vmem>>, vector<18x24x128xbf16>
    %c3 = arith.constant 3 : index
    %c0_17 = arith.constant 0 : index
    %c0_18 = arith.constant 0 : index
    %9 = vector.load %arg4[%c3, %c0_17, %c0_18] : memref<9x128x128xbf16, #tpu.memory_space<vmem>>, vector<1x128x128xbf16>
    %10 = vector.shape_cast %9 : vector<1x128x128xbf16> to vector<128x128xbf16>
    "tpu.trace_start"() <{level = 10 : i32, message = "hwc,cd->hwd"}> : () -> ()
    %cst_19 = arith.constant dense<0.000000e+00> : vector<18x24x128xf32>
    %11 = tpu.matmul %8, %10, %cst_19 {dimension_numbers = #tpu.dot_dimension_numbers<[2], [0], [0, 1], [1], [0, 0, 0, 1, 1, 1], [], []>} : vector<18x24x128xbf16>, vector<128x128xbf16>, vector<18x24x128xf32> -> vector<18x24x128xf32>
    "tpu.trace_stop"() : () -> ()
    %c0_20 = arith.constant 0 : index
    %c0_21 = arith.constant 0 : index
    %c0_22 = arith.constant 0 : index
    %12 = vector.load %arg13[%c0_20, %c0_21, %c0_22] : memref<18x24x128xf32, #tpu.memory_space<vmem>>, vector<18x24x128xf32>
    %13 = arith.addf %12, %11 : vector<18x24x128xf32>
    %c0_23 = arith.constant 0 : index
    %c0_24 = arith.constant 0 : index
    %c0_25 = arith.constant 0 : index
    %14 = vector.load %arg13[%c0_23, %c0_24, %c0_25] : memref<18x24x128xf32, #tpu.memory_space<vmem>>, vector<18x24x128xf32>
    tpu.vector_store %arg13[%c0_23, %c0_24, %c0_25], %13 {strides = array<i32>} : memref<18x24x128xf32, #tpu.memory_space<vmem>>, vector<18x24x128xf32>,
    %c2 = arith.constant 2 : index
    %c0_26 = arith.constant 0 : index
    %c0_27 = arith.constant 0 : index
    %15 = vector.load %arg12[%c2, %c0_26, %c0_27] : memref<20x24x128xbf16, #tpu.memory_space<vmem>>, vector<18x24x128xbf16>
    %c6 = arith.constant 6 : index
    %c0_28 = arith.constant 0 : index
    %c0_29 = arith.constant 0 : index
    %16 = vector.load %arg4[%c6, %c0_28, %c0_29] : memref<9x128x128xbf16, #tpu.memory_space<vmem>>, vector<1x128x128xbf16>
    %17 = vector.shape_cast %16 : vector<1x128x128xbf16> to vector<128x128xbf16>
    "tpu.trace_start"() <{level = 10 : i32, message = "hwc,cd->hwd"}> : () -> ()
    %cst_30 = arith.constant dense<0.000000e+00> : vector<18x24x128xf32>
    %18 = tpu.matmul %15, %17, %cst_30 {dimension_numbers = #tpu.dot_dimension_numbers<[2], [0], [0, 1], [1], [0, 0, 0, 1, 1, 1], [], []>} : vector<18x24x128xbf16>, vector<128x128xbf16>, vector<18x24x128xf32> -> vector<18x24x128xf32>
    "tpu.trace_stop"() : () -> ()
    %c0_31 = arith.constant 0 : index
    %c0_32 = arith.constant 0 : index
    %c0_33 = arith.constant 0 : index
    %19 = vector.load %arg13[%c0_31, %c0_32, %c0_33] : memref<18x24x128xf32, #tpu.memory_space<vmem>>, vector<18x24x128xf32>
    %20 = arith.addf %19, %18 : vector<18x24x128xf32>
    %c0_34 = arith.constant 0 : index
    %c0_35 = arith.constant 0 : index
    %c0_36 = arith.constant 0 : index
    %21 = vector.load %arg13[%c0_34, %c0_35, %c0_36] : memref<18x24x128xf32, #tpu.memory_space<vmem>>, vector<18x24x128xf32>
    tpu.vector_store %arg13[%c0_34, %c0_35, %c0_36], %20 {strides = array<i32>} : memref<18x24x128xf32, #tpu.memory_space<vmem>>, vector<18x24x128xf32>,
    %c0_37 = arith.constant 0 : index
    %c0_38 = arith.constant 0 : index
    %c1_39 = arith.constant 1 : index
    %c0_40 = arith.constant 0 : index
    %22 = vector.load %arg2[%c0_37, %c0_38, %c1_39, %c0_40] : memref<1x20x32x128xbf16, #tpu.memory_space<vmem>>, vector<1x20x24x128xbf16>
    %23 = vector.shape_cast %22 : vector<1x20x24x128xbf16> to vector<20x24x128xbf16>
    %c0_41 = arith.constant 0 : index
    %c0_42 = arith.constant 0 : index
    %c0_43 = arith.constant 0 : index
    %24 = vector.load %arg12[%c0_41, %c0_42, %c0_43] : memref<20x24x128xbf16, #tpu.memory_space<vmem>>, vector<20x24x128xbf16>
    tpu.vector_store %arg12[%c0_41, %c0_42, %c0_43], %23 {strides = array<i32>} : memref<20x24x128xbf16, #tpu.memory_space<vmem>>, vector<20x24x128xbf16>,
    %c0_44 = arith.constant 0 : index
    %c0_45 = arith.constant 0 : index
    %c0_46 = arith.constant 0 : index
    %25 = vector.load %arg12[%c0_44, %c0_45, %c0_46] : memref<20x24x128xbf16, #tpu.memory_space<vmem>>, vector<18x24x128xbf16>
    %c1_47 = arith.constant 1 : index
    %c0_48 = arith.constant 0 : index
    %c0_49 = arith.constant 0 : index
    %26 = vector.load %arg4[%c1_47, %c0_48, %c0_49] : memref<9x128x128xbf16, #tpu.memory_space<vmem>>, vector<1x128x128xbf16>
    %27 = vector.shape_cast %26 : vector<1x128x128xbf16> to vector<128x128xbf16>
    "tpu.trace_start"() <{level = 10 : i32, message = "hwc,cd->hwd"}> : () -> ()
    %cst_50 = arith.constant dense<0.000000e+00> : vector<18x24x128xf32>
    %28 = tpu.matmul %25, %27, %cst_50 {dimension_numbers = #tpu.dot_dimension_numbers<[2], [0], [0, 1], [1], [0, 0, 0, 1, 1, 1], [], []>} : vector<18x24x128xbf16>, vector<128x128xbf16>, vector<18x24x128xf32> -> vector<18x24x128xf32>
    "tpu.trace_stop"() : () -> ()
    %c0_51 = arith.constant 0 : index
    %c0_52 = arith.constant 0 : index
    %c0_53 = arith.constant 0 : index
    %29 = vector.load %arg13[%c0_51, %c0_52, %c0_53] : memref<18x24x128xf32, #tpu.memory_space<vmem>>, vector<18x24x128xf32>
    %30 = arith.addf %29, %28 : vector<18x24x128xf32>
    %c0_54 = arith.constant 0 : index
    %c0_55 = arith.constant 0 : index
    %c0_56 = arith.constant 0 : index
    %31 = vector.load %arg13[%c0_54, %c0_55, %c0_56] : memref<18x24x128xf32, #tpu.memory_space<vmem>>, vector<18x24x128xf32>
    tpu.vector_store %arg13[%c0_54, %c0_55, %c0_56], %30 {strides = array<i32>} : memref<18x24x128xf32, #tpu.memory_space<vmem>>, vector<18x24x128xf32>,
    %c1_57 = arith.constant 1 : index
    %c0_58 = arith.constant 0 : index
    %c0_59 = arith.constant 0 : index
    %32 = vector.load %arg12[%c1_57, %c0_58, %c0_59] : memref<20x24x128xbf16, #tpu.memory_space<vmem>>, vector<18x24x128xbf16>
    %c4 = arith.constant 4 : index
    %c0_60 = arith.constant 0 : index
    %c0_61 = arith.constant 0 : index
    %33 = vector.load %arg4[%c4, %c0_60, %c0_61] : memref<9x128x128xbf16, #tpu.memory_space<vmem>>, vector<1x128x128xbf16>
    %34 = vector.shape_cast %33 : vector<1x128x128xbf16> to vector<128x128xbf16>
    "tpu.trace_start"() <{level = 10 : i32, message = "hwc,cd->hwd"}> : () -> ()
    %cst_62 = arith.constant dense<0.000000e+00> : vector<18x24x128xf32>
    %35 = tpu.matmul %32, %34, %cst_62 {dimension_numbers = #tpu.dot_dimension_numbers<[2], [0], [0, 1], [1], [0, 0, 0, 1, 1, 1], [], []>} : vector<18x24x128xbf16>, vector<128x128xbf16>, vector<18x24x128xf32> -> vector<18x24x128xf32>
    "tpu.trace_stop"() : () -> ()
    %c0_63 = arith.constant 0 : index
    %c0_64 = arith.constant 0 : index
    %c0_65 = arith.constant 0 : index
    %36 = vector.load %arg13[%c0_63, %c0_64, %c0_65] : memref<18x24x128xf32, #tpu.memory_space<vmem>>, vector<18x24x128xf32>
    %37 = arith.addf %36, %35 : vector<18x24x128xf32>
    %c0_66 = arith.constant 0 : index
    %c0_67 = arith.constant 0 : index
    %c0_68 = arith.constant 0 : index
    %38 = vector.load %arg13[%c0_66, %c0_67, %c0_68] : memref<18x24x128xf32, #tpu.memory_space<vmem>>, vector<18x24x128xf32>
    tpu.vector_store %arg13[%c0_66, %c0_67, %c0_68], %37 {strides = array<i32>} : memref<18x24x128xf32, #tpu.memory_space<vmem>>, vector<18x24x128xf32>,
    %c2_69 = arith.constant 2 : index
    %c0_70 = arith.constant 0 : index
    %c0_71 = arith.constant 0 : index
    %39 = vector.load %arg12[%c2_69, %c0_70, %c0_71] : memref<20x24x128xbf16, #tpu.memory_space<vmem>>, vector<18x24x128xbf16>
    %c7 = arith.constant 7 : index
    %c0_72 = arith.constant 0 : index
    %c0_73 = arith.constant 0 : index
    %40 = vector.load %arg4[%c7, %c0_72, %c0_73] : memref<9x128x128xbf16, #tpu.memory_space<vmem>>, vector<1x128x128xbf16>
    %41 = vector.shape_cast %40 : vector<1x128x128xbf16> to vector<128x128xbf16>
    "tpu.trace_start"() <{level = 10 : i32, message = "hwc,cd->hwd"}> : () -> ()
    %cst_74 = arith.constant dense<0.000000e+00> : vector<18x24x128xf32>
    %42 = tpu.matmul %39, %41, %cst_74 {dimension_numbers = #tpu.dot_dimension_numbers<[2], [0], [0, 1], [1], [0, 0, 0, 1, 1, 1], [], []>} : vector<18x24x128xbf16>, vector<128x128xbf16>, vector<18x24x128xf32> -> vector<18x24x128xf32>
    "tpu.trace_stop"() : () -> ()
    %c0_75 = arith.constant 0 : index
    %c0_76 = arith.constant 0 : index
    %c0_77 = arith.constant 0 : index
    %43 = vector.load %arg13[%c0_75, %c0_76, %c0_77] : memref<18x24x128xf32, #tpu.memory_space<vmem>>, vector<18x24x128xf32>
    %44 = arith.addf %43, %42 : vector<18x24x128xf32>
    %c0_78 = arith.constant 0 : index
    %c0_79 = arith.constant 0 : index
    %c0_80 = arith.constant 0 : index
    %45 = vector.load %arg13[%c0_78, %c0_79, %c0_80] : memref<18x24x128xf32, #tpu.memory_space<vmem>>, vector<18x24x128xf32>
    tpu.vector_store %arg13[%c0_78, %c0_79, %c0_80], %44 {strides = array<i32>} : memref<18x24x128xf32, #tpu.memory_space<vmem>>, vector<18x24x128xf32>,
    %c0_81 = arith.constant 0 : index
    %c0_82 = arith.constant 0 : index
    %c2_83 = arith.constant 2 : index
    %c0_84 = arith.constant 0 : index
    %46 = vector.load %arg2[%c0_81, %c0_82, %c2_83, %c0_84] : memref<1x20x32x128xbf16, #tpu.memory_space<vmem>>, vector<1x20x24x128xbf16>
    %47 = vector.shape_cast %46 : vector<1x20x24x128xbf16> to vector<20x24x128xbf16>
    %c0_85 = arith.constant 0 : index
    %c0_86 = arith.constant 0 : index
    %c0_87 = arith.constant 0 : index
    %48 = vector.load %arg12[%c0_85, %c0_86, %c0_87] : memref<20x24x128xbf16, #tpu.memory_space<vmem>>, vector<20x24x128xbf16>
    tpu.vector_store %arg12[%c0_85, %c0_86, %c0_87], %47 {strides = array<i32>} : memref<20x24x128xbf16, #tpu.memory_space<vmem>>, vector<20x24x128xbf16>,
    %c0_88 = arith.constant 0 : index
    %c0_89 = arith.constant 0 : index
    %c0_90 = arith.constant 0 : index
    %49 = vector.load %arg12[%c0_88, %c0_89, %c0_90] : memref<20x24x128xbf16, #tpu.memory_space<vmem>>, vector<18x24x128xbf16>
    %c2_91 = arith.constant 2 : index
    %c0_92 = arith.constant 0 : index
    %c0_93 = arith.constant 0 : index
    %50 = vector.load %arg4[%c2_91, %c0_92, %c0_93] : memref<9x128x128xbf16, #tpu.memory_space<vmem>>, vector<1x128x128xbf16>
    %51 = vector.shape_cast %50 : vector<1x128x128xbf16> to vector<128x128xbf16>
    "tpu.trace_start"() <{level = 10 : i32, message = "hwc,cd->hwd"}> : () -> ()
    %cst_94 = arith.constant dense<0.000000e+00> : vector<18x24x128xf32>
    %52 = tpu.matmul %49, %51, %cst_94 {dimension_numbers = #tpu.dot_dimension_numbers<[2], [0], [0, 1], [1], [0, 0, 0, 1, 1, 1], [], []>} : vector<18x24x128xbf16>, vector<128x128xbf16>, vector<18x24x128xf32> -> vector<18x24x128xf32>
    "tpu.trace_stop"() : () -> ()
    %c0_95 = arith.constant 0 : index
    %c0_96 = arith.constant 0 : index
    %c0_97 = arith.constant 0 : index
    %53 = vector.load %arg13[%c0_95, %c0_96, %c0_97] : memref<18x24x128xf32, #tpu.memory_space<vmem>>, vector<18x24x128xf32>
    %54 = arith.addf %53, %52 : vector<18x24x128xf32>
    %c0_98 = arith.constant 0 : index
    %c0_99 = arith.constant 0 : index
    %c0_100 = arith.constant 0 : index
    %55 = vector.load %arg13[%c0_98, %c0_99, %c0_100] : memref<18x24x128xf32, #tpu.memory_space<vmem>>, vector<18x24x128xf32>
    tpu.vector_store %arg13[%c0_98, %c0_99, %c0_100], %54 {strides = array<i32>} : memref<18x24x128xf32, #tpu.memory_space<vmem>>, vector<18x24x128xf32>,
    %c1_101 = arith.constant 1 : index
    %c0_102 = arith.constant 0 : index
    %c0_103 = arith.constant 0 : index
    %56 = vector.load %arg12[%c1_101, %c0_102, %c0_103] : memref<20x24x128xbf16, #tpu.memory_space<vmem>>, vector<18x24x128xbf16>
    %c5 = arith.constant 5 : index
    %c0_104 = arith.constant 0 : index
    %c0_105 = arith.constant 0 : index
    %57 = vector.load %arg4[%c5, %c0_104, %c0_105] : memref<9x128x128xbf16, #tpu.memory_space<vmem>>, vector<1x128x128xbf16>
    %58 = vector.shape_cast %57 : vector<1x128x128xbf16> to vector<128x128xbf16>
    "tpu.trace_start"() <{level = 10 : i32, message = "hwc,cd->hwd"}> : () -> ()
    %cst_106 = arith.constant dense<0.000000e+00> : vector<18x24x128xf32>
    %59 = tpu.matmul %56, %58, %cst_106 {dimension_numbers = #tpu.dot_dimension_numbers<[2], [0], [0, 1], [1], [0, 0, 0, 1, 1, 1], [], []>} : vector<18x24x128xbf16>, vector<128x128xbf16>, vector<18x24x128xf32> -> vector<18x24x128xf32>
    "tpu.trace_stop"() : () -> ()
    %c0_107 = arith.constant 0 : index
    %c0_108 = arith.constant 0 : index
    %c0_109 = arith.constant 0 : index
    %60 = vector.load %arg13[%c0_107, %c0_108, %c0_109] : memref<18x24x128xf32, #tpu.memory_space<vmem>>, vector<18x24x128xf32>
    %61 = arith.addf %60, %59 : vector<18x24x128xf32>
    %c0_110 = arith.constant 0 : index
    %c0_111 = arith.constant 0 : index
    %c0_112 = arith.constant 0 : index
    %62 = vector.load %arg13[%c0_110, %c0_111, %c0_112] : memref<18x24x128xf32, #tpu.memory_space<vmem>>, vector<18x24x128xf32>
    tpu.vector_store %arg13[%c0_110, %c0_111, %c0_112], %61 {strides = array<i32>} : memref<18x24x128xf32, #tpu.memory_space<vmem>>, vector<18x24x128xf32>,
    %c2_113 = arith.constant 2 : index
    %c0_114 = arith.constant 0 : index
    %c0_115 = arith.constant 0 : index
    %63 = vector.load %arg12[%c2_113, %c0_114, %c0_115] : memref<20x24x128xbf16, #tpu.memory_space<vmem>>, vector<18x24x128xbf16>
    %c8 = arith.constant 8 : index
    %c0_116 = arith.constant 0 : index
    %c0_117 = arith.constant 0 : index
    %64 = vector.load %arg4[%c8, %c0_116, %c0_117] : memref<9x128x128xbf16, #tpu.memory_space<vmem>>, vector<1x128x128xbf16>
    %65 = vector.shape_cast %64 : vector<1x128x128xbf16> to vector<128x128xbf16>
    "tpu.trace_start"() <{level = 10 : i32, message = "hwc,cd->hwd"}> : () -> ()
    %cst_118 = arith.constant dense<0.000000e+00> : vector<18x24x128xf32>
    %66 = tpu.matmul %63, %65, %cst_118 {dimension_numbers = #tpu.dot_dimension_numbers<[2], [0], [0, 1], [1], [0, 0, 0, 1, 1, 1], [], []>} : vector<18x24x128xbf16>, vector<128x128xbf16>, vector<18x24x128xf32> -> vector<18x24x128xf32>
    "tpu.trace_stop"() : () -> ()
    %c0_119 = arith.constant 0 : index
    %c0_120 = arith.constant 0 : index
    %c0_121 = arith.constant 0 : index
    %67 = vector.load %arg13[%c0_119, %c0_120, %c0_121] : memref<18x24x128xf32, #tpu.memory_space<vmem>>, vector<18x24x128xf32>
    %68 = arith.addf %67, %66 : vector<18x24x128xf32>
    %c0_122 = arith.constant 0 : index
    %c0_123 = arith.constant 0 : index
    %c0_124 = arith.constant 0 : index
    %69 = vector.load %arg13[%c0_122, %c0_123, %c0_124] : memref<18x24x128xf32, #tpu.memory_space<vmem>>, vector<18x24x128xf32>
    tpu.vector_store %arg13[%c0_122, %c0_123, %c0_124], %68 {strides = array<i32>} : memref<18x24x128xf32, #tpu.memory_space<vmem>>, vector<18x24x128xf32>,
    %c0_125 = arith.constant 0 : index
    %c0_126 = arith.constant 0 : index
    %c0_127 = arith.constant 0 : index
    %70 = vector.load %arg13[%c0_125, %c0_126, %c0_127] : memref<18x24x128xf32, #tpu.memory_space<vmem>>, vector<18x24x128xf32>
    %c0_128 = arith.constant 0 : index
    %c0_129 = arith.constant 0 : index
    %71 = vector.load %arg6[%c0_128, %c0_129] : memref<1x128xf32, #tpu.memory_space<vmem>>, vector<1x128xf32>
    %72 = vector.shape_cast %71 : vector<1x128xf32> to vector<128xf32>
    %73 = vector.shape_cast %72 : vector<128xf32> to vector<1x1x128xf32>
    %74 = vector.broadcast %73 : vector<1x1x128xf32> to vector<18x24x128xf32>
    %75 = arith.mulf %70, %74 : vector<18x24x128xf32>
    %c0_130 = arith.constant 0 : index
    %c0_131 = arith.constant 0 : index
    %76 = vector.load %arg7[%c0_130, %c0_131] : memref<1x128xf32, #tpu.memory_space<vmem>>, vector<1x128xf32>
    %77 = vector.shape_cast %76 : vector<1x128xf32> to vector<128xf32>
    %78 = vector.shape_cast %77 : vector<128xf32> to vector<1x1x128xf32>
    %79 = vector.broadcast %78 : vector<1x1x128xf32> to vector<18x24x128xf32>
    %80 = arith.addf %75, %79 : vector<18x24x128xf32>
    %cst_132 = arith.constant 0.000000e+00 : f32
    %81 = vector.broadcast %cst_132 : f32 to vector<18x24x128xf32>
    %82 = arith.maximumf %80, %81 : vector<18x24x128xf32>
    %83 = arith.truncf %82 : vector<18x24x128xf32> to vector<18x24x128xbf16>
    %c0_133 = arith.constant 0 : index
    %c0_134 = arith.constant 0 : index
    %c0_135 = arith.constant 0 : index
    %84 = vector.load %arg11[%c0_133, %c0_134, %c0_135] : memref<18x24x128xbf16, #tpu.memory_space<vmem>>, vector<18x24x128xbf16>
    tpu.vector_store %arg11[%c0_133, %c0_134, %c0_135], %83 {strides = array<i32>} : memref<18x24x128xbf16, #tpu.memory_space<vmem>>, vector<18x24x128xbf16>,
    %cst_136 = arith.constant 0.000000e+00 : bf16
    %85 = vector.broadcast %cst_136 : bf16 to vector<18x1x128xbf16>
    %c0_137 = arith.constant 0 : index
    %c0_138 = arith.constant 0 : index
    %c0_139 = arith.constant 0 : index
    %86 = vector.load %arg11[%c0_137, %c0_138, %c0_139] : memref<18x24x128xbf16, #tpu.memory_space<vmem>>, vector<18x1x128xbf16>
    tpu.vector_store %arg11[%c0_137, %c0_138, %c0_139], %85 {strides = array<i32>} : memref<18x24x128xbf16, #tpu.memory_space<vmem>>, vector<18x1x128xbf16>,
    %c0_140 = arith.constant 0 : index
    %c17 = arith.constant 17 : index
    %c0_141 = arith.constant 0 : index
    %87 = vector.load %arg11[%c0_140, %c17, %c0_141] : memref<18x24x128xbf16, #tpu.memory_space<vmem>>, vector<18x1x128xbf16>
    tpu.vector_store %arg11[%c0_140, %c17, %c0_141], %85 {strides = array<i32>} : memref<18x24x128xbf16, #tpu.memory_space<vmem>>, vector<18x1x128xbf16>,
    %cst_142 = arith.constant 0.000000e+00 : bf16
    %88 = vector.broadcast %cst_142 : bf16 to vector<1x24x128xbf16>
    %c0_i32 = arith.constant 0 : i32
    %89 = arith.cmpi eq, %arg1, %c0_i32 : i32
    %90 = arith.extui %89 : i1 to i32
    %c0_i32_143 = arith.constant 0 : i32
    %91 = arith.cmpi ne, %90, %c0_i32_143 : i32
    scf.if %91 {
      %c0_294 = arith.constant 0 : index
      %c0_295 = arith.constant 0 : index
      %c0_296 = arith.constant 0 : index
      %183 = vector.load %arg11[%c0_294, %c0_295, %c0_296] : memref<18x24x128xbf16, #tpu.memory_space<vmem>>, vector<1x24x128xbf16>
      tpu.vector_store %arg11[%c0_294, %c0_295, %c0_296], %88 {strides = array<i32>} : memref<18x24x128xbf16, #tpu.memory_space<vmem>>, vector<1x24x128xbf16>,
    } else {
    }
    %c0_i32_144 = arith.constant 0 : i32
    %92 = arith.cmpi eq, %arg1, %c0_i32_144 : i32
    %93 = arith.extui %92 : i1 to i32
    %c0_i32_145 = arith.constant 0 : i32
    %94 = arith.cmpi ne, %93, %c0_i32_145 : i32
    scf.if %94 {
      %c17_294 = arith.constant 17 : index
      %c0_295 = arith.constant 0 : index
      %c0_296 = arith.constant 0 : index
      %183 = vector.load %arg11[%c17_294, %c0_295, %c0_296] : memref<18x24x128xbf16, #tpu.memory_space<vmem>>, vector<1x24x128xbf16>
      tpu.vector_store %arg11[%c17_294, %c0_295, %c0_296], %88 {strides = array<i32>} : memref<18x24x128xbf16, #tpu.memory_space<vmem>>, vector<1x24x128xbf16>,
    } else {
    }
    %c0_146 = arith.constant 0 : index
    %c0_147 = arith.constant 0 : index
    %c0_148 = arith.constant 0 : index
    %95 = vector.load %arg11[%c0_146, %c0_147, %c0_148] : memref<18x24x128xbf16, #tpu.memory_space<vmem>>, vector<18x16x128xbf16>
    %c0_149 = arith.constant 0 : index
    %c0_150 = arith.constant 0 : index
    %c0_151 = arith.constant 0 : index
    %96 = vector.load %arg12[%c0_149, %c0_150, %c0_151] : memref<20x24x128xbf16, #tpu.memory_space<vmem>>, vector<18x16x128xbf16>
    tpu.vector_store %arg12[%c0_149, %c0_150, %c0_151], %95 {strides = array<i32>} : memref<20x24x128xbf16, #tpu.memory_space<vmem>>, vector<18x16x128xbf16>,
    %c0_152 = arith.constant 0 : index
    %c0_153 = arith.constant 0 : index
    %c0_154 = arith.constant 0 : index
    %97 = vector.load %arg12[%c0_152, %c0_153, %c0_154] : memref<20x24x128xbf16, #tpu.memory_space<vmem>>, vector<16x16x128xbf16>
    %c0_155 = arith.constant 0 : index
    %c0_156 = arith.constant 0 : index
    %c0_157 = arith.constant 0 : index
    %98 = vector.load %arg5[%c0_155, %c0_156, %c0_157] : memref<9x128x128xbf16, #tpu.memory_space<vmem>>, vector<1x128x128xbf16>
    %99 = vector.shape_cast %98 : vector<1x128x128xbf16> to vector<128x128xbf16>
    "tpu.trace_start"() <{level = 10 : i32, message = "hwc,cd->hwd"}> : () -> ()
    %cst_158 = arith.constant dense<0.000000e+00> : vector<16x16x128xf32>
    %100 = tpu.matmul %97, %99, %cst_158 {dimension_numbers = #tpu.dot_dimension_numbers<[2], [0], [0, 1], [1], [0, 0, 0, 1, 1, 1], [], []>} : vector<16x16x128xbf16>, vector<128x128xbf16>, vector<16x16x128xf32> -> vector<16x16x128xf32>
    "tpu.trace_stop"() : () -> ()
    %c0_159 = arith.constant 0 : index
    %c0_160 = arith.constant 0 : index
    %c0_161 = arith.constant 0 : index
    %101 = vector.load %arg13[%c0_159, %c0_160, %c0_161] : memref<18x24x128xf32, #tpu.memory_space<vmem>>, vector<16x16x128xf32>
    tpu.vector_store %arg13[%c0_159, %c0_160, %c0_161], %100 {strides = array<i32>} : memref<18x24x128xf32, #tpu.memory_space<vmem>>, vector<16x16x128xf32>,
    %c1_162 = arith.constant 1 : index
    %c0_163 = arith.constant 0 : index
    %c0_164 = arith.constant 0 : index
    %102 = vector.load %arg12[%c1_162, %c0_163, %c0_164] : memref<20x24x128xbf16, #tpu.memory_space<vmem>>, vector<16x16x128xbf16>
    %c3_165 = arith.constant 3 : index
    %c0_166 = arith.constant 0 : index
    %c0_167 = arith.constant 0 : index
    %103 = vector.load %arg5[%c3_165, %c0_166, %c0_167] : memref<9x128x128xbf16, #tpu.memory_space<vmem>>, vector<1x128x128xbf16>
    %104 = vector.shape_cast %103 : vector<1x128x128xbf16> to vector<128x128xbf16>
    "tpu.trace_start"() <{level = 10 : i32, message = "hwc,cd->hwd"}> : () -> ()
    %cst_168 = arith.constant dense<0.000000e+00> : vector<16x16x128xf32>
    %105 = tpu.matmul %102, %104, %cst_168 {dimension_numbers = #tpu.dot_dimension_numbers<[2], [0], [0, 1], [1], [0, 0, 0, 1, 1, 1], [], []>} : vector<16x16x128xbf16>, vector<128x128xbf16>, vector<16x16x128xf32> -> vector<16x16x128xf32>
    "tpu.trace_stop"() : () -> ()
    %c0_169 = arith.constant 0 : index
    %c0_170 = arith.constant 0 : index
    %c0_171 = arith.constant 0 : index
    %106 = vector.load %arg13[%c0_169, %c0_170, %c0_171] : memref<18x24x128xf32, #tpu.memory_space<vmem>>, vector<16x16x128xf32>
    %107 = arith.addf %106, %105 : vector<16x16x128xf32>
    %c0_172 = arith.constant 0 : index
    %c0_173 = arith.constant 0 : index
    %c0_174 = arith.constant 0 : index
    %108 = vector.load %arg13[%c0_172, %c0_173, %c0_174] : memref<18x24x128xf32, #tpu.memory_space<vmem>>, vector<16x16x128xf32>
    tpu.vector_store %arg13[%c0_172, %c0_173, %c0_174], %107 {strides = array<i32>} : memref<18x24x128xf32, #tpu.memory_space<vmem>>, vector<16x16x128xf32>,
    %c2_175 = arith.constant 2 : index
    %c0_176 = arith.constant 0 : index
    %c0_177 = arith.constant 0 : index
    %109 = vector.load %arg12[%c2_175, %c0_176, %c0_177] : memref<20x24x128xbf16, #tpu.memory_space<vmem>>, vector<16x16x128xbf16>
    %c6_178 = arith.constant 6 : index
    %c0_179 = arith.constant 0 : index
    %c0_180 = arith.constant 0 : index
    %110 = vector.load %arg5[%c6_178, %c0_179, %c0_180] : memref<9x128x128xbf16, #tpu.memory_space<vmem>>, vector<1x128x128xbf16>
    %111 = vector.shape_cast %110 : vector<1x128x128xbf16> to vector<128x128xbf16>
    "tpu.trace_start"() <{level = 10 : i32, message = "hwc,cd->hwd"}> : () -> ()
    %cst_181 = arith.constant dense<0.000000e+00> : vector<16x16x128xf32>
    %112 = tpu.matmul %109, %111, %cst_181 {dimension_numbers = #tpu.dot_dimension_numbers<[2], [0], [0, 1], [1], [0, 0, 0, 1, 1, 1], [], []>} : vector<16x16x128xbf16>, vector<128x128xbf16>, vector<16x16x128xf32> -> vector<16x16x128xf32>
    "tpu.trace_stop"() : () -> ()
    %c0_182 = arith.constant 0 : index
    %c0_183 = arith.constant 0 : index
    %c0_184 = arith.constant 0 : index
    %113 = vector.load %arg13[%c0_182, %c0_183, %c0_184] : memref<18x24x128xf32, #tpu.memory_space<vmem>>, vector<16x16x128xf32>
    %114 = arith.addf %113, %112 : vector<16x16x128xf32>
    %c0_185 = arith.constant 0 : index
    %c0_186 = arith.constant 0 : index
    %c0_187 = arith.constant 0 : index
    %115 = vector.load %arg13[%c0_185, %c0_186, %c0_187] : memref<18x24x128xf32, #tpu.memory_space<vmem>>, vector<16x16x128xf32>
    tpu.vector_store %arg13[%c0_185, %c0_186, %c0_187], %114 {strides = array<i32>} : memref<18x24x128xf32, #tpu.memory_space<vmem>>, vector<16x16x128xf32>,
    %c0_188 = arith.constant 0 : index
    %c1_189 = arith.constant 1 : index
    %c0_190 = arith.constant 0 : index
    %116 = vector.load %arg11[%c0_188, %c1_189, %c0_190] : memref<18x24x128xbf16, #tpu.memory_space<vmem>>, vector<18x16x128xbf16>
    %c0_191 = arith.constant 0 : index
    %c0_192 = arith.constant 0 : index
    %c0_193 = arith.constant 0 : index
    %117 = vector.load %arg12[%c0_191, %c0_192, %c0_193] : memref<20x24x128xbf16, #tpu.memory_space<vmem>>, vector<18x16x128xbf16>
    tpu.vector_store %arg12[%c0_191, %c0_192, %c0_193], %116 {strides = array<i32>} : memref<20x24x128xbf16, #tpu.memory_space<vmem>>, vector<18x16x128xbf16>,
    %c0_194 = arith.constant 0 : index
    %c0_195 = arith.constant 0 : index
    %c0_196 = arith.constant 0 : index
    %118 = vector.load %arg12[%c0_194, %c0_195, %c0_196] : memref<20x24x128xbf16, #tpu.memory_space<vmem>>, vector<16x16x128xbf16>
    %c1_197 = arith.constant 1 : index
    %c0_198 = arith.constant 0 : index
    %c0_199 = arith.constant 0 : index
    %119 = vector.load %arg5[%c1_197, %c0_198, %c0_199] : memref<9x128x128xbf16, #tpu.memory_space<vmem>>, vector<1x128x128xbf16>
    %120 = vector.shape_cast %119 : vector<1x128x128xbf16> to vector<128x128xbf16>
    "tpu.trace_start"() <{level = 10 : i32, message = "hwc,cd->hwd"}> : () -> ()
    %cst_200 = arith.constant dense<0.000000e+00> : vector<16x16x128xf32>
    %121 = tpu.matmul %118, %120, %cst_200 {dimension_numbers = #tpu.dot_dimension_numbers<[2], [0], [0, 1], [1], [0, 0, 0, 1, 1, 1], [], []>} : vector<16x16x128xbf16>, vector<128x128xbf16>, vector<16x16x128xf32> -> vector<16x16x128xf32>
    "tpu.trace_stop"() : () -> ()
    %c0_201 = arith.constant 0 : index
    %c0_202 = arith.constant 0 : index
    %c0_203 = arith.constant 0 : index
    %122 = vector.load %arg13[%c0_201, %c0_202, %c0_203] : memref<18x24x128xf32, #tpu.memory_space<vmem>>, vector<16x16x128xf32>
    %123 = arith.addf %122, %121 : vector<16x16x128xf32>
    %c0_204 = arith.constant 0 : index
    %c0_205 = arith.constant 0 : index
    %c0_206 = arith.constant 0 : index
    %124 = vector.load %arg13[%c0_204, %c0_205, %c0_206] : memref<18x24x128xf32, #tpu.memory_space<vmem>>, vector<16x16x128xf32>
    tpu.vector_store %arg13[%c0_204, %c0_205, %c0_206], %123 {strides = array<i32>} : memref<18x24x128xf32, #tpu.memory_space<vmem>>, vector<16x16x128xf32>,
    %c1_207 = arith.constant 1 : index
    %c0_208 = arith.constant 0 : index
    %c0_209 = arith.constant 0 : index
    %125 = vector.load %arg12[%c1_207, %c0_208, %c0_209] : memref<20x24x128xbf16, #tpu.memory_space<vmem>>, vector<16x16x128xbf16>
    %c4_210 = arith.constant 4 : index
    %c0_211 = arith.constant 0 : index
    %c0_212 = arith.constant 0 : index
    %126 = vector.load %arg5[%c4_210, %c0_211, %c0_212] : memref<9x128x128xbf16, #tpu.memory_space<vmem>>, vector<1x128x128xbf16>
    %127 = vector.shape_cast %126 : vector<1x128x128xbf16> to vector<128x128xbf16>
    "tpu.trace_start"() <{level = 10 : i32, message = "hwc,cd->hwd"}> : () -> ()
    %cst_213 = arith.constant dense<0.000000e+00> : vector<16x16x128xf32>
    %128 = tpu.matmul %125, %127, %cst_213 {dimension_numbers = #tpu.dot_dimension_numbers<[2], [0], [0, 1], [1], [0, 0, 0, 1, 1, 1], [], []>} : vector<16x16x128xbf16>, vector<128x128xbf16>, vector<16x16x128xf32> -> vector<16x16x128xf32>
    "tpu.trace_stop"() : () -> ()
    %c0_214 = arith.constant 0 : index
    %c0_215 = arith.constant 0 : index
    %c0_216 = arith.constant 0 : index
    %129 = vector.load %arg13[%c0_214, %c0_215, %c0_216] : memref<18x24x128xf32, #tpu.memory_space<vmem>>, vector<16x16x128xf32>
    %130 = arith.addf %129, %128 : vector<16x16x128xf32>
    %c0_217 = arith.constant 0 : index
    %c0_218 = arith.constant 0 : index
    %c0_219 = arith.constant 0 : index
    %131 = vector.load %arg13[%c0_217, %c0_218, %c0_219] : memref<18x24x128xf32, #tpu.memory_space<vmem>>, vector<16x16x128xf32>
    tpu.vector_store %arg13[%c0_217, %c0_218, %c0_219], %130 {strides = array<i32>} : memref<18x24x128xf32, #tpu.memory_space<vmem>>, vector<16x16x128xf32>,
    %c2_220 = arith.constant 2 : index
    %c0_221 = arith.constant 0 : index
    %c0_222 = arith.constant 0 : index
    %132 = vector.load %arg12[%c2_220, %c0_221, %c0_222] : memref<20x24x128xbf16, #tpu.memory_space<vmem>>, vector<16x16x128xbf16>
    %c7_223 = arith.constant 7 : index
    %c0_224 = arith.constant 0 : index
    %c0_225 = arith.constant 0 : index
    %133 = vector.load %arg5[%c7_223, %c0_224, %c0_225] : memref<9x128x128xbf16, #tpu.memory_space<vmem>>, vector<1x128x128xbf16>
    %134 = vector.shape_cast %133 : vector<1x128x128xbf16> to vector<128x128xbf16>
    "tpu.trace_start"() <{level = 10 : i32, message = "hwc,cd->hwd"}> : () -> ()
    %cst_226 = arith.constant dense<0.000000e+00> : vector<16x16x128xf32>
    %135 = tpu.matmul %132, %134, %cst_226 {dimension_numbers = #tpu.dot_dimension_numbers<[2], [0], [0, 1], [1], [0, 0, 0, 1, 1, 1], [], []>} : vector<16x16x128xbf16>, vector<128x128xbf16>, vector<16x16x128xf32> -> vector<16x16x128xf32>
    "tpu.trace_stop"() : () -> ()
    %c0_227 = arith.constant 0 : index
    %c0_228 = arith.constant 0 : index
    %c0_229 = arith.constant 0 : index
    %136 = vector.load %arg13[%c0_227, %c0_228, %c0_229] : memref<18x24x128xf32, #tpu.memory_space<vmem>>, vector<16x16x128xf32>
    %137 = arith.addf %136, %135 : vector<16x16x128xf32>
    %c0_230 = arith.constant 0 : index
    %c0_231 = arith.constant 0 : index
    %c0_232 = arith.constant 0 : index
    %138 = vector.load %arg13[%c0_230, %c0_231, %c0_232] : memref<18x24x128xf32, #tpu.memory_space<vmem>>, vector<16x16x128xf32>
    tpu.vector_store %arg13[%c0_230, %c0_231, %c0_232], %137 {strides = array<i32>} : memref<18x24x128xf32, #tpu.memory_space<vmem>>, vector<16x16x128xf32>,
    %c0_233 = arith.constant 0 : index
    %c2_234 = arith.constant 2 : index
    %c0_235 = arith.constant 0 : index
    %139 = vector.load %arg11[%c0_233, %c2_234, %c0_235] : memref<18x24x128xbf16, #tpu.memory_space<vmem>>, vector<18x16x128xbf16>
    %c0_236 = arith.constant 0 : index
    %c0_237 = arith.constant 0 : index
    %c0_238 = arith.constant 0 : index
    %140 = vector.load %arg12[%c0_236, %c0_237, %c0_238] : memref<20x24x128xbf16, #tpu.memory_space<vmem>>, vector<18x16x128xbf16>
    tpu.vector_store %arg12[%c0_236, %c0_237, %c0_238], %139 {strides = array<i32>} : memref<20x24x128xbf16, #tpu.memory_space<vmem>>, vector<18x16x128xbf16>,
    %c0_239 = arith.constant 0 : index
    %c0_240 = arith.constant 0 : index
    %c0_241 = arith.constant 0 : index
    %141 = vector.load %arg12[%c0_239, %c0_240, %c0_241] : memref<20x24x128xbf16, #tpu.memory_space<vmem>>, vector<16x16x128xbf16>
    %c2_242 = arith.constant 2 : index
    %c0_243 = arith.constant 0 : index
    %c0_244 = arith.constant 0 : index
    %142 = vector.load %arg5[%c2_242, %c0_243, %c0_244] : memref<9x128x128xbf16, #tpu.memory_space<vmem>>, vector<1x128x128xbf16>
    %143 = vector.shape_cast %142 : vector<1x128x128xbf16> to vector<128x128xbf16>
    "tpu.trace_start"() <{level = 10 : i32, message = "hwc,cd->hwd"}> : () -> ()
    %cst_245 = arith.constant dense<0.000000e+00> : vector<16x16x128xf32>
    %144 = tpu.matmul %141, %143, %cst_245 {dimension_numbers = #tpu.dot_dimension_numbers<[2], [0], [0, 1], [1], [0, 0, 0, 1, 1, 1], [], []>} : vector<16x16x128xbf16>, vector<128x128xbf16>, vector<16x16x128xf32> -> vector<16x16x128xf32>
    "tpu.trace_stop"() : () -> ()
    %c0_246 = arith.constant 0 : index
    %c0_247 = arith.constant 0 : index
    %c0_248 = arith.constant 0 : index
    %145 = vector.load %arg13[%c0_246, %c0_247, %c0_248] : memref<18x24x128xf32, #tpu.memory_space<vmem>>, vector<16x16x128xf32>
    %146 = arith.addf %145, %144 : vector<16x16x128xf32>
    %c0_249 = arith.constant 0 : index
    %c0_250 = arith.constant 0 : index
    %c0_251 = arith.constant 0 : index
    %147 = vector.load %arg13[%c0_249, %c0_250, %c0_251] : memref<18x24x128xf32, #tpu.memory_space<vmem>>, vector<16x16x128xf32>
    tpu.vector_store %arg13[%c0_249, %c0_250, %c0_251], %146 {strides = array<i32>} : memref<18x24x128xf32, #tpu.memory_space<vmem>>, vector<16x16x128xf32>,
    %c1_252 = arith.constant 1 : index
    %c0_253 = arith.constant 0 : index
    %c0_254 = arith.constant 0 : index
    %148 = vector.load %arg12[%c1_252, %c0_253, %c0_254] : memref<20x24x128xbf16, #tpu.memory_space<vmem>>, vector<16x16x128xbf16>
    %c5_255 = arith.constant 5 : index
    %c0_256 = arith.constant 0 : index
    %c0_257 = arith.constant 0 : index
    %149 = vector.load %arg5[%c5_255, %c0_256, %c0_257] : memref<9x128x128xbf16, #tpu.memory_space<vmem>>, vector<1x128x128xbf16>
    %150 = vector.shape_cast %149 : vector<1x128x128xbf16> to vector<128x128xbf16>
    "tpu.trace_start"() <{level = 10 : i32, message = "hwc,cd->hwd"}> : () -> ()
    %cst_258 = arith.constant dense<0.000000e+00> : vector<16x16x128xf32>
    %151 = tpu.matmul %148, %150, %cst_258 {dimension_numbers = #tpu.dot_dimension_numbers<[2], [0], [0, 1], [1], [0, 0, 0, 1, 1, 1], [], []>} : vector<16x16x128xbf16>, vector<128x128xbf16>, vector<16x16x128xf32> -> vector<16x16x128xf32>
    "tpu.trace_stop"() : () -> ()
    %c0_259 = arith.constant 0 : index
    %c0_260 = arith.constant 0 : index
    %c0_261 = arith.constant 0 : index
    %152 = vector.load %arg13[%c0_259, %c0_260, %c0_261] : memref<18x24x128xf32, #tpu.memory_space<vmem>>, vector<16x16x128xf32>
    %153 = arith.addf %152, %151 : vector<16x16x128xf32>
    %c0_262 = arith.constant 0 : index
    %c0_263 = arith.constant 0 : index
    %c0_264 = arith.constant 0 : index
    %154 = vector.load %arg13[%c0_262, %c0_263, %c0_264] : memref<18x24x128xf32, #tpu.memory_space<vmem>>, vector<16x16x128xf32>
    tpu.vector_store %arg13[%c0_262, %c0_263, %c0_264], %153 {strides = array<i32>} : memref<18x24x128xf32, #tpu.memory_space<vmem>>, vector<16x16x128xf32>,
    %c2_265 = arith.constant 2 : index
    %c0_266 = arith.constant 0 : index
    %c0_267 = arith.constant 0 : index
    %155 = vector.load %arg12[%c2_265, %c0_266, %c0_267] : memref<20x24x128xbf16, #tpu.memory_space<vmem>>, vector<16x16x128xbf16>
    %c8_268 = arith.constant 8 : index
    %c0_269 = arith.constant 0 : index
    %c0_270 = arith.constant 0 : index
    %156 = vector.load %arg5[%c8_268, %c0_269, %c0_270] : memref<9x128x128xbf16, #tpu.memory_space<vmem>>, vector<1x128x128xbf16>
    %157 = vector.shape_cast %156 : vector<1x128x128xbf16> to vector<128x128xbf16>
    "tpu.trace_start"() <{level = 10 : i32, message = "hwc,cd->hwd"}> : () -> ()
    %cst_271 = arith.constant dense<0.000000e+00> : vector<16x16x128xf32>
    %158 = tpu.matmul %155, %157, %cst_271 {dimension_numbers = #tpu.dot_dimension_numbers<[2], [0], [0, 1], [1], [0, 0, 0, 1, 1, 1], [], []>} : vector<16x16x128xbf16>, vector<128x128xbf16>, vector<16x16x128xf32> -> vector<16x16x128xf32>
    "tpu.trace_stop"() : () -> ()
    %c0_272 = arith.constant 0 : index
    %c0_273 = arith.constant 0 : index
    %c0_274 = arith.constant 0 : index
    %159 = vector.load %arg13[%c0_272, %c0_273, %c0_274] : memref<18x24x128xf32, #tpu.memory_space<vmem>>, vector<16x16x128xf32>
    %160 = arith.addf %159, %158 : vector<16x16x128xf32>
    %c0_275 = arith.constant 0 : index
    %c0_276 = arith.constant 0 : index
    %c0_277 = arith.constant 0 : index
    %161 = vector.load %arg13[%c0_275, %c0_276, %c0_277] : memref<18x24x128xf32, #tpu.memory_space<vmem>>, vector<16x16x128xf32>
    tpu.vector_store %arg13[%c0_275, %c0_276, %c0_277], %160 {strides = array<i32>} : memref<18x24x128xf32, #tpu.memory_space<vmem>>, vector<16x16x128xf32>,
    %c0_278 = arith.constant 0 : index
    %c0_279 = arith.constant 0 : index
    %c0_280 = arith.constant 0 : index
    %162 = vector.load %arg13[%c0_278, %c0_279, %c0_280] : memref<18x24x128xf32, #tpu.memory_space<vmem>>, vector<16x16x128xf32>
    %c0_281 = arith.constant 0 : index
    %c0_282 = arith.constant 0 : index
    %163 = vector.load %arg8[%c0_281, %c0_282] : memref<1x128xf32, #tpu.memory_space<vmem>>, vector<1x128xf32>
    %164 = vector.shape_cast %163 : vector<1x128xf32> to vector<128xf32>
    %165 = vector.shape_cast %164 : vector<128xf32> to vector<1x1x128xf32>
    %166 = vector.broadcast %165 : vector<1x1x128xf32> to vector<16x16x128xf32>
    %167 = arith.mulf %162, %166 : vector<16x16x128xf32>
    %c0_283 = arith.constant 0 : index
    %c0_284 = arith.constant 0 : index
    %168 = vector.load %arg9[%c0_283, %c0_284] : memref<1x128xf32, #tpu.memory_space<vmem>>, vector<1x128xf32>
    %169 = vector.shape_cast %168 : vector<1x128xf32> to vector<128xf32>
    %170 = vector.shape_cast %169 : vector<128xf32> to vector<1x1x128xf32>
    %171 = vector.broadcast %170 : vector<1x1x128xf32> to vector<16x16x128xf32>
    %172 = arith.addf %167, %171 : vector<16x16x128xf32>
    %c0_285 = arith.constant 0 : index
    %c0_286 = arith.constant 0 : index
    %c0_287 = arith.constant 0 : index
    %c0_288 = arith.constant 0 : index
    %173 = vector.load %arg3[%c0_285, %c0_286, %c0_287, %c0_288] : memref<1x16x16x128xbf16, #tpu.memory_space<vmem>>, vector<1x16x16x128xbf16>
    %174 = vector.shape_cast %173 : vector<1x16x16x128xbf16> to vector<16x16x128xbf16>
    %175 = arith.extf %174 : vector<16x16x128xbf16> to vector<16x16x128xf32>
    %176 = arith.addf %175, %172 : vector<16x16x128xf32>
    %cst_289 = arith.constant 0.000000e+00 : f32
    %177 = vector.broadcast %cst_289 : f32 to vector<16x16x128xf32>
    %178 = arith.maximumf %176, %177 : vector<16x16x128xf32>
    %179 = arith.truncf %178 : vector<16x16x128xf32> to vector<16x16x128xbf16>
    %c0_290 = arith.constant 0 : index
    %c0_291 = arith.constant 0 : index
    %c0_292 = arith.constant 0 : index
    %c0_293 = arith.constant 0 : index
    %180 = vector.load %arg10[%c0_290, %c0_291, %c0_292, %c0_293] : memref<1x16x16x128xbf16, #tpu.memory_space<vmem>>, vector<1x16x16x128xbf16>
    %181 = vector.shape_cast %180 : vector<1x16x16x128xbf16> to vector<16x16x128xbf16>
    %182 = vector.shape_cast %179 : vector<16x16x128xbf16> to vector<1x16x16x128xbf16>
    tpu.vector_store %arg10[%c0_290, %c0_291, %c0_292, %c0_293], %182 {strides = array<i32>} : memref<1x16x16x128xbf16, #tpu.memory_space<vmem>>, vector<1x16x16x128xbf16>,
    return
  }
  func.func @transform_0(%arg0: i32, %arg1: i32) -> (i32, i32, i32, i32) {
    %c1_i32 = arith.constant 1 : i32
    %0 = arith.muli %arg0, %c1_i32 : i32
    %1 = arith.addi %0, %arg1 : i32
    %c0_i32 = arith.constant 0 : i32
    %c0_i32_0 = arith.constant 0 : i32
    %c0_i32_1 = arith.constant 0 : i32
    %c0_i32_2 = arith.constant 0 : i32
    return %1, %c0_i32, %c0_i32_0, %c0_i32_1 : i32, i32, i32, i32
  }
  func.func @transform_1(%arg0: i32, %arg1: i32) -> (i32, i32, i32, i32) {
    %c0_i32 = arith.constant 0 : i32
    %c0_i32_0 = arith.constant 0 : i32
    %c0_i32_1 = arith.constant 0 : i32
    return %arg0, %arg1, %c0_i32, %c0_i32_0 : i32, i32, i32, i32
  }
  func.func @transform_2(%arg0: i32, %arg1: i32) -> (i32, i32, i32) {
    %c0_i32 = arith.constant 0 : i32
    %c0_i32_0 = arith.constant 0 : i32
    %c0_i32_1 = arith.constant 0 : i32
    %c0_i32_2 = arith.constant 0 : i32
    return %c0_i32, %c0_i32_0, %c0_i32_1 : i32, i32, i32
  }
  func.func @transform_3(%arg0: i32, %arg1: i32) -> (i32, i32, i32) {
    %c0_i32 = arith.constant 0 : i32
    %c0_i32_0 = arith.constant 0 : i32
    %c0_i32_1 = arith.constant 0 : i32
    %c0_i32_2 = arith.constant 0 : i32
    return %c0_i32, %c0_i32_0, %c0_i32_1 : i32, i32, i32
  }
  func.func @transform_4(%arg0: i32, %arg1: i32) -> (i32, i32) {
    %c0_i32 = arith.constant 0 : i32
    %c0_i32_0 = arith.constant 0 : i32
    %c0_i32_1 = arith.constant 0 : i32
    return %c0_i32, %c0_i32_0 : i32, i32
  }
  func.func @transform_5(%arg0: i32, %arg1: i32) -> (i32, i32) {
    %c0_i32 = arith.constant 0 : i32
    %c0_i32_0 = arith.constant 0 : i32
    %c0_i32_1 = arith.constant 0 : i32
    return %c0_i32, %c0_i32_0 : i32, i32
  }
  func.func @transform_6(%arg0: i32, %arg1: i32) -> (i32, i32) {
    %c0_i32 = arith.constant 0 : i32
    %c0_i32_0 = arith.constant 0 : i32
    %c0_i32_1 = arith.constant 0 : i32
    return %c0_i32, %c0_i32_0 : i32, i32
  }
  func.func @transform_7(%arg0: i32, %arg1: i32) -> (i32, i32) {
    %c0_i32 = arith.constant 0 : i32
    %c0_i32_0 = arith.constant 0 : i32
    %c0_i32_1 = arith.constant 0 : i32
    return %c0_i32, %c0_i32_0 : i32, i32
  }
  func.func @transform_8(%arg0: i32, %arg1: i32) -> (i32, i32, i32, i32) {
    %c0_i32 = arith.constant 0 : i32
    %c0_i32_0 = arith.constant 0 : i32
    %c0_i32_1 = arith.constant 0 : i32
    return %arg0, %arg1, %c0_i32, %c0_i32_0 : i32, i32, i32, i32
  }
}

</mosaic_0001>

<bundles_post_ra>
// kernel: tpu_custom_call.1
= control target key start
LH: loop header
LB: loop body
LE: loop exit
PB: predicated region body
PF: predicated region fallthrough
CT: control target
= control target key end

     0   :  { %s22050_s0 = inlined_call_operand.hbm [shape: bf16[2,20,32,128], index: 0, kind: input, shape index: {}]   ;;  %s22051_s1 = inlined_call_operand.hbm [shape: bf16[2,16,16,128], index: 1, kind: input, shape index: {}]   ;;  %s22052_s2 = inlined_call_operand.hbm [shape: bf16[9,128,128], index: 2, kind: input, shape index: {}]   ;;  %s22053_s3 = inlined_call_operand.hbm [shape: bf16[9,128,128], index: 3, kind: input, shape index: {}]   ;;  %s22054_s4 = inlined_call_operand.vmem [shape: f32[1,128], index: 4, kind: input, shape index: {}]   ;;  %s22055_s5 = inlined_call_operand.vmem [shape: f32[1,128], index: 5, kind: input, shape index: {}]   ;;  %s22056_s6 = inlined_call_operand.vmem [shape: f32[1,128], index: 6, kind: input, shape index: {}]   ;;  %s22057_s7 = inlined_call_operand.vmem [shape: f32[1,128], index: 7, kind: input, shape index: {}]   ;;  %s22058_s8 = inlined_call_operand.hbm [shape: bf16[2,16,16,128], index: 8, kind: output, shape index: {}]  }
   0x1   :  { %22080 = sst [smem:[#allocation72_spill]] %s22050_s0 }
   0x2   :  { %22081 = sst [smem:[#allocation73_spill]] %s22052_s2 }
   0x3   :  { %22082 = sst [smem:[#allocation74_spill]] %s22053_s3 }
   0x4   :  { %22083 = sst [smem:[#allocation75_spill]] %s22058_s8 }
   0x5   :  { %13 = vsyncpa [#allocation6], 0 }
   0x6   :  { %15 = vsyncpa [#allocation6 + $0x1], 0 }
   0x7   :  { %16 = vsyncpa [#allocation9], 0 }
   0x8   :  { %18 = vsyncpa [#allocation9 + $0x1], 0 }
   0x9   :  { %19 = vsyncpa [#allocation12], 0 }
   0xa   :  { %20 = vsyncpa [#allocation7], 0 }
   0xb   :  { %22 = vsyncpa [#allocation7 + $0x1], 0  ;;  %s18225_s27 = smov 0   ;;  %s18227_s28 = smov 0  }
   0xc   :  { %s18229_s29 = smov 0   ;;  %s18231_s30 = smov 0  }
   0xd   :  { %s18233_s9 = smov 0   ;;  %s18235_s10 = smov 0  }
   0xe LB: > { %22084 = sst [smem:[#allocation19_spill]] %s18146_s27  ;;  %s18256_s11 = sadd.s32 4294967295, %s18166_s10   ;;  %s18166_s10 = sphi %s18235_s10, %s28_s10   ;;  %s18162_s9 = sphi %s18233_s9, %s22481_s9   ;;  %s18158_s30 = sphi %s18231_s30, %s22480_s30   ;;  %s18154_s29 = sphi %s18229_s29, %s22476_s29   ;;  %s18150_s28 = sphi %s18227_s28, %s22479_s28   ;;  %s18146_s27 = sphi %s18225_s27, %s22478_s27  }
   0xf   : > { %22085 = sst [smem:[#allocation20_spill]] %s18154_s29  ;;  %s14135_s12 = sadd.s32 4294967294, %s18166_s10  }
  0x10   : > { %p62_p0 = scmp.ne.s32.totalorder %s18150_s28, %s18146_s27  ;;  %p63_p1 = scmp.eq.s32.totalorder %s18256_s11, 0 }
  0x11   : > { %p242_p2 = scmp.eq.s32.totalorder %s18256_s11, 1  ;;  %p248_p3 = scmp.eq.s32.totalorder %s14135_s12, 1 }
  0x12   : > { %p18265_p4 = por %p63_p1, %p62_p0  ;;  %p14136_p5 = scmp.ge.s32.totalorder %s18166_s10, 1 }
  0x13   : > { %p18270_p6 = por %p248_p3, %p62_p0  ;;  %p255_p7 = scmp.lt.s32.totalorder %s18166_s10, 3 }
  0x14   : > { %s18168_s16 = smov [#allocation10]   ;;  %s18169_s19 = smov [#allocation11]  }
  0x15   : > { %s22087_s14 = scalar_select %p18270_p6, 1, 0 }
  0x16   : > { %p18275_p8 = pnand %p14136_p5, %p255_p7  ;;  %s267_s17 = sshll.u32 %s18168_s16, 4  ;;  %s268_s17 = int_to_ptr.vmem [resolvable:$true] %s267_s17 }
  0x17   : > { %22088 = sst [smem:[#allocation21_spill]] %s22087_s14  ;;  %s280_s20 = sshll.u32 %s18169_s19, 4  ;;  %s281_s20 = int_to_ptr.vmem [resolvable:$true] %s280_s20 }
  0x18   : > { %p17348_p9 = pneg %p18275_p8  ;;  %s17977_s21 = scalar_lea.vmem %s268_s17, 9216 }
  0x19   : > { %p17978_p13 = scmp.ne.s32.totalorder %s268_s17, %s17977_s21  ;;  %p17985_p5 = scmp.lt.s32.totalorder %s268_s17, %s268_s17 }
  0x1a   : > { %p18284_p11 = pnand %p17348_p9, %p63_p1  ;;  %p17986_p7 = scmp.lt.s32.totalorder %s17977_s21, %s17977_s21 }
  0x1c   : > { %p17968_p12 = pneg %p18284_p11  ;;  %p17987_p10 = por %p17986_p7, %p17985_p5 }
  0x1e   : > { %p17980_p0 = pnand %p17978_p13, %p17968_p12 }
  0x20   : > { %p17981_p3 = pneg %p17980_p0 }
  0x22   : > { %p17988_p9 = pnand %p17987_p10, %p17981_p3 }
  0x24   : > { %17991 = shalt.err (!%p17988_p9)
}
  0x25   : > { %s22059_s22 = smov 64   ;;  %s22061_s23 = smov 4  }
  0x26   : > { %s22091_s2 = sld [smem:[#allocation73_spill]]  ;;  %s18003_s26 = scalar_lea.vmem %s281_s20, 9216 }
  0x27   : > { %p18004_p13 = scmp.ne.s32.totalorder %s281_s20, %s18003_s26  ;;  %p18011_p10 = scmp.lt.s32.totalorder %s281_s20, %s281_s20 }
  0x28   : > { %p18012_p3 = scmp.lt.s32.totalorder %s18003_s26, %s18003_s26 }
  0x29   : > { %p18006_p0 = pnand %p18004_p13, %p17968_p12 }
  0x2a   : > { %p18013_p7 = por %p18012_p3, %p18011_p10 }
  0x2b   : > { %p18007_p5 = pneg %p18006_p0 }
  0x2c   : > { %17351 = dma.hbm_to_vmem [thread:$0]  (!%p18284_p11), %s22091_s2, 9216, %s268_s17, [#allocation9], %s22059_s22, %s22059_s22, %s22061_s23  }
  0x2d   : > { %p18014_p9 = pnand %p18013_p7, %p18007_p5 }
  0x2f   : > { %18017 = shalt.err (!%p18014_p9)
}
  0x30   : > { %s22092_s3 = sld [smem:[#allocation74_spill]]  ;;  %s40_s17 = sadd.s32 1, %s18162_s9 }
  0x31   : > { %s49_s18 = sadd.s32 1, %s18154_s29  ;;  %p42_p12 = scmp.ge.s32.totalorder %s40_s17, 2 }
  0x32   : > { %p56_p13 = scmp.ne.s32.totalorder %s18154_s29, %s18150_s28  ;;  %p57_p0 = scmp.eq.s32.totalorder %s18166_s10, 0 }
  0x33   : > { %p17368_p5 = scmp.lt.s32.totalorder %s18166_s10, 2  ;;  %s22483_s17 = smov (%p42_p12, %s40_s17), 0 }
  0x34   : > { %22093 = sst [smem:[#allocation22_spill]] %s22483_s17  ;;  %p58_p10 = por %p57_p0, %p56_p13 }
  0x35   : > { %p18322_p3 = por %p242_p2, %p56_p13  ;;  %s46_s21 = ssub.s32 %s18162_s9, %s22483_s17 }
  0x36   : > { %17354 = dma.hbm_to_vmem [thread:$0]  (!%p18284_p11), %s22092_s3, 9216, %s281_s20, [#allocation12], %s22059_s22, %s22059_s22, %s22061_s23  }
  0x37   : > { %s22094_s19 = scalar_select %p18322_p3, 1, 0 }
  0x38   : > { %s18329_s24 = sand.u32 1, %s18154_s29   ;;  %p47_p11 = scmp.eq.s32.totalorder %s46_s21, 0 }
  0x39   : > { %22095 = sst [smem:[#allocation23_spill]] %s22094_s19  ;;  %s17331_s20 = smul.u32 320, %s18329_s24 }
  0x3a   : > { %p18332_p7 = pnand %p17368_p5, %p58_p10  ;;  %s17332_s12 = smul.u32 5120, %s18162_s9 }
  0x3b   : > { %s18337_s26 = scalar_select %p47_p11, %s18154_s29, %s49_s18  }
  0x3c   : > { %s310_s16 = scalar_lea.vmem [#allocation5], %s17331_s20  ;;  %s22098_s0 = sld [smem:[#allocation72_spill]] }
  0x3d   : > { %22097 = sst [smem:[#allocation24_spill]] %s18337_s26  ;;  %s318_s22 = sshll.u32 %s310_s16, 4  ;;  %s319_s22 = int_to_ptr.vmem [resolvable:$true] %s318_s22 }
  0x3e   : > { %s307_s17 = scalar_lea.sflag [#allocation6], %s18329_s24  ;;  %p18020_p2 = pneg %p18332_p7 }
  0x3f   : > { %s18031_s21 = scalar_lea.vmem %s319_s22, 5120  ;;  %s18172_s14 = smov [#allocation5]  }
  0x40   : > { %p18032_p9 = scmp.ne.s32.totalorder %s319_s22, %s18031_s21  ;;  %s18036_s18 = sshll.u32 %s18172_s14, 4  ;;  %s18037_s18 = int_to_ptr.vmem [resolvable:$false] %s18036_s18 }
  0x41   : > { %s18038_s26 = scalar_lea.vmem %s18037_s18, 10240  ;;  %p18039_p0 = scmp.lt.s32.totalorder %s319_s22, %s18037_s18 }
  0x42   : > { %s317_s3 = scalar_lea.hbm %s22098_s0, %s17332_s12  ;;  %p18034_p12 = pnand %p18032_p9, %p18020_p2 }
  0x43   : > { %p18040_p5 = scmp.lt.s32.totalorder %s18038_s26, %s18031_s21 }
  0x44   : > { %p18035_p13 = pneg %p18034_p12 }
  0x45   : > { %p18041_p10 = por %p18040_p5, %p18039_p0 }
  0x47   : > { %p18042_p11 = pnand %p18041_p10, %p18035_p13 }
  0x49   : > { %18045 = shalt.err (!%p18042_p11)
}
  0x4a   : > { %s22099_s2 = smov 4   ;;  %s22100_s23 = smov 64  }
  0x4b   : > { %17358 = dma.hbm_to_vmem [thread:$0]  (!%p18332_p7), %s317_s3, 5120, %s319_s22, %s307_s17, %s22100_s23, %s22100_s23, %s22099_s2  }
  0x4c   : > { %s328_s20 = sand.u32 1, %s18166_s10   ;;  %s14141_s12 = sshll.u32 %s18329_s24, 7 }
  0x4d   : > { %s14813_s14 = sshll.u32 %s18162_s9, 11  ;;  %s332_s16 = scalar_lea.vmem [#allocation8], %s14141_s12 }
  0x4e   : > { %s342_s0 = sshll.u32 %s332_s16, 4  ;;  %s341_s21 = scalar_lea.hbm %s22051_s1, %s14813_s14  ;;  %s343_s0 = int_to_ptr.vmem [resolvable:$true] %s342_s0 }
  0x4f   : > { %s329_s29 = scalar_lea.sflag [#allocation9], %s328_s20  ;;  %s18059_s27 = scalar_lea.vmem %s343_s0, 2048 }
  0x50   : > { %p18060_p9 = scmp.ne.s32.totalorder %s343_s0, %s18059_s27  ;;  %s18173_s8 = smov [#allocation8]  }
  0x51   : > { %s18064_s19 = sshll.u32 %s18173_s8, 4  ;;  %s18065_s19 = int_to_ptr.vmem [resolvable:$false] %s18064_s19 }
  0x52   : > { %p18062_p12 = pnand %p18060_p9, %p18020_p2  ;;  %s18066_s3 = scalar_lea.vmem %s18065_s19, 4096 }
  0x53   : > { %p18067_p0 = scmp.lt.s32.totalorder %s343_s0, %s18065_s19  ;;  %p18068_p5 = scmp.lt.s32.totalorder %s18066_s3, %s18059_s27 }
  0x54   : > { %p18063_p13 = pneg %p18062_p12 }
  0x55   : > { %p18069_p10 = por %p18068_p5, %p18067_p0 }
  0x57   : > { %p18070_p11 = pnand %p18069_p10, %p18063_p13 }
  0x59   : > { %18073 = shalt.err (!%p18070_p11)
}
  0x5a   : > { %17361 = dma.hbm_to_vmem [thread:$0]  (!%p18332_p7), %s341_s21, 2048, %s343_s0, %s329_s29, %s22100_s23, %s22100_s23, %s22099_s2  }
  0x5b   : > { %354 = sbr.rel (%p18275_p8) target bundleno = 1978 (0x7ba), region = 52 }
  0x60   : > { %s18371_s22 = sand.u32 1, %s18150_s28  }
  0x61   : > { %s17333_s8 = smul.u32 320, %s18371_s22  ;;  %s357_s27 = scalar_lea.sflag [#allocation6], %s18371_s22 }
  0x63   : > { %s18375_s17 = scalar_lea.vmem [#allocation5], %s17333_s8 }
  0x64   : > { %18125 = dma.done.wait (%p18265_p4), %s357_s27, 5120  }
  0x65   : > { %18127 = vsyncadd (%p18265_p4), %s357_s27, 4294962176  ;;  %s365_s0 = sand.u32 1, %s18256_s11   ;;  %s14145_s29 = sshll.u32 %s18371_s22, 7 }
  0x66   : > { %s366_s15 = scalar_lea.sflag [#allocation9], %s365_s0  ;;  %s18385_s19 = scalar_lea.vmem [#allocation8], %s14145_s29 }
  0x67   : > { %18129 = dma.done.wait (%p18265_p4), %s366_s15, 2048  }
  0x68   : > { %18131 = vsyncadd (%p18265_p4), %s366_s15, 4294965248 }
  0x69   : > { %18133 = dma.done.wait (%p63_p1), [#allocation9], 9216  }
  0x6a   : > { %18135 = vsyncadd (%p63_p1), [#allocation9], 4294958080 }
  0x6b   : > { %18137 = dma.done.wait (%p63_p1), [#allocation12], 9216  }
  0x6c   : > { %18139 = vsyncadd (%p63_p1), [#allocation12], 4294958080  ;;  %v22070_v0 = vmov 0.0   ;;  %vm18175_vm0 = vmmov 0   ;;  %v17429_v1 = vld [vmem:[#allocation10 + $0x38] sm:$0xff]   ;;  %v17431_v3 = vld [vmem:[#allocation10 + $0x30] sm:$0xff]  }
  0x6d   : > { %15767 = vmatprep.subr.bf16.mxu0 %v22070_v0  ;;  %15891 = vmatprep.subr.bf16.mxu1 %v22070_v0  ;;  %v17430_v2 = vld [vmem:[#allocation10 + $0xf8] sm:$0xff]   ;;  %v17432_v4 = vld [vmem:[#allocation10 + $0xf0] sm:$0xff]   ;;  %v17433_v5 = vld [vmem:[#allocation10 + $0x28] sm:$0xff]   ;;  %vm2588_vm1 = vsmask.f32 3328  ;;  %v22101_v39 = vmov 0 }
  0x6e   : > { %15783 = vmatprep.mubr.msk.bf16.mxu0 %vm18175_vm0, %v22070_v0  ;;  %15907 = vmatprep.mubr.msk.bf16.mxu1 %vm18175_vm0, %v22070_v0  ;;  %v17434_v6 = vld [vmem:[#allocation10 + $0xe8] sm:$0xff]   ;;  %v17435_v7 = vld [vmem:[#allocation10 + $0x20] sm:$0xff]   ;;  %vm2589_vm2 = vsmask.f32 7440  ;;  %v17437_v9 = vld [vmem:[#allocation10 + $0x18] sm:$0xff]   ;;  %vm5627_vm4 = vcmask 1042432  }
  0x6f   : > { %15768 = vmatpush3.bf16.msra.mxu0 %v17429_v1  ;;  %15892 = vmatpush3.bf16.msra.mxu1 %v17430_v2  ;;  %v17436_v8 = vld [vmem:[#allocation10 + $0xe0] sm:$0xff]   ;;  %v17438_v10 = vld [vmem:[#allocation10 + $0xd8] sm:$0xff]   ;;  %v17439_v11 = vld [vmem:[#allocation10 + $0x10] sm:$0xff]   ;;  %vm5628_vm5 = vcmask 1046532   ;;  %vm8544_vm7 = vcmask 1040384   ;;  %s22471_s13 = sld [smem:[#allocation75_spill]] }
  0x70   : > { %15769 = vmatprep.subr.bf16.mxu0 %v22070_v0  ;;  %15893 = vmatprep.subr.bf16.mxu1 %v22070_v0  ;;  %v419_v12 = vld [vmem:[%s18375_s17] sm:$0xff]   ;;  %v17440_v15 = vld [vmem:[#allocation10 + $0xd0] sm:$0xff]   ;;  %v421_v21 = vld [vmem:[%s18375_s17 + $0x8] sm:$0xf]  ;;  %vm8545_vm8 = vsmask.f32 256 }
  0x71   : > { %v2508_v13 = vld [vmem:[%s18375_s17] sm:$0xf]  ;;  %v2509_v14 = vld [vmem:[%s18375_s17 + $0x4] sm:$0xf]  ;;  %479 = vst [vmem:[#allocation3] sm:$0xff] %v419_v12   ;;  %v422_v20 = vld [vmem:[%s18375_s17 + $0x10] sm:$0xff]  }
  0x72   : > { %v2592_v16 = vshrl.u32 %v2508_v13, 16  ;;  %v2595_v17 = vshll.u32 %v2508_v13, 16  ;;  %v2601_v18 = vshll.u32 %v2509_v14, 16  ;;  %v2605_v19 = vshrl.u32 %v2509_v14, 16  ;;  %482 = vst [vmem:[#allocation3 + $0xc] sm:$0xff] %v422_v20   ;;  %v17441_v27 = vld [vmem:[#allocation10 + $0x8] sm:$0xff]   ;;  %vm18429_vm3 = vmor %vm2588_vm1, %vm2589_vm2 }
  0x73   : > { %15770 = vmatpush3.bf16.msra.mxu0 %v17431_v3  ;;  %15894 = vmatpush3.bf16.msra.mxu1 %v17432_v4  ;;  %481 = vst [vmem:[#allocation3 + $0x8] sm:$0xf] %v421_v21  ;;  %v2510_v25 = vld [vmem:[%s18375_s17 + $0x8] sm:$0xf]  ;;  %v2511_v28 = vld [vmem:[%s18375_s17 + $0xc] sm:$0x1]  ;;  %vm18555_vm6 = vmor %vm5627_vm4, %vm5628_vm5 }
  0x74   : > { %15771 = vmatprep.subr.bf16.mxu0 %v22070_v0  ;;  %15895 = vmatprep.subr.bf16.mxu1 %v22070_v0  ;;  %v2594_v22 = vrot.slane %v2592_v16, 4  ;;  %v2597_v23 = vrot.slane %v2595_v17, 5  ;;  %v2603_v24 = vrot.slane %v2601_v18, 5  ;;  %v2607_v26 = vrot.slane %v2605_v19, 4  ;;  %v2512_v29 = vld [vmem:[%s18375_s17 + $0x10] sm:$0xf]  ;;  %vm20276_vm9 = vmand %vm8544_vm7, %vm8545_vm8 }
  0x75   : > { %v2513_v30 = vld [vmem:[%s18375_s17 + $0x14] sm:$0xf]  ;;  %v17442_v31 = vld [vmem:[#allocation10 + $0xc8] sm:$0xff]   ;;  %v2611_v34 = vshll.u32 %v2510_v25, 16  ;;  %v2615_v35 = vshrl.u32 %v2510_v25, 16  ;;  %v425_v37 = vld [vmem:[%s18375_s17 + $0x20] sm:$0xff]  }
  0x76   : > { %v2598_v32 = vor.u32 %v2597_v23, %v2594_v22  ;;  %v2608_v33 = vor.u32 %v2607_v26, %v2603_v24  ;;  %v424_v36 = vld [vmem:[%s18375_s17 + $0x18] sm:$0xf]  ;;  %v428_v38 = vld [vmem:[%s18375_s17 + $0x30] sm:$0xff]   ;;  %v22102_v39 = vsel %vm18429_vm3, 4294967295, %v22101_v39  ;;  %v2621_v40 = vshll.u32 %v2511_v28, 16  ;;  %485 = vst [vmem:[#allocation3 + $0x18] sm:$0xff] %v425_v37  }
  0x77   : > { %15772 = vmatpush3.bf16.msra.mxu0 %v17433_v5  ;;  %15896 = vmatpush3.bf16.msra.mxu1 %v17434_v6  ;;  %22103 = vst [vmem:[#allocation25_spill] sm:$0xff] %v22102_v39  ;;  %v2626_v41 = vshrl.u32 %v2512_v29, 16  ;;  %v2629_v42 = vshll.u32 %v2512_v29, 16  ;;  %v2635_v43 = vshll.u32 %v2513_v30, 16  ;;  %484 = vst [vmem:[#allocation3 + $0x14] sm:$0xf] %v424_v36 }
  0x78   : > { %15773 = vmatprep.subr.bf16.mxu0 %v22070_v0  ;;  %15897 = vmatprep.subr.bf16.mxu1 %v22070_v0  ;;  %v2514_v44 = vld [vmem:[%s18375_s17 + $0x18] sm:$0xf]  ;;  %488 = vst [vmem:[#allocation3 + $0x24] sm:$0xff] %v428_v38   ;;  %v2599_v45 = vrot.slane %v2598_v32, 4  ;;  %v2609_v46 = vrot.slane %v2608_v33, 4  ;;  %v2613_v47 = vrot.slane %v2611_v34, 5 }
  0x79   : > { %v2617_v48 = vrot.slane %v2615_v35, 4  ;;  %v2515_v49 = vld [vmem:[%s18375_s17 + $0x1c] sm:$0x1]  ;;  %v17443_v50 = vld [vmem:[#allocation10] sm:$0xff]   ;;  %v2623_v51 = vrot.slane %v2621_v40, 5  ;;  %v17445_v52 = vld [vmem:[#allocation3] sm:$0xff]  }
  0x7a   : > { %v2604_v53 = vsel %vm18429_vm3, %v2599_v45, %v2603_v24  ;;  %v2614_v54 = vsel %vm18429_vm3, %v2609_v46, %v2613_v47  ;;  %v2628_v56 = vrot.slane %v2626_v41, 4  ;;  %v17444_v57 = vld [vmem:[#allocation10 + $0xc0] sm:$0xff]   ;;  %v2631_v58 = vrot.slane %v2629_v42, 5  ;;  %v17447_v63 = vld [vmem:[#allocation10 + $0x1b8] sm:$0xff]   ;;  %v427_v4 = vld [vmem:[%s18375_s17 + $0x28] sm:$0xf] }
  0x7b   : > { %15774 = vmatpush3.bf16.msra.mxu0 %v17435_v7  ;;  %15898 = vmatpush3.bf16.msra.mxu1 %v17436_v8  ;;  %v2618_v55 = vor.u32 %v2617_v48, %v2613_v47  ;;  %3331 = vst [vmem:[#allocation3] sm:$0xf] %v2604_v53  ;;  %3332 = vst [vmem:[#allocation3 + $0x4] sm:$0xf] %v2614_v54  ;;  %v2637_v60 = vrot.slane %v2635_v43, 5  ;;  %v2639_v61 = vshrl.u32 %v2513_v30, 16 }
  0x7c   : > { %15775 = vmatprep.subr.bf16.mxu0 %v22070_v0  ;;  %15899 = vmatprep.subr.bf16.mxu1 %v22070_v0  ;;  %v2645_v62 = vshll.u32 %v2514_v44, 16  ;;  %v2632_v1 = vor.u32 %v2631_v58, %v2628_v56  ;;  %v2649_v2 = vshrl.u32 %v2514_v44, 16  ;;  %v2655_v3 = vshll.u32 %v2515_v49, 16  ;;  %v17448_v5 = vld [vmem:[#allocation3 + $0x8] sm:$0xff]   ;;  %487 = vst [vmem:[#allocation3 + $0x20] sm:$0xf] %v427_v4 }
  0x7d   : > { %v2619_v59 = vrot.slane %v2618_v55, 4  ;;  %v2641_v7 = vrot.slane %v2639_v61, 4  ;;  %v17446_v8 = vld [vmem:[#allocation3 + $0xc] sm:$0xff]   ;;  %v17454_v18 = vld [vmem:[#allocation10 + $0x1b0] sm:$0xff]   ;;  %v430_v20 = vld [vmem:[%s18375_s17 + $0x38] sm:$0xf] }
  0x7e   : > { %v2657_v13 = vrot.slane %v2655_v3, 5  ;;  %v17450_v16 = vld [vmem:[#allocation3 + $0x10] sm:$0xff]   ;;  %490 = vst [vmem:[#allocation3 + $0x2c] sm:$0xf] %v430_v20  ;;  %v433_v23 = vld [vmem:[%s18375_s17 + $0x48] sm:$0xf] }
  0x7f   : > { %15776 = vmatpush3.bf16.msra.mxu0 %v17437_v9  ;;  %15900 = vmatpush3.bf16.msra.mxu1 %v17438_v10  ;;  %v2624_v6 = vsel %vm18429_vm3, %v2619_v59, %v2623_v51  ;;  %v2633_v9 = vrot.slane %v2632_v1, 4  ;;  %v2647_v10 = vrot.slane %v2645_v62, 5  ;;  %v2642_v12 = vor.u32 %v2641_v7, %v2637_v60  ;;  %v431_v21 = vld [vmem:[%s18375_s17 + $0x40] sm:$0xff]   ;;  %v434_v24 = vld [vmem:[%s18375_s17 + $0x50] sm:$0xff]   ;;  %493 = vst [vmem:[#allocation3 + $0x38] sm:$0xf] %v433_v23 }
  0x80   : > { %15777 = vmatprep.subr.bf16.mxu0 %v22070_v0  ;;  %15901 = vmatprep.subr.bf16.mxu1 %v22070_v0  ;;  %3333 = vst [vmem:[#allocation3 + $0x8] sm:$0xf] %v2624_v6  ;;  %491 = vst [vmem:[#allocation3 + $0x30] sm:$0xff] %v431_v21   ;;  %v17449_v25 = vld [vmem:[#allocation3 + $0x14] sm:$0xff]   ;;  %v436_v28 = vld [vmem:[%s18375_s17 + $0x58] sm:$0xf] }
  0x81   : > { %v2638_v14 = vsel %vm18429_vm3, %v2633_v9, %v2637_v60  ;;  %v2643_v17 = vrot.slane %v2642_v12, 4  ;;  %494 = vst [vmem:[#allocation3 + $0x3c] sm:$0xff] %v434_v24   ;;  %v437_v29 = vld [vmem:[%s18375_s17 + $0x60] sm:$0xff]   ;;  %496 = vst [vmem:[#allocation3 + $0x44] sm:$0xf] %v436_v28  ;;  %v446_v35 = vld [vmem:[%s18375_s17 + $0x90] sm:$0xff]  }
  0x82   : > { %3334 = vst [vmem:[#allocation3 + $0xc] sm:$0xf] %v2638_v14  ;;  %497 = vst [vmem:[#allocation3 + $0x48] sm:$0xff] %v437_v29   ;;  %v439_v30 = vld [vmem:[%s18375_s17 + $0x68] sm:$0xf]  ;;  %v443_v33 = vld [vmem:[%s18375_s17 + $0x80] sm:$0xff]  }
  0x83   : > { %15778 = vmatpush3.bf16.msra.mxu0 %v17439_v11  ;;  %15902 = vmatpush3.bf16.msra.mxu1 %v17440_v15  ;;  %v2651_v11 = vrot.slane %v2649_v2, 4  ;;  %v2648_v22 = vsel %vm18429_vm3, %v2643_v17, %v2647_v10  ;;  %v442_v32 = vld [vmem:[%s18375_s17 + $0x78] sm:$0xf]  ;;  %499 = vst [vmem:[#allocation3 + $0x50] sm:$0xf] %v439_v30  ;;  %503 = vst [vmem:[#allocation3 + $0x60] sm:$0xff] %v443_v33  }
  0x84   : > { %15779 = vmatprep.subr.bf16.mxu0 %v22070_v0  ;;  %15903 = vmatprep.subr.bf16.mxu1 %v22070_v0  ;;  %3335 = vst [vmem:[#allocation3 + $0x10] sm:$0xf] %v2648_v22  ;;  %502 = vst [vmem:[#allocation3 + $0x5c] sm:$0xf] %v442_v32  ;;  %v445_v34 = vld [vmem:[%s18375_s17 + $0x88] sm:$0xf] }
  0x85   : > { %v2652_v15 = vor.u32 %v2651_v11, %v2647_v10  ;;  %505 = vst [vmem:[#allocation3 + $0x68] sm:$0xf] %v445_v34  ;;  %506 = vst [vmem:[#allocation3 + $0x6c] sm:$0xff] %v446_v35   ;;  %v17470_v36 = vld [vmem:[#allocation10 + $0x1a0] sm:$0xff]   ;;  %v17451_v37 = vld [vmem:[#allocation3 + $0x1c] sm:$0xff]   ;;  %s13988_s25 = scalar_lea.sflag [#allocation7], %s18371_s22 }
  0x86   : > { %v17452_v38 = vld [vmem:[#allocation3 + $0x18] sm:$0xff]   ;;  %v17453_v40 = vld [vmem:[#allocation3 + $0x24] sm:$0xff]   ;;  %v449_v44 = vld [vmem:[%s18375_s17 + $0xa0] sm:$0xff]   ;;  %vm8601_vm10 = vsmask.f32 7938 }
  0x87   : > { %15780 = vmatpush3.bf16.msra.mxu0 %v17441_v27  ;;  %15904 = vmatpush3.bf16.msra.mxu1 %v17442_v31  ;;  %v2653_v19 = vrot.slane %v2652_v15, 4  ;;  %v17461_v27 = vld [vmem:[#allocation10 + $0x1a8] sm:$0xff]   ;;  %v440_v31 = vld [vmem:[%s18375_s17 + $0x70] sm:$0xff]   ;;  %v448_v42 = vld [vmem:[%s18375_s17 + $0x98] sm:$0xf]  ;;  %509 = vst [vmem:[#allocation3 + $0x78] sm:$0xff] %v449_v44  }
  0x88   : > { %15781 = vmatprep.subr.bf16.mxu0 %v22070_v0  ;;  %15905 = vmatprep.subr.bf16.mxu1 %v22070_v0  ;;  %500 = vst [vmem:[#allocation3 + $0x54] sm:$0xff] %v440_v31   ;;  %v17455_v41 = vld [vmem:[#allocation3 + $0x20] sm:$0xff]   ;;  %v17456_v43 = vld [vmem:[#allocation3 + $0x2c] sm:$0xff]   ;;  %508 = vst [vmem:[#allocation3 + $0x74] sm:$0xf] %v448_v42 }
  0x89   : > { %v2658_v26 = vsel %vm18429_vm3, %v2653_v19, %v2657_v13  ;;  %v17477_v45 = vld [vmem:[#allocation10 + $0x198] sm:$0xff]   ;;  %v451_v46 = vld [vmem:[%s18375_s17 + $0xa8] sm:$0xf]  ;;  %v452_v47 = vld [vmem:[%s18375_s17 + $0xb0] sm:$0xff]  }
  0x8a   : > { %3336 = vst [vmem:[#allocation3 + $0x14] sm:$0xf] %v2658_v26  ;;  %511 = vst [vmem:[#allocation3 + $0x80] sm:$0xf] %v451_v46  ;;  %v454_v48 = vld [vmem:[%s18375_s17 + $0xb8] sm:$0xf] }
  0x8b   : > { %15782 = vmatpush3.bf16.msra.mxu0 %v17443_v50  ;;  %15906 = vmatpush3.bf16.msra.mxu1 %v17444_v57  ;;  %v455_v49 = vld [vmem:[%s18375_s17 + $0xc0] sm:$0xff]   ;;  %512 = vst [vmem:[#allocation3 + $0x84] sm:$0xff] %v452_v47   ;;  %514 = vst [vmem:[#allocation3 + $0x8c] sm:$0xf] %v454_v48  ;;  %v457_v50 = vld [vmem:[%s18375_s17 + $0xc8] sm:$0xf] }
  0x8c   : > { %16015 = vmatprep.subr.bf16.mxu0 %v22070_v0  ;;  %16139 = vmatprep.subr.bf16.mxu1 %v22070_v0  ;;  %515 = vst [vmem:[#allocation3 + $0x90] sm:$0xff] %v455_v49   ;;  %517 = vst [vmem:[#allocation3 + $0x98] sm:$0xf] %v457_v50  ;;  %v17486_v51 = vld [vmem:[#allocation10 + $0x190] sm:$0xff]   ;;  %v460_v53 = vld [vmem:[%s18375_s17 + $0xd8] sm:$0xf] }
  0x8d   : > { %v461_v54 = vld [vmem:[%s18375_s17 + $0xe0] sm:$0xff]   ;;  %520 = vst [vmem:[#allocation3 + $0xa4] sm:$0xf] %v460_v53  ;;  %v463_v55 = vld [vmem:[%s18375_s17 + $0xe8] sm:$0xf]  ;;  %v464_v56 = vld [vmem:[%s18375_s17 + $0xf0] sm:$0xff]  }
  0x8e   : > { %15784 = vmatmul.mubr.bf16.vlgmr.msra.gmra.mxu0 %v17445_v52  ;;  %15908 = vmatmul.mubr.bf16.vlgmr.msra.gmra.mxu1 %v17446_v8  ;;  %v458_v52 = vld [vmem:[%s18375_s17 + $0xd0] sm:$0xff]   ;;  %521 = vst [vmem:[#allocation3 + $0xa8] sm:$0xff] %v461_v54   ;;  %523 = vst [vmem:[#allocation3 + $0xb0] sm:$0xf] %v463_v55  ;;  %v17493_v57 = vld [vmem:[#allocation10 + $0x188] sm:$0xff]   ;;  %v22104_v48 = vmov 0 }
  0x8f   : > { %16016 = vmatpush3.bf16.msra.mxu0 %v17447_v63  ;;  %15787 = vmatprep.mubr.msk.bf16.mxu0 %vm18175_vm0, %v22070_v0  ;;  %518 = vst [vmem:[#allocation3 + $0x9c] sm:$0xff] %v458_v52   ;;  %524 = vst [vmem:[#allocation3 + $0xb4] sm:$0xff] %v464_v56   ;;  %v17457_v58 = vld [vmem:[#allocation3 + $0x28] sm:$0xff]   ;;  %v17458_v59 = vld [vmem:[#allocation3 + $0x34] sm:$0xff]   ;;  %v22105_v48 = vsel %vm18555_vm6, 4294967295, %v22104_v48 }
  0x90   : > { %15911 = vmatprep.mubr.msk.bf16.mxu1 %vm18175_vm0, %v22070_v0  ;;  %16017 = vmatprep.subr.bf16.mxu0 %v22070_v0  ;;  %v17459_v60 = vld [vmem:[#allocation3 + $0x30] sm:$0xff]   ;;  %v17460_v61 = vld [vmem:[#allocation3 + $0x3c] sm:$0xff]   ;;  %v17463_v63 = vld [vmem:[#allocation3 + $0x44] sm:$0xff]   ;;  %22106 = vst [vmem:[#allocation26_spill] sm:$0xff] %v22105_v48 }
  0x91   : > { %v17462_v62 = vld [vmem:[#allocation3 + $0x38] sm:$0xff]   ;;  %v466_v1 = vld [vmem:[%s18375_s17 + $0xf8] sm:$0xf]  ;;  %v467_v2 = vld [vmem:[%s18375_s17 + $0x100] sm:$0xff]  }
  0x92   : > { %526 = vst [vmem:[#allocation3 + $0xbc] sm:$0xf] %v466_v1  ;;  %v469_v3 = vld [vmem:[%s18375_s17 + $0x108] sm:$0xf]  ;;  %527 = vst [vmem:[#allocation3 + $0xc0] sm:$0xff] %v467_v2   ;;  %v470_v4 = vld [vmem:[%s18375_s17 + $0x110] sm:$0xff]  }
  0x93   : > { %16018 = vmatpush3.bf16.msra.mxu0 %v17454_v18  ;;  %529 = vst [vmem:[#allocation3 + $0xc8] sm:$0xf] %v469_v3  ;;  %530 = vst [vmem:[#allocation3 + $0xcc] sm:$0xff] %v470_v4   ;;  %v17501_v6 = vld [vmem:[#allocation10 + $0x180] sm:$0xff]   ;;  %v17502_v7 = vld [vmem:[#allocation10 + $0x70] sm:$0xff]  }
  0x94   : > { %16019 = vmatprep.subr.bf16.mxu0 %v22070_v0  ;;  %v17464_v8 = vld [vmem:[#allocation3 + $0x40] sm:$0xff]   ;;  %v17465_v9 = vld [vmem:[#allocation3 + $0x4c] sm:$0xff]   ;;  %v472_v10 = vld [vmem:[%s18375_s17 + $0x118] sm:$0xf] }
  0x95   : > { %v473_v11 = vld [vmem:[%s18375_s17 + $0x120] sm:$0xff]   ;;  %532 = vst [vmem:[#allocation3 + $0xd4] sm:$0xf] %v472_v10  ;;  %v17466_v12 = vld [vmem:[#allocation3 + $0x48] sm:$0xff]   ;;  %v17505_v13 = vld [vmem:[#allocation10 + $0x68] sm:$0xff]  }
  0x96   : > { %15788 = vmatmul.mubr.bf16.gmra.mxu0 %v17448_v5  ;;  %15912 = vmatmul.mubr.bf16.gmra.mxu1 %v17449_v25  ;;  %v17500_v5 = vld [vmem:[#allocation10 + $0x78] sm:$0xff]   ;;  %533 = vst [vmem:[#allocation3 + $0xd8] sm:$0xff] %v473_v11   ;;  %v17467_v14 = vld [vmem:[#allocation3 + $0x54] sm:$0xff]   ;;  %v17469_v19 = vld [vmem:[#allocation3 + $0x5c] sm:$0xff]  }
  0x97   : > { %15791 = vmatprep.mubr.msk.bf16.mxu0 %vm18175_vm0, %v22070_v0  ;;  %15915 = vmatprep.mubr.msk.bf16.mxu1 %vm18175_vm0, %v22070_v0  ;;  %v17506_v15 = vld [vmem:[#allocation10 + $0x60] sm:$0xff]   ;;  %v17509_v18 = vld [vmem:[#allocation10 + $0x58] sm:$0xff]   ;;  %v17510_v20 = vld [vmem:[#allocation10 + $0x50] sm:$0xff]  }
  0x98   : > { %16020 = vmatpush3.bf16.msra.mxu0 %v17461_v27  ;;  %16140 = vmatpush3.bf16.msra.mxu1 %v17500_v5  ;;  %v17468_v17 = vld [vmem:[#allocation3 + $0x50] sm:$0xff]   ;;  %v17471_v21 = vld [vmem:[#allocation3 + $0x58] sm:$0xff]   ;;  %v17472_v23 = vld [vmem:[#allocation3 + $0x64] sm:$0xff]  }
  0x99   : > { %16021 = vmatprep.subr.bf16.mxu0 %v22070_v0  ;;  %16141 = vmatprep.subr.bf16.mxu1 %v22070_v0  ;;  %v17513_v22 = vld [vmem:[#allocation10 + $0x48] sm:$0xff]   ;;  %v17514_v24 = vld [vmem:[#allocation10 + $0x40] sm:$0xff]   ;;  %v17473_v28 = vld [vmem:[#allocation3 + $0x60] sm:$0xff]  }
  0x9a   : > { %v2516_v25 = vld [vmem:[%s18375_s17 + $0x20] sm:$0xf]  ;;  %v2517_v26 = vld [vmem:[%s18375_s17 + $0x24] sm:$0xf]  ;;  %v2518_v27 = vld [vmem:[%s18375_s17 + $0x28] sm:$0xf] }
  0x9b   : > { %v17474_v29 = vld [vmem:[#allocation3 + $0x6c] sm:$0xff]   ;;  %v2660_v30 = vshrl.u32 %v2516_v25, 16  ;;  %v2663_v31 = vshll.u32 %v2516_v25, 16  ;;  %v2669_v32 = vshll.u32 %v2517_v26, 16  ;;  %v2673_v33 = vshrl.u32 %v2517_v26, 16  ;;  %v18559_v50 = vld [vmem:[#allocation3] sm:$0xff]   ;;  %vm20289_vm11 = vmand %vm8544_vm7, %vm8601_vm10 }
  0x9c   : > { %16022 = vmatpush3.bf16.msra.mxu0 %v17470_v36  ;;  %16142 = vmatpush3.bf16.msra.mxu1 %v17502_v7  ;;  %v2679_v34 = vshll.u32 %v2518_v27, 16  ;;  %v5467_v35 = vld [vmem:[%s18375_s17] sm:$0xe]  ;;  %v5468_v36 = vld [vmem:[%s18375_s17 + $0x4] sm:$0xf]  ;;  %v18565_v53 = vld [vmem:[#allocation3 + $0x18] sm:$0xff]  }
  0x9d   : > { %16023 = vmatprep.subr.bf16.mxu0 %v22070_v0  ;;  %16143 = vmatprep.subr.bf16.mxu1 %v22070_v0  ;;  %v5469_v42 = vld [vmem:[%s18375_s17 + $0x8] sm:$0xf]  ;;  %v5632_v44 = vrot.slane %v5468_v36, 5  ;;  %v5470_v1 = vld [vmem:[%s18375_s17 + $0xc] sm:$0x1]  ;;  %v17475_v2 = vld [vmem:[#allocation3 + $0x68] sm:$0xff]  }
  0x9e   : > { %15792 = vmatmul.mubr.bf16.gmra.mxu0 %v17450_v16  ;;  %15916 = vmatmul.mubr.bf16.gmra.mxu1 %v17451_v37  ;;  %v475_v16 = vld [vmem:[%s18375_s17 + $0x128] sm:$0xf]  ;;  %v2662_v37 = vrot.slane %v2660_v30, 4  ;;  %v2681_v47 = vrot.slane %v2679_v34, 5  ;;  %v5635_v49 = vrot.slane %v5469_v42, 5  ;;  %v18589_v25 = vld [vmem:[#allocation3 + $0x20] sm:$0xff]  }
  0x9f   : > { %15795 = vmatprep.mubr.msk.bf16.mxu0 %vm18175_vm0, %v22070_v0  ;;  %15919 = vmatprep.mubr.msk.bf16.mxu1 %vm18175_vm0, %v22070_v0  ;;  %535 = vst [vmem:[#allocation3 + $0xe0] sm:$0xf] %v475_v16  ;;  %v5634_v52 = vrot.slane %v5632_v44, 4  ;;  %v18595_v36 = vld [vmem:[#allocation3 + $0x28] sm:$0xff]   ;;  %v2524_v42 = vld [vmem:[%s18375_s17 + $0x40] sm:$0xf] }
  0xa0   : > { %16024 = vmatpush3.bf16.msra.mxu0 %v17477_v45  ;;  %16144 = vmatpush3.bf16.msra.mxu1 %v17505_v13  ;;  %v18579_v13 = vld [vmem:[#allocation3 + $0x8] sm:$0xff]   ;;  %v5477_v39 = vld [vmem:[%s18375_s17 + $0x28] sm:$0xf] }
  0xa1   : > { %16025 = vmatprep.subr.bf16.mxu0 %v22070_v0  ;;  %16145 = vmatprep.subr.bf16.mxu1 %v22070_v0  ;;  %v5636_v56 = vsel %vm18555_vm6, %v5634_v52, %v5635_v49 }
  0xa2   : > { %5891 = vst [vmem:[#allocation3 + $0x4] sm:$0xf] %v5636_v56 }
  0xa4   : > { %16026 = vmatpush3.bf16.msra.mxu0 %v17486_v51  ;;  %16146 = vmatpush3.bf16.msra.mxu1 %v17506_v15 }
  0xa5   : > { %16027 = vmatprep.subr.bf16.mxu0 %v22070_v0  ;;  %16147 = vmatprep.subr.bf16.mxu1 %v22070_v0 }
  0xa6   : > { %15796 = vmatmul.mubr.bf16.gmra.mxu0 %v17452_v38  ;;  %15920 = vmatmul.mubr.bf16.gmra.mxu1 %v17453_v40  ;;  %v2665_v38 = vrot.slane %v2663_v31, 5  ;;  %v2671_v40 = vrot.slane %v2669_v32, 5  ;;  %v17479_v32 = vld [vmem:[#allocation3 + $0x7c] sm:$0xff]  }
  0xa7   : > { %15799 = vmatprep.mubr.msk.bf16.mxu0 %vm18175_vm0, %v22070_v0  ;;  %15923 = vmatprep.mubr.msk.bf16.mxu1 %vm18175_vm0, %v22070_v0 }
  0xa8   : > { %16028 = vmatpush3.bf16.msra.mxu0 %v17493_v57  ;;  %16148 = vmatpush3.bf16.msra.mxu1 %v17509_v18  ;;  %v2666_v45 = vor.u32 %v2665_v38, %v2662_v37  ;;  %v2519_v57 = vld [vmem:[%s18375_s17 + $0x2c] sm:$0x1] }
  0xa9   : > { %16029 = vmatprep.subr.bf16.mxu0 %v22070_v0  ;;  %16149 = vmatprep.subr.bf16.mxu1 %v22070_v0 }
  0xaa   : > { %v2667_v54 = vrot.slane %v2666_v45, 4  ;;  %v17480_v45 = vld [vmem:[#allocation3 + $0x78] sm:$0xff]  }
  0xac   : > { %16030 = vmatpush3.bf16.msra.mxu0 %v17501_v6  ;;  %16150 = vmatpush3.bf16.msra.mxu1 %v17510_v20  ;;  %v17476_v6 = vld [vmem:[#allocation3 + $0x74] sm:$0xff]  }
  0xad   : > { %16263 = vmatprep.subr.bf16.mxu0 %v22070_v0  ;;  %16151 = vmatprep.subr.bf16.mxu1 %v22070_v0  ;;  %v17478_v20 = vld [vmem:[#allocation3 + $0x70] sm:$0xff]  }
  0xae   : > { %15800 = vmatmul.mubr.bf16.gmra.mxu0 %v17455_v41  ;;  %15924 = vmatmul.mubr.bf16.gmra.mxu1 %v17456_v43  ;;  %v2675_v41 = vrot.slane %v2673_v33, 4  ;;  %v14359_v43 = vrot.slane %v5467_v35, 9 }
  0xaf   : > { %15803 = vmatprep.mubr.msk.bf16.mxu0 %vm18175_vm0, %v22070_v0  ;;  %15927 = vmatprep.mubr.msk.bf16.mxu1 %vm18175_vm0, %v22070_v0 }
  0xb0   : > { %16152 = vmatpush3.bf16.msra.mxu1 %v17513_v22  ;;  %v2676_v46 = vor.u32 %v2675_v41, %v2671_v40  ;;  %v5633_v51 = vsel %vm18555_vm6, %v14359_v43, %v5632_v44  ;;  %v2522_v22 = vld [vmem:[%s18375_s17 + $0x38] sm:$0xf]  ;;  %v2525_v43 = vld [vmem:[%s18375_s17 + $0x44] sm:$0xf]  ;;  %v2526_v44 = vld [vmem:[%s18375_s17 + $0x48] sm:$0xf] }
  0xb1   : > { %16153 = vmatprep.subr.bf16.mxu1 %v22070_v0  ;;  %5890 = vst [vmem:[#allocation3] sm:$0xf] %v5633_v51  ;;  %v2737_v51 = vshll.u32 %v2525_v43, 16  ;;  %v2741_v52 = vshrl.u32 %v2525_v43, 16 }
  0xb2   : > { %v2677_v55 = vrot.slane %v2676_v46, 4 }
  0xb4   : > { %16154 = vmatpush3.bf16.msra.mxu1 %v17514_v24 }
  0xb5   : > { %16387 = vmatprep.subr.bf16.mxu1 %v22070_v0 }
  0xb6   : > { %15804 = vmatmul.mubr.bf16.gmra.mxu0 %v17457_v58  ;;  %15928 = vmatmul.mubr.bf16.gmra.mxu1 %v17458_v59  ;;  %v2520_v58 = vld [vmem:[%s18375_s17 + $0x30] sm:$0xf]  ;;  %v2521_v59 = vld [vmem:[%s18375_s17 + $0x34] sm:$0xf] }
  0xb7   : > { %15807 = vmatprep.mubr.msk.bf16.mxu0 %vm18175_vm0, %v22070_v0  ;;  %15931 = vmatprep.mubr.msk.bf16.mxu1 %vm18175_vm0, %v22070_v0  ;;  %v2694_v3 = vshrl.u32 %v2520_v58, 16  ;;  %v2697_v4 = vshll.u32 %v2520_v58, 16  ;;  %v2703_v5 = vshll.u32 %v2521_v59, 16  ;;  %v2739_v58 = vrot.slane %v2737_v51, 5  ;;  %v2532_v51 = vld [vmem:[%s18375_s17 + $0x60] sm:$0xf] }
  0xb9   : > { %v2696_v10 = vrot.slane %v2694_v3, 4  ;;  %v2699_v11 = vrot.slane %v2697_v4, 5  ;;  %v2705_v16 = vrot.slane %v2703_v5, 5  ;;  %v2528_v3 = vld [vmem:[%s18375_s17 + $0x50] sm:$0xf]  ;;  %v2751_v4 = vshrl.u32 %v2526_v44, 16 }
  0xba   : > { %v18614_v5 = vld [vmem:[#allocation3 + $0x30] sm:$0xff]  }
  0xbb   : > { %v2700_v18 = vor.u32 %v2699_v11, %v2696_v10  ;;  %v2765_v10 = vshll.u32 %v2528_v3, 16  ;;  %v17482_v11 = vld [vmem:[#allocation3 + $0x80] sm:$0xff]  }
  0xbe   : > { %15808 = vmatmul.mubr.bf16.gmra.mxu0 %v17459_v60  ;;  %15932 = vmatmul.mubr.bf16.gmra.mxu1 %v17460_v61  ;;  %v2672_v60 = vsel %vm18429_vm3, %v2667_v54, %v2671_v40  ;;  %v2682_v61 = vsel %vm18429_vm3, %v2677_v55, %v2681_v47  ;;  %v2747_v54 = vshll.u32 %v2526_v44, 16  ;;  %v17481_v55 = vld [vmem:[#allocation3 + $0x84] sm:$0xff]  }
  0xbf   : > { %15811 = vmatprep.mubr.msk.bf16.mxu0 %vm18175_vm0, %v22070_v0  ;;  %15935 = vmatprep.mubr.msk.bf16.mxu1 %vm18175_vm0, %v22070_v0  ;;  %3337 = vst [vmem:[#allocation3 + $0x18] sm:$0xf] %v2672_v60  ;;  %3338 = vst [vmem:[#allocation3 + $0x1c] sm:$0xf] %v2682_v61  ;;  %v18633_v44 = vld [vmem:[#allocation3 + $0x40] sm:$0xff]  }
  0xc0   : > { %v2749_v61 = vrot.slane %v2747_v54, 5  ;;  %v2534_v54 = vld [vmem:[%s18375_s17 + $0x68] sm:$0xf] }
  0xc6   : > { %15812 = vmatmul.mubr.bf16.gmra.mxu0 %v17462_v62  ;;  %15936 = vmatmul.mubr.bf16.gmra.mxu1 %v17463_v63  ;;  %v2683_v62 = vshrl.u32 %v2518_v27, 16  ;;  %v2689_v63 = vshll.u32 %v2519_v57, 16  ;;  %v2713_v27 = vshll.u32 %v2522_v22, 16 }
  0xc7   : > { %15815 = vmatprep.mubr.msk.bf16.mxu0 %vm18175_vm0, %v22070_v0  ;;  %15939 = vmatprep.mubr.msk.bf16.mxu1 %vm18175_vm0, %v22070_v0 }
  0xc8   : > { %v2685_v7 = vrot.slane %v2683_v62, 4  ;;  %v2691_v15 = vrot.slane %v2689_v63, 5  ;;  %v2715_v33 = vrot.slane %v2713_v27, 5  ;;  %v18625_v27 = vld [vmem:[#allocation3 + $0x38] sm:$0xff]  }
  0xce   : > { %15816 = vmatmul.mubr.bf16.gmra.mxu0 %v17464_v8  ;;  %15940 = vmatmul.mubr.bf16.gmra.mxu1 %v17465_v9  ;;  %v5637_v8 = vrot.slane %v5635_v49, 4  ;;  %v5638_v9 = vrot.slane %v5470_v1, 5  ;;  %v2731_v49 = vshll.u32 %v2524_v42, 16 }
  0xcf   : > { %15819 = vmatprep.mubr.msk.bf16.mxu0 %vm18175_vm0, %v22070_v0  ;;  %15943 = vmatprep.mubr.msk.bf16.mxu1 %vm18175_vm0, %v22070_v0 }
  0xd0   : > { %v2733_v57 = vrot.slane %v2731_v49, 5 }
  0xd6   : > { %15820 = vmatmul.mubr.bf16.gmra.mxu0 %v17466_v12  ;;  %15944 = vmatmul.mubr.bf16.gmra.mxu1 %v17467_v14  ;;  %v2707_v12 = vshrl.u32 %v2521_v59, 16  ;;  %v2686_v14 = vor.u32 %v2685_v7, %v2681_v47  ;;  %v2728_v47 = vshrl.u32 %v2524_v42, 16  ;;  %v2743_v59 = vrot.slane %v2741_v52, 4  ;;  %v2529_v7 = vld [vmem:[%s18375_s17 + $0x54] sm:$0xf] }
  0xd7   : > { %15823 = vmatprep.mubr.msk.bf16.mxu0 %vm18175_vm0, %v22070_v0  ;;  %15947 = vmatprep.mubr.msk.bf16.mxu1 %vm18175_vm0, %v22070_v0  ;;  %v2533_v52 = vld [vmem:[%s18375_s17 + $0x64] sm:$0xf] }
  0xd8   : > { %v2709_v24 = vrot.slane %v2707_v12, 4  ;;  %v2730_v56 = vrot.slane %v2728_v47, 4  ;;  %v2744_v62 = vor.u32 %v2743_v59, %v2739_v58  ;;  %v2805_v59 = vshll.u32 %v2533_v52, 16 }
  0xda   : > { %v2710_v31 = vor.u32 %v2709_v24, %v2705_v16  ;;  %v2734_v60 = vor.u32 %v2733_v57, %v2730_v56  ;;  %v2745_v1 = vrot.slane %v2744_v62, 4  ;;  %v2796_v57 = vshrl.u32 %v2532_v51, 16  ;;  %v17488_v62 = vld [vmem:[#allocation3 + $0x9c] sm:$0xff]  }
  0xdc   : > { %v2711_v35 = vrot.slane %v2710_v31, 4  ;;  %v2735_v63 = vrot.slane %v2734_v60, 4  ;;  %v2750_v12 = vsel %vm18429_vm3, %v2745_v1, %v2749_v61  ;;  %v2809_v60 = vshrl.u32 %v2533_v52, 16  ;;  %v17492_v52 = vld [vmem:[#allocation3 + $0xac] sm:$0xff]  }
  0xdd   : > { %3344 = vst [vmem:[#allocation3 + $0x34] sm:$0xf] %v2750_v12  ;;  %v2819_v12 = vshrl.u32 %v2534_v54, 16 }
  0xde   : > { %15824 = vmatmul.mubr.bf16.gmra.mxu0 %v17468_v17  ;;  %15948 = vmatmul.mubr.bf16.gmra.mxu1 %v17469_v19  ;;  %v5639_v17 = vsel %vm18555_vm6, %v5637_v8, %v5638_v9  ;;  %v2687_v19 = vrot.slane %v2686_v14, 4  ;;  %v2716_v40 = vsel %vm18429_vm3, %v2711_v35, %v2715_v33  ;;  %v2762_v9 = vshrl.u32 %v2528_v3, 16 }
  0xdf   : > { %15827 = vmatprep.mubr.msk.bf16.mxu0 %vm18175_vm0, %v22070_v0  ;;  %15951 = vmatprep.mubr.msk.bf16.mxu1 %vm18175_vm0, %v22070_v0  ;;  %5892 = vst [vmem:[#allocation3 + $0x8] sm:$0xf] %v5639_v17  ;;  %3341 = vst [vmem:[#allocation3 + $0x28] sm:$0xf] %v2716_v40  ;;  %v2753_v14 = vrot.slane %v2751_v4, 4  ;;  %v17485_v40 = vld [vmem:[#allocation3 + $0x94] sm:$0xff]  }
  0xe0   : > { %v2692_v26 = vsel %vm18429_vm3, %v2687_v19, %v2691_v15  ;;  %v2771_v15 = vshll.u32 %v2529_v7, 16  ;;  %v2764_v17 = vrot.slane %v2762_v9, 4  ;;  %v2811_v3 = vrot.slane %v2809_v60, 4 }
  0xe1   : > { %3339 = vst [vmem:[#allocation3 + $0x20] sm:$0xf] %v2692_v26  ;;  %v2754_v19 = vor.u32 %v2753_v14, %v2749_v61  ;;  %v2815_v61 = vshll.u32 %v2534_v54, 16  ;;  %v18652_v14 = vld [vmem:[#allocation3 + $0x48] sm:$0xff]  }
  0xe3   : > { %v2755_v24 = vrot.slane %v2754_v19, 4 }
  0xe6   : > { %15828 = vmatmul.mubr.bf16.gmra.mxu0 %v17471_v21  ;;  %15952 = vmatmul.mubr.bf16.gmra.mxu1 %v17472_v23  ;;  %v2701_v21 = vrot.slane %v2700_v18, 4  ;;  %v2523_v23 = vld [vmem:[%s18375_s17 + $0x3c] sm:$0x1]  ;;  %v2767_v18 = vrot.slane %v2765_v10, 5  ;;  %v2535_v10 = vld [vmem:[%s18375_s17 + $0x6c] sm:$0x1] }
  0xe7   : > { %15831 = vmatprep.mubr.msk.bf16.mxu0 %vm18175_vm0, %v22070_v0  ;;  %15955 = vmatprep.mubr.msk.bf16.mxu1 %vm18175_vm0, %v22070_v0 }
  0xe8   : > { %v2706_v30 = vsel %vm18429_vm3, %v2701_v21, %v2705_v16  ;;  %v17483_v16 = vld [vmem:[#allocation3 + $0x8c] sm:$0xff]   ;;  %v2775_v21 = vshrl.u32 %v2529_v7, 16 }
  0xe9   : > { %3340 = vst [vmem:[#allocation3 + $0x24] sm:$0xf] %v2706_v30  ;;  %v2531_v30 = vld [vmem:[%s18375_s17 + $0x5c] sm:$0x1] }
  0xea   : > { %v2777_v31 = vrot.slane %v2775_v21, 4 }
  0xee   : > { %15832 = vmatmul.mubr.bf16.gmra.mxu0 %v17473_v28  ;;  %15956 = vmatmul.mubr.bf16.gmra.mxu1 %v17474_v29  ;;  %v2717_v28 = vshrl.u32 %v2522_v22, 16  ;;  %v2723_v29 = vshll.u32 %v2523_v23, 16  ;;  %v2768_v22 = vor.u32 %v2767_v18, %v2764_v17  ;;  %v2773_v23 = vrot.slane %v2771_v15, 5 }
  0xef   : > { %15835 = vmatprep.mubr.msk.bf16.mxu0 %vm18175_vm0, %v22070_v0  ;;  %15959 = vmatprep.mubr.msk.bf16.mxu1 %vm18175_vm0, %v22070_v0  ;;  %v2825_v17 = vshll.u32 %v2535_v10, 16  ;;  %v17495_v10 = vld [vmem:[#allocation3 + $0xb4] sm:$0xff]  }
  0xf0   : > { %v2719_v34 = vrot.slane %v2717_v28, 4  ;;  %v2725_v38 = vrot.slane %v2723_v29, 5  ;;  %v2769_v26 = vrot.slane %v2768_v22, 4  ;;  %v2530_v29 = vld [vmem:[%s18375_s17 + $0x58] sm:$0xf]  ;;  %v2821_v22 = vrot.slane %v2819_v12, 4 }
  0xf1   : > { %v2785_v35 = vshrl.u32 %v2530_v29, 16 }
  0xf2   : > { %v2720_v37 = vor.u32 %v2719_v34, %v2715_v33  ;;  %v2774_v33 = vsel %vm18429_vm3, %v2769_v26, %v2773_v23  ;;  %v2781_v34 = vshll.u32 %v2530_v29, 16 }
  0xf3   : > { %3346 = vst [vmem:[#allocation3 + $0x3c] sm:$0xf] %v2774_v33  ;;  %v2787_v42 = vrot.slane %v2785_v35, 4 }
  0xf4   : > { %v2721_v41 = vrot.slane %v2720_v37, 4  ;;  %v2791_v37 = vshll.u32 %v2531_v30, 16  ;;  %v2827_v30 = vrot.slane %v2825_v17, 5 }
  0xf6   : > { %15836 = vmatmul.mubr.bf16.gmra.mxu0 %v17475_v2  ;;  %15960 = vmatmul.mubr.bf16.gmra.mxu1 %v17476_v6  ;;  %v2726_v46 = vsel %vm18429_vm3, %v2721_v41, %v2725_v38  ;;  %v2527_v2 = vld [vmem:[%s18375_s17 + $0x4c] sm:$0x1]  ;;  %v2740_v6 = vsel %vm18429_vm3, %v2735_v63, %v2739_v58  ;;  %v2778_v38 = vor.u32 %v2777_v31, %v2773_v23  ;;  %v2783_v41 = vrot.slane %v2781_v34, 5 }
  0xf7   : > { %15839 = vmatprep.mubr.msk.bf16.mxu0 %vm18175_vm0, %v22070_v0  ;;  %15963 = vmatprep.mubr.msk.bf16.mxu1 %vm18175_vm0, %v22070_v0  ;;  %3342 = vst [vmem:[#allocation3 + $0x2c] sm:$0xf] %v2726_v46  ;;  %v2757_v8 = vshll.u32 %v2527_v2, 16  ;;  %3343 = vst [vmem:[#allocation3 + $0x30] sm:$0xf] %v2740_v6  ;;  %v2793_v46 = vrot.slane %v2791_v37, 5 }
  0xf8   : > { %v2779_v43 = vrot.slane %v2778_v38, 4  ;;  %v2799_v58 = vshll.u32 %v2532_v51, 16  ;;  %v2798_v63 = vrot.slane %v2796_v57, 4  ;;  %v2807_v2 = vrot.slane %v2805_v59, 5  ;;  %v18663_v37 = vld [vmem:[#allocation3 + $0x50] sm:$0xff]   ;;  %v18671_v57 = vld [vmem:[#allocation3 + $0x58] sm:$0xff]  }
  0xf9   : > { %v2817_v6 = vrot.slane %v2815_v61, 5 }
  0xfa   : > { %v2784_v47 = vsel %vm18429_vm3, %v2779_v43, %v2783_v41  ;;  %v2801_v1 = vrot.slane %v2799_v58, 5  ;;  %v2812_v7 = vor.u32 %v2811_v3, %v2807_v2  ;;  %v17491_v43 = vld [vmem:[#allocation3 + $0xa0] sm:$0xff]  }
  0xfb   : > { %3347 = vst [vmem:[#allocation3 + $0x40] sm:$0xf] %v2784_v47  ;;  %v2822_v29 = vor.u32 %v2821_v22, %v2817_v6  ;;  %v2543_v22 = vld [vmem:[%s18375_s17 + $0x8c] sm:$0x1] }
  0xfc   : > { %v2802_v4 = vor.u32 %v2801_v1, %v2798_v63  ;;  %v2813_v9 = vrot.slane %v2812_v7, 4  ;;  %v2541_v63 = vld [vmem:[%s18375_s17 + $0x84] sm:$0xf]  ;;  %v2542_v1 = vld [vmem:[%s18375_s17 + $0x88] sm:$0xf] }
  0xfd   : > { %v2823_v34 = vrot.slane %v2822_v29, 4  ;;  %v2873_v7 = vshll.u32 %v2541_v63, 16  ;;  %v2545_v29 = vld [vmem:[%s18375_s17 + $0x94] sm:$0xf] }
  0xfe   : > { %15840 = vmatmul.mubr.bf16.gmra.mxu0 %v17478_v20  ;;  %15964 = vmatmul.mubr.bf16.gmra.mxu1 %v17479_v32  ;;  %v2759_v20 = vrot.slane %v2757_v8, 5  ;;  %v17484_v32 = vld [vmem:[#allocation3 + $0x88] sm:$0xff]   ;;  %v2803_v8 = vrot.slane %v2802_v4, 4  ;;  %v2818_v21 = vsel %vm18429_vm3, %v2813_v9, %v2817_v6  ;;  %v2883_v9 = vshll.u32 %v2542_v1, 16 }
  0xff   : > { %15843 = vmatprep.mubr.msk.bf16.mxu0 %vm18175_vm0, %v22070_v0  ;;  %15967 = vmatprep.mubr.msk.bf16.mxu1 %vm18175_vm0, %v22070_v0  ;;  %3350 = vst [vmem:[#allocation3 + $0x4c] sm:$0xf] %v2818_v21  ;;  %v2828_v38 = vsel %vm18429_vm3, %v2823_v34, %v2827_v30  ;;  %v2893_v30 = vshll.u32 %v2543_v22, 16 }
 0x100   : > { %v2760_v28 = vsel %vm18429_vm3, %v2755_v24, %v2759_v20  ;;  %v2808_v15 = vsel %vm18429_vm3, %v2803_v8, %v2807_v2  ;;  %v17489_v20 = vld [vmem:[#allocation3 + $0x98] sm:$0xff]   ;;  %v17490_v24 = vld [vmem:[#allocation3 + $0xa4] sm:$0xff]   ;;  %3351 = vst [vmem:[#allocation3 + $0x50] sm:$0xf] %v2828_v38  ;;  %v2877_v8 = vshrl.u32 %v2541_v63, 16  ;;  %v2907_v38 = vshll.u32 %v2545_v29, 16 }
 0x101   : > { %3345 = vst [vmem:[#allocation3 + $0x38] sm:$0xf] %v2760_v28  ;;  %3349 = vst [vmem:[#allocation3 + $0x48] sm:$0xf] %v2808_v15  ;;  %v17494_v2 = vld [vmem:[#allocation3 + $0xa8] sm:$0xff]   ;;  %v2875_v15 = vrot.slane %v2873_v7, 5 }
 0x106   : > { %15844 = vmatmul.mubr.bf16.gmra.mxu0 %v17480_v45  ;;  %15968 = vmatmul.mubr.bf16.gmra.mxu1 %v17481_v55  ;;  %v2788_v45 = vor.u32 %v2787_v42, %v2783_v41  ;;  %v17487_v55 = vld [vmem:[#allocation3 + $0x90] sm:$0xff]   ;;  %v2539_v41 = vld [vmem:[%s18375_s17 + $0x7c] sm:$0x1] }
 0x107   : > { %15847 = vmatprep.mubr.msk.bf16.mxu0 %vm18175_vm0, %v22070_v0  ;;  %15971 = vmatprep.mubr.msk.bf16.mxu1 %vm18175_vm0, %v22070_v0 }
 0x108   : > { %v2789_v49 = vrot.slane %v2788_v45, 4 }
 0x10a   : > { %v2794_v56 = vsel %vm18429_vm3, %v2789_v49, %v2793_v46  ;;  %v2859_v49 = vshll.u32 %v2539_v41, 16 }
 0x10b   : > { %3348 = vst [vmem:[#allocation3 + $0x44] sm:$0xf] %v2794_v56 }
 0x10c   : > { %v2861_v59 = vrot.slane %v2859_v49, 5  ;;  %v2909_v49 = vrot.slane %v2907_v38, 5 }
 0x10e   : > { %15848 = vmatmul.mubr.bf16.gmra.mxu0 %v17482_v11  ;;  %15972 = vmatmul.mubr.bf16.gmra.mxu1 %v17483_v16  ;;  %v2536_v11 = vld [vmem:[%s18375_s17 + $0x70] sm:$0xf]  ;;  %v2537_v16 = vld [vmem:[%s18375_s17 + $0x74] sm:$0xf] }
 0x10f   : > { %15851 = vmatprep.mubr.msk.bf16.mxu0 %vm18175_vm0, %v22070_v0  ;;  %15975 = vmatprep.mubr.msk.bf16.mxu1 %vm18175_vm0, %v22070_v0  ;;  %v2830_v18 = vshrl.u32 %v2536_v11, 16  ;;  %v2833_v19 = vshll.u32 %v2536_v11, 16  ;;  %v2839_v23 = vshll.u32 %v2537_v16, 16  ;;  %v2843_v31 = vshrl.u32 %v2537_v16, 16 }
 0x110   : > { %v2879_v16 = vrot.slane %v2877_v8, 4  ;;  %v18709_v8 = vld [vmem:[#allocation3 + $0x70] sm:$0xff]  }
 0x111   : > { %v2832_v26 = vrot.slane %v2830_v18, 4  ;;  %v2835_v28 = vrot.slane %v2833_v19, 5  ;;  %v2841_v33 = vrot.slane %v2839_v23, 5  ;;  %v2845_v42 = vrot.slane %v2843_v31, 4  ;;  %v2544_v23 = vld [vmem:[%s18375_s17 + $0x90] sm:$0xf] }
 0x112   : > { %v2885_v18 = vrot.slane %v2883_v9, 5  ;;  %v2880_v19 = vor.u32 %v2879_v16, %v2875_v15  ;;  %v2898_v31 = vshrl.u32 %v2544_v23, 16  ;;  %v2549_v16 = vld [vmem:[%s18375_s17 + $0xa4] sm:$0xf] }
 0x113   : > { %v2846_v51 = vor.u32 %v2845_v42, %v2841_v33  ;;  %v2941_v22 = vshll.u32 %v2549_v16, 16 }
 0x114   : > { %v2881_v21 = vrot.slane %v2880_v19, 4  ;;  %v2900_v41 = vrot.slane %v2898_v31, 4 }
 0x115   : > { %v2847_v56 = vrot.slane %v2846_v51, 4  ;;  %v2943_v31 = vrot.slane %v2941_v22, 5 }
 0x116   : > { %15852 = vmatmul.mubr.bf16.gmra.mxu0 %v17484_v32  ;;  %15976 = vmatmul.mubr.bf16.gmra.mxu1 %v17485_v40  ;;  %v2836_v32 = vor.u32 %v2835_v28, %v2832_v26  ;;  %v2538_v40 = vld [vmem:[%s18375_s17 + $0x78] sm:$0xf]  ;;  %v18690_v26 = vld [vmem:[#allocation3 + $0x60] sm:$0xff]   ;;  %v2886_v34 = vsel %vm18429_vm3, %v2881_v21, %v2885_v18 }
 0x117   : > { %15855 = vmatprep.mubr.msk.bf16.mxu0 %vm18175_vm0, %v22070_v0  ;;  %15979 = vmatprep.mubr.msk.bf16.mxu1 %vm18175_vm0, %v22070_v0  ;;  %v2849_v46 = vshll.u32 %v2538_v40, 16  ;;  %v2853_v47 = vshrl.u32 %v2538_v40, 16  ;;  %v17497_v40 = vld [vmem:[#allocation3 + $0xbc] sm:$0xff]   ;;  %3356 = vst [vmem:[#allocation3 + $0x64] sm:$0xf] %v2886_v34 }
 0x118   : > { %v2837_v35 = vrot.slane %v2836_v32, 4  ;;  %v2901_v32 = vshll.u32 %v2544_v23, 16  ;;  %v2945_v23 = vshrl.u32 %v2549_v16, 16 }
 0x119   : > { %v2851_v54 = vrot.slane %v2849_v46, 5  ;;  %v2911_v46 = vshrl.u32 %v2545_v29, 16 }
 0x11a   : > { %v2842_v45 = vsel %vm18429_vm3, %v2837_v35, %v2841_v33  ;;  %v17496_v33 = vld [vmem:[#allocation3 + $0xb0] sm:$0xff]   ;;  %v2903_v42 = vrot.slane %v2901_v32, 5  ;;  %v2947_v32 = vrot.slane %v2945_v23, 4 }
 0x11b   : > { %3352 = vst [vmem:[#allocation3 + $0x54] sm:$0xf] %v2842_v45  ;;  %v2852_v60 = vsel %vm18429_vm3, %v2847_v56, %v2851_v54  ;;  %v2895_v45 = vrot.slane %v2893_v30, 5  ;;  %v2546_v56 = vld [vmem:[%s18375_s17 + $0x98] sm:$0xf] }
 0x11c   : > { %3353 = vst [vmem:[#allocation3 + $0x58] sm:$0xf] %v2852_v60  ;;  %v17498_v60 = vld [vmem:[#allocation3 + $0xb8] sm:$0xff]   ;;  %v2921_v63 = vshrl.u32 %v2546_v56, 16  ;;  %v2948_v38 = vor.u32 %v2947_v32, %v2943_v31 }
 0x11e   : > { %15856 = vmatmul.mubr.bf16.gmra.mxu0 %v17487_v55  ;;  %15980 = vmatmul.mubr.bf16.gmra.mxu1 %v17488_v62  ;;  %v2855_v55 = vrot.slane %v2853_v47, 4  ;;  %v2540_v62 = vld [vmem:[%s18375_s17 + $0x80] sm:$0xf]  ;;  %v2904_v47 = vor.u32 %v2903_v42, %v2900_v41 }
 0x11f   : > { %15859 = vmatprep.mubr.msk.bf16.mxu0 %vm18175_vm0, %v22070_v0  ;;  %15983 = vmatprep.mubr.msk.bf16.mxu1 %vm18175_vm0, %v22070_v0  ;;  %v2864_v4 = vshrl.u32 %v2540_v62, 16  ;;  %v2867_v6 = vshll.u32 %v2540_v62, 16  ;;  %v2917_v62 = vshll.u32 %v2546_v56, 16  ;;  %v2553_v56 = vld [vmem:[%s18375_s17 + $0xb4] sm:$0xf] }
 0x120   : > { %v2856_v58 = vor.u32 %v2855_v55, %v2851_v54  ;;  %v18701_v54 = vld [vmem:[#allocation3 + $0x68] sm:$0xff]  }
 0x121   : > { %v2866_v11 = vrot.slane %v2864_v4, 4  ;;  %v2869_v12 = vrot.slane %v2867_v6, 5  ;;  %v2919_v4 = vrot.slane %v2917_v62, 5  ;;  %v2923_v6 = vrot.slane %v2921_v63, 4  ;;  %v17507_v62 = vld [vmem:[#allocation3 + $0xc8] sm:$0xff]  }
 0x122   : > { %v2857_v61 = vrot.slane %v2856_v58, 4  ;;  %v2547_v58 = vld [vmem:[%s18375_s17 + $0x9c] sm:$0x1] }
 0x123   : > { %v2870_v17 = vor.u32 %v2869_v12, %v2866_v11  ;;  %v2924_v9 = vor.u32 %v2923_v6, %v2919_v4 }
 0x124   : > { %v2862_v3 = vsel %vm18429_vm3, %v2857_v61, %v2861_v59  ;;  %v2913_v59 = vrot.slane %v2911_v46, 4  ;;  %v2551_v46 = vld [vmem:[%s18375_s17 + $0xac] sm:$0x1] }
 0x125   : > { %3354 = vst [vmem:[#allocation3 + $0x5c] sm:$0xf] %v2862_v3  ;;  %v17499_v3 = vld [vmem:[#allocation3 + $0xc4] sm:$0xff]   ;;  %v2925_v12 = vrot.slane %v2924_v9, 4 }
 0x126   : > { %15860 = vmatmul.mubr.bf16.gmra.mxu0 %v17489_v20  ;;  %15984 = vmatmul.mubr.bf16.gmra.mxu1 %v17490_v24  ;;  %v2871_v20 = vrot.slane %v2870_v17, 4  ;;  %v2887_v24 = vshrl.u32 %v2542_v1, 16  ;;  %v2927_v1 = vshll.u32 %v2547_v58, 16  ;;  %v2550_v17 = vld [vmem:[%s18375_s17 + $0xa8] sm:$0xf]  ;;  %v2961_v58 = vshll.u32 %v2551_v46, 16 }
 0x127   : > { %15863 = vmatprep.mubr.msk.bf16.mxu0 %vm18175_vm0, %v22070_v0  ;;  %15987 = vmatprep.mubr.msk.bf16.mxu1 %vm18175_vm0, %v22070_v0 }
 0x128   : > { %v2876_v28 = vsel %vm18429_vm3, %v2871_v20, %v2875_v15  ;;  %v2889_v35 = vrot.slane %v2887_v24, 4  ;;  %v2548_v15 = vld [vmem:[%s18375_s17 + $0xa0] sm:$0xf]  ;;  %v2951_v24 = vshll.u32 %v2550_v17, 16 }
 0x129   : > { %3355 = vst [vmem:[#allocation3 + $0x60] sm:$0xf] %v2876_v28  ;;  %v2932_v20 = vshrl.u32 %v2548_v15, 16  ;;  %v2935_v21 = vshll.u32 %v2548_v15, 16  ;;  %v17504_v28 = vld [vmem:[#allocation3 + $0xcc] sm:$0xff]   ;;  %v2979_v15 = vshrl.u32 %v2553_v56, 16 }
 0x12a   : > { %v2953_v34 = vrot.slane %v2951_v24, 5 }
 0x12b   : > { %v2934_v29 = vrot.slane %v2932_v20, 4  ;;  %v2937_v30 = vrot.slane %v2935_v21, 5  ;;  %v2981_v32 = vrot.slane %v2979_v15, 4 }
 0x12e   : > { %15864 = vmatmul.mubr.bf16.gmra.mxu0 %v17491_v43  ;;  %15988 = vmatmul.mubr.bf16.gmra.mxu1 %v17492_v52  ;;  %v2890_v43 = vor.u32 %v2889_v35, %v2885_v18  ;;  %v2905_v52 = vrot.slane %v2904_v47, 4  ;;  %v17503_v18 = vld [vmem:[#allocation3 + $0xc0] sm:$0xff]  }
 0x12f   : > { %15867 = vmatprep.mubr.msk.bf16.mxu0 %vm18175_vm0, %v22070_v0  ;;  %15991 = vmatprep.mubr.msk.bf16.mxu1 %vm18175_vm0, %v22070_v0  ;;  %v2552_v47 = vld [vmem:[%s18375_s17 + $0xb0] sm:$0xf] }
 0x130   : > { %v2891_v51 = vrot.slane %v2890_v43, 4  ;;  %v2910_v61 = vsel %vm18429_vm3, %v2905_v52, %v2909_v49  ;;  %v18730_v52 = vld [vmem:[#allocation3 + $0x78] sm:$0xff]  }
 0x131   : > { %3358 = vst [vmem:[#allocation3 + $0x6c] sm:$0xf] %v2910_v61 }
 0x132   : > { %v2896_v55 = vsel %vm18429_vm3, %v2891_v51, %v2895_v45  ;;  %v2949_v45 = vrot.slane %v2948_v38, 4 }
 0x133   : > { %3357 = vst [vmem:[#allocation3 + $0x68] sm:$0xf] %v2896_v55 }
 0x134   : > { %v2954_v63 = vsel %vm18429_vm3, %v2949_v45, %v2953_v34 }
 0x135   : > { %3362 = vst [vmem:[#allocation3 + $0x7c] sm:$0xf] %v2954_v63 }
 0x136   : > { %15868 = vmatmul.mubr.bf16.gmra.mxu0 %v17494_v2  ;;  %15992 = vmatmul.mubr.bf16.gmra.mxu1 %v17495_v10  ;;  %v2914_v2 = vor.u32 %v2913_v59, %v2909_v49  ;;  %v2929_v10 = vrot.slane %v2927_v1, 5  ;;  %v2955_v49 = vshrl.u32 %v2550_v17, 16  ;;  %v2966_v59 = vshrl.u32 %v2552_v47, 16 }
 0x137   : > { %15871 = vmatprep.mubr.msk.bf16.mxu0 %vm18175_vm0, %v22070_v0  ;;  %15995 = vmatprep.mubr.msk.bf16.mxu1 %vm18175_vm0, %v22070_v0 }
 0x138   : > { %v2915_v7 = vrot.slane %v2914_v2, 4  ;;  %v2930_v19 = vsel %vm18429_vm3, %v2925_v12, %v2929_v10  ;;  %v2957_v1 = vrot.slane %v2955_v49, 4  ;;  %v2975_v2 = vshll.u32 %v2553_v56, 16 }
 0x139   : > { %3360 = vst [vmem:[#allocation3 + $0x74] sm:$0xf] %v2930_v19  ;;  %v2968_v6 = vrot.slane %v2966_v59, 4  ;;  %v2963_v12 = vrot.slane %v2961_v58, 5 }
 0x13a   : > { %v2920_v11 = vsel %vm18429_vm3, %v2915_v7, %v2919_v4  ;;  %v17508_v4 = vld [vmem:[#allocation3 + $0xd4] sm:$0xff]  }
 0x13b   : > { %3359 = vst [vmem:[#allocation3 + $0x70] sm:$0xf] %v2920_v11  ;;  %v2958_v11 = vor.u32 %v2957_v1, %v2953_v34  ;;  %v17511_v34 = vld [vmem:[#allocation3 + $0xd0] sm:$0xff]  }
 0x13d   : > { %v2959_v20 = vrot.slane %v2958_v11, 4  ;;  %v2558_v11 = vld [vmem:[%s18375_s17 + $0xc8] sm:$0xf] }
 0x13e   : > { %15872 = vmatmul.mubr.bf16.gmra.mxu0 %v17496_v33  ;;  %15996 = vmatmul.mubr.bf16.gmra.mxu1 %v17497_v40  ;;  %v2938_v33 = vor.u32 %v2937_v30, %v2934_v29  ;;  %v2554_v30 = vld [vmem:[%s18375_s17 + $0xb8] sm:$0xf] }
 0x13f   : > { %15875 = vmatprep.mubr.msk.bf16.mxu0 %vm18175_vm0, %v22070_v0  ;;  %15999 = vmatprep.mubr.msk.bf16.mxu1 %vm18175_vm0, %v22070_v0  ;;  %v2964_v29 = vsel %vm18429_vm3, %v2959_v20, %v2963_v12  ;;  %v2985_v38 = vshll.u32 %v2554_v30, 16 }
 0x140   : > { %v2939_v41 = vrot.slane %v2938_v33, 4 }
 0x141   : > { %v2987_v49 = vrot.slane %v2985_v38, 5 }
 0x142   : > { %v2944_v55 = vsel %vm18429_vm3, %v2939_v41, %v2943_v31  ;;  %v2555_v31 = vld [vmem:[%s18375_s17 + $0xbc] sm:$0x1] }
 0x143   : > { %3361 = vst [vmem:[#allocation3 + $0x78] sm:$0xf] %v2944_v55  ;;  %v2995_v41 = vshll.u32 %v2555_v31, 16 }
 0x146   : > { %15876 = vmatmul.mubr.bf16.gmra.mxu0 %v17498_v60  ;;  %16000 = vmatmul.mubr.bf16.gmra.mxu1 %v17499_v3  ;;  %v2969_v60 = vshll.u32 %v2552_v47, 16  ;;  %v17512_v47 = vld [vmem:[#allocation3 + $0xdc] sm:$0xff]  }
 0x147   : > { %15879 = vmatprep.mubr.msk.bf16.mxu0 %vm18175_vm0, %v22070_v0  ;;  %16003 = vmatprep.mubr.msk.bf16.mxu1 %vm18175_vm0, %v22070_v0 }
 0x148   : > { %v2971_v7 = vrot.slane %v2969_v60, 5  ;;  %v18755_v60 = vld [vmem:[#allocation3 + $0x88] sm:$0xff]  }
 0x14a   : > { %v2972_v17 = vor.u32 %v2971_v7, %v2968_v6  ;;  %v2556_v7 = vld [vmem:[%s18375_s17 + $0xc0] sm:$0xf] }
 0x14c   : > { %v2973_v22 = vrot.slane %v2972_v17, 4  ;;  %v3003_v17 = vshll.u32 %v2556_v7, 16 }
 0x14e   : > { %v853_v35 = vpop.f32.mrf.mxu0  ;;  %15880 = vmatmul.mubr.bf16.gmra.mxu0 %v17503_v18  ;;  %v1438_v40 = vpop.f32.mrf.mxu1  ;;  %16004 = vmatmul.mubr.bf16.gmra.mxu1 %v17504_v28  ;;  %v2977_v18 = vrot.slane %v2975_v2, 5  ;;  %v18745_v28 = vld [vmem:[#allocation3 + $0x80] sm:$0xff]  }
 0x14f   : > { %15883 = vmatprep.mubr.msk.bf16.mxu0 %vm18175_vm0, %v22070_v0  ;;  %v18724_v42 = vadd.f32 %v1438_v40, %v853_v35  ;;  %16007 = vmatprep.mubr.msk.bf16.mxu1 %vm18175_vm0, %v22070_v0  ;;  %3363 = vst [vmem:[#allocation3 + $0x80] sm:$0xf] %v2964_v29  ;;  %v2989_v40 = vshrl.u32 %v2554_v30, 16  ;;  %v3005_v30 = vrot.slane %v3003_v17, 5 }
 0x150   : > { %v15785_v43 = vpop.f32.mrf.mxu0  ;;  %v15909_v51 = vpop.f32.mrf.mxu1  ;;  %v2978_v35 = vsel %vm18429_vm3, %v2973_v22, %v2977_v18  ;;  %v2982_v45 = vor.u32 %v2981_v32, %v2977_v18 }
 0x151   : > { %3364 = vst [vmem:[#allocation3 + $0x84] sm:$0xf] %v2978_v35  ;;  %v2991_v51 = vrot.slane %v2989_v40, 4 }
 0x152   : > { %v856_v61 = vpop.f32.mrf.mxu0  ;;  %v1441_v3 = vpop.f32.mrf.mxu1  ;;  %v2983_v58 = vrot.slane %v2982_v45, 4 }
 0x153   : > { %v18737_v9 = vadd.f32 %v1441_v3, %v856_v61  ;;  %v2992_v61 = vor.u32 %v2991_v51, %v2987_v49 }
 0x154   : > { %v15786_v10 = vpop.f32.mrf.mxu0  ;;  %v15910_v16 = vpop.f32.mrf.mxu1  ;;  %v2988_v1 = vsel %vm18429_vm3, %v2983_v58, %v2987_v49  ;;  %v2559_v58 = vld [vmem:[%s18375_s17 + $0xcc] sm:$0x1] }
 0x155   : > { %v2993_v3 = vrot.slane %v2992_v61, 4  ;;  %3365 = vst [vmem:[#allocation3 + $0x88] sm:$0xf] %v2988_v1  ;;  %v2557_v10 = vld [vmem:[%s18375_s17 + $0xc4] sm:$0xf]  ;;  %v3000_v16 = vshrl.u32 %v2556_v7, 16 }
 0x156   : > { %v861_v19 = vpop.f32.mrf.mxu0  ;;  %15884 = vmatmul.mubr.bf16.gmra.mxu0 %v17507_v62  ;;  %v1446_v21 = vpop.f32.mrf.mxu1  ;;  %16008 = vmatmul.mubr.bf16.gmra.mxu1 %v17508_v4  ;;  %v2997_v62 = vrot.slane %v2995_v41, 5  ;;  %v3009_v18 = vshll.u32 %v2557_v10, 16  ;;  %v3013_v20 = vshrl.u32 %v2557_v10, 16  ;;  %v3029_v1 = vshll.u32 %v2559_v58, 16 }
 0x157   : > { %15887 = vmatprep.mubr.msk.bf16.mxu0 %vm18175_vm0, %v22070_v0  ;;  %v18741_v23 = vadd.f32 %v1446_v21, %v861_v19  ;;  %16011 = vmatprep.mubr.msk.bf16.mxu1 %vm18175_vm0, %v22070_v0  ;;  %v3019_v21 = vshll.u32 %v2558_v11, 16  ;;  %v3002_v29 = vrot.slane %v3000_v16, 4 }
 0x158   : > { %v15789_v24 = vpop.f32.mrf.mxu0  ;;  %v15913_v33 = vpop.f32.mrf.mxu1  ;;  %v2998_v15 = vsel %vm18429_vm3, %v2993_v3, %v2997_v62  ;;  %v3011_v31 = vrot.slane %v3009_v18, 5  ;;  %v18783_v62 = vld [vmem:[#allocation3 + $0x90] sm:$0xff]  }
 0x159   : > { %3366 = vst [vmem:[#allocation3 + $0x8c] sm:$0xf] %v2998_v15  ;;  %v17516_v24 = vld [vmem:[#allocation10 + $0x138] sm:$0xff]   ;;  %v3006_v38 = vor.u32 %v3005_v30, %v3002_v29  ;;  %v3021_v40 = vrot.slane %v3019_v21, 5  ;;  %v17531_v15 = vld [vmem:[#allocation10 + $0x128] sm:$0xff]   ;;  %v3031_v21 = vrot.slane %v3029_v1, 5 }
 0x15a   : > { %v864_v43 = vpop.f32.mrf.mxu0  ;;  %v1449_v46 = vpop.f32.mrf.mxu1 }
 0x15b   : > { %v18753_v55 = vadd.f32 %v1449_v46, %v864_v43  ;;  %v17524_v46 = vld [vmem:[#allocation10 + $0x130] sm:$0xff]  }
 0x15c   : > { %v15790_v56 = vpop.f32.mrf.mxu0  ;;  %v15914_v59 = vpop.f32.mrf.mxu1 }
 0x15d   : > { %v3023_v59 = vshrl.u32 %v2558_v11, 16 }
 0x15e   : > { %v869_v63 = vpop.f32.mrf.mxu0  ;;  %15888 = vmatmul.mubr.bf16.gmra.mxu0 %v17511_v34  ;;  %v1454_v2 = vpop.f32.mrf.mxu1  ;;  %16012 = vmatmul.mubr.bf16.gmra.mxu1 %v17512_v47  ;;  %v3015_v34 = vrot.slane %v3013_v20, 4  ;;  %v3007_v47 = vrot.slane %v3006_v38, 4 }
 0x15f   : > { %16031 = vmatprep.mubr.msk.bf16.mxu0 %vm18175_vm0, %v22070_v0  ;;  %v18761_v4 = vadd.f32 %v1454_v2, %v869_v63  ;;  %16155 = vmatprep.mubr.msk.bf16.mxu1 %vm18175_vm0, %v22070_v0  ;;  %v2561_v63 = vld [vmem:[%s18375_s17 + $0xd4] sm:$0xf]  ;;  %v3025_v10 = vrot.slane %v3023_v59, 4 }
 0x160   : > { %v15793_v6 = vpop.f32.mrf.mxu0  ;;  %v15917_v12 = vpop.f32.mrf.mxu1  ;;  %v3016_v43 = vor.u32 %v3015_v34, %v3011_v31 }
 0x161   : > { %v3043_v12 = vshll.u32 %v2561_v63, 16  ;;  %v3026_v20 = vor.u32 %v3025_v10, %v3021_v40 }
 0x162   : > { %v872_v19 = vpop.f32.mrf.mxu0  ;;  %v1457_v22 = vpop.f32.mrf.mxu1  ;;  %v3017_v56 = vrot.slane %v3016_v43, 4  ;;  %v18801_v43 = vld [vmem:[#allocation3 + $0x98] sm:$0xff]  }
 0x163   : > { %v18770_v32 = vadd.f32 %v1457_v22, %v872_v19  ;;  %v3047_v22 = vshrl.u32 %v2561_v63, 16  ;;  %v3045_v30 = vrot.slane %v3043_v12, 5  ;;  %v17521_v63 = vld [vmem:[#allocation3 + $0x10] sm:$0xff]  }
 0x164   : > { %v15794_v33 = vpop.f32.mrf.mxu0  ;;  %v15918_v35 = vpop.f32.mrf.mxu1  ;;  %v3022_v7 = vsel %vm18429_vm3, %v3017_v56, %v3021_v40 }
 0x165   : > { %3368 = vst [vmem:[#allocation3 + $0x94] sm:$0xf] %v3022_v7  ;;  %v3027_v33 = vrot.slane %v3026_v20, 4  ;;  %v17540_v35 = vld [vmem:[#allocation10 + $0x120] sm:$0xff]   ;;  %v17547_v7 = vld [vmem:[#allocation10 + $0x118] sm:$0xff]  }
 0x166   : > { %v877_v41 = vpop.f32.mrf.mxu0  ;;  %16032 = vmatmul.mubr.bf16.vlgmr.msra.gmra.mxu0 %v18565_v53  ;;  %v1462_v45 = vpop.f32.mrf.mxu1  ;;  %16156 = vmatmul.mubr.bf16.vlgmr.msra.gmra.mxu1 %v18559_v50  ;;  %v2560_v53 = vld [vmem:[%s18375_s17 + $0xd0] sm:$0xf]  ;;  %v3012_v50 = vsel %vm18429_vm3, %v3007_v47, %v3011_v31 }
 0x167   : > { %16264 = vmatpush3.bf16.msra.mxu0 %v17516_v24  ;;  %v18774_v49 = vadd.f32 %v1462_v45, %v877_v41  ;;  %16035 = vmatprep.mubr.msk.bf16.mxu0 %vm18175_vm0, %v22070_v0  ;;  %v3034_v2 = vshrl.u32 %v2560_v53, 16  ;;  %v3037_v3 = vshll.u32 %v2560_v53, 16  ;;  %3367 = vst [vmem:[#allocation3 + $0x90] sm:$0xf] %v3012_v50  ;;  %v2562_v45 = vld [vmem:[%s18375_s17 + $0xd8] sm:$0xf] }
 0x168   : > { %v15797_v51 = vpop.f32.mrf.mxu0  ;;  %16159 = vmatprep.mubr.msk.bf16.mxu1 %vm18175_vm0, %v22070_v0  ;;  %v15921_v61 = vpop.f32.mrf.mxu1  ;;  %16265 = vmatprep.subr.bf16.mxu0 %v22070_v0  ;;  %v3053_v56 = vshll.u32 %v2562_v45, 16  ;;  %v3057_v58 = vshrl.u32 %v2562_v45, 16 }
 0x169   : > { %v3036_v16 = vrot.slane %v3034_v2, 4  ;;  %v3039_v17 = vrot.slane %v3037_v3, 5 }
 0x16a   : > { %v880_v6 = vpop.f32.mrf.mxu0  ;;  %v1465_v11 = vpop.f32.mrf.mxu1  ;;  %v3055_v1 = vrot.slane %v3053_v56, 5  ;;  %v3059_v2 = vrot.slane %v3057_v58, 4 }
 0x16b   : > { %16266 = vmatpush3.bf16.msra.mxu0 %v17524_v46  ;;  %v18790_v18 = vadd.f32 %v1465_v11, %v880_v6  ;;  %v3040_v29 = vor.u32 %v3039_v17, %v3036_v16  ;;  %v2563_v46 = vld [vmem:[%s18375_s17 + $0xdc] sm:$0x1]  ;;  %v18813_v11 = vld [vmem:[#allocation3 + $0xa0] sm:$0xff]  }
 0x16c   : > { %v15798_v19 = vpop.f32.mrf.mxu0  ;;  %16267 = vmatprep.subr.bf16.mxu0 %v22070_v0  ;;  %v15922_v24 = vpop.f32.mrf.mxu1  ;;  %v3063_v53 = vshll.u32 %v2563_v46, 16 }
 0x16d   : > { %v3041_v38 = vrot.slane %v3040_v29, 4 }
 0x16e   : > { %v885_v31 = vpop.f32.mrf.mxu0  ;;  %16036 = vmatmul.mubr.bf16.gmra.mxu0 %v18589_v25  ;;  %v1470_v34 = vpop.f32.mrf.mxu1  ;;  %16160 = vmatmul.mubr.bf16.gmra.mxu1 %v18579_v13  ;;  %v3032_v25 = vsel %vm18429_vm3, %v3027_v33, %v3031_v21  ;;  %v3049_v13 = vrot.slane %v3047_v22, 4  ;;  %v3065_v16 = vrot.slane %v3063_v53, 5  ;;  %v17555_v22 = vld [vmem:[#allocation10 + $0x110] sm:$0xff]  }
 0x16f   : > { %16039 = vmatprep.mubr.msk.bf16.mxu0 %vm18175_vm0, %v22070_v0  ;;  %v18797_v40 = vadd.f32 %v1470_v34, %v885_v31  ;;  %16163 = vmatprep.mubr.msk.bf16.mxu1 %vm18175_vm0, %v22070_v0  ;;  %v3046_v51 = vsel %vm18429_vm3, %v3041_v38, %v3045_v30  ;;  %3369 = vst [vmem:[#allocation3 + $0x98] sm:$0xf] %v3032_v25  ;;  %v2566_v31 = vld [vmem:[%s18375_s17 + $0xe8] sm:$0xf] }
 0x170   : > { %v15801_v41 = vpop.f32.mrf.mxu0  ;;  %16268 = vmatpush3.bf16.msra.mxu0 %v17531_v15  ;;  %v15925_v47 = vpop.f32.mrf.mxu1  ;;  %3370 = vst [vmem:[#allocation3 + $0x9c] sm:$0xf] %v3046_v51  ;;  %v3050_v61 = vor.u32 %v3049_v13, %v3045_v30  ;;  %v3060_v15 = vor.u32 %v3059_v2, %v3055_v1  ;;  %v2564_v30 = vld [vmem:[%s18375_s17 + $0xe0] sm:$0xf]  ;;  %v3087_v46 = vshll.u32 %v2566_v31, 16 }
 0x171   : > { %16269 = vmatprep.subr.bf16.mxu0 %v22070_v0  ;;  %v3071_v38 = vshll.u32 %v2564_v30, 16  ;;  %v17523_v47 = vld [vmem:[#allocation3 + $0x18] sm:$0xff]  }
 0x172   : > { %v888_v59 = vpop.f32.mrf.mxu0  ;;  %v1473_v50 = vpop.f32.mrf.mxu1  ;;  %v3051_v10 = vrot.slane %v3050_v61, 4  ;;  %v3061_v21 = vrot.slane %v3060_v15, 4 }
 0x173   : > { %v18810_v3 = vadd.f32 %v1473_v50, %v888_v59  ;;  %v3073_v56 = vrot.slane %v3071_v38, 5 }
 0x174   : > { %v15802_v6 = vpop.f32.mrf.mxu0  ;;  %16270 = vmatpush3.bf16.msra.mxu0 %v17540_v35  ;;  %v15926_v12 = vpop.f32.mrf.mxu1  ;;  %v3056_v19 = vsel %vm18429_vm3, %v3051_v10, %v3055_v1  ;;  %v3066_v34 = vsel %vm18429_vm3, %v3061_v21, %v3065_v16  ;;  %v3068_v35 = vshrl.u32 %v2564_v30, 16  ;;  %v3089_v1 = vrot.slane %v3087_v46, 5 }
 0x175   : > { %16271 = vmatprep.subr.bf16.mxu0 %v22070_v0  ;;  %3371 = vst [vmem:[#allocation3 + $0xa0] sm:$0xf] %v3056_v19  ;;  %3372 = vst [vmem:[#allocation3 + $0xa4] sm:$0xf] %v3066_v34  ;;  %v2568_v19 = vld [vmem:[%s18375_s17 + $0xf0] sm:$0xf] }
 0x176   : > { %v893_v17 = vpop.f32.mrf.mxu0  ;;  %16040 = vmatmul.mubr.bf16.gmra.mxu0 %v18595_v36  ;;  %v1478_v20 = vpop.f32.mrf.mxu1  ;;  %16164 = vmatmul.mubr.bf16.gmra.mxu1 %v17521_v63  ;;  %v2565_v36 = vld [vmem:[%s18375_s17 + $0xe4] sm:$0xf]  ;;  %v3070_v51 = vrot.slane %v3068_v35, 4 }
 0x177   : > { %16043 = vmatprep.mubr.msk.bf16.mxu0 %vm18175_vm0, %v22070_v0  ;;  %v18820_v24 = vadd.f32 %v1478_v20, %v893_v17  ;;  %16167 = vmatprep.mubr.msk.bf16.mxu1 %vm18175_vm0, %v22070_v0  ;;  %v3077_v41 = vshll.u32 %v2565_v36, 16  ;;  %v3081_v45 = vshrl.u32 %v2565_v36, 16  ;;  %v2567_v17 = vld [vmem:[%s18375_s17 + $0xec] sm:$0x1]  ;;  %v3091_v20 = vshrl.u32 %v2566_v31, 16 }
 0x178   : > { %v15805_v29 = vpop.f32.mrf.mxu0  ;;  %16272 = vmatpush3.bf16.msra.mxu0 %v17547_v7  ;;  %v15929_v33 = vpop.f32.mrf.mxu1  ;;  %v3074_v63 = vor.u32 %v3073_v56, %v3070_v51  ;;  %v3097_v30 = vshll.u32 %v2567_v17, 16  ;;  %v3102_v36 = vshrl.u32 %v2568_v19, 16  ;;  %v2570_v17 = vld [vmem:[%s18375_s17 + $0xf8] sm:$0xf] }
 0x179   : > { %16273 = vmatprep.subr.bf16.mxu0 %v22070_v0  ;;  %v3079_v58 = vrot.slane %v3077_v41, 5  ;;  %v3083_v61 = vrot.slane %v3081_v45, 4  ;;  %v2569_v29 = vld [vmem:[%s18375_s17 + $0xf4] sm:$0xf]  ;;  %v3105_v33 = vshll.u32 %v2568_v19, 16  ;;  %v3093_v38 = vrot.slane %v3091_v20, 4 }
 0x17a   : > { %v896_v25 = vpop.f32.mrf.mxu0  ;;  %v1481_v13 = vpop.f32.mrf.mxu1  ;;  %v3075_v10 = vrot.slane %v3074_v63, 4  ;;  %v3111_v41 = vshll.u32 %v2569_v29, 16  ;;  %v17526_v45 = vld [vmem:[#allocation3 + $0x20] sm:$0xff]   ;;  %v3104_v31 = vrot.slane %v3102_v36, 4  ;;  %v3099_v56 = vrot.slane %v3097_v30, 5  ;;  %v17563_v36 = vld [vmem:[#allocation10 + $0x108] sm:$0xff]  }
 0x17b   : > { %v18830_v53 = vadd.f32 %v1481_v13, %v896_v25  ;;  %v3084_v6 = vor.u32 %v3083_v61, %v3079_v58  ;;  %v3107_v46 = vrot.slane %v3105_v33, 5  ;;  %v3094_v51 = vor.u32 %v3093_v38, %v3089_v1  ;;  %v17528_v38 = vld [vmem:[#allocation3 + $0x28] sm:$0xff]  }
 0x17c   : > { %v15806_v59 = vpop.f32.mrf.mxu0  ;;  %16274 = vmatpush3.bf16.msra.mxu0 %v17555_v22  ;;  %v15930_v50 = vpop.f32.mrf.mxu1  ;;  %v3080_v22 = vsel %vm18429_vm3, %v3075_v10, %v3079_v58  ;;  %v3115_v58 = vshrl.u32 %v2569_v29, 16  ;;  %v3125_v29 = vshrl.u32 %v2570_v17, 16 }
 0x17d   : > { %16275 = vmatprep.subr.bf16.mxu0 %v22070_v0  ;;  %v3085_v16 = vrot.slane %v3084_v6, 4  ;;  %v3108_v61 = vor.u32 %v3107_v46, %v3104_v31  ;;  %v3113_v50 = vrot.slane %v3111_v41, 5 }
 0x17e   : > { %v901_v2 = vpop.f32.mrf.mxu0  ;;  %16044 = vmatmul.mubr.bf16.gmra.mxu0 %v18614_v5  ;;  %v1486_v7 = vpop.f32.mrf.mxu1  ;;  %16168 = vmatmul.mubr.bf16.gmra.mxu1 %v17523_v47  ;;  %v18842_v5 = vld [vmem:[#allocation3 + $0xa8] sm:$0xff]   ;;  %v3117_v19 = vrot.slane %v3115_v58, 4 }
 0x17f   : > { %16047 = vmatprep.mubr.msk.bf16.mxu0 %vm18175_vm0, %v22070_v0  ;;  %v18836_v12 = vadd.f32 %v1486_v7, %v901_v2  ;;  %16171 = vmatprep.mubr.msk.bf16.mxu1 %vm18175_vm0, %v22070_v0  ;;  %v3090_v35 = vsel %vm18429_vm3, %v3085_v16, %v3089_v1  ;;  %3373 = vst [vmem:[#allocation3 + $0xa8] sm:$0xf] %v3080_v22  ;;  %v3095_v2 = vrot.slane %v3094_v51, 4  ;;  %v3109_v7 = vrot.slane %v3108_v61, 4  ;;  %v18869_v51 = vld [vmem:[#allocation3 + $0xb8] sm:$0xff]  }
 0x180   : > { %v15809_v15 = vpop.f32.mrf.mxu0  ;;  %v15933_v21 = vpop.f32.mrf.mxu1  ;;  %3374 = vst [vmem:[#allocation3 + $0xac] sm:$0xf] %v3090_v35  ;;  %v3121_v22 = vshll.u32 %v2570_v17, 16  ;;  %16276 = vmatpush3.bf16.msra.mxu0 %v17563_v36  ;;  %v17530_v36 = vld [vmem:[#allocation3 + $0x30] sm:$0xff]  }
 0x181   : > { %v18858_v15 = vld [vmem:[#allocation3 + $0xb0] sm:$0xff]   ;;  %v3100_v16 = vsel %vm18429_vm3, %v3095_v2, %v3099_v56  ;;  %v3114_v21 = vsel %vm18429_vm3, %v3109_v7, %v3113_v50  ;;  %16277 = vmatprep.subr.bf16.mxu0 %v22070_v0 }
 0x182   : > { %v904_v34 = vpop.f32.mrf.mxu0  ;;  %v1489_v25 = vpop.f32.mrf.mxu1  ;;  %3375 = vst [vmem:[#allocation3 + $0xb0] sm:$0xf] %v3100_v16  ;;  %3376 = vst [vmem:[#allocation3 + $0xb4] sm:$0xf] %v3114_v21  ;;  %v3123_v41 = vrot.slane %v3121_v22, 5 }
 0x183   : > { %v18849_v13 = vadd.f32 %v1489_v25, %v904_v34  ;;  %v3118_v34 = vor.u32 %v3117_v19, %v3113_v50  ;;  %v3127_v25 = vrot.slane %v3125_v29, 4  ;;  %v2572_v7 = vld [vmem:[%s18375_s17 + $0x100] sm:$0xf]  ;;  %v2574_v16 = vld [vmem:[%s18375_s17 + $0x108] sm:$0xf] }
 0x184   : > { %v15810_v47 = vpop.f32.mrf.mxu0  ;;  %v15934_v59 = vpop.f32.mrf.mxu1  ;;  %v3139_v19 = vshll.u32 %v2572_v7, 16  ;;  %v3155_v29 = vshll.u32 %v2574_v16, 16 }
 0x185   : > { %v3119_v46 = vrot.slane %v3118_v34, 4  ;;  %v3128_v56 = vor.u32 %v3127_v25, %v3123_v41 }
 0x186   : > { %v909_v63 = vpop.f32.mrf.mxu0  ;;  %16048 = vmatmul.mubr.bf16.gmra.mxu0 %v18625_v27  ;;  %v1494_v6 = vpop.f32.mrf.mxu1  ;;  %16172 = vmatmul.mubr.bf16.gmra.mxu1 %v17526_v45  ;;  %v2571_v27 = vld [vmem:[%s18375_s17 + $0xfc] sm:$0x1]  ;;  %v3141_v34 = vrot.slane %v3139_v19, 5  ;;  %v2577_v19 = vld [vmem:[%s18375_s17 + $0x114] sm:$0xf] }
 0x187   : > { %16051 = vmatprep.mubr.msk.bf16.mxu0 %vm18175_vm0, %v22070_v0  ;;  %v18854_v10 = vadd.f32 %v1494_v6, %v909_v63  ;;  %16175 = vmatprep.mubr.msk.bf16.mxu1 %vm18175_vm0, %v22070_v0  ;;  %v3131_v30 = vshll.u32 %v2571_v27, 16  ;;  %v3124_v61 = vsel %vm18429_vm3, %v3119_v46, %v3123_v41  ;;  %v3129_v63 = vrot.slane %v3128_v56, 4 }
 0x188   : > { %v15813_v1 = vpop.f32.mrf.mxu0  ;;  %v15937_v20 = vpop.f32.mrf.mxu1  ;;  %3377 = vst [vmem:[#allocation3 + $0xb8] sm:$0xf] %v3124_v61  ;;  %v3136_v27 = vshrl.u32 %v2572_v7, 16  ;;  %v2575_v7 = vld [vmem:[%s18375_s17 + $0x10c] sm:$0x1] }
 0x189   : > { %v3133_v58 = vrot.slane %v3131_v30, 5  ;;  %v2573_v1 = vld [vmem:[%s18375_s17 + $0x104] sm:$0xf] }
 0x18a   : > { %v912_v33 = vpop.f32.mrf.mxu0  ;;  %v1497_v35 = vpop.f32.mrf.mxu1  ;;  %v3145_v20 = vshll.u32 %v2573_v1, 16  ;;  %v3149_v22 = vshrl.u32 %v2573_v1, 16  ;;  %v2576_v1 = vld [vmem:[%s18375_s17 + $0x110] sm:$0xf] }
 0x18b   : > { %v18866_v45 = vadd.f32 %v1497_v35, %v912_v33  ;;  %v3134_v17 = vsel %vm18429_vm3, %v3129_v63, %v3133_v58  ;;  %v3138_v33 = vrot.slane %v3136_v27, 4 }
 0x18c   : > { %v15814_v31 = vpop.f32.mrf.mxu0  ;;  %v15938_v47 = vpop.f32.mrf.mxu1  ;;  %3378 = vst [vmem:[#allocation3 + $0xbc] sm:$0xf] %v3134_v17  ;;  %v3147_v35 = vrot.slane %v3145_v20, 5  ;;  %v3151_v25 = vrot.slane %v3149_v22, 4  ;;  %v3165_v20 = vshll.u32 %v2575_v7, 16  ;;  %v3173_v22 = vshll.u32 %v2576_v1, 16 }
 0x18d   : > { %v3142_v46 = vor.u32 %v3141_v34, %v3138_v33  ;;  %v3157_v47 = vrot.slane %v3155_v29, 5  ;;  %v3179_v33 = vshll.u32 %v2577_v19, 16 }
 0x18e   : > { %v917_v59 = vpop.f32.mrf.mxu0  ;;  %16052 = vmatmul.mubr.bf16.gmra.mxu0 %v18633_v44  ;;  %v1502_v50 = vpop.f32.mrf.mxu1  ;;  %16176 = vmatmul.mubr.bf16.gmra.mxu1 %v17528_v38  ;;  %v3152_v58 = vor.u32 %v3151_v25, %v3147_v35  ;;  %v3175_v25 = vrot.slane %v3173_v22, 5  ;;  %v17570_v22 = vld [vmem:[#allocation10 + $0x1f8] sm:$0xff]  }
 0x18f   : > { %16055 = vmatprep.mubr.msk.bf16.mxu0 %vm18175_vm0, %v22070_v0  ;;  %v18876_v2 = vadd.f32 %v1502_v50, %v917_v59  ;;  %16179 = vmatprep.mubr.msk.bf16.mxu1 %vm18175_vm0, %v22070_v0  ;;  %v3143_v61 = vrot.slane %v3142_v46, 4 }
 0x190   : > { %v15817_v6 = vpop.f32.mrf.mxu0  ;;  %v15941_v44 = vpop.f32.mrf.mxu1  ;;  %16388 = vmatpush3.bf16.msra.mxu1 %v17570_v22 }
 0x191   : > { %v3153_v6 = vrot.slane %v3152_v58, 4  ;;  %v3159_v44 = vshrl.u32 %v2574_v16, 16  ;;  %v3148_v27 = vsel %vm18429_vm3, %v3143_v61, %v3147_v35  ;;  %v3183_v58 = vshrl.u32 %v2577_v19, 16  ;;  %16389 = vmatprep.subr.bf16.mxu1 %v22070_v0 }
 0x192   : > { %v920_v21 = vpop.f32.mrf.mxu0  ;;  %v1505_v30 = vpop.f32.mrf.mxu1 }
 0x193   : > { %v18885_v38 = vadd.f32 %v1505_v30, %v920_v21  ;;  %v3170_v21 = vshrl.u32 %v2576_v1, 16  ;;  %v3158_v30 = vsel %vm18429_vm3, %v3153_v6, %v3157_v47 }
 0x194   : > { %v15818_v41 = vpop.f32.mrf.mxu0  ;;  %v15942_v31 = vpop.f32.mrf.mxu1 }
 0x195   : > { %v17533_v41 = vld [vmem:[#allocation3 + $0x38] sm:$0xff]   ;;  %v3172_v16 = vrot.slane %v3170_v21, 4  ;;  %v3185_v21 = vrot.slane %v3183_v58, 4 }
 0x196   : > { %v925_v56 = vpop.f32.mrf.mxu0  ;;  %16056 = vmatmul.mubr.bf16.gmra.mxu0 %v18652_v14  ;;  %v1510_v59 = vpop.f32.mrf.mxu1  ;;  %16180 = vmatmul.mubr.bf16.gmra.mxu1 %v17530_v36  ;;  %v18896_v14 = vld [vmem:[#allocation3 + $0xc0] sm:$0xff]   ;;  %v3161_v36 = vrot.slane %v3159_v44, 4  ;;  %v18908_v44 = vld [vmem:[#allocation3 + $0xc8] sm:$0xff]  }
 0x197   : > { %16059 = vmatprep.mubr.msk.bf16.mxu0 %vm18175_vm0, %v22070_v0  ;;  %v18890_v50 = vadd.f32 %v1510_v59, %v925_v56  ;;  %16183 = vmatprep.mubr.msk.bf16.mxu1 %vm18175_vm0, %v22070_v0  ;;  %3379 = vst [vmem:[#allocation3 + $0xc0] sm:$0xf] %v3148_v27  ;;  %3380 = vst [vmem:[#allocation3 + $0xc4] sm:$0xf] %v3158_v30  ;;  %v3167_v56 = vrot.slane %v3165_v20, 5  ;;  %v3176_v61 = vor.u32 %v3175_v25, %v3172_v16 }
 0x198   : > { %v15821_v63 = vpop.f32.mrf.mxu0  ;;  %v15945_v17 = vpop.f32.mrf.mxu1  ;;  %v3162_v35 = vor.u32 %v3161_v36, %v3157_v47  ;;  %v2578_v20 = vld [vmem:[%s18375_s17 + $0x118] sm:$0xf] }
 0x199   : > { %v3181_v63 = vrot.slane %v3179_v33, 5  ;;  %v3177_v17 = vrot.slane %v3176_v61, 4  ;;  %v3189_v36 = vshll.u32 %v2578_v20, 16  ;;  %v3193_v33 = vshrl.u32 %v2578_v20, 16 }
 0x19a   : > { %v928_v29 = vpop.f32.mrf.mxu0  ;;  %v1513_v34 = vpop.f32.mrf.mxu1  ;;  %v3163_v7 = vrot.slane %v3162_v35, 4 }
 0x19b   : > { %v18903_v31 = vadd.f32 %v1513_v34, %v928_v29  ;;  %v3182_v30 = vsel %vm18429_vm3, %v3177_v17, %v3181_v63  ;;  %v3186_v16 = vor.u32 %v3185_v21, %v3181_v63  ;;  %v3191_v35 = vrot.slane %v3189_v36, 5  ;;  %v18923_v17 = vld [vmem:[#allocation3 + $0xd0] sm:$0xff]  }
 0x19c   : > { %v15822_v46 = vpop.f32.mrf.mxu0  ;;  %v15946_v59 = vpop.f32.mrf.mxu1  ;;  %v3168_v19 = vsel %vm18429_vm3, %v3163_v7, %v3167_v56  ;;  %3382 = vst [vmem:[#allocation3 + $0xcc] sm:$0xf] %v3182_v30  ;;  %v3195_v56 = vrot.slane %v3193_v33, 4  ;;  %v17572_v7 = vld [vmem:[#allocation10 + $0x1f0] sm:$0xff]   ;;  %v2581_v30 = vld [vmem:[%s18375_s17 + $0x124] sm:$0xf] }
 0x19d   : > { %3381 = vst [vmem:[#allocation3 + $0xc8] sm:$0xf] %v3168_v19  ;;  %v17535_v46 = vld [vmem:[#allocation3 + $0x40] sm:$0xff]   ;;  %v3187_v61 = vrot.slane %v3186_v16, 4  ;;  %16390 = vmatpush3.bf16.msra.mxu1 %v17572_v7  ;;  %v3213_v16 = vshll.u32 %v2581_v30, 16  ;;  %v17537_v7 = vld [vmem:[#allocation3 + $0x48] sm:$0xff]  }
 0x19e   : > { %v933_v6 = vpop.f32.mrf.mxu0  ;;  %16060 = vmatmul.mubr.bf16.gmra.mxu0 %v18663_v37  ;;  %v1518_v1 = vpop.f32.mrf.mxu1  ;;  %16184 = vmatmul.mubr.bf16.gmra.mxu1 %v17533_v41  ;;  %v2579_v37 = vld [vmem:[%s18375_s17 + $0x11c] sm:$0x1]  ;;  %v3196_v63 = vor.u32 %v3195_v56, %v3191_v35  ;;  %v476_v19 = vld [vmem:[%s18375_s17 + $0x130] sm:$0xff]   ;;  %v3217_v56 = vshrl.u32 %v2581_v30, 16 }
 0x19f   : > { %16063 = vmatprep.mubr.msk.bf16.mxu0 %vm18175_vm0, %v22070_v0  ;;  %v18910_v47 = vadd.f32 %v1518_v1, %v933_v6  ;;  %16187 = vmatprep.mubr.msk.bf16.mxu1 %vm18175_vm0, %v22070_v0  ;;  %v3199_v34 = vshll.u32 %v2579_v37, 16  ;;  %v17571_v6 = vld [vmem:[#allocation10 + $0x100] sm:$0xff]   ;;  %v3192_v37 = vsel %vm18429_vm3, %v3187_v61, %v3191_v35  ;;  %536 = vst [vmem:[#allocation3 + $0xe4] sm:$0xff] %v476_v19  }
 0x1a0   : > { %v15825_v27 = vpop.f32.mrf.mxu0  ;;  %v15949_v29 = vpop.f32.mrf.mxu1  ;;  %v3197_v22 = vrot.slane %v3196_v63, 4  ;;  %3383 = vst [vmem:[#allocation3 + $0xd0] sm:$0xf] %v3192_v37  ;;  %16278 = vmatpush3.bf16.msra.mxu0 %v17571_v6  ;;  %16391 = vmatprep.subr.bf16.mxu1 %v22070_v0  ;;  %v3215_v63 = vrot.slane %v3213_v16, 5 }
 0x1a1   : > { %v3201_v27 = vrot.slane %v3199_v34, 5  ;;  %v2580_v29 = vld [vmem:[%s18375_s17 + $0x120] sm:$0xf]  ;;  %16511 = vmatprep.subr.bf16.mxu0 %v22070_v0 }
 0x1a2   : > { %v936_v41 = vpop.f32.mrf.mxu0  ;;  %v1521_v25 = vpop.f32.mrf.mxu1  ;;  %v3204_v34 = vshrl.u32 %v2580_v29, 16 }
 0x1a3   : > { %v18921_v58 = vadd.f32 %v1521_v25, %v936_v41  ;;  %v3207_v41 = vshll.u32 %v2580_v29, 16  ;;  %v17575_v25 = vld [vmem:[#allocation10 + $0x1e8] sm:$0xff]   ;;  %v3202_v35 = vsel %vm18429_vm3, %v3197_v22, %v3201_v27  ;;  %v17576_v29 = vld [vmem:[#allocation10 + $0x1e0] sm:$0xff]  }
 0x1a4   : > { %v15826_v59 = vpop.f32.mrf.mxu0  ;;  %v15950_v1 = vpop.f32.mrf.mxu1  ;;  %3384 = vst [vmem:[#allocation3 + $0xd4] sm:$0xf] %v3202_v35  ;;  %v3206_v6 = vrot.slane %v3204_v34, 4  ;;  %16392 = vmatpush3.bf16.msra.mxu1 %v17575_v25  ;;  %v478_v35 = vld [vmem:[%s18375_s17 + $0x138] sm:$0xf] }
 0x1a5   : > { %v3209_v1 = vrot.slane %v3207_v41, 5  ;;  %16393 = vmatprep.subr.bf16.mxu1 %v22070_v0  ;;  %538 = vst [vmem:[#allocation3 + $0xec] sm:$0xf] %v478_v35  ;;  %v2583_v25 = vld [vmem:[%s18375_s17 + $0x12c] sm:$0x1] }
 0x1a6   : > { %v941_v20 = vpop.f32.mrf.mxu0  ;;  %16064 = vmatmul.mubr.bf16.gmra.mxu0 %v18671_v57  ;;  %v1526_v21 = vpop.f32.mrf.mxu1  ;;  %16188 = vmatmul.mubr.bf16.gmra.mxu1 %v17535_v46  ;;  %v2582_v57 = vld [vmem:[%s18375_s17 + $0x128] sm:$0xf] }
 0x1a7   : > { %16067 = vmatprep.mubr.msk.bf16.mxu0 %vm18175_vm0, %v22070_v0  ;;  %v18933_v36 = vadd.f32 %v1526_v21, %v941_v20  ;;  %16191 = vmatprep.mubr.msk.bf16.mxu1 %vm18175_vm0, %v22070_v0  ;;  %v3223_v59 = vshll.u32 %v2582_v57, 16  ;;  %v3219_v20 = vrot.slane %v3217_v56, 4  ;;  %v3227_v37 = vshrl.u32 %v2582_v57, 16  ;;  %v2584_v56 = vld [vmem:[%s18375_s17 + $0x130] sm:$0xf] }
 0x1a8   : > { %v15829_v33 = vpop.f32.mrf.mxu0  ;;  %v15953_v46 = vpop.f32.mrf.mxu1  ;;  %v3210_v22 = vor.u32 %v3209_v1, %v3206_v6  ;;  %16394 = vmatpush3.bf16.msra.mxu1 %v17576_v29 }
 0x1a9   : > { %v3220_v33 = vor.u32 %v3219_v20, %v3215_v63  ;;  %v3225_v46 = vrot.slane %v3223_v59, 5  ;;  %v3238_v20 = vshrl.u32 %v2584_v56, 16  ;;  %16395 = vmatprep.subr.bf16.mxu1 %v22070_v0 }
 0x1aa   : > { %v944_v61 = vpop.f32.mrf.mxu0  ;;  %v1529_v19 = vpop.f32.mrf.mxu1  ;;  %v3211_v41 = vrot.slane %v3210_v22, 4 }
 0x1ab   : > { %v18943_v27 = vadd.f32 %v1529_v19, %v944_v61  ;;  %v3221_v16 = vrot.slane %v3220_v33, 4  ;;  %v3229_v61 = vrot.slane %v3227_v37, 4  ;;  %v2585_v19 = vld [vmem:[%s18375_s17 + $0x134] sm:$0xf] }
 0x1ac   : > { %v15830_v21 = vpop.f32.mrf.mxu0  ;;  %v15954_v30 = vpop.f32.mrf.mxu1  ;;  %v3216_v1 = vsel %vm18429_vm3, %v3211_v41, %v3215_v63  ;;  %v3247_v33 = vshll.u32 %v2585_v19, 16  ;;  %v17539_v41 = vld [vmem:[#allocation3 + $0x50] sm:$0xff]  }
 0x1ad   : > { %22107 = vst [vmem:[#allocation27_spill] sm:$0xff] %v18943_v27  ;;  %v17579_v21 = vld [vmem:[#allocation10 + $0x1d8] sm:$0xff]   ;;  %v3226_v37 = vsel %vm18429_vm3, %v3221_v16, %v3225_v46  ;;  %v3230_v29 = vor.u32 %v3229_v61, %v3225_v46  ;;  %v3241_v30 = vshll.u32 %v2584_v56, 16  ;;  %v17580_v46 = vld [vmem:[#allocation10 + $0x1d0] sm:$0xff]  }
 0x1ae   : > { %v949_v34 = vpop.f32.mrf.mxu0  ;;  %16068 = vmatmul.mubr.bf16.gmra.mxu0 %v18690_v26  ;;  %v1534_v57 = vpop.f32.mrf.mxu1  ;;  %16192 = vmatmul.mubr.bf16.gmra.mxu1 %v17537_v7  ;;  %v18955_v26 = vld [vmem:[#allocation3 + $0xd8] sm:$0xff]   ;;  %v3233_v7 = vshll.u32 %v2583_v25, 16  ;;  %v18966_v61 = vld [vmem:[#allocation3 + $0xe0] sm:$0xff]  }
 0x1af   : > { %16071 = vmatprep.mubr.msk.bf16.mxu0 %vm18175_vm0, %v22070_v0  ;;  %v18951_v6 = vadd.f32 %v1534_v57, %v949_v34  ;;  %16195 = vmatprep.mubr.msk.bf16.mxu1 %vm18175_vm0, %v22070_v0  ;;  %3385 = vst [vmem:[#allocation3 + $0xd8] sm:$0xf] %v3216_v1  ;;  %3386 = vst [vmem:[#allocation3 + $0xdc] sm:$0xf] %v3226_v37  ;;  %v3240_v57 = vrot.slane %v3238_v20, 4  ;;  %v3231_v25 = vrot.slane %v3230_v29, 4 }
 0x1b0   : > { %v15833_v59 = vpop.f32.mrf.mxu0  ;;  %v15957_v22 = vpop.f32.mrf.mxu1  ;;  %v3235_v34 = vrot.slane %v3233_v7, 5  ;;  %16396 = vmatpush3.bf16.msra.mxu1 %v17579_v21  ;;  %v3249_v20 = vrot.slane %v3247_v33, 5  ;;  %v2586_v29 = vld [vmem:[%s18375_s17 + $0x138] sm:$0xf] }
 0x1b1   : > { %22108 = vst [vmem:[#allocation28_spill] sm:$0xff] %v18951_v6  ;;  %v3243_v59 = vrot.slane %v3241_v30, 5  ;;  %v3251_v6 = vshrl.u32 %v2585_v19, 16  ;;  %16397 = vmatprep.subr.bf16.mxu1 %v22070_v0  ;;  %v2587_v30 = vld [vmem:[%s18375_s17 + $0x13c] sm:$0x1]  ;;  %v3257_v33 = vshll.u32 %v2586_v29, 16 }
 0x1b2   : > { %v952_v35 = vpop.f32.mrf.mxu0  ;;  %v1537_v63 = vpop.f32.mrf.mxu1  ;;  %v3236_v1 = vsel %vm18429_vm3, %v3231_v25, %v3235_v34  ;;  %v3261_v34 = vshrl.u32 %v2586_v29, 16 }
 0x1b3   : > { %v18964_v22 = vadd.f32 %v1537_v63, %v952_v35  ;;  %v3244_v7 = vor.u32 %v3243_v59, %v3240_v57  ;;  %3387 = vst [vmem:[#allocation3 + $0xe0] sm:$0xf] %v3236_v1  ;;  %v3253_v35 = vrot.slane %v3251_v6, 4  ;;  %v17583_v57 = vld [vmem:[#allocation10 + $0x1c8] sm:$0xff]   ;;  %v3259_v6 = vrot.slane %v3257_v33, 5 }
 0x1b4   : > { %v15834_v16 = vpop.f32.mrf.mxu0  ;;  %v15958_v56 = vpop.f32.mrf.mxu1  ;;  %16398 = vmatpush3.bf16.msra.mxu1 %v17580_v46 }
 0x1b5   : > { %22109 = vst [vmem:[#allocation29_spill] sm:$0xff] %v18964_v22  ;;  %v3245_v37 = vrot.slane %v3244_v7, 4  ;;  %16399 = vmatprep.subr.bf16.mxu1 %v22070_v0  ;;  %v3254_v59 = vor.u32 %v3253_v35, %v3249_v20  ;;  %v3263_v56 = vrot.slane %v3261_v34, 4  ;;  %v17542_v7 = vld [vmem:[#allocation3 + $0x58] sm:$0xff]   ;;  %v18985_v35 = vld [vmem:[#allocation3 + $0xe8] sm:$0xff]  }
 0x1b6   : > { %v957_v21 = vpop.f32.mrf.mxu0  ;;  %16072 = vmatmul.mubr.bf16.gmra.mxu0 %v18701_v54  ;;  %v1542_v19 = vpop.f32.mrf.mxu1  ;;  %16196 = vmatmul.mubr.bf16.gmra.mxu1 %v17539_v41  ;;  %v3267_v54 = vshll.u32 %v2587_v30, 16 }
 0x1b7   : > { %16075 = vmatprep.mubr.msk.bf16.mxu0 %vm18175_vm0, %v22070_v0  ;;  %v18975_v63 = vadd.f32 %v1542_v19, %v957_v21  ;;  %16199 = vmatprep.mubr.msk.bf16.mxu1 %vm18175_vm0, %v22070_v0  ;;  %v3250_v25 = vsel %vm18429_vm3, %v3245_v37, %v3249_v20  ;;  %v3255_v21 = vrot.slane %v3254_v59, 4  ;;  %v3264_v30 = vor.u32 %v3263_v56, %v3259_v6  ;;  %v17584_v37 = vld [vmem:[#allocation10 + $0x1c0] sm:$0xff]   ;;  %v5473_v59 = vld [vmem:[%s18375_s17 + $0x18] sm:$0xf] }
 0x1b8   : > { %v15837_v16 = vpop.f32.mrf.mxu0  ;;  %v15961_v41 = vpop.f32.mrf.mxu1  ;;  %3388 = vst [vmem:[#allocation3 + $0xe4] sm:$0xf] %v3250_v25  ;;  %16400 = vmatpush3.bf16.msra.mxu1 %v17583_v57  ;;  %v5471_v25 = vld [vmem:[%s18375_s17 + $0x10] sm:$0xe] }
 0x1b9   : > { %22110 = vst [vmem:[#allocation30_spill] sm:$0xff] %v18975_v63  ;;  %16401 = vmatprep.subr.bf16.mxu1 %v22070_v0  ;;  %v3269_v16 = vrot.slane %v3267_v54, 5  ;;  %v3260_v33 = vsel %vm18429_vm3, %v3255_v21, %v3259_v6  ;;  %v3265_v57 = vrot.slane %v3264_v30, 4  ;;  %v5472_v54 = vld [vmem:[%s18375_s17 + $0x14] sm:$0xf]  ;;  %v14360_v6 = vrot.slane %v5471_v25, 9 }
 0x1ba   : > { %v960_v46 = vpop.f32.mrf.mxu0  ;;  %v1545_v1 = vpop.f32.mrf.mxu1  ;;  %3389 = vst [vmem:[#allocation3 + $0xe8] sm:$0xf] %v3260_v33  ;;  %v17544_v21 = vld [vmem:[#allocation3 + $0x60] sm:$0xff]   ;;  %v5492_v63 = vld [vmem:[%s18375_s17 + $0x64] sm:$0xf] }
 0x1bb   : > { %v18983_v19 = vadd.f32 %v1545_v1, %v960_v46  ;;  %v5642_v1 = vrot.slane %v5472_v54, 5 }
 0x1bc   : > { %v15838_v29 = vpop.f32.mrf.mxu0  ;;  %v15962_v20 = vpop.f32.mrf.mxu1  ;;  %16402 = vmatpush3.bf16.msra.mxu1 %v17584_v37  ;;  %v19002_v37 = vld [vmem:[#allocation3 + $0xc] sm:$0xff]  }
 0x1bd   : > { %22111 = vst [vmem:[#allocation31_spill] sm:$0xff] %v18983_v19  ;;  %16635 = vmatprep.subr.bf16.mxu1 %v22070_v0  ;;  %v5645_v29 = vrot.slane %v5473_v59, 5  ;;  %v5643_v20 = vsel %vm18555_vm6, %v14360_v6, %v5642_v1  ;;  %v5644_v33 = vrot.slane %v5642_v1, 4  ;;  %v5476_v6 = vld [vmem:[%s18375_s17 + $0x24] sm:$0xf] }
 0x1be   : > { %v965_v34 = vpop.f32.mrf.mxu0  ;;  %16076 = vmatmul.mubr.bf16.gmra.mxu0 %v18709_v8  ;;  %v1550_v41 = vpop.f32.mrf.mxu1  ;;  %16200 = vmatmul.mubr.bf16.gmra.mxu1 %v17542_v7  ;;  %v3270_v8 = vsel %vm18429_vm3, %v3265_v57, %v3269_v16  ;;  %5893 = vst [vmem:[#allocation3 + $0xc] sm:$0xf] %v5643_v20 }
 0x1bf   : > { %16079 = vmatprep.mubr.msk.bf16.mxu0 %vm18175_vm0, %v22070_v0  ;;  %v18995_v46 = vadd.f32 %v1550_v41, %v965_v34  ;;  %16203 = vmatprep.mubr.msk.bf16.mxu1 %vm18175_vm0, %v22070_v0  ;;  %3390 = vst [vmem:[#allocation3 + $0xec] sm:$0xf] %v3270_v8  ;;  %v5646_v41 = vsel %vm18555_vm6, %v5644_v33, %v5645_v29  ;;  %v5475_v8 = vld [vmem:[%s18375_s17 + $0x20] sm:$0xe] }
 0x1c0   : > { %v15841_v56 = vpop.f32.mrf.mxu0  ;;  %v15965_v7 = vpop.f32.mrf.mxu1  ;;  %5894 = vst [vmem:[#allocation3 + $0x10] sm:$0xf] %v5646_v41  ;;  %v14361_v33 = vrot.slane %v5475_v8, 9  ;;  %v5652_v41 = vrot.slane %v5476_v6, 5  ;;  %v22116_v6 = vmov 0.0  }
 0x1c1   : > { %22112 = vst [vmem:[#allocation32_spill] sm:$0xff] %v18995_v46  ;;  %v5474_v56 = vld [vmem:[%s18375_s17 + $0x1c] sm:$0x1] }
 0x1c2   : > { %v968_v30 = vpop.f32.mrf.mxu0  ;;  %v1553_v34 = vpop.f32.mrf.mxu1  ;;  %v5648_v20 = vrot.slane %v5474_v56, 5 }
 0x1c3   : > { %v19006_v16 = vadd.f32 %v1553_v34, %v968_v30  ;;  %v5647_v30 = vrot.slane %v5645_v29, 4 }
 0x1c4   : > { %v15842_v57 = vpop.f32.mrf.mxu0  ;;  %v15966_v25 = vpop.f32.mrf.mxu1 }
 0x1c5   : > { %22113 = vst [vmem:[#allocation33_spill] sm:$0xff] %v19006_v16  ;;  %v17546_v57 = vld [vmem:[#allocation3 + $0x68] sm:$0xff]   ;;  %v5484_v16 = vld [vmem:[%s18375_s17 + $0x44] sm:$0xf] }
 0x1c6   : > { %v973_v54 = vpop.f32.mrf.mxu0  ;;  %16080 = vmatmul.mubr.bf16.gmra.mxu0 %v18730_v52  ;;  %v1558_v59 = vpop.f32.mrf.mxu1  ;;  %16204 = vmatmul.mubr.bf16.gmra.mxu1 %v17544_v21  ;;  %v19020_v52 = vld [vmem:[#allocation3 + $0x18] sm:$0xff]  }
 0x1c7   : > { %16083 = vmatprep.mubr.msk.bf16.mxu0 %vm18175_vm0, %v22070_v0  ;;  %v19016_v1 = vadd.f32 %v1558_v59, %v973_v54  ;;  %16207 = vmatprep.mubr.msk.bf16.mxu1 %vm18175_vm0, %v22070_v0  ;;  %v19022_v21 = vld [vmem:[#allocation3 + $0x14] sm:$0xff]   ;;  %v5649_v54 = vsel %vm18555_vm6, %v5647_v30, %v5648_v20  ;;  %v5478_v30 = vld [vmem:[%s18375_s17 + $0x2c] sm:$0x1]  ;;  %v5654_v20 = vrot.slane %v5652_v41, 4 }
 0x1c8   : > { %v15845_v7 = vpop.f32.mrf.mxu0  ;;  %v15969_v34 = vpop.f32.mrf.mxu1  ;;  %5895 = vst [vmem:[#allocation3 + $0x14] sm:$0xf] %v5649_v54  ;;  %v5658_v54 = vrot.slane %v5478_v30, 5 }
 0x1c9   : > { %22114 = vst [vmem:[#allocation34_spill] sm:$0xff] %v19016_v1  ;;  %v5653_v7 = vsel %vm18555_vm6, %v14361_v33, %v5652_v41 }
 0x1ca   : > { %v976_v25 = vpop.f32.mrf.mxu0  ;;  %v1561_v59 = vpop.f32.mrf.mxu1  ;;  %5896 = vst [vmem:[#allocation3 + $0x18] sm:$0xf] %v5653_v7  ;;  %v17549_v7 = vld [vmem:[#allocation3 + $0x70] sm:$0xff]  }
 0x1cb   : > { %v19028_v29 = vadd.f32 %v1561_v59, %v976_v25  ;;  %v5655_v25 = vrot.slane %v5477_v39, 5 }
 0x1cc   : > { %v15846_v56 = vpop.f32.mrf.mxu0  ;;  %v15970_v8 = vpop.f32.mrf.mxu1 }
 0x1cd   : > { %22115 = vst [vmem:[#allocation35_spill] sm:$0xff] %v19028_v29  ;;  %v5656_v41 = vsel %vm18555_vm6, %v5654_v20, %v5655_v25  ;;  %v5479_v20 = vld [vmem:[%s18375_s17 + $0x30] sm:$0xe]  ;;  %v5481_v29 = vld [vmem:[%s18375_s17 + $0x38] sm:$0xf] }
 0x1ce   : > { %v981_v34 = vpop.f32.mrf.mxu0  ;;  %16084 = vmatmul.mubr.bf16.gmra.mxu0 %v18745_v28  ;;  %v1566_v0 = vpop.f32.mrf.mxu1  ;;  %16208 = vmatmul.mubr.bf16.gmra.mxu1 %v17546_v57  ;;  %v19039_v28 = vld [vmem:[#allocation3 + $0x20] sm:$0xff]  }
 0x1cf   : > { %16087 = vmatprep.mubr.msk.bf16.mxu0 %vm18175_vm0, %v22116_v6  ;;  %v19035_v1 = vadd.f32 %v1566_v0, %v981_v34  ;;  %16211 = vmatprep.mubr.msk.bf16.mxu1 %vm18175_vm0, %v22116_v6  ;;  %v19041_v57 = vld [vmem:[#allocation3 + $0x1c] sm:$0xff]   ;;  %v5657_v0 = vrot.slane %v5655_v25, 4  ;;  %v5480_v25 = vld [vmem:[%s18375_s17 + $0x34] sm:$0xf] }
 0x1d0   : > { %v15849_v33 = vpop.f32.mrf.mxu0  ;;  %v15973_v59 = vpop.f32.mrf.mxu1  ;;  %5897 = vst [vmem:[#allocation3 + $0x1c] sm:$0xf] %v5656_v41 }
 0x1d1   : > { %22117 = vst [vmem:[#allocation36_spill] sm:$0xff] %v19035_v1  ;;  %v5659_v30 = vsel %vm18555_vm6, %v5657_v0, %v5658_v54  ;;  %v14362_v54 = vrot.slane %v5479_v20, 9  ;;  %v5662_v0 = vrot.slane %v5480_v25, 5 }
 0x1d2   : > { %v984_v56 = vpop.f32.mrf.mxu0  ;;  %v1569_v8 = vpop.f32.mrf.mxu1  ;;  %5898 = vst [vmem:[#allocation3 + $0x20] sm:$0xf] %v5659_v30  ;;  %v17551_v30 = vld [vmem:[#allocation3 + $0x78] sm:$0xff]  }
 0x1d3   : > { %v19045_v34 = vadd.f32 %v1569_v8, %v984_v56  ;;  %v5665_v8 = vrot.slane %v5481_v29, 5 }
 0x1d4   : > { %v15850_v39 = vpop.f32.mrf.mxu0  ;;  %v15974_v33 = vpop.f32.mrf.mxu1 }
 0x1d5   : > { %22118 = vst [vmem:[#allocation37_spill] sm:$0xff] %v19045_v34  ;;  %v19059_v33 = vld [vmem:[#allocation3 + $0x24] sm:$0xff]   ;;  %v5664_v34 = vrot.slane %v5662_v0, 4 }
 0x1d6   : > { %v989_v59 = vpop.f32.mrf.mxu0  ;;  %16088 = vmatmul.mubr.bf16.gmra.mxu0 %v18755_v60  ;;  %v1574_v1 = vpop.f32.mrf.mxu1  ;;  %16212 = vmatmul.mubr.bf16.gmra.mxu1 %v17549_v7  ;;  %v5663_v7 = vsel %vm18555_vm6, %v14362_v54, %v5662_v0  ;;  %v5482_v54 = vld [vmem:[%s18375_s17 + $0x3c] sm:$0x1]  ;;  %v5483_v0 = vld [vmem:[%s18375_s17 + $0x40] sm:$0xe] }
 0x1d7   : > { %16091 = vmatprep.mubr.msk.bf16.mxu0 %vm18175_vm0, %v22116_v6  ;;  %v19055_v41 = vadd.f32 %v1574_v1, %v989_v59  ;;  %16215 = vmatprep.mubr.msk.bf16.mxu1 %vm18175_vm0, %v22116_v6  ;;  %v19063_v59 = vld [vmem:[#allocation3 + $0x28] sm:$0xff]   ;;  %5899 = vst [vmem:[#allocation3 + $0x24] sm:$0xf] %v5663_v7  ;;  %v5666_v29 = vsel %vm18555_vm6, %v5664_v34, %v5665_v8  ;;  %v5667_v34 = vrot.slane %v5665_v8, 4 }
 0x1d8   : > { %v15853_v56 = vpop.f32.mrf.mxu0  ;;  %v15977_v39 = vpop.f32.mrf.mxu1  ;;  %5900 = vst [vmem:[#allocation3 + $0x28] sm:$0xf] %v5666_v29 }
 0x1d9   : > { %22119 = vst [vmem:[#allocation38_spill] sm:$0xff] %v19055_v41 }
 0x1da   : > { %v992_v60 = vpop.f32.mrf.mxu0  ;;  %v1577_v1 = vpop.f32.mrf.mxu1 }
 0x1db   : > { %v19065_v56 = vadd.f32 %v1577_v1, %v992_v60  ;;  %v5668_v1 = vrot.slane %v5482_v54, 5 }
 0x1dc   : > { %v15854_v20 = vpop.f32.mrf.mxu0  ;;  %v15978_v25 = vpop.f32.mrf.mxu1 }
 0x1dd   : > { %22120 = vst [vmem:[#allocation39_spill] sm:$0xff] %v19065_v56  ;;  %v14363_v20 = vrot.slane %v5483_v0, 9  ;;  %v17553_v25 = vld [vmem:[#allocation3 + $0x80] sm:$0xff]   ;;  %v5672_v56 = vrot.slane %v5484_v16, 5  ;;  %v5485_v16 = vld [vmem:[%s18375_s17 + $0x48] sm:$0xf] }
 0x1de   : > { %v997_v39 = vpop.f32.mrf.mxu0  ;;  %16092 = vmatmul.mubr.bf16.gmra.mxu0 %v18783_v62  ;;  %v1582_v41 = vpop.f32.mrf.mxu1  ;;  %16216 = vmatmul.mubr.bf16.gmra.mxu1 %v17551_v30  ;;  %v19079_v62 = vld [vmem:[#allocation3 + $0x30] sm:$0xff]  }
 0x1df   : > { %16095 = vmatprep.mubr.msk.bf16.mxu0 %vm18175_vm0, %v22116_v6  ;;  %v19075_v7 = vadd.f32 %v1582_v41, %v997_v39  ;;  %16219 = vmatprep.mubr.msk.bf16.mxu1 %vm18175_vm0, %v22116_v6  ;;  %v19081_v30 = vld [vmem:[#allocation3 + $0x2c] sm:$0xff]   ;;  %v5669_v41 = vsel %vm18555_vm6, %v5667_v34, %v5668_v1  ;;  %v5486_v34 = vld [vmem:[%s18375_s17 + $0x4c] sm:$0x1]  ;;  %v5674_v1 = vrot.slane %v5672_v56, 4 }
 0x1e0   : > { %v15857_v60 = vpop.f32.mrf.mxu0  ;;  %v15981_v29 = vpop.f32.mrf.mxu1  ;;  %5901 = vst [vmem:[#allocation3 + $0x2c] sm:$0xf] %v5669_v41  ;;  %v5678_v41 = vrot.slane %v5486_v34, 5 }
 0x1e1   : > { %22121 = vst [vmem:[#allocation40_spill] sm:$0xff] %v19075_v7  ;;  %v5673_v60 = vsel %vm18555_vm6, %v14363_v20, %v5672_v56 }
 0x1e2   : > { %v1000_v46 = vpop.f32.mrf.mxu0  ;;  %v1585_v39 = vpop.f32.mrf.mxu1  ;;  %5902 = vst [vmem:[#allocation3 + $0x30] sm:$0xf] %v5673_v60  ;;  %v17556_v60 = vld [vmem:[#allocation3 + $0x88] sm:$0xff]  }
 0x1e3   : > { %v19087_v8 = vadd.f32 %v1585_v39, %v1000_v46  ;;  %v5675_v46 = vrot.slane %v5485_v16, 5 }
 0x1e4   : > { %v15858_v54 = vpop.f32.mrf.mxu0  ;;  %v15982_v0 = vpop.f32.mrf.mxu1 }
 0x1e5   : > { %22122 = vst [vmem:[#allocation41_spill] sm:$0xff] %v19087_v8  ;;  %v5676_v56 = vsel %vm18555_vm6, %v5674_v1, %v5675_v46  ;;  %v5487_v1 = vld [vmem:[%s18375_s17 + $0x50] sm:$0xe]  ;;  %v5489_v8 = vld [vmem:[%s18375_s17 + $0x58] sm:$0xf] }
 0x1e6   : > { %v1005_v29 = vpop.f32.mrf.mxu0  ;;  %16096 = vmatmul.mubr.bf16.gmra.mxu0 %v18801_v43  ;;  %v1590_v7 = vpop.f32.mrf.mxu1  ;;  %16220 = vmatmul.mubr.bf16.gmra.mxu1 %v17553_v25  ;;  %v19098_v43 = vld [vmem:[#allocation3 + $0x38] sm:$0xff]  }
 0x1e7   : > { %16099 = vmatprep.mubr.msk.bf16.mxu0 %vm18175_vm0, %v22116_v6  ;;  %v19094_v19 = vadd.f32 %v1590_v7, %v1005_v29  ;;  %16223 = vmatprep.mubr.msk.bf16.mxu1 %vm18175_vm0, %v22116_v6  ;;  %v19100_v25 = vld [vmem:[#allocation3 + $0x34] sm:$0xff]   ;;  %v5677_v7 = vrot.slane %v5675_v46, 4  ;;  %v5488_v46 = vld [vmem:[%s18375_s17 + $0x54] sm:$0xf] }
 0x1e8   : > { %v15861_v20 = vpop.f32.mrf.mxu0  ;;  %v15985_v39 = vpop.f32.mrf.mxu1  ;;  %5903 = vst [vmem:[#allocation3 + $0x34] sm:$0xf] %v5676_v56 }
 0x1e9   : > { %22123 = vst [vmem:[#allocation42_spill] sm:$0xff] %v19094_v19  ;;  %v5679_v34 = vsel %vm18555_vm6, %v5677_v7, %v5678_v41  ;;  %v14364_v41 = vrot.slane %v5487_v1, 9  ;;  %v5682_v7 = vrot.slane %v5488_v46, 5 }
 0x1ea   : > { %v1008_v54 = vpop.f32.mrf.mxu0  ;;  %v1593_v0 = vpop.f32.mrf.mxu1  ;;  %5904 = vst [vmem:[#allocation3 + $0x38] sm:$0xf] %v5679_v34 }
 0x1eb   : > { %v19104_v29 = vadd.f32 %v1593_v0, %v1008_v54  ;;  %v5685_v0 = vrot.slane %v5489_v8, 5 }
 0x1ec   : > { %v15862_v16 = vpop.f32.mrf.mxu0  ;;  %v15986_v20 = vpop.f32.mrf.mxu1 }
 0x1ed   : > { %22124 = vst [vmem:[#allocation43_spill] sm:$0xff] %v19104_v29  ;;  %v5684_v20 = vrot.slane %v5682_v7, 4 }
 0x1ee   : > { %v1013_v39 = vpop.f32.mrf.mxu0  ;;  %16100 = vmatmul.mubr.bf16.gmra.mxu0 %v18813_v11  ;;  %v1598_v19 = vpop.f32.mrf.mxu1  ;;  %16224 = vmatmul.mubr.bf16.gmra.mxu1 %v17556_v60  ;;  %v19118_v11 = vld [vmem:[#allocation3 + $0x3c] sm:$0xff]   ;;  %v5683_v60 = vsel %vm18555_vm6, %v14364_v41, %v5682_v7  ;;  %v5490_v7 = vld [vmem:[%s18375_s17 + $0x5c] sm:$0x1] }
 0x1ef   : > { %16103 = vmatprep.mubr.msk.bf16.mxu0 %vm18175_vm0, %v22116_v6  ;;  %v19114_v56 = vadd.f32 %v1598_v19, %v1013_v39  ;;  %16227 = vmatprep.mubr.msk.bf16.mxu1 %vm18175_vm0, %v22116_v6  ;;  %v17558_v19 = vld [vmem:[#allocation3 + $0x90] sm:$0xff]   ;;  %v19122_v39 = vld [vmem:[#allocation3 + $0x40] sm:$0xff]   ;;  %5905 = vst [vmem:[#allocation3 + $0x3c] sm:$0xf] %v5683_v60  ;;  %v5686_v8 = vsel %vm18555_vm6, %v5684_v20, %v5685_v0  ;;  %v5688_v20 = vrot.slane %v5490_v7, 5 }
 0x1f0   : > { %v15865_v54 = vpop.f32.mrf.mxu0  ;;  %v15989_v16 = vpop.f32.mrf.mxu1  ;;  %5906 = vst [vmem:[#allocation3 + $0x40] sm:$0xf] %v5686_v8 }
 0x1f1   : > { %22125 = vst [vmem:[#allocation44_spill] sm:$0xff] %v19114_v56  ;;  %v5491_v56 = vld [vmem:[%s18375_s17 + $0x60] sm:$0xe] }
 0x1f2   : > { %v1016_v34 = vpop.f32.mrf.mxu0  ;;  %v1601_v29 = vpop.f32.mrf.mxu1 }
 0x1f3   : > { %v19124_v54 = vadd.f32 %v1601_v29, %v1016_v34  ;;  %v5687_v34 = vrot.slane %v5685_v0, 4 }
 0x1f4   : > { %v15866_v1 = vpop.f32.mrf.mxu0  ;;  %v15990_v46 = vpop.f32.mrf.mxu1 }
 0x1f5   : > { %22126 = vst [vmem:[#allocation45_spill] sm:$0xff] %v19124_v54  ;;  %v14365_v1 = vrot.slane %v5491_v56, 9  ;;  %v19138_v46 = vld [vmem:[#allocation3 + $0x44] sm:$0xff]   ;;  %v5689_v54 = vsel %vm18555_vm6, %v5687_v34, %v5688_v20  ;;  %v5493_v34 = vld [vmem:[%s18375_s17 + $0x68] sm:$0xf] }
 0x1f6   : > { %v1021_v16 = vpop.f32.mrf.mxu0  ;;  %16104 = vmatmul.mubr.bf16.gmra.mxu0 %v18842_v5  ;;  %v1606_v41 = vpop.f32.mrf.mxu1  ;;  %16228 = vmatmul.mubr.bf16.gmra.mxu1 %v17558_v19  ;;  %v5692_v5 = vrot.slane %v5492_v63, 5  ;;  %5907 = vst [vmem:[#allocation3 + $0x44] sm:$0xf] %v5689_v54  ;;  %v5494_v20 = vld [vmem:[%s18375_s17 + $0x6c] sm:$0x1] }
 0x1f7   : > { %16107 = vmatprep.mubr.msk.bf16.mxu0 %vm18175_vm0, %v22116_v6  ;;  %v19134_v60 = vadd.f32 %v1606_v41, %v1021_v16  ;;  %16231 = vmatprep.mubr.msk.bf16.mxu1 %vm18175_vm0, %v22116_v6  ;;  %v17560_v16 = vld [vmem:[#allocation3 + $0x98] sm:$0xff]   ;;  %v19142_v41 = vld [vmem:[#allocation3 + $0x48] sm:$0xff]   ;;  %v5698_v54 = vrot.slane %v5494_v20, 5 }
 0x1f8   : > { %v15869_v29 = vpop.f32.mrf.mxu0  ;;  %v15993_v8 = vpop.f32.mrf.mxu1 }
 0x1f9   : > { %22127 = vst [vmem:[#allocation46_spill] sm:$0xff] %v19134_v60  ;;  %v5693_v29 = vsel %vm18555_vm6, %v14365_v1, %v5692_v5  ;;  %v5694_v60 = vrot.slane %v5692_v5, 4 }
 0x1fa   : > { %v1024_v19 = vpop.f32.mrf.mxu0  ;;  %v1609_v22 = vpop.f32.mrf.mxu1  ;;  %5908 = vst [vmem:[#allocation3 + $0x48] sm:$0xf] %v5693_v29  ;;  %v17562_v29 = vld [vmem:[#allocation3 + $0xa0] sm:$0xff]  }
 0x1fb   : > { %v19146_v0 = vadd.f32 %v1609_v22, %v1024_v19  ;;  %v5695_v22 = vrot.slane %v5493_v34, 5 }
 0x1fc   : > { %v15870_v56 = vpop.f32.mrf.mxu0  ;;  %v15994_v7 = vpop.f32.mrf.mxu1 }
 0x1fd   : > { %22128 = vst [vmem:[#allocation47_spill] sm:$0xff] %v19146_v0  ;;  %v5697_v7 = vrot.slane %v5695_v22, 4 }
 0x1fe   : > { %v1029_v63 = vpop.f32.mrf.mxu0  ;;  %16108 = vmatmul.mubr.bf16.gmra.mxu0 %v18858_v15  ;;  %v1614_v8 = vpop.f32.mrf.mxu1  ;;  %16232 = vmatmul.mubr.bf16.gmra.mxu1 %v17560_v16  ;;  %v19157_v15 = vld [vmem:[#allocation3 + $0x4c] sm:$0xff]   ;;  %v5696_v16 = vsel %vm18555_vm6, %v5694_v60, %v5695_v22  ;;  %v5495_v60 = vld [vmem:[%s18375_s17 + $0x70] sm:$0xe]  ;;  %v5496_v22 = vld [vmem:[%s18375_s17 + $0x74] sm:$0xf] }
 0x1ff   : > { %16111 = vmatprep.mubr.msk.bf16.mxu0 %vm18175_vm0, %v22116_v6  ;;  %v19153_v27 = vadd.f32 %v1614_v8, %v1029_v63  ;;  %16235 = vmatprep.mubr.msk.bf16.mxu1 %vm18175_vm0, %v22116_v6  ;;  %5909 = vst [vmem:[#allocation3 + $0x4c] sm:$0xf] %v5696_v16  ;;  %v5699_v34 = vsel %vm18555_vm6, %v5697_v7, %v5698_v54  ;;  %v14366_v54 = vrot.slane %v5495_v60, 9  ;;  %v5702_v7 = vrot.slane %v5496_v22, 5 }
 0x200   : > { %v15873_v1 = vpop.f32.mrf.mxu0  ;;  %v15997_v19 = vpop.f32.mrf.mxu1 }
 0x201   : > { %22129 = vst [vmem:[#allocation48_spill] sm:$0xff] %v19153_v27  ;;  %v19163_v1 = vld [vmem:[#allocation3 + $0x50] sm:$0xff]  }
 0x202   : > { %v1032_v56 = vpop.f32.mrf.mxu0  ;;  %v1617_v5 = vpop.f32.mrf.mxu1  ;;  %5910 = vst [vmem:[#allocation3 + $0x50] sm:$0xf] %v5699_v34 }
 0x203   : > { %v19161_v63 = vadd.f32 %v1617_v5, %v1032_v56  ;;  %v5497_v56 = vld [vmem:[%s18375_s17 + $0x78] sm:$0xf] }
 0x204   : > { %v15874_v8 = vpop.f32.mrf.mxu0  ;;  %v15998_v20 = vpop.f32.mrf.mxu1 }
 0x205   : > { %22130 = vst [vmem:[#allocation49_spill] sm:$0xff] %v19161_v63  ;;  %v5705_v8 = vrot.slane %v5497_v56, 5  ;;  %v5704_v63 = vrot.slane %v5702_v7, 4 }
 0x206   : > { %v1037_v19 = vpop.f32.mrf.mxu0  ;;  %16112 = vmatmul.mubr.bf16.gmra.mxu0 %v18869_v51  ;;  %v1622_v27 = vpop.f32.mrf.mxu1  ;;  %16236 = vmatmul.mubr.bf16.gmra.mxu1 %v17562_v29  ;;  %v19177_v51 = vld [vmem:[#allocation3 + $0x54] sm:$0xff]   ;;  %v5703_v29 = vsel %vm18555_vm6, %v14366_v54, %v5702_v7  ;;  %v5498_v7 = vld [vmem:[%s18375_s17 + $0x7c] sm:$0x1] }
 0x207   : > { %16115 = vmatprep.mubr.msk.bf16.mxu0 %vm18175_vm0, %v22116_v6  ;;  %v19173_v16 = vadd.f32 %v1622_v27, %v1037_v19  ;;  %16239 = vmatprep.mubr.msk.bf16.mxu1 %vm18175_vm0, %v22116_v6  ;;  %22132 = vst [vmem:[#allocation51_spill] sm:$0xff] %v19177_v51  ;;  %v17565_v27 = vld [vmem:[#allocation3 + $0xa8] sm:$0xff]   ;;  %v19181_v19 = vld [vmem:[#allocation3 + $0x58] sm:$0xff]   ;;  %5911 = vst [vmem:[#allocation3 + $0x54] sm:$0xf] %v5703_v29  ;;  %v5706_v22 = vsel %vm18555_vm6, %v5704_v63, %v5705_v8  ;;  %v5707_v63 = vrot.slane %v5705_v8, 4 }
 0x208   : > { %v15877_v5 = vpop.f32.mrf.mxu0  ;;  %v16001_v34 = vpop.f32.mrf.mxu1  ;;  %22133 = vst [vmem:[#allocation52_spill] sm:$0xff] %v19181_v19  ;;  %5912 = vst [vmem:[#allocation3 + $0x58] sm:$0xf] %v5706_v22  ;;  %v5500_v51 = vld [vmem:[%s18375_s17 + $0x84] sm:$0xf] }
 0x209   : > { %22131 = vst [vmem:[#allocation50_spill] sm:$0xff] %v19173_v16  ;;  %v5499_v16 = vld [vmem:[%s18375_s17 + $0x80] sm:$0xe] }
 0x20a   : > { %v1040_v20 = vpop.f32.mrf.mxu0  ;;  %v1625_v0 = vpop.f32.mrf.mxu1 }
 0x20b   : > { %v19183_v5 = vadd.f32 %v1625_v0, %v1040_v20  ;;  %v5708_v20 = vrot.slane %v5498_v7, 5 }
 0x20c   : > { %v15878_v60 = vpop.f32.mrf.mxu0  ;;  %v16002_v56 = vpop.f32.mrf.mxu1 }
 0x20d   : > { %22134 = vst [vmem:[#allocation53_spill] sm:$0xff] %v19183_v5  ;;  %v14367_v60 = vrot.slane %v5499_v16, 9  ;;  %v19197_v56 = vld [vmem:[#allocation3 + $0x5c] sm:$0xff]   ;;  %v5709_v5 = vsel %vm18555_vm6, %v5707_v63, %v5708_v20  ;;  %v5501_v63 = vld [vmem:[%s18375_s17 + $0x88] sm:$0xf] }
 0x20e   : > { %v1045_v34 = vpop.f32.mrf.mxu0  ;;  %16116 = vmatmul.mubr.bf16.gmra.mxu0 %v18896_v14  ;;  %v1630_v54 = vpop.f32.mrf.mxu1  ;;  %16240 = vmatmul.mubr.bf16.gmra.mxu1 %v17565_v27  ;;  %22136 = vst [vmem:[#allocation55_spill] sm:$0xff] %v19197_v56  ;;  %v5712_v14 = vrot.slane %v5500_v51, 5  ;;  %5913 = vst [vmem:[#allocation3 + $0x5c] sm:$0xf] %v5709_v5  ;;  %v5502_v20 = vld [vmem:[%s18375_s17 + $0x8c] sm:$0x1] }
 0x20f   : > { %16119 = vmatprep.mubr.msk.bf16.mxu0 %vm18175_vm0, %v22116_v6  ;;  %v19193_v29 = vadd.f32 %v1630_v54, %v1045_v34  ;;  %16243 = vmatprep.mubr.msk.bf16.mxu1 %vm18175_vm0, %v22116_v6  ;;  %v17567_v34 = vld [vmem:[#allocation3 + $0xb0] sm:$0xff]   ;;  %v19201_v54 = vld [vmem:[#allocation3 + $0x60] sm:$0xff]   ;;  %v5718_v5 = vrot.slane %v5502_v20, 5 }
 0x210   : > { %v15881_v0 = vpop.f32.mrf.mxu0  ;;  %v16005_v22 = vpop.f32.mrf.mxu1 }
 0x211   : > { %22135 = vst [vmem:[#allocation54_spill] sm:$0xff] %v19193_v29  ;;  %v5713_v0 = vsel %vm18555_vm6, %v14367_v60, %v5712_v14  ;;  %v5714_v29 = vrot.slane %v5712_v14, 4 }
 0x212   : > { %v1048_v27 = vpop.f32.mrf.mxu0  ;;  %v1633_v19 = vpop.f32.mrf.mxu1  ;;  %5914 = vst [vmem:[#allocation3 + $0x60] sm:$0xf] %v5713_v0  ;;  %v17569_v0 = vld [vmem:[#allocation3 + $0xb8] sm:$0xff]  }
 0x213   : > { %v19205_v8 = vadd.f32 %v1633_v19, %v1048_v27  ;;  %v5715_v19 = vrot.slane %v5501_v63, 5 }
 0x214   : > { %v15882_v16 = vpop.f32.mrf.mxu0  ;;  %v16006_v7 = vpop.f32.mrf.mxu1 }
 0x215   : > { %22137 = vst [vmem:[#allocation56_spill] sm:$0xff] %v19205_v8  ;;  %v5717_v7 = vrot.slane %v5715_v19, 4 }
 0x216   : > { %v1053_v51 = vpop.f32.mrf.mxu0  ;;  %16120 = vmatmul.mubr.bf16.gmra.mxu0 %v18908_v44  ;;  %v1638_v22 = vpop.f32.mrf.mxu1  ;;  %16244 = vmatmul.mubr.bf16.gmra.mxu1 %v17567_v34  ;;  %v19216_v44 = vld [vmem:[#allocation3 + $0x64] sm:$0xff]   ;;  %v5716_v34 = vsel %vm18555_vm6, %v5714_v29, %v5715_v19  ;;  %v5503_v29 = vld [vmem:[%s18375_s17 + $0x90] sm:$0xe] }
 0x217   : > { %16123 = vmatprep.mubr.msk.bf16.mxu0 %vm18175_vm0, %v22116_v6  ;;  %v19212_v56 = vadd.f32 %v1638_v22, %v1053_v51  ;;  %16247 = vmatprep.mubr.msk.bf16.mxu1 %vm18175_vm0, %v22116_v6  ;;  %5915 = vst [vmem:[#allocation3 + $0x64] sm:$0xf] %v5716_v34  ;;  %v5719_v63 = vsel %vm18555_vm6, %v5717_v7, %v5718_v5  ;;  %v5504_v19 = vld [vmem:[%s18375_s17 + $0x94] sm:$0xf]  ;;  %v14368_v5 = vrot.slane %v5503_v29, 9 }
 0x218   : > { %v15885_v60 = vpop.f32.mrf.mxu0  ;;  %v16009_v27 = vpop.f32.mrf.mxu1  ;;  %v5722_v7 = vrot.slane %v5504_v19, 5 }
 0x219   : > { %22138 = vst [vmem:[#allocation57_spill] sm:$0xff] %v19212_v56  ;;  %v19222_v60 = vld [vmem:[#allocation3 + $0x68] sm:$0xff]  }
 0x21a   : > { %v1056_v16 = vpop.f32.mrf.mxu0  ;;  %v1641_v14 = vpop.f32.mrf.mxu1  ;;  %5916 = vst [vmem:[#allocation3 + $0x68] sm:$0xf] %v5719_v63 }
 0x21b   : > { %v19220_v51 = vadd.f32 %v1641_v14, %v1056_v16  ;;  %v5505_v16 = vld [vmem:[%s18375_s17 + $0x98] sm:$0xf] }
 0x21c   : > { %v15886_v22 = vpop.f32.mrf.mxu0  ;;  %v16010_v20 = vpop.f32.mrf.mxu1 }
 0x21d   : > { %22139 = vst [vmem:[#allocation58_spill] sm:$0xff] %v19220_v51  ;;  %v5725_v22 = vrot.slane %v5505_v16, 5  ;;  %v5724_v51 = vrot.slane %v5722_v7, 4 }
 0x21e   : > { %v1061_v27 = vpop.f32.mrf.mxu0  ;;  %16124 = vmatmul.mubr.bf16.gmra.mxu0 %v18923_v17  ;;  %v1646_v56 = vpop.f32.mrf.mxu1  ;;  %16248 = vmatmul.mubr.bf16.gmra.mxu1 %v17569_v0  ;;  %v19236_v17 = vld [vmem:[#allocation3 + $0x6c] sm:$0xff]   ;;  %v5723_v0 = vsel %vm18555_vm6, %v14368_v5, %v5722_v7 }
 0x21f   : > { %16127 = vmatprep.mubr.msk.bf16.mxu0 %vm18175_vm0, %v22116_v6  ;;  %v19232_v34 = vadd.f32 %v1646_v56, %v1061_v27  ;;  %16251 = vmatprep.mubr.msk.bf16.mxu1 %vm18175_vm0, %v22116_v6  ;;  %22141 = vst [vmem:[#allocation60_spill] sm:$0xff] %v19236_v17  ;;  %v17574_v56 = vld [vmem:[#allocation3 + $0xc0] sm:$0xff]   ;;  %v19240_v27 = vld [vmem:[#allocation3 + $0x70] sm:$0xff]   ;;  %5917 = vst [vmem:[#allocation3 + $0x6c] sm:$0xf] %v5723_v0  ;;  %v5726_v19 = vsel %vm18555_vm6, %v5724_v51, %v5725_v22  ;;  %v5727_v51 = vrot.slane %v5725_v22, 4 }
 0x220   : > { %v15889_v14 = vpop.f32.mrf.mxu0  ;;  %v16013_v63 = vpop.f32.mrf.mxu1  ;;  %5918 = vst [vmem:[#allocation3 + $0x70] sm:$0xf] %v5726_v19  ;;  %v5507_v0 = vld [vmem:[%s18375_s17 + $0xa0] sm:$0xe] }
 0x221   : > { %22140 = vst [vmem:[#allocation59_spill] sm:$0xff] %v19232_v34  ;;  %v5506_v34 = vld [vmem:[%s18375_s17 + $0x9c] sm:$0x1]  ;;  %v14369_v19 = vrot.slane %v5507_v0, 9 }
 0x222   : > { %v1064_v20 = vpop.f32.mrf.mxu0  ;;  %v1649_v8 = vpop.f32.mrf.mxu1  ;;  %v17578_v0 = vld [vmem:[#allocation3 + $0xc8] sm:$0xff]  }
 0x223   : > { %v19242_v14 = vadd.f32 %v1649_v8, %v1064_v20  ;;  %v5508_v8 = vld [vmem:[%s18375_s17 + $0xa4] sm:$0xf] }
 0x224   : > { %v15890_v29 = vpop.f32.mrf.mxu0  ;;  %v16014_v16 = vpop.f32.mrf.mxu1 }
 0x225   : > { %22142 = vst [vmem:[#allocation61_spill] sm:$0xff] %v19242_v14  ;;  %v5728_v29 = vrot.slane %v5506_v34, 5  ;;  %v5732_v16 = vrot.slane %v5508_v8, 5 }
 0x226   : > { %v2131_v63 = vpop.f32.mrf.mxu0  ;;  %16128 = vmatmul.mubr.bf16.gmra.mxu0 %v18955_v26  ;;  %v3706_v7 = vpop.f32.mrf.mxu1  ;;  %16252 = vmatmul.mubr.bf16.gmra.mxu1 %v17574_v56  ;;  %v19259_v56 = vld [vmem:[#allocation3 + $0x74] sm:$0xff]  }
 0x227   : > { %v2400_v5 = vadd.f32 %v2131_v63, %v18724_v42  ;;  %16131 = vmatprep.mubr.msk.bf16.mxu0 %vm18175_vm0, %v22116_v6  ;;  %16255 = vmatprep.mubr.msk.bf16.mxu1 %vm18175_vm0, %v22116_v6  ;;  %v19257_v42 = vld [vmem:[#allocation3 + $0x78] sm:$0xff]   ;;  %v5729_v17 = vsel %vm18555_vm6, %v5727_v51, %v5728_v29 }
 0x228   : > { %v16033_v20 = vpop.f32.mrf.mxu0  ;;  %v16157_v26 = vpop.f32.mrf.mxu1  ;;  %5919 = vst [vmem:[#allocation3 + $0x74] sm:$0xf] %v5729_v17 }
 0x229   : > { %v19255_v14 = vadd.f32 %v3706_v7, %v2400_v5  ;;  %v5733_v20 = vsel %vm18555_vm6, %v14369_v19, %v5732_v16  ;;  %v5509_v19 = vld [vmem:[%s18375_s17 + $0xa8] sm:$0xf] }
 0x22a   : > { %v2134_v63 = vpop.f32.mrf.mxu0  ;;  %v3709_v22 = vpop.f32.mrf.mxu1  ;;  %5920 = vst [vmem:[#allocation3 + $0x78] sm:$0xf] %v5733_v20  ;;  %v5735_v17 = vrot.slane %v5509_v19, 5  ;;  %v19283_v19 = vld [vmem:[#allocation3 + $0x80] sm:$0xff]  }
 0x22b   : > { %22143 = vst [vmem:[#allocation62_spill] sm:$0xff] %v19255_v14  ;;  %v2401_v34 = vadd.f32 %v2134_v63, %v18737_v9  ;;  %v5510_v9 = vld [vmem:[%s18375_s17 + $0xac] sm:$0x1]  ;;  %v5734_v63 = vrot.slane %v5732_v16, 4 }
 0x22c   : > { %v16034_v5 = vpop.f32.mrf.mxu0  ;;  %v16158_v8 = vpop.f32.mrf.mxu1  ;;  %v5738_v20 = vrot.slane %v5510_v9, 5 }
 0x22d   : > { %v19266_v7 = vadd.f32 %v3709_v22, %v2401_v34  ;;  %v5737_v8 = vrot.slane %v5735_v17, 4 }
 0x22e   : > { %v2139_v26 = vpop.f32.mrf.mxu0  ;;  %16132 = vmatmul.mubr.bf16.gmra.mxu0 %v18966_v61  ;;  %v3714_v29 = vpop.f32.mrf.mxu1  ;;  %16256 = vmatmul.mubr.bf16.gmra.mxu1 %v17578_v0  ;;  %v17582_v61 = vld [vmem:[#allocation3 + $0xd0] sm:$0xff]   ;;  %v5736_v0 = vsel %vm18555_vm6, %v5734_v63, %v5735_v17  ;;  %v5511_v17 = vld [vmem:[%s18375_s17 + $0xb0] sm:$0xe] }
 0x22f   : > { %v2402_v51 = vadd.f32 %v2139_v26, %v18741_v23  ;;  %16135 = vmatprep.mubr.msk.bf16.mxu0 %vm18175_vm0, %v22116_v6  ;;  %16259 = vmatprep.mubr.msk.bf16.mxu1 %vm18175_vm0, %v22116_v6  ;;  %v19278_v23 = vld [vmem:[#allocation3 + $0x7c] sm:$0xff]  }
 0x230   : > { %v16037_v14 = vpop.f32.mrf.mxu0  ;;  %v16161_v22 = vpop.f32.mrf.mxu1  ;;  %5921 = vst [vmem:[#allocation3 + $0x7c] sm:$0xf] %v5736_v0  ;;  %v5513_v0 = vld [vmem:[%s18375_s17 + $0xb8] sm:$0xf] }
 0x231   : > { %v19276_v34 = vadd.f32 %v3714_v29, %v2402_v51  ;;  %v5739_v51 = vsel %vm18555_vm6, %v5737_v8, %v5738_v20  ;;  %v14370_v20 = vrot.slane %v5511_v17, 9 }
 0x232   : > { %v2142_v5 = vpop.f32.mrf.mxu0  ;;  %v3717_v14 = vpop.f32.mrf.mxu1  ;;  %5922 = vst [vmem:[#allocation3 + $0x80] sm:$0xf] %v5739_v51 }
 0x233   : > { %22144 = vst [vmem:[#allocation63_spill] sm:$0xff] %v19276_v34  ;;  %v2403_v16 = vadd.f32 %v2142_v5, %v18753_v55  ;;  %v5512_v5 = vld [vmem:[%s18375_s17 + $0xb4] sm:$0xf]  ;;  %v19305_v34 = vld [vmem:[#allocation3 + $0x88] sm:$0xff]  }
 0x234   : > { %v16038_v26 = vpop.f32.mrf.mxu0  ;;  %v16162_v9 = vpop.f32.mrf.mxu1  ;;  %v5742_v8 = vrot.slane %v5512_v5, 5 }
 0x235   : > { %v19287_v29 = vadd.f32 %v3717_v14, %v2403_v16  ;;  %v5745_v16 = vrot.slane %v5513_v0, 5 }
 0x236   : > { %v2147_v22 = vpop.f32.mrf.mxu0  ;;  %16136 = vmatmul.mubr.bf16.gmra.mxu0 %v18985_v35  ;;  %v3722_v55 = vpop.f32.mrf.mxu1  ;;  %16260 = vmatmul.mubr.bf16.gmra.mxu1 %v17582_v61  ;;  %v5743_v61 = vsel %vm18555_vm6, %v14370_v20, %v5742_v8  ;;  %v5744_v9 = vrot.slane %v5742_v8, 4 }
 0x237   : > { %22145 = vst [vmem:[#allocation64_spill] sm:$0xff] %v19287_v29  ;;  %v2404_v63 = vadd.f32 %v2147_v22, %v18761_v4  ;;  %16279 = vmatprep.mubr.msk.bf16.mxu0 %vm18175_vm0, %v22116_v6  ;;  %16403 = vmatprep.mubr.msk.bf16.mxu1 %vm18175_vm0, %v22116_v6  ;;  %v19300_v4 = vld [vmem:[#allocation3 + $0x84] sm:$0xff]  }
 0x238   : > { %v16041_v26 = vpop.f32.mrf.mxu0  ;;  %v16165_v35 = vpop.f32.mrf.mxu1  ;;  %5923 = vst [vmem:[#allocation3 + $0x84] sm:$0xf] %v5743_v61  ;;  %v5516_v61 = vld [vmem:[%s18375_s17 + $0xc4] sm:$0xf] }
 0x239   : > { %v19298_v14 = vadd.f32 %v3722_v55, %v2404_v63  ;;  %v17586_v26 = vld [vmem:[#allocation10 + $0xb8] sm:$0xff]   ;;  %v5746_v55 = vsel %vm18555_vm6, %v5744_v9, %v5745_v16 }
 0x23a   : > { %v2150_v51 = vpop.f32.mrf.mxu0  ;;  %v3725_v29 = vpop.f32.mrf.mxu1  ;;  %5924 = vst [vmem:[#allocation3 + $0x88] sm:$0xf] %v5746_v55  ;;  %v5514_v35 = vld [vmem:[%s18375_s17 + $0xbc] sm:$0x1] }
 0x23b   : > { %v2405_v22 = vadd.f32 %v2150_v51, %v18770_v32  ;;  %v17594_v32 = vld [vmem:[#allocation10 + $0xb0] sm:$0xff]   ;;  %v5515_v51 = vld [vmem:[%s18375_s17 + $0xc0] sm:$0xe]  ;;  %v5748_v9 = vrot.slane %v5514_v35, 5 }
 0x23c   : > { %v16042_v63 = vpop.f32.mrf.mxu0  ;;  %v16166_v5 = vpop.f32.mrf.mxu1 }
 0x23d   : > { %v19309_v17 = vadd.f32 %v3725_v29, %v2405_v22  ;;  %v5747_v29 = vrot.slane %v5745_v16, 4  ;;  %v5752_v22 = vrot.slane %v5516_v61, 5 }
 0x23e   : > { %v2155_v0 = vpop.f32.mrf.mxu0  ;;  %16280 = vmatmul.mubr.bf16.vlgmr.msra.gmra.mxu0 %v19002_v37  ;;  %v3730_v8 = vpop.f32.mrf.mxu1  ;;  %16404 = vmatmul.mubr.bf16.vlgmr.msra.gmra.mxu1 %v19020_v52  ;;  %v14371_v37 = vrot.slane %v5515_v51, 9  ;;  %v19324_v52 = vld [vmem:[#allocation3 + $0x90] sm:$0xff]  }
 0x23f   : > { %v2406_v20 = vadd.f32 %v2155_v0, %v18774_v49  ;;  %16512 = vmatpush3.bf16.msra.mxu0 %v17586_v26  ;;  %16283 = vmatprep.mubr.msk.bf16.mxu0 %vm18175_vm0, %v22116_v6  ;;  %v19326_v26 = vld [vmem:[#allocation3 + $0x8c] sm:$0xff]   ;;  %v5749_v0 = vsel %vm18555_vm6, %v5747_v29, %v5748_v9 }
 0x240   : > { %v16045_v63 = vpop.f32.mrf.mxu0  ;;  %16407 = vmatprep.mubr.msk.bf16.mxu1 %vm18175_vm0, %v22116_v6  ;;  %v16169_v49 = vpop.f32.mrf.mxu1  ;;  %16513 = vmatprep.subr.bf16.mxu0 %v22116_v6  ;;  %5925 = vst [vmem:[#allocation3 + $0x8c] sm:$0xf] %v5749_v0  ;;  %v17610_v0 = vld [vmem:[#allocation10 + $0xa0] sm:$0xff]  }
 0x241   : > { %v19321_v55 = vadd.f32 %v3730_v8, %v2406_v20  ;;  %v5753_v63 = vsel %vm18555_vm6, %v14371_v37, %v5752_v22  ;;  %v17601_v20 = vld [vmem:[#allocation10 + $0xa8] sm:$0xff]   ;;  %v5754_v37 = vrot.slane %v5752_v22, 4 }
 0x242   : > { %v2158_v5 = vpop.f32.mrf.mxu0  ;;  %v3733_v35 = vpop.f32.mrf.mxu1  ;;  %5926 = vst [vmem:[#allocation3 + $0x90] sm:$0xf] %v5753_v63 }
 0x243   : > { %v2407_v16 = vadd.f32 %v2158_v5, %v18790_v18  ;;  %16514 = vmatpush3.bf16.msra.mxu0 %v17594_v32  ;;  %v5517_v18 = vld [vmem:[%s18375_s17 + $0xc8] sm:$0xf]  ;;  %v5518_v32 = vld [vmem:[%s18375_s17 + $0xcc] sm:$0x1] }
 0x244   : > { %v16046_v8 = vpop.f32.mrf.mxu0  ;;  %16515 = vmatprep.subr.bf16.mxu0 %v22116_v6  ;;  %v16170_v61 = vpop.f32.mrf.mxu1  ;;  %v5755_v63 = vrot.slane %v5517_v18, 5 }
 0x245   : > { %v19334_v51 = vadd.f32 %v3733_v35, %v2407_v16  ;;  %v5758_v16 = vrot.slane %v5518_v32, 5  ;;  %v19348_v35 = vld [vmem:[#allocation3 + $0x94] sm:$0xff]  }
 0x246   : > { %v2163_v49 = vpop.f32.mrf.mxu0  ;;  %16284 = vmatmul.mubr.bf16.gmra.mxu0 %v19022_v21  ;;  %v3738_v9 = vpop.f32.mrf.mxu1  ;;  %16408 = vmatmul.mubr.bf16.gmra.mxu1 %v19039_v28  ;;  %v5756_v8 = vsel %vm18555_vm6, %v5754_v37, %v5755_v63  ;;  %v5757_v22 = vrot.slane %v5755_v63, 4 }
 0x247   : > { %v2408_v29 = vadd.f32 %v2163_v49, %v18797_v40  ;;  %16287 = vmatprep.mubr.msk.bf16.mxu0 %vm18175_vm0, %v22116_v6  ;;  %16411 = vmatprep.mubr.msk.bf16.mxu1 %vm18175_vm0, %v22116_v6  ;;  %5927 = vst [vmem:[#allocation3 + $0x94] sm:$0xf] %v5756_v8  ;;  %v17625_v8 = vld [vmem:[#allocation10 + $0x90] sm:$0xff]  }
 0x248   : > { %v16049_v5 = vpop.f32.mrf.mxu0  ;;  %16516 = vmatpush3.bf16.msra.mxu0 %v17601_v20  ;;  %v16173_v40 = vpop.f32.mrf.mxu1  ;;  %v5759_v18 = vsel %vm18555_vm6, %v5757_v22, %v5758_v16  ;;  %v5521_v16 = vld [vmem:[%s18375_s17 + $0xd8] sm:$0xf] }
 0x249   : > { %v19345_v21 = vadd.f32 %v3738_v9, %v2408_v29  ;;  %16517 = vmatprep.subr.bf16.mxu0 %v22116_v6  ;;  %v17617_v29 = vld [vmem:[#allocation10 + $0x98] sm:$0xff]   ;;  %v19353_v9 = vld [vmem:[#allocation3 + $0x98] sm:$0xff]   ;;  %v5520_v40 = vld [vmem:[%s18375_s17 + $0xd4] sm:$0xf] }
 0x24a   : > { %v2166_v28 = vpop.f32.mrf.mxu0  ;;  %v3741_v49 = vpop.f32.mrf.mxu1  ;;  %5928 = vst [vmem:[#allocation3 + $0x98] sm:$0xf] %v5759_v18 }
 0x24b   : > { %v2409_v61 = vadd.f32 %v2166_v28, %v18810_v3 }
 0x24c   : > { %v16050_v20 = vpop.f32.mrf.mxu0  ;;  %16518 = vmatpush3.bf16.msra.mxu0 %v17610_v0  ;;  %v16174_v5 = vpop.f32.mrf.mxu1  ;;  %v5519_v0 = vld [vmem:[%s18375_s17 + $0xd0] sm:$0xe] }
 0x24d   : > { %v19357_v32 = vadd.f32 %v3741_v49, %v2409_v61  ;;  %16519 = vmatprep.subr.bf16.mxu0 %v22116_v6  ;;  %v14372_v22 = vrot.slane %v5519_v0, 9  ;;  %v5762_v61 = vrot.slane %v5520_v40, 5  ;;  %v19373_v20 = vld [vmem:[#allocation3 + $0x9c] sm:$0xff]  }
 0x24e   : > { %v2171_v3 = vpop.f32.mrf.mxu0  ;;  %16288 = vmatmul.mubr.bf16.gmra.mxu0 %v19041_v57  ;;  %v3746_v63 = vpop.f32.mrf.mxu1  ;;  %16412 = vmatmul.mubr.bf16.gmra.mxu1 %v19063_v59  ;;  %v5765_v57 = vrot.slane %v5521_v16, 5 }
 0x24f   : > { %v2410_v37 = vadd.f32 %v2171_v3, %v18820_v24  ;;  %16291 = vmatprep.mubr.msk.bf16.mxu0 %vm18175_vm0, %v22116_v6  ;;  %16415 = vmatprep.mubr.msk.bf16.mxu1 %vm18175_vm0, %v22116_v6  ;;  %v5763_v18 = vsel %vm18555_vm6, %v14372_v22, %v5762_v61  ;;  %v5764_v5 = vrot.slane %v5762_v61, 4  ;;  %v5523_v61 = vld [vmem:[%s18375_s17 + $0xe0] sm:$0xe] }
 0x250   : > { %v16053_v28 = vpop.f32.mrf.mxu0  ;;  %16520 = vmatpush3.bf16.msra.mxu0 %v17617_v29  ;;  %v16177_v24 = vpop.f32.mrf.mxu1  ;;  %v19378_v29 = vld [vmem:[#allocation3 + $0xa0] sm:$0xff]   ;;  %5929 = vst [vmem:[#allocation3 + $0x9c] sm:$0xf] %v5763_v18  ;;  %v5767_v18 = vrot.slane %v5765_v57, 4 }
 0x251   : > { %v19370_v49 = vadd.f32 %v3746_v63, %v2410_v37  ;;  %16521 = vmatprep.subr.bf16.mxu0 %v22116_v6  ;;  %v5766_v63 = vsel %vm18555_vm6, %v5764_v5, %v5765_v57  ;;  %v5524_v24 = vld [vmem:[%s18375_s17 + $0xe4] sm:$0xf] }
 0x252   : > { %v2174_v59 = vpop.f32.mrf.mxu0  ;;  %v3749_v28 = vpop.f32.mrf.mxu1  ;;  %5930 = vst [vmem:[#allocation3 + $0xa0] sm:$0xf] %v5766_v63 }
 0x253   : > { %v2411_v3 = vadd.f32 %v2174_v59, %v18830_v53 }
 0x254   : > { %v16054_v37 = vpop.f32.mrf.mxu0  ;;  %16522 = vmatpush3.bf16.msra.mxu0 %v17625_v8  ;;  %v16178_v40 = vpop.f32.mrf.mxu1  ;;  %v5522_v8 = vld [vmem:[%s18375_s17 + $0xdc] sm:$0x1] }
 0x255   : > { %v19382_v0 = vadd.f32 %v3749_v28, %v2411_v3  ;;  %16523 = vmatprep.subr.bf16.mxu0 %v22116_v6  ;;  %v5768_v5 = vrot.slane %v5522_v8, 5  ;;  %v14373_v3 = vrot.slane %v5523_v61, 9  ;;  %v5772_v28 = vrot.slane %v5524_v24, 5  ;;  %v19397_v37 = vld [vmem:[#allocation3 + $0xa8] sm:$0xff]  }
 0x256   : > { %v2179_v16 = vpop.f32.mrf.mxu0  ;;  %16292 = vmatmul.mubr.bf16.gmra.mxu0 %v19059_v33  ;;  %v3754_v22 = vpop.f32.mrf.mxu1  ;;  %16416 = vmatmul.mubr.bf16.gmra.mxu1 %v19079_v62  ;;  %v19399_v62 = vld [vmem:[#allocation3 + $0xa4] sm:$0xff]  }
 0x257   : > { %v2412_v53 = vadd.f32 %v2179_v16, %v18836_v12  ;;  %16295 = vmatprep.mubr.msk.bf16.mxu0 %vm18175_vm0, %v22116_v6  ;;  %16419 = vmatprep.mubr.msk.bf16.mxu1 %vm18175_vm0, %v22116_v6  ;;  %v5769_v40 = vsel %vm18555_vm6, %v5767_v18, %v5768_v5  ;;  %v5773_v16 = vsel %vm18555_vm6, %v14373_v3, %v5772_v28  ;;  %v5525_v18 = vld [vmem:[%s18375_s17 + $0xe8] sm:$0xf]  ;;  %v5774_v5 = vrot.slane %v5772_v28, 4 }
 0x258   : > { %v16057_v59 = vpop.f32.mrf.mxu0  ;;  %v16181_v12 = vpop.f32.mrf.mxu1  ;;  %5931 = vst [vmem:[#allocation3 + $0xa4] sm:$0xf] %v5769_v40  ;;  %5932 = vst [vmem:[#allocation3 + $0xa8] sm:$0xf] %v5773_v16 }
 0x259   : > { %v19395_v33 = vadd.f32 %v3754_v22, %v2412_v53 }
 0x25a   : > { %v2182_v63 = vpop.f32.mrf.mxu0  ;;  %v3757_v8 = vpop.f32.mrf.mxu1 }
 0x25b   : > { %v2413_v57 = vadd.f32 %v2182_v63, %v18849_v13  ;;  %v5526_v13 = vld [vmem:[%s18375_s17 + $0xec] sm:$0x1]  ;;  %v5775_v63 = vrot.slane %v5525_v18, 5 }
 0x25c   : > { %v16058_v53 = vpop.f32.mrf.mxu0  ;;  %v16182_v61 = vpop.f32.mrf.mxu1  ;;  %v5778_v40 = vrot.slane %v5526_v13, 5 }
 0x25d   : > { %v19406_v22 = vadd.f32 %v3757_v8, %v2413_v57  ;;  %v17633_v57 = vld [vmem:[#allocation10 + $0x88] sm:$0xff]   ;;  %v19419_v8 = vld [vmem:[#allocation3 + $0xac] sm:$0xff]   ;;  %v5777_v53 = vrot.slane %v5775_v63, 4 }
 0x25e   : > { %v2187_v24 = vpop.f32.mrf.mxu0  ;;  %16296 = vmatmul.mubr.bf16.gmra.mxu0 %v19081_v30  ;;  %v3762_v12 = vpop.f32.mrf.mxu1  ;;  %16420 = vmatmul.mubr.bf16.gmra.mxu1 %v19098_v43  ;;  %v5776_v43 = vsel %vm18555_vm6, %v5774_v5, %v5775_v63  ;;  %v5527_v63 = vld [vmem:[%s18375_s17 + $0xf0] sm:$0xe] }
 0x25f   : > { %v2414_v59 = vadd.f32 %v2187_v24, %v18854_v10  ;;  %16299 = vmatprep.mubr.msk.bf16.mxu0 %vm18175_vm0, %v22116_v6  ;;  %16423 = vmatprep.mubr.msk.bf16.mxu1 %vm18175_vm0, %v22116_v6  ;;  %5933 = vst [vmem:[#allocation3 + $0xac] sm:$0xf] %v5776_v43 }
 0x260   : > { %v16061_v3 = vpop.f32.mrf.mxu0  ;;  %v16185_v30 = vpop.f32.mrf.mxu1  ;;  %16524 = vmatpush3.bf16.msra.mxu0 %v17633_v57 }
 0x261   : > { %v19417_v16 = vadd.f32 %v3762_v12, %v2414_v59  ;;  %v19424_v59 = vld [vmem:[#allocation3 + $0xb0] sm:$0xff]   ;;  %v5779_v12 = vsel %vm18555_vm6, %v5777_v53, %v5778_v40  ;;  %16525 = vmatprep.subr.bf16.mxu0 %v22116_v6  ;;  %v5528_v30 = vld [vmem:[%s18375_s17 + $0xf4] sm:$0xf]  ;;  %v5529_v40 = vld [vmem:[%s18375_s17 + $0xf8] sm:$0xf] }
 0x262   : > { %v2190_v10 = vpop.f32.mrf.mxu0  ;;  %v3765_v28 = vpop.f32.mrf.mxu1  ;;  %5934 = vst [vmem:[#allocation3 + $0xb0] sm:$0xf] %v5779_v12  ;;  %v5782_v43 = vrot.slane %v5528_v30, 5  ;;  %v5785_v53 = vrot.slane %v5529_v40, 5 }
 0x263   : > { %v2415_v61 = vadd.f32 %v2190_v10, %v18866_v45  ;;  %v14374_v10 = vrot.slane %v5527_v63, 9 }
 0x264   : > { %v16062_v24 = vpop.f32.mrf.mxu0  ;;  %v16186_v13 = vpop.f32.mrf.mxu1 }
 0x265   : > { %v19429_v18 = vadd.f32 %v3765_v28, %v2415_v61  ;;  %v19443_v28 = vld [vmem:[#allocation3 + $0xb4] sm:$0xff]   ;;  %v5784_v24 = vrot.slane %v5782_v43, 4 }
 0x266   : > { %v2195_v5 = vpop.f32.mrf.mxu0  ;;  %16300 = vmatmul.mubr.bf16.gmra.mxu0 %v19100_v25  ;;  %v3770_v3 = vpop.f32.mrf.mxu1  ;;  %16424 = vmatmul.mubr.bf16.gmra.mxu1 %v19122_v39  ;;  %v5783_v39 = vsel %vm18555_vm6, %v14374_v10, %v5782_v43  ;;  %v5530_v10 = vld [vmem:[%s18375_s17 + $0xfc] sm:$0x1]  ;;  %v5531_v43 = vld [vmem:[%s18375_s17 + $0x100] sm:$0xe] }
 0x267   : > { %22146 = vst [vmem:[#allocation65_spill] sm:$0xff] %v19429_v18  ;;  %v2416_v45 = vadd.f32 %v2195_v5, %v18876_v2  ;;  %16303 = vmatprep.mubr.msk.bf16.mxu0 %vm18175_vm0, %v22116_v6  ;;  %16427 = vmatprep.mubr.msk.bf16.mxu1 %vm18175_vm0, %v22116_v6  ;;  %v19448_v5 = vld [vmem:[#allocation3 + $0xb8] sm:$0xff]   ;;  %5935 = vst [vmem:[#allocation3 + $0xb4] sm:$0xf] %v5783_v39  ;;  %v5787_v39 = vrot.slane %v5785_v53, 4 }
 0x268   : > { %v16065_v57 = vpop.f32.mrf.mxu0  ;;  %v16189_v25 = vpop.f32.mrf.mxu1 }
 0x269   : > { %v19441_v61 = vadd.f32 %v3770_v3, %v2416_v45  ;;  %v5786_v45 = vsel %vm18555_vm6, %v5784_v24, %v5785_v53  ;;  %v5532_v25 = vld [vmem:[%s18375_s17 + $0x104] sm:$0xf]  ;;  %v5788_v24 = vrot.slane %v5530_v10, 5 }
 0x26a   : > { %v2198_v2 = vpop.f32.mrf.mxu0  ;;  %v3773_v13 = vpop.f32.mrf.mxu1  ;;  %5936 = vst [vmem:[#allocation3 + $0xb8] sm:$0xf] %v5786_v45 }
 0x26b   : > { %22147 = vst [vmem:[#allocation66_spill] sm:$0xff] %v19441_v61  ;;  %v2417_v12 = vadd.f32 %v2198_v2, %v18885_v38  ;;  %v22165_v61 = vld [vmem:[#allocation31_spill] sm:$0xff] }
 0x26c   : > { %v16066_v63 = vpop.f32.mrf.mxu0  ;;  %v16190_v30 = vpop.f32.mrf.mxu1 }
 0x26d   : > { %v19452_v3 = vadd.f32 %v3773_v13, %v2417_v12  ;;  %v14375_v12 = vrot.slane %v5531_v43, 9  ;;  %v5792_v13 = vrot.slane %v5532_v25, 5  ;;  %v19466_v63 = vld [vmem:[#allocation3 + $0xc0] sm:$0xff]   ;;  %v5789_v30 = vsel %vm18555_vm6, %v5787_v39, %v5788_v24  ;;  %v5533_v39 = vld [vmem:[%s18375_s17 + $0x108] sm:$0xf] }
 0x26e   : > { %v2203_v40 = vpop.f32.mrf.mxu0  ;;  %16304 = vmatmul.mubr.bf16.gmra.mxu0 %v19118_v11  ;;  %v3778_v38 = vpop.f32.mrf.mxu1  ;;  %16428 = vmatmul.mubr.bf16.gmra.mxu1 %v19142_v41  ;;  %v19468_v41 = vld [vmem:[#allocation3 + $0xbc] sm:$0xff]  }
 0x26f   : > { %22148 = vst [vmem:[#allocation67_spill] sm:$0xff] %v19452_v3  ;;  %v2418_v57 = vadd.f32 %v2203_v40, %v18890_v50  ;;  %16307 = vmatprep.mubr.msk.bf16.mxu0 %vm18175_vm0, %v22116_v6  ;;  %16431 = vmatprep.mubr.msk.bf16.mxu1 %vm18175_vm0, %v22116_v6  ;;  %v5793_v40 = vsel %vm18555_vm6, %v14375_v12, %v5792_v13  ;;  %5937 = vst [vmem:[#allocation3 + $0xbc] sm:$0xf] %v5789_v30  ;;  %v5794_v24 = vrot.slane %v5792_v13, 4 }
 0x270   : > { %v16069_v2 = vpop.f32.mrf.mxu0  ;;  %v16193_v50 = vpop.f32.mrf.mxu1  ;;  %5938 = vst [vmem:[#allocation3 + $0xc0] sm:$0xf] %v5793_v40  ;;  %v17640_v40 = vld [vmem:[#allocation10 + $0x178] sm:$0xff]  }
 0x271   : > { %v19464_v11 = vadd.f32 %v3778_v38, %v2418_v57  ;;  %16636 = vmatpush3.bf16.msra.mxu1 %v17640_v40 }
 0x272   : > { %v2206_v45 = vpop.f32.mrf.mxu0  ;;  %v3781_v10 = vpop.f32.mrf.mxu1  ;;  %16637 = vmatprep.subr.bf16.mxu1 %v22116_v6 }
 0x273   : > { %22149 = vst [vmem:[#allocation68_spill] sm:$0xff] %v19464_v11  ;;  %v2419_v53 = vadd.f32 %v2206_v45, %v18903_v31  ;;  %v5534_v31 = vld [vmem:[%s18375_s17 + $0x10c] sm:$0x1]  ;;  %v5795_v45 = vrot.slane %v5533_v39, 5  ;;  %v17642_v39 = vld [vmem:[#allocation10 + $0x170] sm:$0xff]  }
 0x274   : > { %v16070_v57 = vpop.f32.mrf.mxu0  ;;  %v16194_v43 = vpop.f32.mrf.mxu1  ;;  %v5798_v30 = vrot.slane %v5534_v31, 5 }
 0x275   : > { %v19475_v38 = vadd.f32 %v3781_v10, %v2419_v53  ;;  %v19488_v10 = vld [vmem:[#allocation3 + $0xc4] sm:$0xff]   ;;  %v5797_v57 = vrot.slane %v5795_v45, 4  ;;  %16638 = vmatpush3.bf16.msra.mxu1 %v17642_v39 }
 0x276   : > { %v2211_v25 = vpop.f32.mrf.mxu0  ;;  %16308 = vmatmul.mubr.bf16.gmra.mxu0 %v19138_v46  ;;  %v3786_v50 = vpop.f32.mrf.mxu1  ;;  %16432 = vmatmul.mubr.bf16.gmra.mxu1 %v19163_v1  ;;  %v5796_v1 = vsel %vm18555_vm6, %v5794_v24, %v5795_v45 }
 0x277   : > { %22150 = vst [vmem:[#allocation69_spill] sm:$0xff] %v19475_v38  ;;  %v2420_v2 = vadd.f32 %v2211_v25, %v18910_v47  ;;  %16311 = vmatprep.mubr.msk.bf16.mxu0 %vm18175_vm0, %v22116_v6  ;;  %16435 = vmatprep.mubr.msk.bf16.mxu1 %vm18175_vm0, %v22116_v6  ;;  %5939 = vst [vmem:[#allocation3 + $0xc4] sm:$0xf] %v5796_v1  ;;  %v5537_v1 = vld [vmem:[%s18375_s17 + $0x118] sm:$0xf] }
 0x278   : > { %v16073_v12 = vpop.f32.mrf.mxu0  ;;  %v16197_v46 = vpop.f32.mrf.mxu1  ;;  %16639 = vmatprep.subr.bf16.mxu1 %v22116_v6 }
 0x279   : > { %v19486_v53 = vadd.f32 %v3786_v50, %v2420_v2  ;;  %v19494_v2 = vld [vmem:[#allocation3 + $0xc8] sm:$0xff]   ;;  %v5799_v50 = vsel %vm18555_vm6, %v5797_v57, %v5798_v30  ;;  %v17641_v12 = vld [vmem:[#allocation10 + $0x80] sm:$0xff]   ;;  %v5536_v30 = vld [vmem:[%s18375_s17 + $0x114] sm:$0xf] }
 0x27a   : > { %v2214_v47 = vpop.f32.mrf.mxu0  ;;  %v3789_v43 = vpop.f32.mrf.mxu1  ;;  %5940 = vst [vmem:[#allocation3 + $0xc8] sm:$0xf] %v5799_v50  ;;  %v22153_v46 = vld [vmem:[#allocation52_spill] sm:$0xff]  ;;  %16526 = vmatpush3.bf16.msra.mxu0 %v17641_v12  ;;  %v22155_v12 = vld [vmem:[#allocation27_spill] sm:$0xff] }
 0x27b   : > { %22151 = vst [vmem:[#allocation70_spill] sm:$0xff] %v19486_v53  ;;  %v2421_v13 = vadd.f32 %v2214_v47, %v18921_v58  ;;  %v5535_v47 = vld [vmem:[%s18375_s17 + $0x110] sm:$0xe]  ;;  %16759 = vmatprep.subr.bf16.mxu0 %v22116_v6  ;;  %v5544_v53 = vld [vmem:[%s18375_s17 + $0x134] sm:$0xf] }
 0x27c   : > { %v16074_v25 = vpop.f32.mrf.mxu0  ;;  %v16198_v24 = vpop.f32.mrf.mxu1 }
 0x27d   : > { %v19498_v31 = vadd.f32 %v3789_v43, %v2421_v13  ;;  %v14376_v13 = vrot.slane %v5535_v47, 9  ;;  %v5802_v43 = vrot.slane %v5536_v30, 5  ;;  %v17645_v25 = vld [vmem:[#allocation10 + $0x168] sm:$0xff]   ;;  %v19514_v24 = vld [vmem:[#allocation3 + $0xcc] sm:$0xff]  }
 0x27e   : > { %v2219_v58 = vpop.f32.mrf.mxu0  ;;  %16312 = vmatmul.mubr.bf16.gmra.mxu0 %v19157_v15  ;;  %v3794_v40 = vpop.f32.mrf.mxu1  ;;  %16436 = vmatmul.mubr.bf16.gmra.mxu1 %v22153_v46  ;;  %v5805_v15 = vrot.slane %v5537_v1, 5  ;;  %v19519_v1 = vld [vmem:[#allocation3 + $0xd0] sm:$0xff]  }
 0x27f   : > { %22152 = vst [vmem:[#allocation71_spill] sm:$0xff] %v19498_v31  ;;  %v2422_v45 = vadd.f32 %v2219_v58, %v18933_v36  ;;  %16315 = vmatprep.mubr.msk.bf16.mxu0 %vm18175_vm0, %v22116_v6  ;;  %16439 = vmatprep.mubr.msk.bf16.mxu1 %vm18175_vm0, %v22116_v6  ;;  %v5803_v58 = vsel %vm18555_vm6, %v14376_v13, %v5802_v43  ;;  %v5804_v46 = vrot.slane %v5802_v43, 4  ;;  %v5543_v31 = vld [vmem:[%s18375_s17 + $0x130] sm:$0xe] }
 0x280   : > { %v16077_v57 = vpop.f32.mrf.mxu0  ;;  %v16201_v36 = vpop.f32.mrf.mxu1  ;;  %16640 = vmatpush3.bf16.msra.mxu1 %v17645_v25  ;;  %5941 = vst [vmem:[#allocation3 + $0xcc] sm:$0xf] %v5803_v58  ;;  %v22157_v25 = vld [vmem:[#allocation51_spill] sm:$0xff] }
 0x281   : > { %v19510_v50 = vadd.f32 %v3794_v40, %v2422_v45  ;;  %16641 = vmatprep.subr.bf16.mxu1 %v22116_v6  ;;  %v5806_v40 = vsel %vm18555_vm6, %v5804_v46, %v5805_v15  ;;  %v17646_v57 = vld [vmem:[#allocation10 + $0x160] sm:$0xff]  }
 0x282   : > { %v2222_v39 = vpop.f32.mrf.mxu0  ;;  %v3797_v30 = vpop.f32.mrf.mxu1  ;;  %5942 = vst [vmem:[#allocation3 + $0xd0] sm:$0xf] %v5806_v40  ;;  %v5539_v46 = vld [vmem:[%s18375_s17 + $0x120] sm:$0xe]  ;;  %v19536_v40 = vld [vmem:[#allocation3 + $0xd8] sm:$0xff]  }
 0x283   : > { %22154 = vst [vmem:[#allocation52_spill] sm:$0xff] %v19510_v50  ;;  %v2423_v47 = vadd.f32 %v2222_v39, %v22155_v12  ;;  %v22158_v39 = vld [vmem:[#allocation28_spill] sm:$0xff]  ;;  %v19541_v50 = vld [vmem:[#allocation3 + $0xd4] sm:$0xff]  }
 0x284   : > { %v16078_v45 = vpop.f32.mrf.mxu0  ;;  %v16202_v13 = vpop.f32.mrf.mxu1  ;;  %16642 = vmatpush3.bf16.msra.mxu1 %v17646_v57  ;;  %v5807_v57 = vrot.slane %v5805_v15, 4 }
 0x285   : > { %v19524_v36 = vadd.f32 %v3797_v30, %v2423_v47  ;;  %v5538_v45 = vld [vmem:[%s18375_s17 + $0x11c] sm:$0x1]  ;;  %v5540_v47 = vld [vmem:[%s18375_s17 + $0x124] sm:$0xf]  ;;  %16643 = vmatprep.subr.bf16.mxu1 %v22116_v6 }
 0x286   : > { %v2227_v43 = vpop.f32.mrf.mxu0  ;;  %16316 = vmatmul.mubr.bf16.gmra.mxu0 %v22157_v25  ;;  %v3802_v58 = vpop.f32.mrf.mxu1  ;;  %16440 = vmatmul.mubr.bf16.gmra.mxu1 %v19201_v54  ;;  %v5808_v13 = vrot.slane %v5538_v45, 5  ;;  %v5812_v25 = vrot.slane %v5540_v47, 5  ;;  %v17649_v54 = vld [vmem:[#allocation10 + $0x158] sm:$0xff]   ;;  %v14378_v45 = vrot.slane %v5543_v31, 9  ;;  %v22160_v47 = vld [vmem:[#allocation29_spill] sm:$0xff] }
 0x287   : > { %22156 = vst [vmem:[#allocation27_spill] sm:$0xff] %v19524_v36  ;;  %v2424_v12 = vadd.f32 %v2227_v43, %v22158_v39  ;;  %16319 = vmatprep.mubr.msk.bf16.mxu0 %vm18175_vm0, %v22116_v6  ;;  %16443 = vmatprep.mubr.msk.bf16.mxu1 %vm18175_vm0, %v22116_v6  ;;  %v14377_v43 = vrot.slane %v5539_v46, 9  ;;  %v5822_v46 = vrot.slane %v5544_v53, 5 }
 0x288   : > { %v16081_v30 = vpop.f32.mrf.mxu0  ;;  %v16205_v36 = vpop.f32.mrf.mxu1  ;;  %v5809_v38 = vsel %vm18555_vm6, %v5807_v57, %v5808_v13  ;;  %16644 = vmatpush3.bf16.msra.mxu1 %v17649_v54  ;;  %v17650_v57 = vld [vmem:[#allocation10 + $0x150] sm:$0xff]  }
 0x289   : > { %v19539_v39 = vadd.f32 %v3802_v58, %v2424_v12  ;;  %v5813_v15 = vsel %vm18555_vm6, %v14377_v43, %v5812_v25  ;;  %5943 = vst [vmem:[#allocation3 + $0xd4] sm:$0xf] %v5809_v38  ;;  %v19550_v36 = vld [vmem:[#allocation3 + $0xe0] sm:$0xff]   ;;  %16645 = vmatprep.subr.bf16.mxu1 %v22116_v6  ;;  %v5823_v58 = vsel %vm18555_vm6, %v14378_v45, %v5822_v46  ;;  %v22163_v38 = vld [vmem:[#allocation30_spill] sm:$0xff] }
 0x28a   : > { %v2230_v30 = vpop.f32.mrf.mxu0  ;;  %v3805_v3 = vpop.f32.mrf.mxu1  ;;  %5944 = vst [vmem:[#allocation3 + $0xd8] sm:$0xf] %v5813_v15  ;;  %5947 = vst [vmem:[#allocation3 + $0xe4] sm:$0xf] %v5823_v58  ;;  %v22162_v43 = vld [vmem:[#allocation55_spill] sm:$0xff]  ;;  %v17653_v58 = vld [vmem:[#allocation10 + $0x148] sm:$0xff]  }
 0x28b   : > { %22159 = vst [vmem:[#allocation51_spill] sm:$0xff] %v19539_v39  ;;  %v2425_v11 = vadd.f32 %v2230_v30, %v22160_v47  ;;  %v5541_v15 = vld [vmem:[%s18375_s17 + $0x128] sm:$0xf]  ;;  %v5542_v45 = vld [vmem:[%s18375_s17 + $0x12c] sm:$0x1]  ;;  %v19575_v39 = vld [vmem:[#allocation3 + $0xe8] sm:$0xff]  }
 0x28c   : > { %v16082_v12 = vpop.f32.mrf.mxu0  ;;  %v16206_v53 = vpop.f32.mrf.mxu1  ;;  %16646 = vmatpush3.bf16.msra.mxu1 %v17650_v57  ;;  %v5815_v47 = vrot.slane %v5541_v15, 5 }
 0x28d   : > { %v19555_v13 = vadd.f32 %v3805_v3, %v2425_v11  ;;  %v5814_v3 = vrot.slane %v5812_v25, 4  ;;  %v5818_v12 = vrot.slane %v5542_v45, 5  ;;  %16647 = vmatprep.subr.bf16.mxu1 %v22116_v6 }
 0x28e   : > { %v2235_v31 = vpop.f32.mrf.mxu0  ;;  %16320 = vmatmul.mubr.bf16.gmra.mxu0 %v22162_v43  ;;  %v3810_v30 = vpop.f32.mrf.mxu1  ;;  %16444 = vmatmul.mubr.bf16.gmra.mxu1 %v19222_v60  ;;  %v5545_v60 = vld [vmem:[%s18375_s17 + $0x138] sm:$0xf]  ;;  %v5546_v43 = vld [vmem:[%s18375_s17 + $0x13c] sm:$0x1]  ;;  %s21801_s17 = scalar_lea.vmem [#allocation13], %s14145_s29  ;;  %s14900_s29 = sshll.u32 %s18158_s30, 11 }
 0x28f   : > { %22161 = vst [vmem:[#allocation28_spill] sm:$0xff] %v19555_v13  ;;  %v2426_v54 = vadd.f32 %v2235_v31, %v22163_v38  ;;  %16323 = vmatprep.mubr.msk.bf16.mxu0 %vm18175_vm0, %v22116_v6  ;;  %16447 = vmatprep.mubr.msk.bf16.mxu1 %vm18175_vm0, %v22116_v6  ;;  %v19569_v31 = vld [vmem:[#allocation3 + $0xdc] sm:$0xff]   ;;  %v5824_v38 = vrot.slane %v5822_v46, 4  ;;  %v5816_v25 = vsel %vm18555_vm6, %v5814_v3, %v5815_v47  ;;  %v5825_v15 = vrot.slane %v5545_v60, 5  ;;  %s14004_s15 = sshll.u32 %s21801_s17, 4  ;;  %s21998_s24 = scalar_lea.hbm %s22471_s13, %s14900_s29  ;;  %s22000_s15 = int_to_ptr.vmem [resolvable:$true] %s14004_s15 }
 0x290   : > { %v16085_v11 = vpop.f32.mrf.mxu0  ;;  %v16209_v53 = vpop.f32.mrf.mxu1  ;;  %v5828_v45 = vrot.slane %v5546_v43, 5  ;;  %16648 = vmatpush3.bf16.msra.mxu1 %v17653_v58  ;;  %5945 = vst [vmem:[#allocation3 + $0xdc] sm:$0xf] %v5816_v25  ;;  %s18074_s2 = scalar_lea.vmem %s22000_s15, 2048  ;;  %s18177_s30 = smov [#allocation13]  }
 0x291   : > { %v19567_v57 = vadd.f32 %v3810_v30, %v2426_v54  ;;  %v5817_v11 = vrot.slane %v5815_v47, 4  ;;  %16649 = vmatprep.subr.bf16.mxu1 %v22116_v6  ;;  %v5826_v53 = vsel %vm18555_vm6, %v5824_v38, %v5825_v15  ;;  %v5827_v3 = vrot.slane %v5825_v15, 4  ;;  %v17654_v47 = vld [vmem:[#allocation10 + $0x140] sm:$0xff]   ;;  %p18075_p1 = scmp.ne.s32.totalorder %s22000_s15, %s18074_s2  ;;  %s18078_s23 = sshll.u32 %s18177_s30, 4  ;;  %s18079_s23 = int_to_ptr.vmem [resolvable:$false] %s18078_s23 }
 0x292   : > { %v2238_v13 = vpop.f32.mrf.mxu0  ;;  %v3813_v54 = vpop.f32.mrf.mxu1  ;;  %5948 = vst [vmem:[#allocation3 + $0xe8] sm:$0xf] %v5826_v53  ;;  %v22168_v53 = vld [vmem:[#allocation60_spill] sm:$0xff]  ;;  %s18080_s20 = scalar_lea.vmem %s18079_s23, 4096  ;;  %p18081_p7 = scmp.lt.s32.totalorder %s22000_s15, %s18079_s23 }
 0x293   : > { %22164 = vst [vmem:[#allocation29_spill] sm:$0xff] %v19567_v57  ;;  %v2427_v18 = vadd.f32 %v2238_v13, %v22165_v61  ;;  %v5819_v46 = vsel %vm18555_vm6, %v5817_v11, %v5818_v12  ;;  %v5829_v61 = vsel %vm18555_vm6, %v5827_v3, %v5828_v45  ;;  %v22166_v13 = vld [vmem:[#allocation32_spill] sm:$0xff]  ;;  %v22167_v11 = vld [vmem:[#allocation33_spill] sm:$0xff]  ;;  %v22169_v3 = vld [vmem:[#allocation34_spill] sm:$0xff]  ;;  %p18076_p4 = pnand %p18075_p1, %p18322_p3  ;;  %p18082_p2 = scmp.lt.s32.totalorder %s18080_s20, %s18074_s2 }
 0x294   : > { %v16086_v30 = vpop.f32.mrf.mxu0  ;;  %v16210_v60 = vpop.f32.mrf.mxu1  ;;  %5946 = vst [vmem:[#allocation3 + $0xe0] sm:$0xf] %v5819_v46  ;;  %16650 = vmatpush3.bf16.msra.mxu1 %v17654_v47  ;;  %5949 = vst [vmem:[#allocation3 + $0xec] sm:$0xf] %v5829_v61 }
 0x295   : > { %v19583_v57 = vadd.f32 %v3813_v54, %v2427_v18  ;;  %p18077_p8 = pneg %p18076_p4  ;;  %p18083_p9 = por %p18082_p2, %p18081_p7 }
 0x296   : > { %v2243_v58 = vpop.f32.mrf.mxu0  ;;  %16324 = vmatmul.mubr.bf16.gmra.mxu0 %v19216_v44  ;;  %v3818_v12 = vpop.f32.mrf.mxu1  ;;  %16448 = vmatmul.mubr.bf16.gmra.mxu1 %v19240_v27 }
 0x297   : > { %v2428_v43 = vadd.f32 %v2243_v58, %v22166_v13  ;;  %16327 = vmatprep.mubr.msk.bf16.mxu0 %vm18175_vm0, %v22116_v6  ;;  %16451 = vmatprep.mubr.msk.bf16.mxu1 %vm18175_vm0, %v22116_v6  ;;  %p18084_p12 = pnand %p18083_p9, %p18077_p8 }
 0x298   : > { %v16089_v18 = vpop.f32.mrf.mxu0  ;;  %v16213_v44 = vpop.f32.mrf.mxu1 }
 0x299   : > { %v19594_v38 = vadd.f32 %v3818_v12, %v2428_v43  ;;  %v22170_v12 = vld [vmem:[#allocation35_spill] sm:$0xff] }
 0x29a   : > { %v2246_v25 = vpop.f32.mrf.mxu0  ;;  %v3821_v45 = vpop.f32.mrf.mxu1 }
 0x29b   : > { %v2429_v15 = vadd.f32 %v2246_v25, %v22167_v11 }
 0x29c   : > { %v16090_v54 = vpop.f32.mrf.mxu0  ;;  %v16214_v46 = vpop.f32.mrf.mxu1 }
 0x29d   : > { %v19597_v30 = vadd.f32 %v3821_v45, %v2429_v15 }
 0x29e   : > { %v2251_v27 = vpop.f32.mrf.mxu0  ;;  %16328 = vmatmul.mubr.bf16.gmra.mxu0 %v22168_v53  ;;  %v3826_v60 = vpop.f32.mrf.mxu1  ;;  %16452 = vmatmul.mubr.bf16.gmra.mxu1 %v19257_v42  ;;  %v22171_v42 = vld [vmem:[#allocation36_spill] sm:$0xff] }
 0x29f   : > { %v2430_v47 = vadd.f32 %v2251_v27, %v22169_v3  ;;  %16331 = vmatprep.mubr.msk.bf16.mxu0 %vm18175_vm0, %v22116_v6  ;;  %16455 = vmatprep.mubr.msk.bf16.mxu1 %vm18175_vm0, %v22116_v6 }
 0x2a0   : > { %v16093_v58 = vpop.f32.mrf.mxu0  ;;  %v16217_v13 = vpop.f32.mrf.mxu1 }
 0x2a1   : > { %v19606_v61 = vadd.f32 %v3826_v60, %v2430_v47  ;;  %v22172_v60 = vld [vmem:[#allocation37_spill] sm:$0xff] }
 0x2a2   : > { %v2254_v43 = vpop.f32.mrf.mxu0  ;;  %v3829_v44 = vpop.f32.mrf.mxu1 }
 0x2a3   : > { %v2431_v18 = vadd.f32 %v2254_v43, %v22170_v12 }
 0x2a4   : > { %v16094_v25 = vpop.f32.mrf.mxu0  ;;  %v16218_v15 = vpop.f32.mrf.mxu1 }
 0x2a5   : > { %v19609_v11 = vadd.f32 %v3829_v44, %v2431_v18 }
 0x2a6   : > { %v2259_v45 = vpop.f32.mrf.mxu0  ;;  %16332 = vmatmul.mubr.bf16.gmra.mxu0 %v19259_v56  ;;  %v3834_v46 = vpop.f32.mrf.mxu1  ;;  %16456 = vmatmul.mubr.bf16.gmra.mxu1 %v19283_v19  ;;  %v22173_v19 = vld [vmem:[#allocation38_spill] sm:$0xff] }
 0x2a7   : > { %v2432_v54 = vadd.f32 %v2259_v45, %v22171_v42  ;;  %16335 = vmatprep.mubr.msk.bf16.mxu0 %vm18175_vm0, %v22116_v6  ;;  %16459 = vmatprep.mubr.msk.bf16.mxu1 %vm18175_vm0, %v22116_v6 }
 0x2a8   : > { %v16097_v27 = vpop.f32.mrf.mxu0  ;;  %v16221_v3 = vpop.f32.mrf.mxu1 }
 0x2a9   : > { %v19618_v53 = vadd.f32 %v3834_v46, %v2432_v54  ;;  %v22174_v46 = vld [vmem:[#allocation39_spill] sm:$0xff] }
 0x2aa   : > { %v2262_v47 = vpop.f32.mrf.mxu0  ;;  %v3837_v13 = vpop.f32.mrf.mxu1 }
 0x2ab   : > { %v2433_v58 = vadd.f32 %v2262_v47, %v22172_v60 }
 0x2ac   : > { %v16098_v56 = vpop.f32.mrf.mxu0  ;;  %v16222_v12 = vpop.f32.mrf.mxu1 }
 0x2ad   : > { %v19621_v43 = vadd.f32 %v3837_v13, %v2433_v58 }
 0x2ae   : > { %v2267_v18 = vpop.f32.mrf.mxu0  ;;  %16336 = vmatmul.mubr.bf16.gmra.mxu0 %v19278_v23  ;;  %v3842_v25 = vpop.f32.mrf.mxu1  ;;  %16460 = vmatmul.mubr.bf16.gmra.mxu1 %v19305_v34  ;;  %v22175_v34 = vld [vmem:[#allocation40_spill] sm:$0xff] }
 0x2af   : > { %v2434_v44 = vadd.f32 %v2267_v18, %v22173_v19  ;;  %16339 = vmatprep.mubr.msk.bf16.mxu0 %vm18175_vm0, %v22116_v6  ;;  %16463 = vmatprep.mubr.msk.bf16.mxu1 %vm18175_vm0, %v22116_v6 }
 0x2b0   : > { %v16101_v15 = vpop.f32.mrf.mxu0  ;;  %v16225_v42 = vpop.f32.mrf.mxu1 }
 0x2b1   : > { %v19630_v45 = vadd.f32 %v3842_v25, %v2434_v44  ;;  %v22176_v25 = vld [vmem:[#allocation41_spill] sm:$0xff] }
 0x2b2   : > { %v2270_v54 = vpop.f32.mrf.mxu0  ;;  %v3845_v3 = vpop.f32.mrf.mxu1 }
 0x2b3   : > { %v2435_v27 = vadd.f32 %v2270_v54, %v22174_v46 }
 0x2b4   : > { %v16102_v23 = vpop.f32.mrf.mxu0  ;;  %v16226_v60 = vpop.f32.mrf.mxu1 }
 0x2b5   : > { %v19633_v47 = vadd.f32 %v3845_v3, %v2435_v27 }
 0x2b6   : > { %v2275_v58 = vpop.f32.mrf.mxu0  ;;  %16340 = vmatmul.mubr.bf16.gmra.mxu0 %v19300_v4  ;;  %v3850_v56 = vpop.f32.mrf.mxu1  ;;  %16464 = vmatmul.mubr.bf16.gmra.mxu1 %v19324_v52  ;;  %v22177_v52 = vld [vmem:[#allocation42_spill] sm:$0xff] }
 0x2b7   : > { %v2436_v13 = vadd.f32 %v2275_v58, %v22175_v34  ;;  %16343 = vmatprep.mubr.msk.bf16.mxu0 %vm18175_vm0, %v22116_v6  ;;  %16467 = vmatprep.mubr.msk.bf16.mxu1 %vm18175_vm0, %v22116_v6 }
 0x2b8   : > { %v16105_v12 = vpop.f32.mrf.mxu0  ;;  %v16229_v19 = vpop.f32.mrf.mxu1 }
 0x2b9   : > { %v19642_v18 = vadd.f32 %v3850_v56, %v2436_v13  ;;  %v22178_v56 = vld [vmem:[#allocation43_spill] sm:$0xff] }
 0x2ba   : > { %v2278_v44 = vpop.f32.mrf.mxu0  ;;  %v3853_v42 = vpop.f32.mrf.mxu1 }
 0x2bb   : > { %v2437_v15 = vadd.f32 %v2278_v44, %v22176_v25 }
 0x2bc   : > { %v16106_v4 = vpop.f32.mrf.mxu0  ;;  %v16230_v46 = vpop.f32.mrf.mxu1 }
 0x2bd   : > { %v19645_v54 = vadd.f32 %v3853_v42, %v2437_v15 }
 0x2be   : > { %v2283_v27 = vpop.f32.mrf.mxu0  ;;  %16344 = vmatmul.mubr.bf16.gmra.mxu0 %v19326_v26  ;;  %v3858_v23 = vpop.f32.mrf.mxu1  ;;  %16468 = vmatmul.mubr.bf16.gmra.mxu1 %v19353_v9  ;;  %v22179_v9 = vld [vmem:[#allocation44_spill] sm:$0xff] }
 0x2bf   : > { %v2438_v3 = vadd.f32 %v2283_v27, %v22177_v52  ;;  %16347 = vmatprep.mubr.msk.bf16.mxu0 %vm18175_vm0, %v22116_v6  ;;  %16471 = vmatprep.mubr.msk.bf16.mxu1 %vm18175_vm0, %v22116_v6 }
 0x2c0   : > { %v16109_v60 = vpop.f32.mrf.mxu0  ;;  %v16233_v34 = vpop.f32.mrf.mxu1 }
 0x2c1   : > { %v19654_v58 = vadd.f32 %v3858_v23, %v2438_v3  ;;  %v22180_v23 = vld [vmem:[#allocation45_spill] sm:$0xff] }
 0x2c2   : > { %v2286_v13 = vpop.f32.mrf.mxu0  ;;  %v3861_v19 = vpop.f32.mrf.mxu1 }
 0x2c3   : > { %v2439_v12 = vadd.f32 %v2286_v13, %v22178_v56 }
 0x2c4   : > { %v16110_v26 = vpop.f32.mrf.mxu0  ;;  %v16234_v25 = vpop.f32.mrf.mxu1 }
 0x2c5   : > { %v19657_v44 = vadd.f32 %v3861_v19, %v2439_v12 }
 0x2c6   : > { %v2291_v15 = vpop.f32.mrf.mxu0  ;;  %16348 = vmatmul.mubr.bf16.gmra.mxu0 %v19348_v35  ;;  %v3866_v4 = vpop.f32.mrf.mxu1  ;;  %16472 = vmatmul.mubr.bf16.gmra.mxu1 %v19378_v29  ;;  %v22181_v29 = vld [vmem:[#allocation46_spill] sm:$0xff] }
 0x2c7   : > { %v2440_v42 = vadd.f32 %v2291_v15, %v22179_v9  ;;  %16351 = vmatprep.mubr.msk.bf16.mxu0 %vm18175_vm0, %v22116_v6  ;;  %16475 = vmatprep.mubr.msk.bf16.mxu1 %vm18175_vm0, %v22116_v6 }
 0x2c8   : > { %v16113_v46 = vpop.f32.mrf.mxu0  ;;  %v16237_v52 = vpop.f32.mrf.mxu1 }
 0x2c9   : > { %v19666_v27 = vadd.f32 %v3866_v4, %v2440_v42  ;;  %v22182_v4 = vld [vmem:[#allocation47_spill] sm:$0xff] }
 0x2ca   : > { %v2294_v3 = vpop.f32.mrf.mxu0  ;;  %v3869_v34 = vpop.f32.mrf.mxu1 }
 0x2cb   : > { %v2441_v60 = vadd.f32 %v2294_v3, %v22180_v23 }
 0x2cc   : > { %v16114_v35 = vpop.f32.mrf.mxu0  ;;  %v16238_v56 = vpop.f32.mrf.mxu1 }
 0x2cd   : > { %v19669_v13 = vadd.f32 %v3869_v34, %v2441_v60 }
 0x2ce   : > { %v2299_v12 = vpop.f32.mrf.mxu0  ;;  %16352 = vmatmul.mubr.bf16.gmra.mxu0 %v19373_v20  ;;  %v3874_v26 = vpop.f32.mrf.mxu1  ;;  %16476 = vmatmul.mubr.bf16.gmra.mxu1 %v19397_v37  ;;  %v22183_v37 = vld [vmem:[#allocation48_spill] sm:$0xff] }
 0x2cf   : > { %v2442_v19 = vadd.f32 %v2299_v12, %v22181_v29  ;;  %16355 = vmatprep.mubr.msk.bf16.mxu0 %vm18175_vm0, %v22116_v6  ;;  %16479 = vmatprep.mubr.msk.bf16.mxu1 %vm18175_vm0, %v22116_v6 }
 0x2d0   : > { %v16117_v25 = vpop.f32.mrf.mxu0  ;;  %v16241_v9 = vpop.f32.mrf.mxu1 }
 0x2d1   : > { %v19678_v15 = vadd.f32 %v3874_v26, %v2442_v19  ;;  %v22184_v26 = vld [vmem:[#allocation49_spill] sm:$0xff] }
 0x2d2   : > { %v2302_v42 = vpop.f32.mrf.mxu0  ;;  %v3877_v52 = vpop.f32.mrf.mxu1 }
 0x2d3   : > { %v2443_v46 = vadd.f32 %v2302_v42, %v22182_v4 }
 0x2d4   : > { %v16118_v20 = vpop.f32.mrf.mxu0  ;;  %v16242_v23 = vpop.f32.mrf.mxu1 }
 0x2d5   : > { %v19681_v3 = vadd.f32 %v3877_v52, %v2443_v46 }
 0x2d6   : > { %v2307_v60 = vpop.f32.mrf.mxu0  ;;  %16356 = vmatmul.mubr.bf16.gmra.mxu0 %v19399_v62  ;;  %v3882_v35 = vpop.f32.mrf.mxu1  ;;  %16480 = vmatmul.mubr.bf16.gmra.mxu1 %v19424_v59  ;;  %v22185_v59 = vld [vmem:[#allocation50_spill] sm:$0xff] }
 0x2d7   : > { %v2444_v34 = vadd.f32 %v2307_v60, %v22183_v37  ;;  %16359 = vmatprep.mubr.msk.bf16.mxu0 %vm18175_vm0, %v22116_v6  ;;  %16483 = vmatprep.mubr.msk.bf16.mxu1 %vm18175_vm0, %v22116_v6 }
 0x2d8   : > { %v16121_v56 = vpop.f32.mrf.mxu0  ;;  %v16245_v29 = vpop.f32.mrf.mxu1 }
 0x2d9   : > { %v19690_v12 = vadd.f32 %v3882_v35, %v2444_v34  ;;  %v22186_v35 = vld [vmem:[#allocation53_spill] sm:$0xff] }
 0x2da   : > { %v2310_v19 = vpop.f32.mrf.mxu0  ;;  %v3885_v9 = vpop.f32.mrf.mxu1 }
 0x2db   : > { %v2445_v25 = vadd.f32 %v2310_v19, %v22184_v26 }
 0x2dc   : > { %v16122_v62 = vpop.f32.mrf.mxu0  ;;  %v16246_v4 = vpop.f32.mrf.mxu1 }
 0x2dd   : > { %v19693_v42 = vadd.f32 %v3885_v9, %v2445_v25 }
 0x2de   : > { %v2315_v46 = vpop.f32.mrf.mxu0  ;;  %16360 = vmatmul.mubr.bf16.gmra.mxu0 %v19419_v8  ;;  %v3890_v20 = vpop.f32.mrf.mxu1  ;;  %16484 = vmatmul.mubr.bf16.gmra.mxu1 %v19448_v5  ;;  %v22187_v5 = vld [vmem:[#allocation54_spill] sm:$0xff] }
 0x2df   : > { %v2446_v52 = vadd.f32 %v2315_v46, %v22185_v59  ;;  %16363 = vmatprep.mubr.msk.bf16.mxu0 %vm18175_vm0, %v22116_v6  ;;  %16487 = vmatprep.mubr.msk.bf16.mxu1 %vm18175_vm0, %v22116_v6 }
 0x2e0   : > { %v16125_v23 = vpop.f32.mrf.mxu0  ;;  %v16249_v37 = vpop.f32.mrf.mxu1 }
 0x2e1   : > { %v19702_v60 = vadd.f32 %v3890_v20, %v2446_v52  ;;  %v22188_v20 = vld [vmem:[#allocation56_spill] sm:$0xff] }
 0x2e2   : > { %v2318_v34 = vpop.f32.mrf.mxu0  ;;  %v3893_v29 = vpop.f32.mrf.mxu1 }
 0x2e3   : > { %v2447_v56 = vadd.f32 %v2318_v34, %v22186_v35 }
 0x2e4   : > { %v16126_v8 = vpop.f32.mrf.mxu0  ;;  %v16250_v26 = vpop.f32.mrf.mxu1 }
 0x2e5   : > { %v19705_v19 = vadd.f32 %v3893_v29, %v2447_v56 }
 0x2e6   : > { %v2323_v25 = vpop.f32.mrf.mxu0  ;;  %16364 = vmatmul.mubr.bf16.gmra.mxu0 %v19443_v28  ;;  %v3898_v62 = vpop.f32.mrf.mxu1  ;;  %16488 = vmatmul.mubr.bf16.gmra.mxu1 %v19466_v63  ;;  %v22189_v63 = vld [vmem:[#allocation57_spill] sm:$0xff] }
 0x2e7   : > { %v2448_v9 = vadd.f32 %v2323_v25, %v22187_v5  ;;  %16367 = vmatprep.mubr.msk.bf16.mxu0 %vm18175_vm0, %v22116_v6  ;;  %16491 = vmatprep.mubr.msk.bf16.mxu1 %vm18175_vm0, %v22116_v6 }
 0x2e8   : > { %v16129_v4 = vpop.f32.mrf.mxu0  ;;  %v16253_v59 = vpop.f32.mrf.mxu1 }
 0x2e9   : > { %v19714_v46 = vadd.f32 %v3898_v62, %v2448_v9  ;;  %v22190_v62 = vld [vmem:[#allocation58_spill] sm:$0xff] }
 0x2ea   : > { %v2326_v52 = vpop.f32.mrf.mxu0  ;;  %v3901_v37 = vpop.f32.mrf.mxu1 }
 0x2eb   : > { %v2449_v23 = vadd.f32 %v2326_v52, %v22188_v20 }
 0x2ec   : > { %v16130_v28 = vpop.f32.mrf.mxu0  ;;  %v16254_v35 = vpop.f32.mrf.mxu1 }
 0x2ed   : > { %v19717_v34 = vadd.f32 %v3901_v37, %v2449_v23 }
 0x2ee   : > { %v2331_v56 = vpop.f32.mrf.mxu0  ;;  %16368 = vmatmul.mubr.bf16.gmra.mxu0 %v19468_v41  ;;  %v3906_v8 = vpop.f32.mrf.mxu1  ;;  %16492 = vmatmul.mubr.bf16.gmra.mxu1 %v19494_v2  ;;  %v22191_v2 = vld [vmem:[#allocation59_spill] sm:$0xff] }
 0x2ef   : > { %v2450_v29 = vadd.f32 %v2331_v56, %v22189_v63  ;;  %16371 = vmatprep.mubr.msk.bf16.mxu0 %vm18175_vm0, %v22116_v6  ;;  %16495 = vmatprep.mubr.msk.bf16.mxu1 %vm18175_vm0, %v22116_v6 }
 0x2f0   : > { %v16133_v26 = vpop.f32.mrf.mxu0  ;;  %v16257_v5 = vpop.f32.mrf.mxu1 }
 0x2f1   : > { %v19726_v25 = vadd.f32 %v3906_v8, %v2450_v29  ;;  %v22192_v8 = vld [vmem:[#allocation61_spill] sm:$0xff] }
 0x2f2   : > { %v2334_v9 = vpop.f32.mrf.mxu0  ;;  %v3909_v59 = vpop.f32.mrf.mxu1 }
 0x2f3   : > { %v2451_v4 = vadd.f32 %v2334_v9, %v22190_v62 }
 0x2f4   : > { %v16134_v41 = vpop.f32.mrf.mxu0  ;;  %v16258_v20 = vpop.f32.mrf.mxu1 }
 0x2f5   : > { %v19729_v52 = vadd.f32 %v3909_v59, %v2451_v4 }
 0x2f6   : > { %v2339_v23 = vpop.f32.mrf.mxu0  ;;  %16372 = vmatmul.mubr.bf16.gmra.mxu0 %v19488_v10  ;;  %v3914_v28 = vpop.f32.mrf.mxu1  ;;  %16496 = vmatmul.mubr.bf16.gmra.mxu1 %v19519_v1  ;;  %v22193_v1 = vld [vmem:[#allocation62_spill] sm:$0xff] }
 0x2f7   : > { %v2452_v37 = vadd.f32 %v2339_v23, %v22191_v2  ;;  %16375 = vmatprep.mubr.msk.bf16.mxu0 %vm18175_vm0, %v22116_v6  ;;  %16499 = vmatprep.mubr.msk.bf16.mxu1 %vm18175_vm0, %v22116_v6 }
 0x2f8   : > { %v16137_v35 = vpop.f32.mrf.mxu0  ;;  %v16261_v63 = vpop.f32.mrf.mxu1 }
 0x2f9   : > { %v19738_v56 = vadd.f32 %v3914_v28, %v2452_v37 }
 0x2fa   : > { %v2342_v29 = vpop.f32.mrf.mxu0  ;;  %v3917_v5 = vpop.f32.mrf.mxu1 }
 0x2fb   : > { %v2453_v26 = vadd.f32 %v2342_v29, %v22192_v8 }
 0x2fc   : > { %v16138_v10 = vpop.f32.mrf.mxu0  ;;  %v16262_v62 = vpop.f32.mrf.mxu1 }
 0x2fd   : > { %v19741_v9 = vadd.f32 %v3917_v5, %v2453_v26 }
 0x2fe   : > { %v4398_v4 = vpop.f32.mrf.mxu0  ;;  %16376 = vmatmul.mubr.bf16.gmra.mxu0 %v19514_v24  ;;  %v5090_v41 = vpop.f32.mrf.mxu1  ;;  %16500 = vmatmul.mubr.bf16.gmra.mxu1 %v19536_v40  ;;  %v22194_v40 = vld [vmem:[#allocation63_spill] sm:$0xff] }
 0x2ff   : > { %v4667_v59 = vadd.f32 %v4398_v4, %v22193_v1  ;;  %16379 = vmatprep.mubr.msk.bf16.mxu0 %vm18175_vm0, %v22116_v6  ;;  %16503 = vmatprep.mubr.msk.bf16.mxu1 %vm18175_vm0, %v22116_v6  ;;  %v22195_v1 = vld [vmem:[#allocation64_spill] sm:$0xff] }
 0x300   : > { %v16281_v20 = vpop.f32.mrf.mxu0  ;;  %v16405_v2 = vpop.f32.mrf.mxu1 }
 0x301   : > { %v19750_v23 = vadd.f32 %v5090_v41, %v4667_v59 }
 0x302   : > { %v4401_v37 = vpop.f32.mrf.mxu0  ;;  %v5093_v35 = vpop.f32.mrf.mxu1 }
 0x303   : > { %v4668_v28 = vadd.f32 %v4401_v37, %v19266_v7 }
 0x304   : > { %v16282_v24 = vpop.f32.mrf.mxu0  ;;  %v16406_v29 = vpop.f32.mrf.mxu1 }
 0x305   : > { %v19753_v63 = vadd.f32 %v5093_v35, %v4668_v28 }
 0x306   : > { %v4406_v8 = vpop.f32.mrf.mxu0  ;;  %16380 = vmatmul.mubr.bf16.gmra.mxu0 %v19541_v50  ;;  %v5098_v5 = vpop.f32.mrf.mxu1  ;;  %16504 = vmatmul.mubr.bf16.gmra.mxu1 %v19550_v36 }
 0x307   : > { %v4669_v26 = vadd.f32 %v4406_v8, %v22194_v40  ;;  %16383 = vmatprep.mubr.msk.bf16.mxu0 %vm18175_vm0, %v22116_v6  ;;  %16507 = vmatprep.mubr.msk.bf16.mxu1 %vm18175_vm0, %v22116_v6  ;;  %v17655_v40 = vld [vmem:[#allocation3] sm:$0xff]  }
 0x308   : > { %v16285_v10 = vpop.f32.mrf.mxu0  ;;  %v16409_v62 = vpop.f32.mrf.mxu1 }
 0x309   : > { %v19762_v7 = vadd.f32 %v5098_v5, %v4669_v26  ;;  %v17656_v5 = vld [vmem:[#allocation10 + $0x238] sm:$0xff]  }
 0x30a   : > { %v4409_v4 = vpop.f32.mrf.mxu0  ;;  %v5101_v41 = vpop.f32.mrf.mxu1 }
 0x30b   : > { %v4670_v59 = vadd.f32 %v4409_v4, %v22195_v1 }
 0x30c   : > { %v16286_v50 = vpop.f32.mrf.mxu0  ;;  %v16410_v2 = vpop.f32.mrf.mxu1 }
 0x30d   : > { %v19765_v20 = vadd.f32 %v5101_v41, %v4670_v59  ;;  %v17664_v41 = vld [vmem:[#allocation10 + $0x230] sm:$0xff]  }
 0x30e   : > { %v4414_v37 = vpop.f32.mrf.mxu0  ;;  %16384 = vmatmul.mubr.bf16.gmra.mxu0 %v19569_v31  ;;  %v5106_v28 = vpop.f32.mrf.mxu1  ;;  %16508 = vmatmul.mubr.bf16.gmra.mxu1 %v19575_v39 }
 0x30f   : > { %v4671_v36 = vadd.f32 %v4414_v37, %v19298_v14  ;;  %16527 = vmatprep.mubr.msk.bf16.mxu0 %vm18175_vm0, %v22116_v6  ;;  %16651 = vmatprep.mubr.msk.bf16.mxu1 %vm18175_vm0, %v22116_v6  ;;  %v17657_v14 = vld [vmem:[#allocation3 + $0xc] sm:$0xff]  }
 0x310   : > { %v16289_v35 = vpop.f32.mrf.mxu0  ;;  %v16413_v29 = vpop.f32.mrf.mxu1 }
 0x311   : > { %v19774_v24 = vadd.f32 %v5106_v28, %v4671_v36  ;;  %v17658_v36 = vld [vmem:[#allocation3 + $0x8] sm:$0xff]   ;;  %v17659_v35 = vld [vmem:[#allocation3 + $0x14] sm:$0xff]  }
 0x312   : > { %v4417_v8 = vpop.f32.mrf.mxu0  ;;  %v5109_v31 = vpop.f32.mrf.mxu1 }
 0x313   : > { %v4672_v26 = vadd.f32 %v4417_v8, %v19309_v17  ;;  %v17671_v8 = vld [vmem:[#allocation10 + $0x228] sm:$0xff]  }
 0x314   : > { %v16290_v10 = vpop.f32.mrf.mxu0  ;;  %v16414_v39 = vpop.f32.mrf.mxu1 }
 0x315   : > { %v19777_v62 = vadd.f32 %v5109_v31, %v4672_v26  ;;  %v17680_v10 = vld [vmem:[#allocation10 + $0x220] sm:$0xff]  }
 0x316   : > { %v4422_v4 = vpop.f32.mrf.mxu0  ;;  %16528 = vmatmul.mubr.bf16.vlgmr.msra.gmra.mxu0 %v17655_v40  ;;  %v5114_v59 = vpop.f32.mrf.mxu1  ;;  %16652 = vmatmul.mubr.bf16.vlgmr.msra.gmra.mxu1 %v17657_v14 }
 0x317   : > { %v4673_v1 = vadd.f32 %v4422_v4, %v19321_v55  ;;  %16760 = vmatpush3.bf16.msra.mxu0 %v17656_v5  ;;  %16531 = vmatprep.mubr.msk.bf16.mxu0 %vm18175_vm0, %v22116_v6 }
 0x318   : > { %v16293_v50 = vpop.f32.mrf.mxu0  ;;  %16655 = vmatprep.mubr.msk.bf16.mxu1 %vm18175_vm0, %v22116_v6  ;;  %v16417_v2 = vpop.f32.mrf.mxu1  ;;  %16761 = vmatprep.subr.bf16.mxu0 %v22116_v6 }
 0x319   : > { %v19784_v17 = vadd.f32 %v5114_v59, %v4673_v1  ;;  %v17660_v59 = vld [vmem:[#allocation3 + $0x10] sm:$0xff]   ;;  %v17661_v50 = vld [vmem:[#allocation3 + $0x1c] sm:$0xff]  }
 0x31a   : > { %v4425_v37 = vpop.f32.mrf.mxu0  ;;  %v5117_v28 = vpop.f32.mrf.mxu1 }
 0x31b   : > { %v4674_v55 = vadd.f32 %v4425_v37, %v19334_v51  ;;  %16762 = vmatpush3.bf16.msra.mxu0 %v17664_v41  ;;  %v17687_v37 = vld [vmem:[#allocation10 + $0x218] sm:$0xff]  }
 0x31c   : > { %v16294_v29 = vpop.f32.mrf.mxu0  ;;  %16763 = vmatprep.subr.bf16.mxu0 %v22116_v6  ;;  %v16418_v26 = vpop.f32.mrf.mxu1 }
 0x31d   : > { %v19789_v40 = vadd.f32 %v5117_v28, %v4674_v55 }
 0x31e   : > { %v4430_v31 = vpop.f32.mrf.mxu0  ;;  %16532 = vmatmul.mubr.bf16.gmra.mxu0 %v17658_v36  ;;  %v5122_v14 = vpop.f32.mrf.mxu1  ;;  %16656 = vmatmul.mubr.bf16.gmra.mxu1 %v17659_v35 }
 0x31f   : > { %v4675_v5 = vadd.f32 %v4430_v31, %v19345_v21  ;;  %16535 = vmatprep.mubr.msk.bf16.mxu0 %vm18175_vm0, %v22116_v6  ;;  %16659 = vmatprep.mubr.msk.bf16.mxu1 %vm18175_vm0, %v22116_v6 }
 0x320   : > { %v16297_v51 = vpop.f32.mrf.mxu0  ;;  %16764 = vmatpush3.bf16.msra.mxu0 %v17671_v8  ;;  %v16421_v4 = vpop.f32.mrf.mxu1  ;;  %v17695_v8 = vld [vmem:[#allocation10 + $0x210] sm:$0xff]  }
 0x321   : > { %v19796_v39 = vadd.f32 %v5122_v14, %v4675_v5  ;;  %16765 = vmatprep.subr.bf16.mxu0 %v22116_v6  ;;  %v17662_v14 = vld [vmem:[#allocation3 + $0x18] sm:$0xff]  }
 0x322   : > { %v4433_v1 = vpop.f32.mrf.mxu0  ;;  %v5125_v41 = vpop.f32.mrf.mxu1 }
 0x323   : > { %v4676_v21 = vadd.f32 %v4433_v1, %v19357_v32 }
 0x324   : > { %v16298_v2 = vpop.f32.mrf.mxu0  ;;  %16766 = vmatpush3.bf16.msra.mxu0 %v17680_v10  ;;  %v16422_v55 = vpop.f32.mrf.mxu1  ;;  %v17663_v10 = vld [vmem:[#allocation3 + $0x24] sm:$0xff]  }
 0x325   : > { %v19800_v36 = vadd.f32 %v5125_v41, %v4676_v21  ;;  %16767 = vmatprep.subr.bf16.mxu0 %v22116_v6 }
 0x326   : > { %v4438_v28 = vpop.f32.mrf.mxu0  ;;  %16536 = vmatmul.mubr.bf16.gmra.mxu0 %v17660_v59  ;;  %v5130_v29 = vpop.f32.mrf.mxu1  ;;  %16660 = vmatmul.mubr.bf16.gmra.mxu1 %v17661_v50 }
 0x327   : > { %v4677_v35 = vadd.f32 %v4438_v28, %v19370_v49  ;;  %16539 = vmatprep.mubr.msk.bf16.mxu0 %vm18175_vm0, %v22116_v6  ;;  %16663 = vmatprep.mubr.msk.bf16.mxu1 %vm18175_vm0, %v22116_v6  ;;  %v17665_v28 = vld [vmem:[#allocation3 + $0x20] sm:$0xff]  }
 0x328   : > { %v16301_v32 = vpop.f32.mrf.mxu0  ;;  %16768 = vmatpush3.bf16.msra.mxu0 %v17687_v37  ;;  %v16425_v31 = vpop.f32.mrf.mxu1 }
 0x329   : > { %v19808_v26 = vadd.f32 %v5130_v29, %v4677_v35  ;;  %16769 = vmatprep.subr.bf16.mxu0 %v22116_v6  ;;  %v17666_v32 = vld [vmem:[#allocation3 + $0x2c] sm:$0xff]  }
 0x32a   : > { %v4441_v5 = vpop.f32.mrf.mxu0  ;;  %v5133_v51 = vpop.f32.mrf.mxu1 }
 0x32b   : > { %v4678_v49 = vadd.f32 %v4441_v5, %v19382_v0 }
 0x32c   : > { %v16302_v4 = vpop.f32.mrf.mxu0  ;;  %16770 = vmatpush3.bf16.msra.mxu0 %v17695_v8  ;;  %v16426_v59 = vpop.f32.mrf.mxu1 }
 0x32d   : > { %v19812_v1 = vadd.f32 %v5133_v51, %v4678_v49  ;;  %16771 = vmatprep.subr.bf16.mxu0 %v22116_v6  ;;  %v17703_v4 = vld [vmem:[#allocation10 + $0x208] sm:$0xff]  }
 0x32e   : > { %v4446_v21 = vpop.f32.mrf.mxu0  ;;  %16540 = vmatmul.mubr.bf16.gmra.mxu0 %v17662_v14  ;;  %v5138_v50 = vpop.f32.mrf.mxu1  ;;  %16664 = vmatmul.mubr.bf16.gmra.mxu1 %v17663_v10 }
 0x32f   : > { %v4679_v41 = vadd.f32 %v4446_v21, %v19395_v33  ;;  %16543 = vmatprep.mubr.msk.bf16.mxu0 %vm18175_vm0, %v22116_v6  ;;  %16667 = vmatprep.mubr.msk.bf16.mxu1 %vm18175_vm0, %v22116_v6  ;;  %v17667_v21 = vld [vmem:[#allocation3 + $0x28] sm:$0xff]  }
 0x330   : > { %v16305_v2 = vpop.f32.mrf.mxu0  ;;  %v16429_v37 = vpop.f32.mrf.mxu1  ;;  %16772 = vmatpush3.bf16.msra.mxu0 %v17703_v4 }
 0x331   : > { %v19820_v0 = vadd.f32 %v5138_v50, %v4679_v41  ;;  %v22196_v41 = vld [vmem:[#allocation65_spill] sm:$0xff]  ;;  %16773 = vmatprep.subr.bf16.mxu0 %v22116_v6 }
 0x332   : > { %v4449_v55 = vpop.f32.mrf.mxu0  ;;  %v5141_v29 = vpop.f32.mrf.mxu1  ;;  %v17668_v37 = vld [vmem:[#allocation3 + $0x34] sm:$0xff]  }
 0x333   : > { %v4680_v35 = vadd.f32 %v4449_v55, %v19406_v22 }
 0x334   : > { %v16306_v8 = vpop.f32.mrf.mxu0  ;;  %v16430_v31 = vpop.f32.mrf.mxu1 }
 0x335   : > { %v19823_v33 = vadd.f32 %v5141_v29, %v4680_v35  ;;  %v22197_v29 = vld [vmem:[#allocation66_spill] sm:$0xff] }
 0x336   : > { %v4454_v5 = vpop.f32.mrf.mxu0  ;;  %16544 = vmatmul.mubr.bf16.gmra.mxu0 %v17665_v28  ;;  %v5146_v49 = vpop.f32.mrf.mxu1  ;;  %16668 = vmatmul.mubr.bf16.gmra.mxu1 %v17666_v32 }
 0x337   : > { %v4681_v14 = vadd.f32 %v4454_v5, %v19417_v16  ;;  %16547 = vmatprep.mubr.msk.bf16.mxu0 %vm18175_vm0, %v22116_v6  ;;  %16671 = vmatprep.mubr.msk.bf16.mxu1 %vm18175_vm0, %v22116_v6 }
 0x338   : > { %v16309_v51 = vpop.f32.mrf.mxu0  ;;  %v16433_v10 = vpop.f32.mrf.mxu1 }
 0x339   : > { %v19830_v22 = vadd.f32 %v5146_v49, %v4681_v14  ;;  %v17669_v51 = vld [vmem:[#allocation3 + $0x30] sm:$0xff]   ;;  %v22198_v10 = vld [vmem:[#allocation67_spill] sm:$0xff] }
 0x33a   : > { %v4457_v59 = vpop.f32.mrf.mxu0  ;;  %v5149_v2 = vpop.f32.mrf.mxu1 }
 0x33b   : > { %v4682_v50 = vadd.f32 %v4457_v59, %v22196_v41 }
 0x33c   : > { %v16310_v16 = vpop.f32.mrf.mxu0  ;;  %v16434_v28 = vpop.f32.mrf.mxu1 }
 0x33d   : > { %v19834_v55 = vadd.f32 %v5149_v2, %v4682_v50  ;;  %v22199_v16 = vld [vmem:[#allocation68_spill] sm:$0xff] }
 0x33e   : > { %v4462_v35 = vpop.f32.mrf.mxu0  ;;  %16548 = vmatmul.mubr.bf16.gmra.mxu0 %v17667_v21  ;;  %v5154_v8 = vpop.f32.mrf.mxu1  ;;  %16672 = vmatmul.mubr.bf16.gmra.mxu1 %v17668_v37  ;;  %v17670_v21 = vld [vmem:[#allocation3 + $0x3c] sm:$0xff]  }
 0x33f   : > { %v4683_v32 = vadd.f32 %v4462_v35, %v22197_v29  ;;  %16551 = vmatprep.mubr.msk.bf16.mxu0 %vm18175_vm0, %v22116_v6  ;;  %16675 = vmatprep.mubr.msk.bf16.mxu1 %vm18175_vm0, %v22116_v6 }
 0x340   : > { %v16313_v31 = vpop.f32.mrf.mxu0  ;;  %v16437_v14 = vpop.f32.mrf.mxu1 }
 0x341   : > { %v19841_v5 = vadd.f32 %v5154_v8, %v4683_v32  ;;  %v17672_v14 = vld [vmem:[#allocation3 + $0x38] sm:$0xff]  }
 0x342   : > { %v4465_v49 = vpop.f32.mrf.mxu0  ;;  %v5157_v59 = vpop.f32.mrf.mxu1 }
 0x343   : > { %v4684_v4 = vadd.f32 %v4465_v49, %v22198_v10  ;;  %v22201_v49 = vld [vmem:[#allocation69_spill] sm:$0xff] }
 0x344   : > { %v16314_v41 = vpop.f32.mrf.mxu0  ;;  %v16438_v2 = vpop.f32.mrf.mxu1 }
 0x345   : > { %v19844_v50 = vadd.f32 %v5157_v59, %v4684_v4 }
 0x346   : > { %v4470_v37 = vpop.f32.mrf.mxu0  ;;  %16552 = vmatmul.mubr.bf16.gmra.mxu0 %v17669_v51  ;;  %v5162_v35 = vpop.f32.mrf.mxu1  ;;  %16676 = vmatmul.mubr.bf16.gmra.mxu1 %v17670_v21  ;;  %v17673_v51 = vld [vmem:[#allocation3 + $0x44] sm:$0xff]  }
 0x347   : > { %v4685_v28 = vadd.f32 %v4470_v37, %v22199_v16  ;;  %16555 = vmatprep.mubr.msk.bf16.mxu0 %vm18175_vm0, %v22116_v6  ;;  %16679 = vmatprep.mubr.msk.bf16.mxu1 %vm18175_vm0, %v22116_v6  ;;  %v22203_v37 = vld [vmem:[#allocation70_spill] sm:$0xff] }
 0x348   : > { %v16317_v29 = vpop.f32.mrf.mxu0  ;;  %v16441_v8 = vpop.f32.mrf.mxu1 }
 0x349   : > { %v19851_v32 = vadd.f32 %v5162_v35, %v4685_v28 }
 0x34a   : > { %v4473_v31 = vpop.f32.mrf.mxu0  ;;  %v5165_v4 = vpop.f32.mrf.mxu1 }
 0x34b   : > { %22200 = vst [vmem:[#allocation55_spill] sm:$0xff] %v19851_v32  ;;  %v4686_v10 = vadd.f32 %v4473_v31, %v22201_v49  ;;  %v17674_v49 = vld [vmem:[#allocation3 + $0x40] sm:$0xff]  }
 0x34c   : > { %v16318_v59 = vpop.f32.mrf.mxu0  ;;  %v16442_v21 = vpop.f32.mrf.mxu1 }
 0x34d   : > { %v19854_v41 = vadd.f32 %v5165_v4, %v4686_v10  ;;  %v22205_v10 = vld [vmem:[#allocation71_spill] sm:$0xff] }
 0x34e   : > { %v4478_v2 = vpop.f32.mrf.mxu0  ;;  %16556 = vmatmul.mubr.bf16.gmra.mxu0 %v17672_v14  ;;  %v5170_v29 = vpop.f32.mrf.mxu1  ;;  %16680 = vmatmul.mubr.bf16.gmra.mxu1 %v17673_v51  ;;  %v17675_v14 = vld [vmem:[#allocation3 + $0x4c] sm:$0xff]  }
 0x34f   : > { %22202 = vst [vmem:[#allocation30_spill] sm:$0xff] %v19854_v41  ;;  %v4687_v16 = vadd.f32 %v4478_v2, %v22203_v37  ;;  %16559 = vmatprep.mubr.msk.bf16.mxu0 %vm18175_vm0, %v22116_v6  ;;  %16683 = vmatprep.mubr.msk.bf16.mxu1 %vm18175_vm0, %v22116_v6  ;;  %v17710_v37 = vld [vmem:[#allocation10 + $0x200] sm:$0xff]  }
 0x350   : > { %v16321_v28 = vpop.f32.mrf.mxu0  ;;  %v16445_v8 = vpop.f32.mrf.mxu1  ;;  %16774 = vmatpush3.bf16.msra.mxu0 %v17710_v37 }
 0x351   : > { %v19861_v35 = vadd.f32 %v5170_v29, %v4687_v16  ;;  %v22207_v28 = vld [vmem:[#allocation52_spill] sm:$0xff] }
 0x352   : > { %v4481_v31 = vpop.f32.mrf.mxu0  ;;  %v5173_v59 = vpop.f32.mrf.mxu1 }
 0x353   : > { %22204 = vst [vmem:[#allocation31_spill] sm:$0xff] %v19861_v35  ;;  %v4688_v4 = vadd.f32 %v4481_v31, %v22205_v10  ;;  %v17676_v10 = vld [vmem:[#allocation3 + $0x48] sm:$0xff]  }
 0x354   : > { %v16322_v21 = vpop.f32.mrf.mxu0  ;;  %v16446_v51 = vpop.f32.mrf.mxu1 }
 0x355   : > { %v19864_v2 = vadd.f32 %v5173_v59, %v4688_v4  ;;  %v22208_v4 = vld [vmem:[#allocation27_spill] sm:$0xff]  ;;  %v17677_v21 = vld [vmem:[#allocation3 + $0x54] sm:$0xff]  }
 0x356   : > { %v4486_v48 = vpop.f32.mrf.mxu0  ;;  %16560 = vmatmul.mubr.bf16.gmra.mxu0 %v17674_v49  ;;  %v5178_v32 = vpop.f32.mrf.mxu1  ;;  %16684 = vmatmul.mubr.bf16.gmra.mxu1 %v17675_v14 }
 0x357   : > { %22206 = vst [vmem:[#allocation32_spill] sm:$0xff] %v19864_v2  ;;  %v4689_v41 = vadd.f32 %v4486_v48, %v22207_v28  ;;  %16563 = vmatprep.mubr.msk.bf16.mxu0 %vm18175_vm0, %v22116_v6  ;;  %16687 = vmatprep.mubr.msk.bf16.mxu1 %vm18175_vm0, %v22116_v6 }
 0x358   : > { %v16325_v16 = vpop.f32.mrf.mxu0  ;;  %v16449_v8 = vpop.f32.mrf.mxu1 }
 0x359   : > { %v19871_v29 = vadd.f32 %v5178_v32, %v4689_v41  ;;  %v22210_v16 = vld [vmem:[#allocation51_spill] sm:$0xff] }
 0x35a   : > { %v4489_v31 = vpop.f32.mrf.mxu0  ;;  %v5181_v49 = vpop.f32.mrf.mxu1 }
 0x35b   : > { %v4690_v59 = vadd.f32 %v4489_v31, %v22208_v4  ;;  %v17678_v31 = vld [vmem:[#allocation3 + $0x50] sm:$0xff]   ;;  %v22211_v4 = vld [vmem:[#allocation28_spill] sm:$0xff] }
 0x35c   : > { %v16326_v48 = vpop.f32.mrf.mxu0  ;;  %v16450_v14 = vpop.f32.mrf.mxu1 }
 0x35d   : > { %v19874_v51 = vadd.f32 %v5181_v49, %v4690_v59 }
 0x35e   : > { %v4494_v28 = vpop.f32.mrf.mxu0  ;;  %16564 = vmatmul.mubr.bf16.gmra.mxu0 %v17676_v10  ;;  %v5186_v35 = vpop.f32.mrf.mxu1  ;;  %16688 = vmatmul.mubr.bf16.gmra.mxu1 %v17677_v21  ;;  %v17679_v10 = vld [vmem:[#allocation3 + $0x5c] sm:$0xff]  }
 0x35f   : > { %22209 = vst [vmem:[#allocation33_spill] sm:$0xff] %v19874_v51  ;;  %v4691_v2 = vadd.f32 %v4494_v28, %v22210_v16  ;;  %16567 = vmatprep.mubr.msk.bf16.mxu0 %vm18175_vm0, %v22116_v6  ;;  %16691 = vmatprep.mubr.msk.bf16.mxu1 %vm18175_vm0, %v22116_v6  ;;  %v22212_v16 = vld [vmem:[#allocation29_spill] sm:$0xff] }
 0x360   : > { %v16329_v32 = vpop.f32.mrf.mxu0  ;;  %v16453_v37 = vpop.f32.mrf.mxu1 }
 0x361   : > { %v19881_v41 = vadd.f32 %v5186_v35, %v4691_v2 }
 0x362   : > { %v4497_v8 = vpop.f32.mrf.mxu0  ;;  %v5189_v49 = vpop.f32.mrf.mxu1 }
 0x363   : > { %v4692_v59 = vadd.f32 %v4497_v8, %v22211_v4  ;;  %v17681_v4 = vld [vmem:[#allocation3 + $0x58] sm:$0xff]  }
 0x364   : > { %v16330_v48 = vpop.f32.mrf.mxu0  ;;  %v16454_v21 = vpop.f32.mrf.mxu1 }
 0x365   : > { %v19884_v14 = vadd.f32 %v5189_v49, %v4692_v59 }
 0x366   : > { %v4502_v28 = vpop.f32.mrf.mxu0  ;;  %16568 = vmatmul.mubr.bf16.gmra.mxu0 %v17678_v31  ;;  %v5194_v51 = vpop.f32.mrf.mxu1  ;;  %16692 = vmatmul.mubr.bf16.gmra.mxu1 %v17679_v10  ;;  %v17682_v31 = vld [vmem:[#allocation3 + $0x64] sm:$0xff]  }
 0x367   : > { %v4693_v32 = vadd.f32 %v4502_v28, %v22212_v16  ;;  %16571 = vmatprep.mubr.msk.bf16.mxu0 %vm18175_vm0, %v22116_v6  ;;  %16695 = vmatprep.mubr.msk.bf16.mxu1 %vm18175_vm0, %v22116_v6 }
 0x368   : > { %v16333_v35 = vpop.f32.mrf.mxu0  ;;  %v16457_v37 = vpop.f32.mrf.mxu1 }
 0x369   : > { %v19891_v2 = vadd.f32 %v5194_v51, %v4693_v32 }
 0x36a   : > { %v4505_v8 = vpop.f32.mrf.mxu0  ;;  %v5197_v49 = vpop.f32.mrf.mxu1 }
 0x36b   : > { %v4694_v59 = vadd.f32 %v4505_v8, %v19583_v57  ;;  %v17683_v8 = vld [vmem:[#allocation3 + $0x60] sm:$0xff]  }
 0x36c   : > { %v16334_v48 = vpop.f32.mrf.mxu0  ;;  %v16458_v10 = vpop.f32.mrf.mxu1 }
 0x36d   : > { %v19894_v21 = vadd.f32 %v5197_v49, %v4694_v59 }
 0x36e   : > { %v4510_v28 = vpop.f32.mrf.mxu0  ;;  %16572 = vmatmul.mubr.bf16.gmra.mxu0 %v17681_v4  ;;  %v5202_v35 = vpop.f32.mrf.mxu1  ;;  %16696 = vmatmul.mubr.bf16.gmra.mxu1 %v17682_v31  ;;  %v17684_v4 = vld [vmem:[#allocation3 + $0x6c] sm:$0xff]  }
 0x36f   : > { %v4695_v16 = vadd.f32 %v4510_v28, %v19594_v38  ;;  %16575 = vmatprep.mubr.msk.bf16.mxu0 %vm18175_vm0, %v22116_v6  ;;  %16699 = vmatprep.mubr.msk.bf16.mxu1 %vm18175_vm0, %v22116_v6 }
 0x370   : > { %v16337_v51 = vpop.f32.mrf.mxu0  ;;  %v16461_v32 = vpop.f32.mrf.mxu1 }
 0x371   : > { %v19901_v57 = vadd.f32 %v5202_v35, %v4695_v16 }
 0x372   : > { %v4513_v37 = vpop.f32.mrf.mxu0  ;;  %v5205_v49 = vpop.f32.mrf.mxu1 }
 0x373   : > { %v4696_v59 = vadd.f32 %v4513_v37, %v19597_v30  ;;  %v17685_v37 = vld [vmem:[#allocation3 + $0x68] sm:$0xff]  }
 0x374   : > { %v16338_v48 = vpop.f32.mrf.mxu0  ;;  %v16462_v31 = vpop.f32.mrf.mxu1 }
 0x375   : > { %v19904_v38 = vadd.f32 %v5205_v49, %v4696_v59 }
 0x376   : > { %v4518_v10 = vpop.f32.mrf.mxu0  ;;  %16576 = vmatmul.mubr.bf16.gmra.mxu0 %v17683_v8  ;;  %v5210_v51 = vpop.f32.mrf.mxu1  ;;  %16700 = vmatmul.mubr.bf16.gmra.mxu1 %v17684_v4  ;;  %v17686_v8 = vld [vmem:[#allocation3 + $0x74] sm:$0xff]  }
 0x377   : > { %v4697_v28 = vadd.f32 %v4518_v10, %v19606_v61  ;;  %16579 = vmatprep.mubr.msk.bf16.mxu0 %vm18175_vm0, %v22116_v6  ;;  %16703 = vmatprep.mubr.msk.bf16.mxu1 %vm18175_vm0, %v22116_v6 }
 0x378   : > { %v16341_v16 = vpop.f32.mrf.mxu0  ;;  %v16465_v35 = vpop.f32.mrf.mxu1 }
 0x379   : > { %v19911_v30 = vadd.f32 %v5210_v51, %v4697_v28 }
 0x37a   : > { %v4521_v32 = vpop.f32.mrf.mxu0  ;;  %v5213_v49 = vpop.f32.mrf.mxu1 }
 0x37b   : > { %v4698_v59 = vadd.f32 %v4521_v32, %v19609_v11  ;;  %v17688_v32 = vld [vmem:[#allocation3 + $0x70] sm:$0xff]  }
 0x37c   : > { %v16342_v48 = vpop.f32.mrf.mxu0  ;;  %v16466_v4 = vpop.f32.mrf.mxu1 }
 0x37d   : > { %v19914_v61 = vadd.f32 %v5213_v49, %v4698_v59 }
 0x37e   : > { %v4526_v31 = vpop.f32.mrf.mxu0  ;;  %16580 = vmatmul.mubr.bf16.gmra.mxu0 %v17685_v37  ;;  %v5218_v16 = vpop.f32.mrf.mxu1  ;;  %16704 = vmatmul.mubr.bf16.gmra.mxu1 %v17686_v8  ;;  %v17689_v37 = vld [vmem:[#allocation3 + $0x7c] sm:$0xff]  }
 0x37f   : > { %v4699_v10 = vadd.f32 %v4526_v31, %v19618_v53  ;;  %16583 = vmatprep.mubr.msk.bf16.mxu0 %vm18175_vm0, %v22116_v6  ;;  %16707 = vmatprep.mubr.msk.bf16.mxu1 %vm18175_vm0, %v22116_v6 }
 0x380   : > { %v16345_v28 = vpop.f32.mrf.mxu0  ;;  %v16469_v51 = vpop.f32.mrf.mxu1 }
 0x381   : > { %v19921_v11 = vadd.f32 %v5218_v16, %v4699_v10 }
 0x382   : > { %v4529_v35 = vpop.f32.mrf.mxu0  ;;  %v5221_v49 = vpop.f32.mrf.mxu1 }
 0x383   : > { %v4700_v59 = vadd.f32 %v4529_v35, %v19621_v43  ;;  %v17690_v35 = vld [vmem:[#allocation3 + $0x78] sm:$0xff]  }
 0x384   : > { %v16346_v48 = vpop.f32.mrf.mxu0  ;;  %v16470_v8 = vpop.f32.mrf.mxu1 }
 0x385   : > { %v19924_v53 = vadd.f32 %v5221_v49, %v4700_v59 }
 0x386   : > { %v4534_v4 = vpop.f32.mrf.mxu0  ;;  %16584 = vmatmul.mubr.bf16.gmra.mxu0 %v17688_v32  ;;  %v5226_v28 = vpop.f32.mrf.mxu1  ;;  %16708 = vmatmul.mubr.bf16.gmra.mxu1 %v17689_v37  ;;  %v17691_v32 = vld [vmem:[#allocation3 + $0x84] sm:$0xff]  }
 0x387   : > { %v4701_v31 = vadd.f32 %v4534_v4, %v19630_v45  ;;  %16587 = vmatprep.mubr.msk.bf16.mxu0 %vm18175_vm0, %v22116_v6  ;;  %16711 = vmatprep.mubr.msk.bf16.mxu1 %vm18175_vm0, %v22116_v6 }
 0x388   : > { %v16349_v10 = vpop.f32.mrf.mxu0  ;;  %v16473_v16 = vpop.f32.mrf.mxu1 }
 0x389   : > { %v19931_v43 = vadd.f32 %v5226_v28, %v4701_v31 }
 0x38a   : > { %v4537_v51 = vpop.f32.mrf.mxu0  ;;  %v5229_v49 = vpop.f32.mrf.mxu1 }
 0x38b   : > { %v4702_v59 = vadd.f32 %v4537_v51, %v19633_v47  ;;  %v17692_v51 = vld [vmem:[#allocation3 + $0x80] sm:$0xff]  }
 0x38c   : > { %v16350_v48 = vpop.f32.mrf.mxu0  ;;  %v16474_v37 = vpop.f32.mrf.mxu1 }
 0x38d   : > { %v19934_v45 = vadd.f32 %v5229_v49, %v4702_v59 }
 0x38e   : > { %v4542_v8 = vpop.f32.mrf.mxu0  ;;  %16588 = vmatmul.mubr.bf16.gmra.mxu0 %v17690_v35  ;;  %v5234_v10 = vpop.f32.mrf.mxu1  ;;  %16712 = vmatmul.mubr.bf16.gmra.mxu1 %v17691_v32  ;;  %v17693_v35 = vld [vmem:[#allocation3 + $0x8c] sm:$0xff]  }
 0x38f   : > { %v4703_v4 = vadd.f32 %v4542_v8, %v19642_v18  ;;  %16591 = vmatprep.mubr.msk.bf16.mxu0 %vm18175_vm0, %v22116_v6  ;;  %16715 = vmatprep.mubr.msk.bf16.mxu1 %vm18175_vm0, %v22116_v6 }
 0x390   : > { %v16353_v31 = vpop.f32.mrf.mxu0  ;;  %v16477_v28 = vpop.f32.mrf.mxu1 }
 0x391   : > { %v19941_v47 = vadd.f32 %v5234_v10, %v4703_v4 }
 0x392   : > { %v4545_v16 = vpop.f32.mrf.mxu0  ;;  %v5237_v49 = vpop.f32.mrf.mxu1 }
 0x393   : > { %v4704_v59 = vadd.f32 %v4545_v16, %v19645_v54  ;;  %v17694_v16 = vld [vmem:[#allocation3 + $0x88] sm:$0xff]  }
 0x394   : > { %v16354_v48 = vpop.f32.mrf.mxu0  ;;  %v16478_v32 = vpop.f32.mrf.mxu1 }
 0x395   : > { %v19944_v18 = vadd.f32 %v5237_v49, %v4704_v59 }
 0x396   : > { %v4550_v37 = vpop.f32.mrf.mxu0  ;;  %16592 = vmatmul.mubr.bf16.gmra.mxu0 %v17692_v51  ;;  %v5242_v31 = vpop.f32.mrf.mxu1  ;;  %16716 = vmatmul.mubr.bf16.gmra.mxu1 %v17693_v35  ;;  %v17696_v51 = vld [vmem:[#allocation3 + $0x94] sm:$0xff]  }
 0x397   : > { %v4705_v8 = vadd.f32 %v4550_v37, %v19654_v58  ;;  %16595 = vmatprep.mubr.msk.bf16.mxu0 %vm18175_vm0, %v22116_v6  ;;  %16719 = vmatprep.mubr.msk.bf16.mxu1 %vm18175_vm0, %v22116_v6 }
 0x398   : > { %v16357_v4 = vpop.f32.mrf.mxu0  ;;  %v16481_v10 = vpop.f32.mrf.mxu1 }
 0x399   : > { %v19951_v54 = vadd.f32 %v5242_v31, %v4705_v8 }
 0x39a   : > { %v4553_v28 = vpop.f32.mrf.mxu0  ;;  %v5245_v49 = vpop.f32.mrf.mxu1 }
 0x39b   : > { %v4706_v59 = vadd.f32 %v4553_v28, %v19657_v44  ;;  %v17697_v28 = vld [vmem:[#allocation3 + $0x90] sm:$0xff]  }
 0x39c   : > { %v16358_v48 = vpop.f32.mrf.mxu0  ;;  %v16482_v35 = vpop.f32.mrf.mxu1 }
 0x39d   : > { %v19954_v58 = vadd.f32 %v5245_v49, %v4706_v59 }
 0x39e   : > { %v4558_v32 = vpop.f32.mrf.mxu0  ;;  %16596 = vmatmul.mubr.bf16.gmra.mxu0 %v17694_v16  ;;  %v5250_v4 = vpop.f32.mrf.mxu1  ;;  %16720 = vmatmul.mubr.bf16.gmra.mxu1 %v17696_v51  ;;  %v17698_v16 = vld [vmem:[#allocation3 + $0x9c] sm:$0xff]  }
 0x39f   : > { %v4707_v37 = vadd.f32 %v4558_v32, %v19666_v27  ;;  %16599 = vmatprep.mubr.msk.bf16.mxu0 %vm18175_vm0, %v22116_v6  ;;  %16723 = vmatprep.mubr.msk.bf16.mxu1 %vm18175_vm0, %v22116_v6 }
 0x3a0   : > { %v16361_v8 = vpop.f32.mrf.mxu0  ;;  %v16485_v31 = vpop.f32.mrf.mxu1 }
 0x3a1   : > { %v19961_v44 = vadd.f32 %v5250_v4, %v4707_v37 }
 0x3a2   : > { %v4561_v10 = vpop.f32.mrf.mxu0  ;;  %v5253_v49 = vpop.f32.mrf.mxu1 }
 0x3a3   : > { %v4708_v59 = vadd.f32 %v4561_v10, %v19669_v13  ;;  %v17699_v10 = vld [vmem:[#allocation3 + $0x98] sm:$0xff]  }
 0x3a4   : > { %v16362_v48 = vpop.f32.mrf.mxu0  ;;  %v16486_v51 = vpop.f32.mrf.mxu1 }
 0x3a5   : > { %v19964_v27 = vadd.f32 %v5253_v49, %v4708_v59 }
 0x3a6   : > { %v4566_v35 = vpop.f32.mrf.mxu0  ;;  %16600 = vmatmul.mubr.bf16.gmra.mxu0 %v17697_v28  ;;  %v5258_v8 = vpop.f32.mrf.mxu1  ;;  %16724 = vmatmul.mubr.bf16.gmra.mxu1 %v17698_v16  ;;  %v17700_v28 = vld [vmem:[#allocation3 + $0xa4] sm:$0xff]  }
 0x3a7   : > { %v4709_v32 = vadd.f32 %v4566_v35, %v19678_v15  ;;  %16603 = vmatprep.mubr.msk.bf16.mxu0 %vm18175_vm0, %v22116_v6  ;;  %16727 = vmatprep.mubr.msk.bf16.mxu1 %vm18175_vm0, %v22116_v6 }
 0x3a8   : > { %v16365_v37 = vpop.f32.mrf.mxu0  ;;  %v16489_v4 = vpop.f32.mrf.mxu1 }
 0x3a9   : > { %v19971_v13 = vadd.f32 %v5258_v8, %v4709_v32 }
 0x3aa   : > { %v4569_v31 = vpop.f32.mrf.mxu0  ;;  %v5261_v49 = vpop.f32.mrf.mxu1 }
 0x3ab   : > { %v4710_v59 = vadd.f32 %v4569_v31, %v19681_v3  ;;  %v17701_v31 = vld [vmem:[#allocation3 + $0xa0] sm:$0xff]  }
 0x3ac   : > { %v16366_v48 = vpop.f32.mrf.mxu0  ;;  %v16490_v16 = vpop.f32.mrf.mxu1 }
 0x3ad   : > { %v19974_v15 = vadd.f32 %v5261_v49, %v4710_v59 }
 0x3ae   : > { %v4574_v51 = vpop.f32.mrf.mxu0  ;;  %16604 = vmatmul.mubr.bf16.gmra.mxu0 %v17699_v10  ;;  %v5266_v37 = vpop.f32.mrf.mxu1  ;;  %16728 = vmatmul.mubr.bf16.gmra.mxu1 %v17700_v28  ;;  %v17702_v10 = vld [vmem:[#allocation3 + $0xac] sm:$0xff]  }
 0x3af   : > { %v4711_v35 = vadd.f32 %v4574_v51, %v19690_v12  ;;  %16607 = vmatprep.mubr.msk.bf16.mxu0 %vm18175_vm0, %v22116_v6  ;;  %16731 = vmatprep.mubr.msk.bf16.mxu1 %vm18175_vm0, %v22116_v6 }
 0x3b0   : > { %v16369_v32 = vpop.f32.mrf.mxu0  ;;  %v16493_v8 = vpop.f32.mrf.mxu1 }
 0x3b1   : > { %v19981_v3 = vadd.f32 %v5266_v37, %v4711_v35 }
 0x3b2   : > { %v4577_v4 = vpop.f32.mrf.mxu0  ;;  %v5269_v49 = vpop.f32.mrf.mxu1 }
 0x3b3   : > { %v4712_v59 = vadd.f32 %v4577_v4, %v19693_v42  ;;  %v17704_v4 = vld [vmem:[#allocation3 + $0xa8] sm:$0xff]  }
 0x3b4   : > { %v16370_v48 = vpop.f32.mrf.mxu0  ;;  %v16494_v28 = vpop.f32.mrf.mxu1 }
 0x3b5   : > { %v19984_v12 = vadd.f32 %v5269_v49, %v4712_v59 }
 0x3b6   : > { %v4582_v16 = vpop.f32.mrf.mxu0  ;;  %16608 = vmatmul.mubr.bf16.gmra.mxu0 %v17701_v31  ;;  %v5274_v32 = vpop.f32.mrf.mxu1  ;;  %16732 = vmatmul.mubr.bf16.gmra.mxu1 %v17702_v10  ;;  %v17705_v31 = vld [vmem:[#allocation3 + $0xb4] sm:$0xff]  }
 0x3b7   : > { %v4713_v51 = vadd.f32 %v4582_v16, %v19702_v60  ;;  %16611 = vmatprep.mubr.msk.bf16.mxu0 %vm18175_vm0, %v22116_v6  ;;  %16735 = vmatprep.mubr.msk.bf16.mxu1 %vm18175_vm0, %v22116_v6 }
 0x3b8   : > { %v16373_v35 = vpop.f32.mrf.mxu0  ;;  %v16497_v37 = vpop.f32.mrf.mxu1 }
 0x3b9   : > { %v19991_v42 = vadd.f32 %v5274_v32, %v4713_v51 }
 0x3ba   : > { %v4585_v8 = vpop.f32.mrf.mxu0  ;;  %v5277_v49 = vpop.f32.mrf.mxu1 }
 0x3bb   : > { %v4714_v59 = vadd.f32 %v4585_v8, %v19705_v19  ;;  %v17706_v8 = vld [vmem:[#allocation3 + $0xb0] sm:$0xff]  }
 0x3bc   : > { %v16374_v48 = vpop.f32.mrf.mxu0  ;;  %v16498_v10 = vpop.f32.mrf.mxu1 }
 0x3bd   : > { %v19994_v60 = vadd.f32 %v5277_v49, %v4714_v59 }
 0x3be   : > { %v4590_v28 = vpop.f32.mrf.mxu0  ;;  %16612 = vmatmul.mubr.bf16.gmra.mxu0 %v17704_v4  ;;  %v5282_v35 = vpop.f32.mrf.mxu1  ;;  %16736 = vmatmul.mubr.bf16.gmra.mxu1 %v17705_v31  ;;  %v17707_v4 = vld [vmem:[#allocation3 + $0xbc] sm:$0xff]  }
 0x3bf   : > { %v4715_v16 = vadd.f32 %v4590_v28, %v19714_v46  ;;  %16615 = vmatprep.mubr.msk.bf16.mxu0 %vm18175_vm0, %v22116_v6  ;;  %16739 = vmatprep.mubr.msk.bf16.mxu1 %vm18175_vm0, %v22116_v6 }
 0x3c0   : > { %v16377_v51 = vpop.f32.mrf.mxu0  ;;  %v16501_v32 = vpop.f32.mrf.mxu1 }
 0x3c1   : > { %v20001_v19 = vadd.f32 %v5282_v35, %v4715_v16 }
 0x3c2   : > { %v4593_v37 = vpop.f32.mrf.mxu0  ;;  %v5285_v49 = vpop.f32.mrf.mxu1 }
 0x3c3   : > { %v4716_v59 = vadd.f32 %v4593_v37, %v19717_v34  ;;  %v17708_v37 = vld [vmem:[#allocation3 + $0xb8] sm:$0xff]  }
 0x3c4   : > { %v16378_v48 = vpop.f32.mrf.mxu0  ;;  %v16502_v31 = vpop.f32.mrf.mxu1 }
 0x3c5   : > { %v20004_v46 = vadd.f32 %v5285_v49, %v4716_v59 }
 0x3c6   : > { %v4598_v10 = vpop.f32.mrf.mxu0  ;;  %16616 = vmatmul.mubr.bf16.gmra.mxu0 %v17706_v8  ;;  %v5290_v51 = vpop.f32.mrf.mxu1  ;;  %16740 = vmatmul.mubr.bf16.gmra.mxu1 %v17707_v4  ;;  %v17709_v8 = vld [vmem:[#allocation3 + $0xc4] sm:$0xff]  }
 0x3c7   : > { %v4717_v28 = vadd.f32 %v4598_v10, %v19726_v25  ;;  %16619 = vmatprep.mubr.msk.bf16.mxu0 %vm18175_vm0, %v22116_v6  ;;  %16743 = vmatprep.mubr.msk.bf16.mxu1 %vm18175_vm0, %v22116_v6 }
 0x3c8   : > { %v16381_v16 = vpop.f32.mrf.mxu0  ;;  %v16505_v35 = vpop.f32.mrf.mxu1 }
 0x3c9   : > { %v20011_v34 = vadd.f32 %v5290_v51, %v4717_v28 }
 0x3ca   : > { %v4601_v32 = vpop.f32.mrf.mxu0  ;;  %v5293_v49 = vpop.f32.mrf.mxu1 }
 0x3cb   : > { %v4718_v59 = vadd.f32 %v4601_v32, %v19729_v52  ;;  %v17711_v32 = vld [vmem:[#allocation3 + $0xc0] sm:$0xff]  }
 0x3cc   : > { %v16382_v48 = vpop.f32.mrf.mxu0  ;;  %v16506_v4 = vpop.f32.mrf.mxu1 }
 0x3cd   : > { %v20014_v25 = vadd.f32 %v5293_v49, %v4718_v59 }
 0x3ce   : > { %v4606_v31 = vpop.f32.mrf.mxu0  ;;  %16620 = vmatmul.mubr.bf16.gmra.mxu0 %v17708_v37  ;;  %v5298_v16 = vpop.f32.mrf.mxu1  ;;  %16744 = vmatmul.mubr.bf16.gmra.mxu1 %v17709_v8  ;;  %v17712_v37 = vld [vmem:[#allocation3 + $0xcc] sm:$0xff]  }
 0x3cf   : > { %v4719_v10 = vadd.f32 %v4606_v31, %v19738_v56  ;;  %16623 = vmatprep.mubr.msk.bf16.mxu0 %vm18175_vm0, %v22116_v6  ;;  %16747 = vmatprep.mubr.msk.bf16.mxu1 %vm18175_vm0, %v22116_v6 }
 0x3d0   : > { %v16385_v28 = vpop.f32.mrf.mxu0  ;;  %v16509_v51 = vpop.f32.mrf.mxu1 }
 0x3d1   : > { %v20021_v52 = vadd.f32 %v5298_v16, %v4719_v10 }
 0x3d2   : > { %v4609_v35 = vpop.f32.mrf.mxu0  ;;  %v5301_v49 = vpop.f32.mrf.mxu1 }
 0x3d3   : > { %v4720_v59 = vadd.f32 %v4609_v35, %v19741_v9  ;;  %v17713_v35 = vld [vmem:[#allocation3 + $0xc8] sm:$0xff]  }
 0x3d4   : > { %v16386_v48 = vpop.f32.mrf.mxu0  ;;  %v16510_v8 = vpop.f32.mrf.mxu1 }
 0x3d5   : > { %v20024_v56 = vadd.f32 %v5301_v49, %v4720_v59 }
 0x3d6   : > { %v6265_v4 = vpop.f32.mrf.mxu0  ;;  %16624 = vmatmul.mubr.bf16.gmra.mxu0 %v17711_v32  ;;  %v6957_v28 = vpop.f32.mrf.mxu1  ;;  %16748 = vmatmul.mubr.bf16.gmra.mxu1 %v17712_v37  ;;  %v17714_v32 = vld [vmem:[#allocation3 + $0xd4] sm:$0xff]  }
 0x3d7   : > { %v6534_v31 = vadd.f32 %v6265_v4, %v19750_v23  ;;  %16627 = vmatprep.mubr.msk.bf16.mxu0 %vm18175_vm0, %v22116_v6  ;;  %16751 = vmatprep.mubr.msk.bf16.mxu1 %vm18175_vm0, %v22116_v6 }
 0x3d8   : > { %v16529_v10 = vpop.f32.mrf.mxu0  ;;  %v16653_v16 = vpop.f32.mrf.mxu1 }
 0x3d9   : > { %v20031_v9 = vadd.f32 %v6957_v28, %v6534_v31 }
 0x3da   : > { %v6268_v51 = vpop.f32.mrf.mxu0  ;;  %v6960_v49 = vpop.f32.mrf.mxu1 }
 0x3db   : > { %v6535_v59 = vadd.f32 %v6268_v51, %v19753_v63  ;;  %v17715_v51 = vld [vmem:[#allocation3 + $0xd0] sm:$0xff]  }
 0x3dc   : > { %v16530_v48 = vpop.f32.mrf.mxu0  ;;  %v16654_v37 = vpop.f32.mrf.mxu1 }
 0x3dd   : > { %v20034_v23 = vadd.f32 %v6960_v49, %v6535_v59 }
 0x3de   : > { %v6273_v8 = vpop.f32.mrf.mxu0  ;;  %16628 = vmatmul.mubr.bf16.gmra.mxu0 %v17713_v35  ;;  %v6965_v10 = vpop.f32.mrf.mxu1  ;;  %16752 = vmatmul.mubr.bf16.gmra.mxu1 %v17714_v32  ;;  %v17716_v35 = vld [vmem:[#allocation3 + $0xdc] sm:$0xff]  }
 0x3df   : > { %v6536_v4 = vadd.f32 %v6273_v8, %v19762_v7  ;;  %16631 = vmatprep.mubr.msk.bf16.mxu0 %vm18175_vm0, %v22116_v6  ;;  %16755 = vmatprep.mubr.msk.bf16.mxu1 %vm18175_vm0, %v22116_v6 }
 0x3e0   : > { %v16533_v31 = vpop.f32.mrf.mxu0  ;;  %v16657_v28 = vpop.f32.mrf.mxu1 }
 0x3e1   : > { %v20041_v63 = vadd.f32 %v6965_v10, %v6536_v4 }
 0x3e2   : > { %v6276_v16 = vpop.f32.mrf.mxu0  ;;  %v6968_v49 = vpop.f32.mrf.mxu1 }
 0x3e3   : > { %v6537_v59 = vadd.f32 %v6276_v16, %v19765_v20  ;;  %v17717_v16 = vld [vmem:[#allocation3 + $0x18] sm:$0xff]  }
 0x3e4   : > { %v16534_v48 = vpop.f32.mrf.mxu0  ;;  %v16658_v32 = vpop.f32.mrf.mxu1 }
 0x3e5   : > { %v20044_v7 = vadd.f32 %v6968_v49, %v6537_v59 }
 0x3e6   : > { %v6281_v37 = vpop.f32.mrf.mxu0  ;;  %16632 = vmatmul.mubr.bf16.gmra.mxu0 %v17715_v51  ;;  %v6973_v31 = vpop.f32.mrf.mxu1  ;;  %16756 = vmatmul.mubr.bf16.gmra.mxu1 %v17716_v35 }
 0x3e7   : > { %22213 = vst [vmem:[#allocation60_spill] sm:$0xff] %v20044_v7  ;;  %v6538_v8 = vadd.f32 %v6281_v37, %v19774_v24  ;;  %16775 = vmatprep.mubr.msk.bf16.mxu0 %vm18175_vm0, %v22116_v6 }
 0x3e8   : > { %v16537_v4 = vpop.f32.mrf.mxu0  ;;  %v16661_v28 = vpop.f32.mrf.mxu1 }
 0x3e9   : > { %v20049_v10 = vadd.f32 %v6973_v31, %v6538_v8  ;;  %v17718_v28 = vld [vmem:[#allocation3 + $0x20] sm:$0xff]  }
 0x3ea   : > { %v6284_v20 = vpop.f32.mrf.mxu0  ;;  %v6976_v59 = vpop.f32.mrf.mxu1 }
 0x3eb   : > { %v6539_v48 = vadd.f32 %v6284_v20, %v19777_v62 }
 0x3ec   : > { %v16538_v49 = vpop.f32.mrf.mxu0  ;;  %v16662_v51 = vpop.f32.mrf.mxu1 }
 0x3ed   : > { %v20052_v32 = vadd.f32 %v6976_v59, %v6539_v48 }
 0x3ee   : > { %v6289_v7 = vpop.f32.mrf.mxu0  ;;  %16776 = vmatmul.mubr.bf16.vlgmr.msra.gmra.mxu0 %v17717_v16  ;;  %v6981_v35 = vpop.f32.mrf.mxu1 }
 0x3ef   : > { %v6540_v24 = vadd.f32 %v6289_v7, %v19784_v17  ;;  %16779 = vmatprep.mubr.msk.bf16.mxu0 %vm18175_vm0, %v22116_v6 }
 0x3f0   : > { %v16541_v37 = vpop.f32.mrf.mxu0  ;;  %v16665_v31 = vpop.f32.mrf.mxu1 }
 0x3f1   : > { %v20057_v8 = vadd.f32 %v6981_v35, %v6540_v24  ;;  %v17735_v37 = vld [vmem:[#allocation11 + $0x38] sm:$0xff]  }
 0x3f2   : > { %v6292_v4 = vpop.f32.mrf.mxu0  ;;  %v6984_v20 = vpop.f32.mrf.mxu1  ;;  %16883 = vmatprep.subr.bf16.mxu1 %v17735_v37 }
 0x3f3   : > { %v6541_v62 = vadd.f32 %v6292_v4, %v19789_v40  ;;  %v17719_v40 = vld [vmem:[#allocation3 + $0x28] sm:$0xff]   ;;  %16884 = vmatpush3.bf16.msra.mxu1 %v17735_v37 }
 0x3f4   : > { %v16542_v48 = vpop.f32.mrf.mxu0  ;;  %v16666_v49 = vpop.f32.mrf.mxu1 }
 0x3f5   : > { %v20060_v59 = vadd.f32 %v6984_v20, %v6541_v62 }
 0x3f6   : > { %v6297_v16 = vpop.f32.mrf.mxu0  ;;  %16780 = vmatmul.mubr.bf16.gmra.mxu0 %v17718_v28  ;;  %v6989_v7 = vpop.f32.mrf.mxu1 }
 0x3f7   : > { %v6542_v17 = vadd.f32 %v6297_v16, %v19796_v39  ;;  %16783 = vmatprep.mubr.msk.bf16.mxu0 %vm18175_vm0, %v22116_v6 }
 0x3f8   : > { %v16545_v51 = vpop.f32.mrf.mxu0  ;;  %v16669_v35 = vpop.f32.mrf.mxu1 }
 0x3f9   : > { %v20065_v24 = vadd.f32 %v6989_v7, %v6542_v17  ;;  %v17720_v35 = vld [vmem:[#allocation3 + $0x30] sm:$0xff]  }
 0x3fa   : > { %v6300_v31 = vpop.f32.mrf.mxu0  ;;  %v6992_v62 = vpop.f32.mrf.mxu1 }
 0x3fb   : > { %v6543_v4 = vadd.f32 %v6300_v31, %v19800_v36 }
 0x3fc   : > { %v16546_v20 = vpop.f32.mrf.mxu0  ;;  %v16670_v39 = vpop.f32.mrf.mxu1 }
 0x3fd   : > { %v20068_v28 = vadd.f32 %v6992_v62, %v6543_v4 }
 0x3fe   : > { %v6305_v48 = vpop.f32.mrf.mxu0  ;;  %16784 = vmatmul.mubr.bf16.gmra.mxu0 %v17719_v40  ;;  %v6997_v16 = vpop.f32.mrf.mxu1 }
 0x3ff   : > { %v6544_v49 = vadd.f32 %v6305_v48, %v19808_v26  ;;  %16787 = vmatprep.mubr.msk.bf16.mxu0 %vm18175_vm0, %v22116_v6 }
 0x400   : > { %v16549_v17 = vpop.f32.mrf.mxu0  ;;  %v16673_v51 = vpop.f32.mrf.mxu1 }
 0x401   : > { %v20073_v7 = vadd.f32 %v6997_v16, %v6544_v49  ;;  %v17721_v51 = vld [vmem:[#allocation3 + $0x38] sm:$0xff]  }
 0x402   : > { %v6308_v36 = vpop.f32.mrf.mxu0  ;;  %v7000_v37 = vpop.f32.mrf.mxu1 }
 0x403   : > { %v6545_v31 = vadd.f32 %v6308_v36, %v19812_v1 }
 0x404   : > { %v16550_v4 = vpop.f32.mrf.mxu0  ;;  %v16674_v20 = vpop.f32.mrf.mxu1 }
 0x405   : > { %v20076_v62 = vadd.f32 %v7000_v37, %v6545_v31 }
 0x406   : > { %v6313_v40 = vpop.f32.mrf.mxu0  ;;  %16788 = vmatmul.mubr.bf16.gmra.mxu0 %v17720_v35  ;;  %v7005_v39 = vpop.f32.mrf.mxu1 }
 0x407   : > { %v6546_v26 = vadd.f32 %v6313_v40, %v19820_v0  ;;  %16791 = vmatprep.mubr.msk.bf16.mxu0 %vm18175_vm0, %v22116_v6 }
 0x408   : > { %v16553_v48 = vpop.f32.mrf.mxu0  ;;  %v16677_v16 = vpop.f32.mrf.mxu1 }
 0x409   : > { %v20081_v49 = vadd.f32 %v7005_v39, %v6546_v26  ;;  %v17722_v16 = vld [vmem:[#allocation3 + $0x40] sm:$0xff]  }
 0x40a   : > { %v6316_v17 = vpop.f32.mrf.mxu0  ;;  %v7008_v36 = vpop.f32.mrf.mxu1 }
 0x40b   : > { %v6547_v1 = vadd.f32 %v6316_v17, %v19823_v33 }
 0x40c   : > { %v16554_v31 = vpop.f32.mrf.mxu0  ;;  %v16678_v4 = vpop.f32.mrf.mxu1 }
 0x40d   : > { %v20084_v37 = vadd.f32 %v7008_v36, %v6547_v1  ;;  %v17739_v1 = vld [vmem:[#allocation11 + $0x30] sm:$0xff]  }
 0x40e   : > { %v6321_v35 = vpop.f32.mrf.mxu0  ;;  %16792 = vmatmul.mubr.bf16.gmra.mxu0 %v17721_v51  ;;  %v7013_v20 = vpop.f32.mrf.mxu1  ;;  %16885 = vmatprep.subr.bf16.mxu1 %v17739_v1 }
 0x40f   : > { %v6548_v0 = vadd.f32 %v6321_v35, %v19830_v22  ;;  %16795 = vmatprep.mubr.msk.bf16.mxu0 %vm18175_vm0, %v22116_v6  ;;  %16886 = vmatpush3.bf16.msra.mxu1 %v17739_v1 }
 0x410   : > { %v16557_v40 = vpop.f32.mrf.mxu0  ;;  %v16681_v39 = vpop.f32.mrf.mxu1 }
 0x411   : > { %v20089_v26 = vadd.f32 %v7013_v20, %v6548_v0  ;;  %v17723_v39 = vld [vmem:[#allocation3 + $0x48] sm:$0xff]  }
 0x412   : > { %v6324_v48 = vpop.f32.mrf.mxu0  ;;  %v7016_v17 = vpop.f32.mrf.mxu1 }
 0x413   : > { %v6549_v33 = vadd.f32 %v6324_v48, %v19834_v55 }
 0x414   : > { %v16558_v36 = vpop.f32.mrf.mxu0  ;;  %v16682_v51 = vpop.f32.mrf.mxu1 }
 0x415   : > { %v20092_v31 = vadd.f32 %v7016_v17, %v6549_v33 }
 0x416   : > { %v6329_v22 = vpop.f32.mrf.mxu0  ;;  %16796 = vmatmul.mubr.bf16.gmra.mxu0 %v17722_v16  ;;  %v7021_v35 = vpop.f32.mrf.mxu1 }
 0x417   : > { %v6550_v4 = vadd.f32 %v6329_v22, %v19841_v5  ;;  %16799 = vmatprep.mubr.msk.bf16.mxu0 %vm18175_vm0, %v22116_v6  ;;  %v22216_v5 = vld [vmem:[#allocation55_spill] sm:$0xff] }
 0x418   : > { %v16561_v0 = vpop.f32.mrf.mxu0  ;;  %v16685_v55 = vpop.f32.mrf.mxu1 }
 0x419   : > { %v20097_v20 = vadd.f32 %v7021_v35, %v6550_v4 }
 0x41a   : > { %v6332_v40 = vpop.f32.mrf.mxu0  ;;  %v7024_v33 = vpop.f32.mrf.mxu1 }
 0x41b   : > { %22214 = vst [vmem:[#allocation34_spill] sm:$0xff] %v20097_v20  ;;  %v6551_v48 = vadd.f32 %v6332_v40, %v19844_v50  ;;  %v17724_v20 = vld [vmem:[#allocation3 + $0x50] sm:$0xff]   ;;  %v22218_v50 = vld [vmem:[#allocation30_spill] sm:$0xff] }
 0x41c   : > { %v16562_v17 = vpop.f32.mrf.mxu0  ;;  %v16686_v16 = vpop.f32.mrf.mxu1 }
 0x41d   : > { %v20100_v36 = vadd.f32 %v7024_v33, %v6551_v48 }
 0x41e   : > { %v6337_v1 = vpop.f32.mrf.mxu0  ;;  %16800 = vmatmul.mubr.bf16.gmra.mxu0 %v17723_v39  ;;  %v7029_v22 = vpop.f32.mrf.mxu1 }
 0x41f   : > { %22215 = vst [vmem:[#allocation35_spill] sm:$0xff] %v20100_v36  ;;  %v6552_v51 = vadd.f32 %v6337_v1, %v22216_v5  ;;  %16803 = vmatprep.mubr.msk.bf16.mxu0 %vm18175_vm0, %v22116_v6  ;;  %v22219_v1 = vld [vmem:[#allocation31_spill] sm:$0xff] }
 0x420   : > { %v16565_v4 = vpop.f32.mrf.mxu0  ;;  %v16689_v0 = vpop.f32.mrf.mxu1 }
 0x421   : > { %v20105_v35 = vadd.f32 %v7029_v22, %v6552_v51 }
 0x422   : > { %v6340_v55 = vpop.f32.mrf.mxu0  ;;  %v7032_v17 = vpop.f32.mrf.mxu1 }
 0x423   : > { %22217 = vst [vmem:[#allocation36_spill] sm:$0xff] %v20105_v35  ;;  %v6553_v40 = vadd.f32 %v6340_v55, %v22218_v50  ;;  %v17725_v35 = vld [vmem:[#allocation3 + $0x58] sm:$0xff]   ;;  %v22221_v55 = vld [vmem:[#allocation32_spill] sm:$0xff] }
 0x424   : > { %v16566_v48 = vpop.f32.mrf.mxu0  ;;  %v16690_v16 = vpop.f32.mrf.mxu1 }
 0x425   : > { %v20108_v33 = vadd.f32 %v7032_v17, %v6553_v40 }
 0x426   : > { %v6345_v39 = vpop.f32.mrf.mxu0  ;;  %16804 = vmatmul.mubr.bf16.gmra.mxu0 %v17724_v20  ;;  %v7037_v36 = vpop.f32.mrf.mxu1 }
 0x427   : > { %v6554_v5 = vadd.f32 %v6345_v39, %v22219_v1  ;;  %16807 = vmatprep.mubr.msk.bf16.mxu0 %vm18175_vm0, %v22116_v6 }
 0x428   : > { %v16569_v51 = vpop.f32.mrf.mxu0  ;;  %v16693_v4 = vpop.f32.mrf.mxu1 }
 0x429   : > { %v20113_v22 = vadd.f32 %v7037_v36, %v6554_v5 }
 0x42a   : > { %v6348_v0 = vpop.f32.mrf.mxu0  ;;  %v7040_v48 = vpop.f32.mrf.mxu1 }
 0x42b   : > { %22220 = vst [vmem:[#allocation37_spill] sm:$0xff] %v20113_v22  ;;  %v6555_v50 = vadd.f32 %v6348_v0, %v22221_v55  ;;  %v17726_v22 = vld [vmem:[#allocation3 + $0x60] sm:$0xff]   ;;  %v22223_v0 = vld [vmem:[#allocation33_spill] sm:$0xff] }
 0x42c   : > { %v16570_v40 = vpop.f32.mrf.mxu0  ;;  %v16694_v16 = vpop.f32.mrf.mxu1 }
 0x42d   : > { %v20116_v17 = vadd.f32 %v7040_v48, %v6555_v50 }
 0x42e   : > { %v6353_v20 = vpop.f32.mrf.mxu0  ;;  %16808 = vmatmul.mubr.bf16.gmra.mxu0 %v17725_v35  ;;  %v7045_v1 = vpop.f32.mrf.mxu1  ;;  %v17744_v35 = vld [vmem:[#allocation11 + $0x28] sm:$0xff]  }
 0x42f   : > { %22222 = vst [vmem:[#allocation38_spill] sm:$0xff] %v20116_v17  ;;  %v6556_v39 = vadd.f32 %v6353_v20, %v19871_v29  ;;  %16811 = vmatprep.mubr.msk.bf16.mxu0 %vm18175_vm0, %v22116_v6  ;;  %16887 = vmatprep.subr.bf16.mxu1 %v17744_v35 }
 0x430   : > { %v16573_v36 = vpop.f32.mrf.mxu0  ;;  %v16697_v51 = vpop.f32.mrf.mxu1  ;;  %16888 = vmatpush3.bf16.msra.mxu1 %v17744_v35 }
 0x431   : > { %v20121_v5 = vadd.f32 %v7045_v1, %v6556_v39 }
 0x432   : > { %v6356_v4 = vpop.f32.mrf.mxu0  ;;  %v7048_v40 = vpop.f32.mrf.mxu1 }
 0x433   : > { %v6557_v55 = vadd.f32 %v6356_v4, %v22223_v0  ;;  %v17727_v4 = vld [vmem:[#allocation3 + $0x68] sm:$0xff]  }
 0x434   : > { %v16574_v50 = vpop.f32.mrf.mxu0  ;;  %v16698_v16 = vpop.f32.mrf.mxu1 }
 0x435   : > { %v20124_v48 = vadd.f32 %v7048_v40, %v6557_v55 }
 0x436   : > { %v6361_v17 = vpop.f32.mrf.mxu0  ;;  %16812 = vmatmul.mubr.bf16.gmra.mxu0 %v17726_v22  ;;  %v7053_v20 = vpop.f32.mrf.mxu1 }
 0x437   : > { %v6558_v29 = vadd.f32 %v6361_v17, %v19881_v41  ;;  %16815 = vmatprep.mubr.msk.bf16.mxu0 %vm18175_vm0, %v22116_v6 }
 0x438   : > { %v16577_v39 = vpop.f32.mrf.mxu0  ;;  %v16701_v36 = vpop.f32.mrf.mxu1 }
 0x439   : > { %v20129_v1 = vadd.f32 %v7053_v20, %v6558_v29  ;;  %v17728_v36 = vld [vmem:[#allocation3 + $0x70] sm:$0xff]  }
 0x43a   : > { %v6364_v51 = vpop.f32.mrf.mxu0  ;;  %v7056_v55 = vpop.f32.mrf.mxu1 }
 0x43b   : > { %v6559_v0 = vadd.f32 %v6364_v51, %v19884_v14 }
 0x43c   : > { %v16578_v40 = vpop.f32.mrf.mxu0  ;;  %v16702_v22 = vpop.f32.mrf.mxu1 }
 0x43d   : > { %v20132_v50 = vadd.f32 %v7056_v55, %v6559_v0 }
 0x43e   : > { %v6369_v41 = vpop.f32.mrf.mxu0  ;;  %16816 = vmatmul.mubr.bf16.gmra.mxu0 %v17727_v4  ;;  %v7061_v16 = vpop.f32.mrf.mxu1 }
 0x43f   : > { %v6560_v17 = vadd.f32 %v6369_v41, %v19891_v2  ;;  %16819 = vmatprep.mubr.msk.bf16.mxu0 %vm18175_vm0, %v22116_v6 }
 0x440   : > { %v16581_v35 = vpop.f32.mrf.mxu0  ;;  %v16705_v20 = vpop.f32.mrf.mxu1 }
 0x441   : > { %v20137_v29 = vadd.f32 %v7061_v16, %v6560_v17  ;;  %v17729_v20 = vld [vmem:[#allocation3 + $0x78] sm:$0xff]  }
 0x442   : > { %v6372_v39 = vpop.f32.mrf.mxu0  ;;  %v7064_v51 = vpop.f32.mrf.mxu1 }
 0x443   : > { %v6561_v14 = vadd.f32 %v6372_v39, %v19894_v21 }
 0x444   : > { %v16582_v0 = vpop.f32.mrf.mxu0  ;;  %v16706_v40 = vpop.f32.mrf.mxu1 }
 0x445   : > { %v20140_v55 = vadd.f32 %v7064_v51, %v6561_v14  ;;  %v17747_v14 = vld [vmem:[#allocation11 + $0x20] sm:$0xff]  }
 0x446   : > { %v6377_v4 = vpop.f32.mrf.mxu0  ;;  %16820 = vmatmul.mubr.bf16.gmra.mxu0 %v17728_v36  ;;  %v7069_v22 = vpop.f32.mrf.mxu1  ;;  %16889 = vmatprep.subr.bf16.mxu1 %v17747_v14 }
 0x447   : > { %v6562_v2 = vadd.f32 %v6377_v4, %v19901_v57  ;;  %16823 = vmatprep.mubr.msk.bf16.mxu0 %vm18175_vm0, %v22116_v6  ;;  %16890 = vmatpush3.bf16.msra.mxu1 %v17747_v14  ;;  %v17749_v14 = vld [vmem:[#allocation11 + $0x10] sm:$0xff]  }
 0x448   : > { %v16585_v41 = vpop.f32.mrf.mxu0  ;;  %v16709_v16 = vpop.f32.mrf.mxu1 }
 0x449   : > { %v20145_v17 = vadd.f32 %v7069_v22, %v6562_v2  ;;  %v17748_v22 = vld [vmem:[#allocation11 + $0x18] sm:$0xff]  }
 0x44a   : > { %v6380_v35 = vpop.f32.mrf.mxu0  ;;  %v7072_v39 = vpop.f32.mrf.mxu1  ;;  %16891 = vmatprep.subr.bf16.mxu1 %v17748_v22 }
 0x44b   : > { %v6563_v21 = vadd.f32 %v6380_v35, %v19904_v38  ;;  %v17730_v35 = vld [vmem:[#allocation3 + $0x80] sm:$0xff]   ;;  %16892 = vmatpush3.bf16.msra.mxu1 %v17748_v22  ;;  %v17750_v22 = vld [vmem:[#allocation11 + $0x8] sm:$0xff]  }
 0x44c   : > { %v16586_v51 = vpop.f32.mrf.mxu0  ;;  %v16710_v36 = vpop.f32.mrf.mxu1  ;;  %16893 = vmatprep.subr.bf16.mxu1 %v17749_v14 }
 0x44d   : > { %v20148_v0 = vadd.f32 %v7072_v39, %v6563_v21 }
 0x44e   : > { %v6385_v57 = vpop.f32.mrf.mxu0  ;;  %16824 = vmatmul.mubr.bf16.gmra.mxu0 %v17729_v20  ;;  %v7077_v4 = vpop.f32.mrf.mxu1 }
 0x44f   : > { %v6564_v40 = vadd.f32 %v6385_v57, %v19911_v30  ;;  %16827 = vmatprep.mubr.msk.bf16.mxu0 %vm18175_vm0, %v22116_v6  ;;  %16894 = vmatpush3.bf16.msra.mxu1 %v17749_v14  ;;  %v17752_v14 = vld [vmem:[#allocation11 + $0x138] sm:$0xff]  }
 0x450   : > { %v16589_v2 = vpop.f32.mrf.mxu0  ;;  %v16713_v38 = vpop.f32.mrf.mxu1  ;;  %16895 = vmatprep.subr.bf16.mxu1 %v17750_v22  ;;  %17075 = vmatprep.subr.bf16.mxu0 %v17752_v14 }
 0x451   : > { %v20153_v41 = vadd.f32 %v7077_v4, %v6564_v40  ;;  %17076 = vmatpush3.bf16.msra.mxu0 %v17752_v14 }
 0x452   : > { %v6388_v16 = vpop.f32.mrf.mxu0  ;;  %v7080_v39 = vpop.f32.mrf.mxu1 }
 0x453   : > { %v6565_v21 = vadd.f32 %v6388_v16, %v19914_v61  ;;  %v17731_v16 = vld [vmem:[#allocation3 + $0x88] sm:$0xff]   ;;  %16896 = vmatpush3.bf16.msra.mxu1 %v17750_v22 }
 0x454   : > { %v16590_v20 = vpop.f32.mrf.mxu0  ;;  %v16714_v30 = vpop.f32.mrf.mxu1 }
 0x455   : > { %v20156_v51 = vadd.f32 %v7080_v39, %v6565_v21  ;;  %v17751_v30 = vld [vmem:[#allocation11] sm:$0xff]  }
 0x456   : > { %v6393_v36 = vpop.f32.mrf.mxu0  ;;  %16828 = vmatmul.mubr.bf16.gmra.mxu0 %v17730_v35  ;;  %v7085_v40 = vpop.f32.mrf.mxu1  ;;  %16897 = vmatprep.subr.bf16.mxu1 %v17751_v30 }
 0x457   : > { %v6566_v57 = vadd.f32 %v6393_v36, %v19921_v11  ;;  %16831 = vmatprep.mubr.msk.bf16.mxu0 %vm18175_vm0, %v22116_v6  ;;  %16898 = vmatpush3.bf16.msra.mxu1 %v17751_v30  ;;  %v17756_v30 = vld [vmem:[#allocation11 + $0x128] sm:$0xff]  }
 0x458   : > { %v16593_v4 = vpop.f32.mrf.mxu0  ;;  %v16717_v61 = vpop.f32.mrf.mxu1 }
 0x459   : > { %v20161_v2 = vadd.f32 %v7085_v40, %v6566_v57 }
 0x45a   : > { %v6396_v38 = vpop.f32.mrf.mxu0  ;;  %v7088_v39 = vpop.f32.mrf.mxu1 }
 0x45b   : > { %v6567_v21 = vadd.f32 %v6396_v38, %v19924_v53  ;;  %v17732_v38 = vld [vmem:[#allocation3 + $0x90] sm:$0xff]  }
 0x45c   : > { %v16594_v35 = vpop.f32.mrf.mxu0  ;;  %v16718_v11 = vpop.f32.mrf.mxu1 }
 0x45d   : > { %v20164_v20 = vadd.f32 %v7088_v39, %v6567_v21  ;;  %v17755_v21 = vld [vmem:[#allocation11 + $0x130] sm:$0xff]  }
 0x45e   : > { %v6401_v36 = vpop.f32.mrf.mxu0  ;;  %16832 = vmatmul.mubr.bf16.gmra.mxu0 %v17731_v16  ;;  %v7093_v40 = vpop.f32.mrf.mxu1  ;;  %17077 = vmatprep.subr.bf16.mxu0 %v17755_v21 }
 0x45f   : > { %v6568_v57 = vadd.f32 %v6401_v36, %v19931_v43  ;;  %16835 = vmatprep.mubr.msk.bf16.mxu0 %vm18175_vm0, %v22116_v6  ;;  %17078 = vmatpush3.bf16.msra.mxu0 %v17755_v21 }
 0x460   : > { %v16597_v4 = vpop.f32.mrf.mxu0  ;;  %v16721_v61 = vpop.f32.mrf.mxu1  ;;  %17079 = vmatprep.subr.bf16.mxu0 %v17756_v30 }
 0x461   : > { %v20169_v53 = vadd.f32 %v7093_v40, %v6568_v57 }
 0x462   : > { %v6404_v22 = vpop.f32.mrf.mxu0  ;;  %v7096_v39 = vpop.f32.mrf.mxu1 }
 0x463   : > { %v6569_v16 = vadd.f32 %v6404_v22, %v19934_v45  ;;  %17080 = vmatpush3.bf16.msra.mxu0 %v17756_v30  ;;  %v17733_v22 = vld [vmem:[#allocation3 + $0x98] sm:$0xff]   ;;  %v17758_v30 = vld [vmem:[#allocation11 + $0x118] sm:$0xff]  }
 0x464   : > { %v16598_v35 = vpop.f32.mrf.mxu0  ;;  %v16722_v11 = vpop.f32.mrf.mxu1 }
 0x465   : > { %v20172_v43 = vadd.f32 %v7096_v39, %v6569_v16  ;;  %v17757_v16 = vld [vmem:[#allocation11 + $0x120] sm:$0xff]  }
 0x466   : > { %v6409_v36 = vpop.f32.mrf.mxu0  ;;  %16836 = vmatmul.mubr.bf16.gmra.mxu0 %v17732_v38  ;;  %v7101_v40 = vpop.f32.mrf.mxu1  ;;  %17081 = vmatprep.subr.bf16.mxu0 %v17757_v16 }
 0x467   : > { %v6570_v57 = vadd.f32 %v6409_v36, %v19941_v47  ;;  %16839 = vmatprep.mubr.msk.bf16.mxu0 %vm18175_vm0, %v22116_v6  ;;  %17082 = vmatpush3.bf16.msra.mxu0 %v17757_v16 }
 0x468   : > { %v16601_v14 = vpop.f32.mrf.mxu0  ;;  %v16725_v45 = vpop.f32.mrf.mxu1  ;;  %17083 = vmatprep.subr.bf16.mxu0 %v17758_v30 }
 0x469   : > { %v20177_v4 = vadd.f32 %v7101_v40, %v6570_v57 }
 0x46a   : > { %v6412_v61 = vpop.f32.mrf.mxu0  ;;  %v7104_v39 = vpop.f32.mrf.mxu1 }
 0x46b   : > { %v6571_v21 = vadd.f32 %v6412_v61, %v19944_v18  ;;  %v17734_v61 = vld [vmem:[#allocation3 + $0xa0] sm:$0xff]   ;;  %17084 = vmatpush3.bf16.msra.mxu0 %v17758_v30 }
 0x46c   : > { %v16602_v38 = vpop.f32.mrf.mxu0  ;;  %v16726_v47 = vpop.f32.mrf.mxu1 }
 0x46d   : > { %v20180_v35 = vadd.f32 %v7104_v39, %v6571_v21  ;;  %v17761_v39 = vld [vmem:[#allocation11 + $0x110] sm:$0xff]  }
 0x46e   : > { %v6417_v11 = vpop.f32.mrf.mxu0  ;;  %16840 = vmatmul.mubr.bf16.gmra.mxu0 %v17733_v22  ;;  %v7109_v57 = vpop.f32.mrf.mxu1  ;;  %17085 = vmatprep.subr.bf16.mxu0 %v17761_v39 }
 0x46f   : > { %v6572_v36 = vadd.f32 %v6417_v11, %v19951_v54  ;;  %16843 = vmatprep.mubr.msk.bf16.mxu0 %vm18175_vm0, %v22116_v6  ;;  %17086 = vmatpush3.bf16.msra.mxu0 %v17761_v39 }
 0x470   : > { %v16605_v40 = vpop.f32.mrf.mxu0  ;;  %v16729_v18 = vpop.f32.mrf.mxu1 }
 0x471   : > { %v20185_v14 = vadd.f32 %v7109_v57, %v6572_v36  ;;  %v17762_v57 = vld [vmem:[#allocation11 + $0x108] sm:$0xff]  }
 0x472   : > { %v6420_v45 = vpop.f32.mrf.mxu0  ;;  %v7112_v16 = vpop.f32.mrf.mxu1  ;;  %17087 = vmatprep.subr.bf16.mxu0 %v17762_v57 }
 0x473   : > { %v6573_v21 = vadd.f32 %v6420_v45, %v19954_v58  ;;  %v17736_v45 = vld [vmem:[#allocation3 + $0xa8] sm:$0xff]   ;;  %17088 = vmatpush3.bf16.msra.mxu0 %v17762_v57 }
 0x474   : > { %v16606_v22 = vpop.f32.mrf.mxu0  ;;  %v16730_v54 = vpop.f32.mrf.mxu1 }
 0x475   : > { %v20188_v38 = vadd.f32 %v7112_v16, %v6573_v21 }
 0x476   : > { %v6425_v47 = vpop.f32.mrf.mxu0  ;;  %16844 = vmatmul.mubr.bf16.gmra.mxu0 %v17734_v61  ;;  %v7117_v36 = vpop.f32.mrf.mxu1  ;;  %v17764_v61 = vld [vmem:[#allocation11 + $0x100] sm:$0xff]  }
 0x477   : > { %v6574_v11 = vadd.f32 %v6425_v47, %v19961_v44  ;;  %16847 = vmatprep.mubr.msk.bf16.mxu0 %vm18175_vm0, %v22116_v6  ;;  %17089 = vmatprep.subr.bf16.mxu0 %v17764_v61 }
 0x478   : > { %v16609_v30 = vpop.f32.mrf.mxu0  ;;  %v16733_v58 = vpop.f32.mrf.mxu1  ;;  %17090 = vmatpush3.bf16.msra.mxu0 %v17764_v61 }
 0x479   : > { %v20193_v40 = vadd.f32 %v7117_v36, %v6574_v11  ;;  %v17737_v58 = vld [vmem:[#allocation3 + $0xb0] sm:$0xff]  }
 0x47a   : > { %v6428_v18 = vpop.f32.mrf.mxu0  ;;  %v7120_v16 = vpop.f32.mrf.mxu1 }
 0x47b   : > { %v6575_v21 = vadd.f32 %v6428_v18, %v19964_v27 }
 0x47c   : > { %v16610_v22 = vpop.f32.mrf.mxu0  ;;  %v16734_v54 = vpop.f32.mrf.mxu1 }
 0x47d   : > { %v20196_v44 = vadd.f32 %v7120_v16, %v6575_v21 }
 0x47e   : > { %v6433_v47 = vpop.f32.mrf.mxu0  ;;  %16848 = vmatmul.mubr.bf16.gmra.mxu0 %v17736_v45  ;;  %v7125_v11 = vpop.f32.mrf.mxu1 }
 0x47f   : > { %v6576_v39 = vadd.f32 %v6433_v47, %v19971_v13  ;;  %16851 = vmatprep.mubr.msk.bf16.mxu0 %vm18175_vm0, %v22116_v6 }
 0x480   : > { %v16613_v36 = vpop.f32.mrf.mxu0  ;;  %v16737_v27 = vpop.f32.mrf.mxu1 }
 0x481   : > { %v20201_v30 = vadd.f32 %v7125_v11, %v6576_v39  ;;  %v17738_v27 = vld [vmem:[#allocation3 + $0xb8] sm:$0xff]  }
 0x482   : > { %v6436_v57 = vpop.f32.mrf.mxu0  ;;  %v7128_v21 = vpop.f32.mrf.mxu1 }
 0x483   : > { %v6577_v18 = vadd.f32 %v6436_v57, %v19974_v15 }
 0x484   : > { %v16614_v16 = vpop.f32.mrf.mxu0  ;;  %v16738_v45 = vpop.f32.mrf.mxu1 }
 0x485   : > { %v20204_v22 = vadd.f32 %v7128_v21, %v6577_v18 }
 0x486   : > { %v6441_v54 = vpop.f32.mrf.mxu0  ;;  %16852 = vmatmul.mubr.bf16.gmra.mxu0 %v17737_v58  ;;  %v7133_v47 = vpop.f32.mrf.mxu1 }
 0x487   : > { %v6578_v13 = vadd.f32 %v6441_v54, %v19981_v3  ;;  %16855 = vmatprep.mubr.msk.bf16.mxu0 %vm18175_vm0, %v22116_v6 }
 0x488   : > { %v16617_v61 = vpop.f32.mrf.mxu0  ;;  %v16741_v11 = vpop.f32.mrf.mxu1 }
 0x489   : > { %v20209_v39 = vadd.f32 %v7133_v47, %v6578_v13  ;;  %v17740_v11 = vld [vmem:[#allocation3 + $0xc0] sm:$0xff]  }
 0x48a   : > { %v6444_v36 = vpop.f32.mrf.mxu0  ;;  %v7136_v57 = vpop.f32.mrf.mxu1 }
 0x48b   : > { %v6579_v15 = vadd.f32 %v6444_v36, %v19984_v12 }
 0x48c   : > { %v16618_v18 = vpop.f32.mrf.mxu0  ;;  %v16742_v16 = vpop.f32.mrf.mxu1 }
 0x48d   : > { %v20212_v21 = vadd.f32 %v7136_v57, %v6579_v15 }
 0x48e   : > { %v6449_v58 = vpop.f32.mrf.mxu0  ;;  %16856 = vmatmul.mubr.bf16.gmra.mxu0 %v17738_v27  ;;  %v7141_v45 = vpop.f32.mrf.mxu1 }
 0x48f   : > { %v6580_v3 = vadd.f32 %v6449_v58, %v19991_v42  ;;  %16859 = vmatprep.mubr.msk.bf16.mxu0 %vm18175_vm0, %v22116_v6 }
 0x490   : > { %v16621_v54 = vpop.f32.mrf.mxu0  ;;  %v16745_v47 = vpop.f32.mrf.mxu1 }
 0x491   : > { %v20217_v13 = vadd.f32 %v7141_v45, %v6580_v3  ;;  %v17741_v47 = vld [vmem:[#allocation3 + $0xc8] sm:$0xff]  }
 0x492   : > { %v6452_v61 = vpop.f32.mrf.mxu0  ;;  %v7144_v36 = vpop.f32.mrf.mxu1 }
 0x493   : > { %v6581_v12 = vadd.f32 %v6452_v61, %v19994_v60 }
 0x494   : > { %v16622_v15 = vpop.f32.mrf.mxu0  ;;  %v16746_v18 = vpop.f32.mrf.mxu1 }
 0x495   : > { %v20220_v57 = vadd.f32 %v7144_v36, %v6581_v12 }
 0x496   : > { %v6457_v27 = vpop.f32.mrf.mxu0  ;;  %16860 = vmatmul.mubr.bf16.gmra.mxu0 %v17740_v11  ;;  %v7149_v16 = vpop.f32.mrf.mxu1 }
 0x497   : > { %22224 = vst [vmem:[#allocation39_spill] sm:$0xff] %v20220_v57  ;;  %v6582_v42 = vadd.f32 %v6457_v27, %v20001_v19  ;;  %16863 = vmatprep.mubr.msk.bf16.mxu0 %vm18175_vm0, %v22116_v6 }
 0x498   : > { %v16625_v58 = vpop.f32.mrf.mxu0  ;;  %v16749_v45 = vpop.f32.mrf.mxu1 }
 0x499   : > { %v20225_v3 = vadd.f32 %v7149_v16, %v6582_v42  ;;  %v17742_v45 = vld [vmem:[#allocation3 + $0xd0] sm:$0xff]  }
 0x49a   : > { %v6460_v54 = vpop.f32.mrf.mxu0  ;;  %v7152_v61 = vpop.f32.mrf.mxu1 }
 0x49b   : > { %22225 = vst [vmem:[#allocation40_spill] sm:$0xff] %v20225_v3  ;;  %v6583_v60 = vadd.f32 %v6460_v54, %v20004_v46 }
 0x49c   : > { %v16626_v12 = vpop.f32.mrf.mxu0  ;;  %v16750_v15 = vpop.f32.mrf.mxu1 }
 0x49d   : > { %v20228_v36 = vadd.f32 %v7152_v61, %v6583_v60 }
 0x49e   : > { %v6465_v11 = vpop.f32.mrf.mxu0  ;;  %16864 = vmatmul.mubr.bf16.gmra.mxu0 %v17741_v47  ;;  %v7157_v18 = vpop.f32.mrf.mxu1 }
 0x49f   : > { %22226 = vst [vmem:[#allocation41_spill] sm:$0xff] %v20228_v36  ;;  %v6584_v19 = vadd.f32 %v6465_v11, %v20011_v34  ;;  %16867 = vmatprep.mubr.msk.bf16.mxu0 %vm18175_vm0, %v22116_v6 }
 0x4a0   : > { %v16629_v27 = vpop.f32.mrf.mxu0  ;;  %v16753_v16 = vpop.f32.mrf.mxu1 }
 0x4a1   : > { %v20233_v42 = vadd.f32 %v7157_v18, %v6584_v19  ;;  %v17743_v16 = vld [vmem:[#allocation3 + $0xd8] sm:$0xff]  }
 0x4a2   : > { %v6468_v58 = vpop.f32.mrf.mxu0  ;;  %v7160_v54 = vpop.f32.mrf.mxu1 }
 0x4a3   : > { %22227 = vst [vmem:[#allocation42_spill] sm:$0xff] %v20233_v42  ;;  %v6585_v46 = vadd.f32 %v6468_v58, %v20014_v25 }
 0x4a4   : > { %v16630_v60 = vpop.f32.mrf.mxu0  ;;  %v16754_v12 = vpop.f32.mrf.mxu1 }
 0x4a5   : > { %v20236_v61 = vadd.f32 %v7160_v54, %v6585_v46 }
 0x4a6   : > { %v6473_v47 = vpop.f32.mrf.mxu0  ;;  %16868 = vmatmul.mubr.bf16.gmra.mxu0 %v17742_v45  ;;  %v7165_v15 = vpop.f32.mrf.mxu1 }
 0x4a7   : > { %22228 = vst [vmem:[#allocation43_spill] sm:$0xff] %v20236_v61  ;;  %v6586_v34 = vadd.f32 %v6473_v47, %v20021_v52  ;;  %16871 = vmatprep.mubr.msk.bf16.mxu0 %vm18175_vm0, %v22116_v6  ;;  %v20249_v52 = vld [vmem:[%s22054_s4] ss:$0 sm:$0xff] }
 0x4a8   : > { %v16633_v11 = vpop.f32.mrf.mxu0  ;;  %v16757_v18 = vpop.f32.mrf.mxu1 }
 0x4a9   : > { %v20241_v19 = vadd.f32 %v7165_v15, %v6586_v34  ;;  %v20258_v34 = vld [vmem:[%s22055_s5] ss:$0 sm:$0xff]  ;;  %v17745_v11 = vld [vmem:[#allocation3 + $0xe0] sm:$0xff]  }
 0x4aa   : > { %v6476_v27 = vpop.f32.mrf.mxu0  ;;  %v7168_v58 = vpop.f32.mrf.mxu1 }
 0x4ab   : > { %22229 = vst [vmem:[#allocation44_spill] sm:$0xff] %v20241_v19  ;;  %v6587_v25 = vadd.f32 %v6476_v27, %v20024_v56 }
 0x4ac   : > { %v16634_v46 = vpop.f32.mrf.mxu0  ;;  %v16758_v60 = vpop.f32.mrf.mxu1 }
 0x4ad   : > { %v20244_v54 = vadd.f32 %v7168_v58, %v6587_v25 }
 0x4ae   : > { %v7649_v45 = vpop.f32.mrf.mxu0  ;;  %16872 = vmatmul.mubr.bf16.gmra.mxu0 %v17743_v16 }
 0x4af   : > { %22230 = vst [vmem:[#allocation45_spill] sm:$0xff] %v20244_v54  ;;  %v7918_v12 = vadd.f32 %v7649_v45, %v20031_v9  ;;  %16875 = vmatprep.mubr.msk.bf16.mxu0 %vm18175_vm0, %v22116_v6 }
 0x4b0   : > { %v16777_v47 = vpop.f32.mrf.mxu0 }
 0x4b1   : > { %v8087_v56 = vmul.f32 %v20249_v52, %v7918_v12 }
 0x4b2   : > { %v7652_v15 = vpop.f32.mrf.mxu0 }
 0x4b3   : > { %v7919_v18 = vadd.f32 %v7652_v15, %v20034_v23  ;;  %v8148_v16 = vadd.f32 %v20258_v34, %v8087_v56  ;;  %v17746_v15 = vld [vmem:[#allocation3 + $0xe8] sm:$0xff]  }
 0x4b4   : > { %v16778_v27 = vpop.f32.mrf.mxu0  ;;  %v22231_v56 = vld [vmem:[#allocation60_spill] sm:$0xff] }
 0x4b5   : > { %v8088_v9 = vmul.f32 %v20249_v52, %v7919_v18  ;;  %v8202_v45 = vmax.f32 %v8148_v16, 0.0 }
 0x4b6   : > { %v7657_v25 = vpop.f32.mrf.mxu0  ;;  %16876 = vmatmul.mubr.bf16.gmra.mxu0 %v17745_v11 }
 0x4b7   : > { %v8149_v58 = vadd.f32 %v20258_v34, %v8088_v9  ;;  %v7920_v46 = vadd.f32 %v7657_v25, %v20041_v63  ;;  %16879 = vmatprep.mubr.msk.bf16.mxu0 %vm18175_vm0, %v22116_v6  ;;  %v22076_v63 = vmov 0  }
 0x4b8   : > { %v16781_v60 = vpop.f32.mrf.mxu0 }
 0x4b9   : > { %v8203_v12 = vmax.f32 %v8149_v58, 0.0  ;;  %v8089_v47 = vmul.f32 %v20249_v52, %v7920_v46 }
 0x4ba   : > { %v7660_v23 = vpop.f32.mrf.mxu0 }
 0x4bb   : > { %v14904_v27 = vpack.c.bf16 %v8203_v12, %v8202_v45  ;;  %v7921_v54 = vadd.f32 %v7660_v23, %v22231_v56  ;;  %v8150_v11 = vadd.f32 %v20258_v34, %v8089_v47 }
 0x4bc   : > { %v16782_v18 = vpop.f32.mrf.mxu0 }
 0x4bd   : > { %14905 = vst [vmem:[#allocation2] sm:$0xff] %v14904_v27   ;;  %v8090_v9 = vmul.f32 %v20249_v52, %v7921_v54  ;;  %v8204_v46 = vmax.f32 %v8150_v11, 0.0 }
 0x4be   : > { %8662 = vst [vmem:[#allocation2 + $0x4] sm:$0xf] %v22076_v63  ;;  %v7665_v6 = vpop.f32.mrf.mxu0  ;;  %16880 = vmatmul.mubr.bf16.gmra.mxu0 %v17746_v15 }
 0x4bf   : > { %v8151_v16 = vadd.f32 %v20258_v34, %v8090_v9  ;;  %v7922_v25 = vadd.f32 %v7665_v6, %v20049_v10 }
 0x4c0   : > { %v16785_v58 = vpop.f32.mrf.mxu0 }
 0x4c1   : > { %v8205_v60 = vmax.f32 %v8151_v16, 0.0  ;;  %v8091_v45 = vmul.f32 %v20249_v52, %v7922_v25 }
 0x4c2   : > { %v7668_v54 = vpop.f32.mrf.mxu0 }
 0x4c3   : > { %v14909_v47 = vpack.c.bf16 %v8205_v60, %v8204_v46  ;;  %v7923_v23 = vadd.f32 %v7668_v54, %v20052_v32  ;;  %v8152_v10 = vadd.f32 %v20258_v34, %v8091_v45 }
 0x4c4   : > { %v8547_v15 = vld [vmem:[#allocation2] sm:$0x1]  ;;  %v16786_v27 = vpop.f32.mrf.mxu0 }
 0x4c5   : > { %v8548_v56 = vsel %vm20276_vm9, 0, %v8547_v15  ;;  %15180 = vst [vmem:[#allocation2 + $0x8] sm:$0xff] %v14909_v47   ;;  %v8092_v18 = vmul.f32 %v20249_v52, %v7923_v23  ;;  %v8206_v16 = vmax.f32 %v8152_v10, 0.0  ;;  %v10026_v27 = vld [vmem:[#allocation2 + $0x4] sm:$0xf] }
 0x4c6   : > { %8549 = vst [vmem:[#allocation2] sm:$0x1] %v8548_v56  ;;  %v7673_v11 = vpop.f32.mrf.mxu0 }
 0x4c7   : > { %8661 = vst [vmem:[#allocation2] sm:$0xf] %v22076_v63  ;;  %v8153_v9 = vadd.f32 %v20258_v34, %v8092_v18  ;;  %v7924_v6 = vadd.f32 %v7673_v11, %v20057_v8 }
 0x4c8   : > { %v16789_v32 = vpop.f32.mrf.mxu0 }
 0x4c9   : > { %v8207_v25 = vmax.f32 %v8153_v9, 0.0  ;;  %v8093_v46 = vmul.f32 %v20249_v52, %v7924_v6 }
 0x4ca   : > { %v7676_v60 = vpop.f32.mrf.mxu0 }
 0x4cb   : > { %v14914_v45 = vpack.c.bf16 %v8207_v25, %v8206_v16  ;;  %v7925_v54 = vadd.f32 %v7676_v60, %v20060_v59  ;;  %v8154_v10 = vadd.f32 %v20258_v34, %v8093_v46  ;;  %v10089_v25 = vshll.u32 %v10026_v27, 16 }
 0x4cc   : > { %v8550_v47 = vld [vmem:[#allocation2 + $0xc] sm:$0x1]  ;;  %v8603_v23 = vld [vmem:[#allocation2 + $0x8] sm:$0x1]  ;;  %v16790_v15 = vpop.f32.mrf.mxu0 }
 0x4cd   : > { %v8551_v8 = vsel %vm20276_vm9, 0, %v8550_v47  ;;  %v8604_v56 = vsel %vm20289_vm11, 0, %v8603_v23  ;;  %15181 = vst [vmem:[#allocation2 + $0x10] sm:$0xff] %v14914_v45   ;;  %v8094_v18 = vmul.f32 %v20249_v52, %v7925_v54  ;;  %v8208_v23 = vmax.f32 %v8154_v10, 0.0 }
 0x4ce   : > { %8552 = vst [vmem:[#allocation2 + $0xc] sm:$0x1] %v8551_v8  ;;  %8605 = vst [vmem:[#allocation2 + $0x8] sm:$0x1] %v8604_v56  ;;  %v7681_v11 = vpop.f32.mrf.mxu0  ;;  %v8668_v9 = vld [vmem:[#allocation2] sm:$0xff]   ;;  %v20306_v19 = vrot.slane %v10089_v25, 5 }
 0x4cf   : > { %v10025_v59 = vld [vmem:[#allocation2] sm:$0xf]  ;;  %8663 = vst [vmem:[#allocation2 + $0x8] sm:$0xf] %v22076_v63  ;;  %v7926_v6 = vadd.f32 %v7681_v11, %v20065_v24  ;;  %8704 = vst [vmem:[#allocation3] sm:$0xff] %v8668_v9   ;;  %v8155_v60 = vadd.f32 %v20258_v34, %v8094_v18  ;;  %v10093_v63 = vshrl.u32 %v10026_v27, 16 }
 0x4d0   : > { %v10080_v32 = vshrl.u32 %v10025_v59, 16  ;;  %v10083_v16 = vshll.u32 %v10025_v59, 16  ;;  %v16793_v45 = vpop.f32.mrf.mxu0 }
 0x4d1   : > { %v8095_v47 = vmul.f32 %v20249_v52, %v7926_v6  ;;  %v8209_v46 = vmax.f32 %v8155_v60, 0.0 }
 0x4d2   : > { %v7684_v15 = vpop.f32.mrf.mxu0  ;;  %v10082_v54 = vrot.slane %v10080_v32, 4  ;;  %v10085_v8 = vrot.slane %v10083_v16, 5 }
 0x4d3   : > { %v7927_v56 = vadd.f32 %v7684_v15, %v20068_v28  ;;  %v14919_v59 = vpack.c.bf16 %v8209_v46, %v8208_v23  ;;  %v8156_v32 = vadd.f32 %v20258_v34, %v8095_v47  ;;  %v10095_v15 = vrot.slane %v10093_v63, 4 }
 0x4d4   : > { %v8606_v24 = vld [vmem:[#allocation2 + $0x14] sm:$0x1]  ;;  %v8671_v11 = vld [vmem:[#allocation2 + $0x10] sm:$0xf]  ;;  %v16794_v61 = vpop.f32.mrf.mxu0  ;;  %v10086_v45 = vor.u32 %v10085_v8, %v10082_v54 }
 0x4d5   : > { %v10029_v9 = vld [vmem:[#allocation2 + $0x10] sm:$0xf]  ;;  %v8670_v42 = vld [vmem:[#allocation2 + $0xc] sm:$0xf]  ;;  %v8607_v6 = vsel %vm20289_vm11, 0, %v8606_v24  ;;  %v8096_v16 = vmul.f32 %v20249_v52, %v7927_v56  ;;  %15182 = vst [vmem:[#allocation2 + $0x18] sm:$0xff] %v14919_v59  }
 0x4d6   : > { %v10028_v18 = vld [vmem:[#allocation2 + $0xc] sm:$0xf]  ;;  %v10113_v10 = vshll.u32 %v10029_v9, 16  ;;  %8707 = vst [vmem:[#allocation3 + $0x10] sm:$0xf] %v8671_v11  ;;  %v10117_v27 = vshrl.u32 %v10029_v9, 16  ;;  %v7689_v60 = vpop.f32.mrf.mxu0 }
 0x4d7   : > { %v10104_v28 = vshrl.u32 %v10028_v18, 16  ;;  %v10107_v25 = vshll.u32 %v10028_v18, 16  ;;  %8706 = vst [vmem:[#allocation3 + $0xc] sm:$0xf] %v8670_v42  ;;  %8608 = vst [vmem:[#allocation2 + $0x14] sm:$0x1] %v8607_v6  ;;  %v8157_v23 = vadd.f32 %v20258_v34, %v8096_v16  ;;  %v7928_v46 = vadd.f32 %v7689_v60, %v20073_v7 }
 0x4d8   : > { %v10115_v61 = vrot.slane %v10113_v10, 5  ;;  %v10119_v36 = vrot.slane %v10117_v27, 4  ;;  %v16797_v47 = vpop.f32.mrf.mxu0  ;;  %v17753_v3 = vld [vmem:[#allocation3] sm:$0xff]   ;;  %v10027_v56 = vld [vmem:[#allocation2 + $0x8] sm:$0x1]  ;;  %v8210_v57 = vmax.f32 %v8156_v32, 0.0  ;;  %v10096_v7 = vor.u32 %v10095_v15, %v20306_v19 }
 0x4d9   : > { %v10106_v24 = vrot.slane %v10104_v28, 4  ;;  %v10109_v11 = vrot.slane %v10107_v25, 5  ;;  %v8211_v18 = vmax.f32 %v8157_v23, 0.0  ;;  %v8097_v42 = vmul.f32 %v20249_v52, %v7928_v46  ;;  %16899 = vmatprep.mubr.bf16.mxu1 %v17753_v3  ;;  %v20317_v10 = vld [vmem:[#allocation2 + $0x4] sm:$0xf] }
 0x4da   : > { %v7692_v59 = vpop.f32.mrf.mxu0  ;;  %v10087_v54 = vrot.slane %v10086_v45, 4  ;;  %v10099_v63 = vshll.u32 %v10027_v56, 16  ;;  %v10120_v28 = vor.u32 %v10119_v36, %v10115_v61  ;;  %v12043_v15 = vrot.slane %v20317_v10, 5  ;;  %v20927_v32 = vld [vmem:[#allocation11 + $0x238] sm:$0xff]  }
 0x4db   : > { %v10110_v9 = vor.u32 %v10109_v11, %v10106_v24  ;;  %v14924_v8 = vpack.c.bf16 %v8211_v18, %v8210_v57  ;;  %v7929_v6 = vadd.f32 %v7692_v59, %v20076_v62  ;;  %v8158_v3 = vadd.f32 %v20258_v34, %v8097_v42 }
 0x4dc   : > { %v16798_v25 = vpop.f32.mrf.mxu0  ;;  %v10092_v27 = vsel %vm18429_vm3, %v10087_v54, %v20306_v19  ;;  %v8553_v23 = vld [vmem:[#allocation2 + $0x18] sm:$0x1]  ;;  %v10032_v19 = vld [vmem:[#allocation2 + $0x1c] sm:$0xf]  ;;  %v10097_v56 = vrot.slane %v10096_v7, 4  ;;  %v10101_v18 = vrot.slane %v10099_v63, 5 }
 0x4dd   : > { %v10111_v16 = vrot.slane %v10110_v9, 4  ;;  %15183 = vst [vmem:[#allocation2 + $0x20] sm:$0xff] %v14924_v8   ;;  %v8098_v57 = vmul.f32 %v20249_v52, %v7929_v6  ;;  %10547 = vst [vmem:[#allocation3] sm:$0xf] %v10092_v27  ;;  %v8554_v36 = vsel %vm20276_vm9, 0, %v8553_v23  ;;  %v10121_v42 = vrot.slane %v10120_v28, 4 }
 0x4de   : > { %v10030_v60 = vld [vmem:[#allocation2 + $0x14] sm:$0x1]  ;;  %v7697_v46 = vpop.f32.mrf.mxu0  ;;  %v17754_v24 = vld [vmem:[#allocation3 + $0xc] sm:$0xff]   ;;  %8555 = vst [vmem:[#allocation2 + $0x18] sm:$0x1] %v8554_v36  ;;  %v8212_v8 = vmax.f32 %v8158_v3, 0.0 }
 0x4df   : > { %v10116_v62 = vsel %vm18429_vm3, %v10111_v16, %v10115_v61  ;;  %v10123_v45 = vshll.u32 %v10030_v60, 16  ;;  %v8159_v11 = vadd.f32 %v20258_v34, %v8098_v57  ;;  %v7930_v47 = vadd.f32 %v7697_v46, %v20081_v49  ;;  %16900 = vmatmul.mubr.bf16.vlgmr.msra.gmra.mxu1 %v17754_v24  ;;  %v20331_v61 = vld [vmem:[#allocation3 + $0xc] sm:$0xff]   ;;  %v11937_v54 = vld [vmem:[#allocation2 + $0x10] sm:$0xf]  ;;  %v11933_v16 = vld [vmem:[#allocation2] sm:$0xe] }
 0x4e0   : > { %v16801_v59 = vpop.f32.mrf.mxu0  ;;  %10549 = vst [vmem:[#allocation3 + $0xc] sm:$0xf] %v10116_v62  ;;  %v11938_v25 = vld [vmem:[#allocation2 + $0x14] sm:$0x1]  ;;  %v10137_v27 = vshll.u32 %v10032_v19, 16  ;;  %v10141_v60 = vshrl.u32 %v10032_v19, 16  ;;  %v10102_v57 = vsel %vm18429_vm3, %v10097_v56, %v10101_v18 }
 0x4e1   : > { %v10125_v9 = vrot.slane %v10123_v45, 5  ;;  %v8213_v6 = vmax.f32 %v8159_v11, 0.0  ;;  %v8099_v49 = vmul.f32 %v20249_v52, %v7930_v47  ;;  %v11935_v7 = vld [vmem:[#allocation2 + $0x8] sm:$0x1]  ;;  %v11936_v28 = vld [vmem:[#allocation2 + $0xc] sm:$0xe] }
 0x4e2   : > { %v7700_v63 = vpop.f32.mrf.mxu0  ;;  %v12045_v45 = vrot.slane %v12043_v15, 4  ;;  %v12050_v62 = vrot.slane %v11937_v54, 5  ;;  %10548 = vst [vmem:[#allocation3 + $0x4] sm:$0xf] %v10102_v57  ;;  %v14684_v24 = vrot.slane %v11933_v16, 9  ;;  %v12053_v19 = vrot.slane %v11938_v25, 5 }
 0x4e3   : > { %v10126_v10 = vsel %vm18429_vm3, %v10121_v42, %v10125_v9  ;;  %v14929_v23 = vpack.c.bf16 %v8213_v6, %v8212_v8  ;;  %v7931_v3 = vadd.f32 %v7700_v63, %v20084_v37  ;;  %v12046_v9 = vrot.slane %v11935_v7, 5 }
 0x4e4   : > { %10550 = vst [vmem:[#allocation3 + $0x10] sm:$0xf] %v10126_v10  ;;  %v8556_v36 = vld [vmem:[#allocation2 + $0x24] sm:$0x1]  ;;  %v8609_v46 = vld [vmem:[#allocation2 + $0x20] sm:$0x1]  ;;  %v16802_v11 = vpop.f32.mrf.mxu0  ;;  %v8160_v54 = vadd.f32 %v20258_v34, %v8099_v49  ;;  %v12044_v57 = vsel %vm18555_vm6, %v14684_v24, %v12043_v15 }
 0x4e5   : > { %v8557_v47 = vsel %vm20276_vm9, 0, %v8556_v36  ;;  %v8610_v42 = vsel %vm20289_vm11, 0, %v8609_v46  ;;  %15184 = vst [vmem:[#allocation2 + $0x28] sm:$0xff] %v14929_v23   ;;  %v8672_v56 = vld [vmem:[#allocation2 + $0x18] sm:$0xff]   ;;  %v20343_v59 = vrot.slane %v10137_v27, 5  ;;  %v10143_v37 = vrot.slane %v10141_v60, 4 }
 0x4e6   : > { %v10031_v18 = vld [vmem:[#allocation2 + $0x18] sm:$0xf]  ;;  %8558 = vst [vmem:[#allocation2 + $0x24] sm:$0x1] %v8557_v47  ;;  %8611 = vst [vmem:[#allocation2 + $0x20] sm:$0x1] %v8610_v42  ;;  %v8100_v8 = vmul.f32 %v20249_v52, %v7931_v3  ;;  %v7705_v6 = vpop.f32.mrf.mxu0 }
 0x4e7   : > { %v14685_v16 = vrot.slane %v11936_v28, 9  ;;  %v10128_v10 = vshrl.u32 %v10031_v18, 16  ;;  %v10131_v25 = vshll.u32 %v10031_v18, 16  ;;  %8708 = vst [vmem:[#allocation3 + $0x18] sm:$0xff] %v8672_v56   ;;  %v7932_v63 = vadd.f32 %v7705_v6, %v20089_v26 }
 0x4e8   : > { %v12052_v23 = vrot.slane %v12050_v62, 4  ;;  %v8161_v27 = vadd.f32 %v20258_v34, %v8100_v8  ;;  %v16805_v60 = vpop.f32.mrf.mxu0  ;;  %v12047_v28 = vsel %vm18555_vm6, %v12045_v45, %v12046_v9  ;;  %v10144_v26 = vor.u32 %v10143_v37, %v20343_v59 }
 0x4e9   : > { %v12051_v36 = vsel %vm18555_vm6, %v14685_v16, %v12050_v62  ;;  %v10130_v49 = vrot.slane %v10128_v10, 4  ;;  %v10133_v46 = vrot.slane %v10131_v25, 5  ;;  %v8214_v11 = vmax.f32 %v8160_v54, 0.0  ;;  %v20360_v18 = vld [vmem:[#allocation3] sm:$0xff]  }
 0x4ea   : > { %v12054_v3 = vsel %vm18555_vm6, %v12052_v23, %v12053_v19  ;;  %v8215_v47 = vmax.f32 %v8161_v27, 0.0  ;;  %v7708_v42 = vpop.f32.mrf.mxu0  ;;  %22239 = vst [vmem:[#allocation47_spill] sm:$0xff] %v20360_v18  ;;  %v8101_v62 = vmul.f32 %v20249_v52, %v7932_v63  ;;  %12203 = vst [vmem:[#allocation3] sm:$0xf] %v12044_v57  ;;  %v20364_v16 = vld [vmem:[#allocation2 + $0x18] sm:$0xe] }
 0x4eb   : > { %v20358_v15 = vld [vmem:[#allocation3 + $0xc] sm:$0xff]   ;;  %v10134_v56 = vor.u32 %v10133_v46, %v10130_v49  ;;  %v7933_v8 = vadd.f32 %v7708_v42, %v20092_v31  ;;  %12204 = vst [vmem:[#allocation3 + $0x4] sm:$0xf] %v12047_v28  ;;  %v10145_v31 = vrot.slane %v10144_v26, 4 }
 0x4ec   : > { %22238 = vst [vmem:[#allocation46_spill] sm:$0xff] %v20358_v15  ;;  %v17759_v24 = vld [vmem:[#allocation3 + $0xc] sm:$0xff]   ;;  %v8612_v45 = vld [vmem:[#allocation2 + $0x2c] sm:$0x1]  ;;  %v14934_v37 = vpack.c.bf16 %v8215_v47, %v8214_v11  ;;  %v16806_v54 = vpop.f32.mrf.mxu0 }
 0x4ed   : > { %12205 = vst [vmem:[#allocation3 + $0xc] sm:$0xf] %v12051_v36  ;;  %12206 = vst [vmem:[#allocation3 + $0x10] sm:$0xf] %v12054_v3  ;;  %v8675_v9 = vld [vmem:[#allocation2 + $0x28] sm:$0xf]  ;;  %17091 = vmatprep.mubr.bf16.mxu0 %v17759_v24  ;;  %v8162_v3 = vadd.f32 %v20258_v34, %v8101_v62  ;;  %v8102_v11 = vmul.f32 %v20249_v52, %v7933_v8 }
 0x4ee   : > { %v10035_v19 = vld [vmem:[#allocation2 + $0x28] sm:$0xf]  ;;  %v10135_v6 = vrot.slane %v10134_v56, 4  ;;  %v8674_v10 = vld [vmem:[#allocation2 + $0x24] sm:$0xf]  ;;  %v8613_v63 = vsel %vm20289_vm11, 0, %v8612_v45  ;;  %v7713_v57 = vpop.f32.mrf.mxu0 }
 0x4ef   : > { %v10033_v25 = vld [vmem:[#allocation2 + $0x20] sm:$0x1]  ;;  %8711 = vst [vmem:[#allocation3 + $0x28] sm:$0xf] %v8675_v9  ;;  %v10034_v23 = vld [vmem:[#allocation2 + $0x24] sm:$0xf] }
 0x4f0   : > { %v10147_v27 = vshll.u32 %v10033_v25, 16  ;;  %8710 = vst [vmem:[#allocation3 + $0x24] sm:$0xf] %v8674_v10  ;;  %8614 = vst [vmem:[#allocation2 + $0x2c] sm:$0x1] %v8613_v63  ;;  %v10161_v60 = vshll.u32 %v10035_v19, 16  ;;  %v10140_v26 = vsel %vm18429_vm3, %v10135_v6, %v20343_v59  ;;  %v16809_v45 = vpop.f32.mrf.mxu0  ;;  %v8163_v6 = vadd.f32 %v20258_v34, %v8102_v11 }
 0x4f1   : > { %15185 = vst [vmem:[#allocation2 + $0x30] sm:$0xff] %v14934_v37   ;;  %v11940_v36 = vld [vmem:[#allocation2 + $0x1c] sm:$0xf]  ;;  %v10152_v49 = vshrl.u32 %v10034_v23, 16  ;;  %v10155_v46 = vshll.u32 %v10034_v23, 16  ;;  %v17760_v47 = vld [vmem:[#allocation3 + $0x18] sm:$0xff]  }
 0x4f2   : > { %v20368_v28 = vld [vmem:[#allocation2 + $0x20] sm:$0x1]  ;;  %v10149_v42 = vrot.slane %v10147_v27, 5  ;;  %v10163_v24 = vrot.slane %v10161_v60, 5  ;;  %v10165_v56 = vshrl.u32 %v10035_v19, 16  ;;  %16903 = vmatprep.mubr.bf16.mxu1 %v17760_v47  ;;  %v20375_v54 = vld [vmem:[#allocation3 + $0x18] sm:$0xff]   ;;  %v7716_v63 = vpop.f32.mrf.mxu0 }
 0x4f3   : > { %v10154_v9 = vrot.slane %v10152_v49, 4  ;;  %v10157_v37 = vrot.slane %v10155_v46, 5  ;;  %v14686_v10 = vrot.slane %v20364_v16, 9  ;;  %v20380_v25 = vld [vmem:[#allocation3 + $0x18] sm:$0xff]   ;;  %v17780_v23 = vld [vmem:[#allocation11 + $0xf8] sm:$0xff]   ;;  %v22241_v60 = vld [vmem:[#allocation35_spill] sm:$0xff] }
 0x4f4   : > { %v10150_v62 = vsel %vm18429_vm3, %v10145_v31, %v10149_v42  ;;  %v10167_v8 = vrot.slane %v10165_v56, 4  ;;  %v22240_v19 = vld [vmem:[#allocation34_spill] sm:$0xff]  ;;  %10551 = vst [vmem:[#allocation3 + $0x18] sm:$0xf] %v10140_v26  ;;  %v7935_v49 = vadd.f32 %v7716_v63, %v22241_v60  ;;  %v12057_v46 = vrot.slane %v11940_v36, 5  ;;  %v16810_v31 = vpop.f32.mrf.mxu0  ;;  %16931 = vmatprep.subr.bf16.mxu1 %v17780_v23  ;;  %v17782_v42 = vld [vmem:[#allocation11 + $0xf0] sm:$0xff]  }
 0x4f5   : > { %v10158_v59 = vor.u32 %v10157_v37, %v10154_v9  ;;  %v7934_v27 = vadd.f32 %v7713_v57, %v22240_v19  ;;  %10552 = vst [vmem:[#allocation3 + $0x1c] sm:$0xf] %v10150_v62  ;;  %v12060_v16 = vrot.slane %v20368_v28, 5  ;;  %v8216_v45 = vmax.f32 %v8162_v3, 0.0  ;;  %16932 = vmatpush3.bf16.msra.mxu1 %v17780_v23  ;;  %v20388_v26 = vld [vmem:[#allocation2 + $0x28] sm:$0xf] }
 0x4f6   : > { %v10168_v47 = vor.u32 %v10167_v8, %v10163_v24  ;;  %v8217_v18 = vmax.f32 %v8163_v6, 0.0  ;;  %v8104_v11 = vmul.f32 %v20249_v52, %v7935_v49  ;;  %v7721_v36 = vpop.f32.mrf.mxu0  ;;  %16933 = vmatprep.subr.bf16.mxu1 %v17782_v42  ;;  %v12059_v23 = vrot.slane %v12057_v46, 4  ;;  %v11942_v49 = vld [vmem:[#allocation2 + $0x24] sm:$0xe]  ;;  %v22284_v7 = vld [vmem:[#allocation46_spill] sm:$0xff] }
 0x4f7   : > { %v10159_v56 = vrot.slane %v10158_v59, 4  ;;  %v10036_v15 = vld [vmem:[#allocation2 + $0x2c] sm:$0x1]  ;;  %v8103_v9 = vmul.f32 %v20249_v52, %v7934_v27  ;;  %v17763_v62 = vld [vmem:[#allocation3 + $0x24] sm:$0xff]  }
 0x4f8   : > { %v10171_v57 = vshll.u32 %v10036_v15, 16  ;;  %v8559_v37 = vld [vmem:[#allocation2 + $0x30] sm:$0x1]  ;;  %v10038_v8 = vld [vmem:[#allocation2 + $0x34] sm:$0xf]  ;;  %v14939_v63 = vpack.c.bf16 %v8217_v18, %v8216_v45  ;;  %v20395_v6 = vld [vmem:[#allocation3 + $0x24] sm:$0xff]   ;;  %v16813_v27 = vpop.f32.mrf.mxu0  ;;  %16904 = vmatmul.mubr.bf16.gmra.mxu1 %v17763_v62  ;;  %v8165_v18 = vadd.f32 %v20258_v34, %v8104_v11 }
 0x4f9   : > { %v10164_v28 = vsel %vm18429_vm3, %v10159_v56, %v10163_v24  ;;  %v8560_v3 = vsel %vm20276_vm9, 0, %v8559_v37  ;;  %v8164_v59 = vadd.f32 %v20258_v34, %v8103_v9  ;;  %v10169_v15 = vrot.slane %v10168_v47, 4  ;;  %v20397_v60 = vld [vmem:[#allocation3 + $0x24] sm:$0xff]   ;;  %v11944_v31 = vld [vmem:[#allocation2 + $0x2c] sm:$0x1]  ;;  %16934 = vmatpush3.bf16.msra.mxu1 %v17782_v42 }
 0x4fa   : > { %v10173_v19 = vrot.slane %v10171_v57, 5  ;;  %8561 = vst [vmem:[#allocation2 + $0x30] sm:$0x1] %v8560_v3  ;;  %22242 = vst [vmem:[#allocation48_spill] sm:$0xff] %v20397_v60  ;;  %v12058_v24 = vsel %vm18555_vm6, %v14686_v10, %v12057_v46  ;;  %v12064_v56 = vrot.slane %v20388_v26, 5  ;;  %v12061_v47 = vsel %vm18555_vm6, %v12059_v23, %v12060_v16  ;;  %v22245_v10 = vld [vmem:[#allocation36_spill] sm:$0xff]  ;;  %v7724_v62 = vpop.f32.mrf.mxu0 }
 0x4fb   : > { %15186 = vst [vmem:[#allocation2 + $0x38] sm:$0xff] %v14939_v63   ;;  %10553 = vst [vmem:[#allocation3 + $0x24] sm:$0xf] %v10164_v28  ;;  %v10185_v9 = vshll.u32 %v10038_v8, 16  ;;  %v7936_v46 = vadd.f32 %v7721_v36, %v22245_v10  ;;  %v10189_v26 = vshrl.u32 %v10038_v8, 16  ;;  %v8218_v3 = vmax.f32 %v8164_v59, 0.0 }
 0x4fc   : > { %v10174_v45 = vsel %vm18429_vm3, %v10169_v15, %v10173_v19  ;;  %v20407_v57 = vld [vmem:[#allocation3 + $0x18] sm:$0xff]   ;;  %v8219_v63 = vmax.f32 %v8165_v18, 0.0  ;;  %v7937_v42 = vadd.f32 %v7724_v62, %v20108_v33  ;;  %v16814_v28 = vpop.f32.mrf.mxu0  ;;  %v14687_v19 = vrot.slane %v11942_v49, 9  ;;  %v22246_v49 = vld [vmem:[#allocation37_spill] sm:$0xff] }
 0x4fd   : > { %22243 = vst [vmem:[#allocation49_spill] sm:$0xff] %v20407_v57  ;;  %v20409_v37 = vld [vmem:[#allocation3 + $0x18] sm:$0xff]   ;;  %10554 = vst [vmem:[#allocation3 + $0x28] sm:$0xf] %v10174_v45  ;;  %v8105_v16 = vmul.f32 %v20249_v52, %v7936_v46  ;;  %v12067_v27 = vrot.slane %v11944_v31, 5  ;;  %v12066_v18 = vrot.slane %v12064_v56, 4 }
 0x4fe   : > { %22244 = vst [vmem:[#allocation50_spill] sm:$0xff] %v20409_v37  ;;  %v17765_v11 = vld [vmem:[#allocation3 + $0x18] sm:$0xff]   ;;  %v14944_v23 = vpack.c.bf16 %v8219_v63, %v8218_v3  ;;  %v8106_v15 = vmul.f32 %v20249_v52, %v7937_v42  ;;  %v7729_v8 = vpop.f32.mrf.mxu0  ;;  %v20416_v33 = vrot.slane %v10185_v9, 5  ;;  %v10191_v62 = vrot.slane %v10189_v26, 4 }
 0x4ff   : > { %12207 = vst [vmem:[#allocation3 + $0x18] sm:$0xf] %v12058_v24  ;;  %12208 = vst [vmem:[#allocation3 + $0x1c] sm:$0xf] %v12061_v47  ;;  %17092 = vmatmul.mubr.bf16.vlgmr.msra.gmra.mxu0 %v17765_v11  ;;  %v8166_v36 = vadd.f32 %v20258_v34, %v8105_v16  ;;  %v17784_v59 = vld [vmem:[#allocation11 + $0xe8] sm:$0xff]   ;;  %v7938_v31 = vadd.f32 %v7729_v8, %v22246_v49  ;;  %v12065_v28 = vsel %vm18555_vm6, %v14687_v19, %v12064_v56 }
 0x500   : > { %15187 = vst [vmem:[#allocation2 + $0x40] sm:$0xff] %v14944_v23   ;;  %v8167_v24 = vadd.f32 %v20258_v34, %v8106_v15  ;;  %v16817_v42 = vpop.f32.mrf.mxu0  ;;  %16935 = vmatprep.subr.bf16.mxu1 %v17784_v59  ;;  %v12068_v23 = vsel %vm18555_vm6, %v12066_v18, %v12067_v27  ;;  %v10192_v56 = vor.u32 %v10191_v62, %v20416_v33  ;;  %v20434_v19 = vld [vmem:[#allocation2 + $0x34] sm:$0xf] }
 0x501   : > { %v8676_v45 = vld [vmem:[#allocation2 + $0x30] sm:$0xff]   ;;  %v8220_v16 = vmax.f32 %v8166_v36, 0.0  ;;  %16936 = vmatpush3.bf16.msra.mxu1 %v17784_v59  ;;  %v8107_v18 = vmul.f32 %v20249_v52, %v7938_v31 }
 0x502   : > { %v10037_v10 = vld [vmem:[#allocation2 + $0x30] sm:$0xf]  ;;  %8712 = vst [vmem:[#allocation3 + $0x30] sm:$0xff] %v8676_v45   ;;  %v8562_v3 = vld [vmem:[#allocation2 + $0x3c] sm:$0x1]  ;;  %v8221_v26 = vmax.f32 %v8167_v24, 0.0 }
 0x503   : > { %v10176_v47 = vshrl.u32 %v10037_v10, 16  ;;  %v10179_v46 = vshll.u32 %v10037_v10, 16  ;;  %v8615_v63 = vld [vmem:[#allocation2 + $0x38] sm:$0x1]  ;;  %v8563_v11 = vsel %vm20276_vm9, 0, %v8562_v3  ;;  %v7732_v3 = vpop.f32.mrf.mxu0  ;;  %v22249_v36 = vld [vmem:[#allocation38_spill] sm:$0xff] }
 0x504   : > { %v8616_v9 = vsel %vm20289_vm11, 0, %v8615_v63  ;;  %8564 = vst [vmem:[#allocation2 + $0x3c] sm:$0x1] %v8563_v11  ;;  %v20428_v8 = vld [vmem:[#allocation3 + $0x24] sm:$0xff]   ;;  %v14949_v63 = vpack.c.bf16 %v8221_v26, %v8220_v16  ;;  %v7939_v24 = vadd.f32 %v7732_v3, %v22249_v36 }
 0x505   : > { %v10178_v15 = vrot.slane %v10176_v47, 4  ;;  %v10181_v45 = vrot.slane %v10179_v46, 5  ;;  %8617 = vst [vmem:[#allocation2 + $0x38] sm:$0x1] %v8616_v9  ;;  %22247 = vst [vmem:[#allocation53_spill] sm:$0xff] %v20428_v8  ;;  %v20430_v10 = vld [vmem:[#allocation3 + $0x24] sm:$0xff]   ;;  %v16818_v27 = vpop.f32.mrf.mxu0 }
 0x506   : > { %22248 = vst [vmem:[#allocation54_spill] sm:$0xff] %v20430_v10  ;;  %v17766_v49 = vld [vmem:[#allocation3 + $0x24] sm:$0xff]   ;;  %15188 = vst [vmem:[#allocation2 + $0x48] sm:$0xff] %v14949_v63   ;;  %v8108_v47 = vmul.f32 %v20249_v52, %v7939_v24  ;;  %v17787_v46 = vld [vmem:[#allocation11 + $0xe0] sm:$0xff]  }
 0x507   : > { %12209 = vst [vmem:[#allocation3 + $0x24] sm:$0xf] %v12065_v28  ;;  %12210 = vst [vmem:[#allocation3 + $0x28] sm:$0xf] %v12068_v23  ;;  %v10182_v59 = vor.u32 %v10181_v45, %v10178_v15  ;;  %17095 = vmatprep.mubr.bf16.mxu0 %v17766_v49  ;;  %v8618_v11 = vld [vmem:[#allocation2 + $0x44] sm:$0x1]  ;;  %v7737_v16 = vpop.f32.mrf.mxu0  ;;  %16937 = vmatprep.subr.bf16.mxu1 %v17787_v46 }
 0x508   : > { %v8679_v9 = vld [vmem:[#allocation2 + $0x40] sm:$0xf]  ;;  %v8619_v28 = vsel %vm20289_vm11, 0, %v8618_v11  ;;  %v10193_v15 = vrot.slane %v10192_v56, 4  ;;  %v8169_v3 = vadd.f32 %v20258_v34, %v8108_v47  ;;  %16938 = vmatpush3.bf16.msra.mxu1 %v17787_v46  ;;  %v8168_v11 = vadd.f32 %v20258_v34, %v8107_v18 }
 0x509   : > { %v10183_v42 = vrot.slane %v10182_v59, 4  ;;  %v10041_v62 = vld [vmem:[#allocation2 + $0x40] sm:$0xf]  ;;  %8715 = vst [vmem:[#allocation3 + $0x40] sm:$0xf] %v8679_v9  ;;  %v17767_v23 = vld [vmem:[#allocation3 + $0x30] sm:$0xff]   ;;  %v16821_v49 = vpop.f32.mrf.mxu0  ;;  %v7940_v56 = vadd.f32 %v7737_v16, %v20121_v5 }
 0x50a   : > { %8620 = vst [vmem:[#allocation2 + $0x44] sm:$0x1] %v8619_v28  ;;  %v10209_v45 = vshll.u32 %v10041_v62, 16  ;;  %v10213_v31 = vshrl.u32 %v10041_v62, 16  ;;  %v20442_v63 = vld [vmem:[#allocation3 + $0x30] sm:$0xff]   ;;  %16907 = vmatprep.mubr.bf16.mxu1 %v17767_v23  ;;  %v8223_v57 = vmax.f32 %v8169_v3, 0.0 }
 0x50b   : > { %v10188_v36 = vsel %vm18429_vm3, %v10183_v42, %v20416_v33  ;;  %v8678_v24 = vld [vmem:[#allocation2 + $0x3c] sm:$0xf]  ;;  %v20449_v9 = vld [vmem:[#allocation2 + $0x30] sm:$0xe]  ;;  %v7740_v46 = vpop.f32.mrf.mxu0  ;;  %v20451_v10 = vld [vmem:[#allocation2 + $0x40] sm:$0xf] }
 0x50c   : > { %v10039_v59 = vld [vmem:[#allocation2 + $0x38] sm:$0x1]  ;;  %v10040_v27 = vld [vmem:[#allocation2 + $0x3c] sm:$0xf]  ;;  %8714 = vst [vmem:[#allocation3 + $0x3c] sm:$0xf] %v8678_v24  ;;  %v8109_v24 = vmul.f32 %v20249_v52, %v7940_v56  ;;  %v7941_v56 = vadd.f32 %v7740_v46, %v20124_v48 }
 0x50d   : > { %v10195_v28 = vshll.u32 %v10039_v59, 16  ;;  %v10200_v47 = vshrl.u32 %v10040_v27, 16  ;;  %v10203_v62 = vshll.u32 %v10040_v27, 16  ;;  %v10211_v49 = vrot.slane %v10209_v45, 5  ;;  %v20453_v33 = vld [vmem:[#allocation3 + $0x30] sm:$0xff]   ;;  %v16822_v5 = vpop.f32.mrf.mxu0  ;;  %v17789_v45 = vld [vmem:[#allocation11 + $0xd8] sm:$0xff]  }
 0x50e   : > { %v10215_v26 = vrot.slane %v10213_v31, 4  ;;  %22250 = vst [vmem:[#allocation56_spill] sm:$0xff] %v20453_v33  ;;  %v8565_v18 = vld [vmem:[#allocation2 + $0x48] sm:$0x1]  ;;  %10555 = vst [vmem:[#allocation3 + $0x30] sm:$0xf] %v10188_v36  ;;  %16939 = vmatprep.subr.bf16.mxu1 %v17789_v45  ;;  %v8110_v48 = vmul.f32 %v20249_v52, %v7941_v56 }
 0x50f   : > { %v10197_v42 = vrot.slane %v10195_v28, 5  ;;  %v10202_v37 = vrot.slane %v10200_v47, 4  ;;  %v10205_v8 = vrot.slane %v10203_v62, 5  ;;  %v8566_v16 = vsel %vm20276_vm9, 0, %v8565_v18  ;;  %v20460_v27 = vld [vmem:[#allocation2 + $0x38] sm:$0x1]  ;;  %v7745_v3 = vpop.f32.mrf.mxu0  ;;  %16940 = vmatpush3.bf16.msra.mxu1 %v17789_v45 }
 0x510   : > { %v8222_v23 = vmax.f32 %v8168_v11, 0.0  ;;  %v20462_v28 = vld [vmem:[#allocation2 + $0x3c] sm:$0xe]  ;;  %v10216_v47 = vor.u32 %v10215_v26, %v10211_v49  ;;  %8567 = vst [vmem:[#allocation2 + $0x48] sm:$0x1] %v8566_v16  ;;  %v14688_v36 = vrot.slane %v20449_v9, 9  ;;  %v8171_v56 = vadd.f32 %v20258_v34, %v8110_v48 }
 0x511   : > { %v10198_v31 = vsel %vm18429_vm3, %v10193_v15, %v10197_v42  ;;  %v10206_v59 = vor.u32 %v10205_v8, %v10202_v37  ;;  %v10042_v62 = vld [vmem:[#allocation2 + $0x44] sm:$0x1]  ;;  %v22078_v18 = vrot.slane %v20451_v10, 5  ;;  %v22251_v15 = vrot.slane %v20434_v19, 5  ;;  %v20469_v5 = vld [vmem:[#allocation2 + $0x4c] sm:$0xf]  ;;  %v16825_v26 = vpop.f32.mrf.mxu0 }
 0x512   : > { %v14954_v11 = vpack.c.bf16 %v8223_v57, %v8222_v23  ;;  %10556 = vst [vmem:[#allocation3 + $0x34] sm:$0xf] %v10198_v31  ;;  %v10219_v42 = vshll.u32 %v10042_v62, 16  ;;  %v17791_v16 = vld [vmem:[#allocation11 + $0xd0] sm:$0xff]   ;;  %v12074_v9 = vrot.slane %v20460_v27, 5  ;;  %v8170_v57 = vadd.f32 %v20258_v34, %v8109_v24  ;;  %v17794_v26 = vld [vmem:[#allocation11 + $0xc8] sm:$0xff]  }
 0x513   : > { %v12073_v37 = vrot.slane %v22251_v15, 4  ;;  %v10207_v8 = vrot.slane %v10206_v59, 4  ;;  %v17768_v46 = vld [vmem:[#allocation3 + $0x3c] sm:$0xff]   ;;  %v10217_v31 = vrot.slane %v10216_v47, 4  ;;  %v7942_v62 = vadd.f32 %v7745_v3, %v20129_v1  ;;  %v7748_v27 = vpop.f32.mrf.mxu0  ;;  %16941 = vmatprep.subr.bf16.mxu1 %v17791_v16 }
 0x514   : > { %15189 = vst [vmem:[#allocation2 + $0x50] sm:$0xff] %v14954_v11   ;;  %v10221_v59 = vrot.slane %v10219_v42, 5  ;;  %v20478_v15 = vld [vmem:[#allocation3 + $0x3c] sm:$0xff]   ;;  %v20484_v24 = vrot.slane %v22078_v18, 4  ;;  %v10233_v11 = vshll.u32 %v20469_v5, 16  ;;  %16908 = vmatmul.mubr.bf16.gmra.mxu1 %v17768_v46  ;;  %v7943_v3 = vadd.f32 %v7748_v27, %v20132_v50 }
 0x515   : > { %v10212_v23 = vsel %vm18429_vm3, %v10207_v8, %v10211_v49  ;;  %v20480_v45 = vld [vmem:[#allocation3 + $0x3c] sm:$0xff]   ;;  %v20490_v49 = vld [vmem:[#allocation2 + $0x44] sm:$0x1]  ;;  %v8111_v47 = vmul.f32 %v20249_v52, %v7942_v62  ;;  %v16826_v8 = vpop.f32.mrf.mxu0  ;;  %16942 = vmatpush3.bf16.msra.mxu1 %v17791_v16  ;;  %v22253_v42 = vrot.slane %v20434_v19, 5  ;;  %v8224_v48 = vmax.f32 %v8170_v57, 0.0 }
 0x516   : > { %22252 = vst [vmem:[#allocation57_spill] sm:$0xff] %v20480_v45  ;;  %10557 = vst [vmem:[#allocation3 + $0x3c] sm:$0xf] %v10212_v23  ;;  %v10222_v1 = vsel %vm18429_vm3, %v10217_v31, %v10221_v59  ;;  %v8225_v46 = vmax.f32 %v8171_v56, 0.0  ;;  %16943 = vmatprep.subr.bf16.mxu1 %v17794_v26  ;;  %v17796_v23 = vld [vmem:[#allocation11 + $0xc0] sm:$0xff]   ;;  %v10237_v27 = vshrl.u32 %v20469_v5, 16 }
 0x517   : > { %v12072_v33 = vsel %vm18555_vm6, %v14688_v36, %v22253_v42  ;;  %v8680_v18 = vld [vmem:[#allocation2 + $0x48] sm:$0xff]   ;;  %10558 = vst [vmem:[#allocation3 + $0x40] sm:$0xf] %v10222_v1  ;;  %v20505_v19 = vld [vmem:[%s22055_s5] ss:$0 sm:$0xff]  ;;  %v7753_v62 = vpop.f32.mrf.mxu0  ;;  %v12081_v60 = vrot.slane %v20490_v49, 5 }
 0x518   : > { %v10043_v34 = vld [vmem:[#allocation2 + $0x48] sm:$0xf]  ;;  %8716 = vst [vmem:[#allocation3 + $0x48] sm:$0xff] %v8680_v18   ;;  %v8172_v36 = vadd.f32 %v20505_v19, %v8111_v47  ;;  %v20511_v16 = vld [vmem:[%s22054_s4] ss:$0 sm:$0xff]  ;;  %v12075_v18 = vsel %vm18555_vm6, %v12073_v37, %v12074_v9  ;;  %v14959_v56 = vpack.c.bf16 %v8225_v46, %v8224_v48  ;;  %v7944_v8 = vadd.f32 %v7753_v62, %v20137_v29  ;;  %v17800_v49 = vld [vmem:[#allocation11 + $0xb0] sm:$0xff]  }
 0x519   : > { %v10224_v31 = vshrl.u32 %v10043_v34, 16  ;;  %v10227_v59 = vshll.u32 %v10043_v34, 16  ;;  %v20498_v52 = vld [vmem:[#allocation3 + $0x30] sm:$0xff]   ;;  %v8112_v57 = vmul.f32 %v20511_v16, %v7943_v3  ;;  %v17798_v42 = vld [vmem:[#allocation11 + $0xb8] sm:$0xff]   ;;  %v16829_v3 = vpop.f32.mrf.mxu0  ;;  %16944 = vmatpush3.bf16.msra.mxu1 %v17794_v26  ;;  %v10235_v48 = vrot.slane %v10233_v11, 5 }
 0x51a   : > { %22254 = vst [vmem:[#allocation58_spill] sm:$0xff] %v20498_v52  ;;  %v20500_v50 = vld [vmem:[#allocation3 + $0x30] sm:$0xff]   ;;  %15190 = vst [vmem:[#allocation2 + $0x58] sm:$0xff] %v14959_v56   ;;  %v8113_v29 = vmul.f32 %v20511_v16, %v7944_v8  ;;  %16945 = vmatprep.subr.bf16.mxu1 %v17796_v23  ;;  %17171 = vmatprep.subr.bf16.mxu0 %v17798_v42 }
 0x51b   : > { %22255 = vst [vmem:[#allocation59_spill] sm:$0xff] %v20500_v50  ;;  %v17769_v1 = vld [vmem:[#allocation3 + $0x30] sm:$0xff]   ;;  %v10226_v34 = vrot.slane %v10224_v31, 4  ;;  %v10229_v47 = vrot.slane %v10227_v59, 5  ;;  %v8568_v50 = vld [vmem:[#allocation2 + $0x54] sm:$0x1]  ;;  %v8173_v45 = vadd.f32 %v20505_v19, %v8112_v57  ;;  %v7756_v26 = vpop.f32.mrf.mxu0  ;;  %17172 = vmatpush3.bf16.msra.mxu0 %v17798_v42 }
 0x51c   : > { %v8621_v52 = vld [vmem:[#allocation2 + $0x50] sm:$0x1]  ;;  %12211 = vst [vmem:[#allocation3 + $0x30] sm:$0xf] %v12072_v33  ;;  %12212 = vst [vmem:[#allocation3 + $0x34] sm:$0xf] %v12075_v18  ;;  %17096 = vmatmul.mubr.bf16.gmra.mxu0 %v17769_v1  ;;  %v20526_v31 = vadd.f32 %v20505_v19, %v8113_v29  ;;  %v7945_v59 = vadd.f32 %v7756_v26, %v20140_v55  ;;  %17173 = vmatprep.subr.bf16.mxu0 %v17800_v49 }
 0x51d   : > { %v8569_v37 = vsel %vm20276_vm9, 0, %v8568_v50  ;;  %v8622_v5 = vsel %vm20289_vm11, 0, %v8621_v52  ;;  %v10230_v9 = vor.u32 %v10229_v47, %v10226_v34  ;;  %v8226_v33 = vmax.f32 %v8172_v36, 0.0  ;;  %v16830_v18 = vpop.f32.mrf.mxu0  ;;  %16946 = vmatpush3.bf16.msra.mxu1 %v17796_v23  ;;  %v11951_v26 = vld [vmem:[#allocation2 + $0x48] sm:$0xe] }
 0x51e   : > { %8570 = vst [vmem:[#allocation2 + $0x54] sm:$0x1] %v8569_v37  ;;  %8623 = vst [vmem:[#allocation2 + $0x50] sm:$0x1] %v8622_v5  ;;  %v8227_v46 = vmax.f32 %v8173_v45, 0.0  ;;  %v10239_v50 = vrot.slane %v10237_v27, 4  ;;  %v12082_v55 = vsel %vm18555_vm6, %v20484_v24, %v12081_v60  ;;  %v8114_v27 = vmul.f32 %v20511_v16, %v7945_v59 }
 0x51f   : > { %v10231_v52 = vrot.slane %v10230_v9, 4  ;;  %v20529_v57 = vld [vmem:[#allocation3 + $0x3c] sm:$0xff]   ;;  %v22257_v45 = vrot.slane %v20451_v10, 5  ;;  %v22258_v36 = vrot.slane %v20462_v28, 9  ;;  %v7761_v23 = vpop.f32.mrf.mxu0  ;;  %v17771_v10 = vld [vmem:[#allocation3 + $0x48] sm:$0xff]   ;;  %v8228_v34 = vmax.f32 %v20526_v31, 0.0  ;;  %17174 = vmatpush3.bf16.msra.mxu0 %v17800_v49 }
 0x520   : > { %v20531_v62 = vld [vmem:[#allocation3 + $0x3c] sm:$0xff]   ;;  %v14964_v11 = vpack.c.bf16 %v8227_v46, %v8226_v33  ;;  %v20545_v42 = vld [vmem:[#allocation3 + $0x48] sm:$0xff]   ;;  %v8175_v47 = vadd.f32 %v20505_v19, %v8114_v27  ;;  %v10240_v24 = vor.u32 %v10239_v50, %v10235_v48  ;;  %16911 = vmatprep.mubr.bf16.mxu1 %v17771_v10  ;;  %v17804_v10 = vld [vmem:[#allocation11 + $0xa0] sm:$0xff]  }
 0x521   : > { %22256 = vst [vmem:[#allocation61_spill] sm:$0xff] %v20531_v62  ;;  %v12079_v56 = vsel %vm18555_vm6, %v22258_v36, %v22257_v45  ;;  %v17770_v1 = vld [vmem:[#allocation3 + $0x3c] sm:$0xff]   ;;  %v10236_v8 = vsel %vm18429_vm3, %v10231_v52, %v10235_v48  ;;  %v20547_v28 = vld [vmem:[#allocation3 + $0x48] sm:$0xff]   ;;  %v8624_v3 = vld [vmem:[#allocation2 + $0x5c] sm:$0x1]  ;;  %v16833_v29 = vpop.f32.mrf.mxu0  ;;  %v7946_v36 = vadd.f32 %v7761_v23, %v20145_v17 }
 0x522   : > { %15191 = vst [vmem:[#allocation2 + $0x60] sm:$0xff] %v14964_v11   ;;  %12213 = vst [vmem:[#allocation3 + $0x3c] sm:$0xf] %v12079_v56  ;;  %17099 = vmatprep.mubr.bf16.mxu0 %v17770_v1  ;;  %v17802_v60 = vld [vmem:[#allocation11 + $0xa8] sm:$0xff]   ;;  %v8683_v37 = vld [vmem:[#allocation2 + $0x58] sm:$0xf] }
 0x523   : > { %12214 = vst [vmem:[#allocation3 + $0x40] sm:$0xf] %v12082_v55  ;;  %10559 = vst [vmem:[#allocation3 + $0x48] sm:$0xf] %v10236_v8  ;;  %v10047_v5 = vld [vmem:[#allocation2 + $0x58] sm:$0xf]  ;;  %17175 = vmatprep.subr.bf16.mxu0 %v17802_v60  ;;  %v7764_v11 = vpop.f32.mrf.mxu0 }
 0x524   : > { %8719 = vst [vmem:[#allocation3 + $0x58] sm:$0xf] %v8683_v37  ;;  %v8625_v49 = vsel %vm20289_vm11, 0, %v8624_v3  ;;  %v11952_v48 = vld [vmem:[#allocation2 + $0x4c] sm:$0xf]  ;;  %v10257_v50 = vshll.u32 %v10047_v5, 16  ;;  %17176 = vmatpush3.bf16.msra.mxu0 %v17802_v60 }
 0x525   : > { %v8682_v9 = vld [vmem:[#allocation2 + $0x54] sm:$0xf]  ;;  %v10045_v33 = vld [vmem:[#allocation2 + $0x50] sm:$0x1]  ;;  %8626 = vst [vmem:[#allocation2 + $0x5c] sm:$0x1] %v8625_v49  ;;  %v16834_v8 = vpop.f32.mrf.mxu0  ;;  %17177 = vmatprep.subr.bf16.mxu0 %v17804_v10 }
 0x526   : > { %v10046_v46 = vld [vmem:[#allocation2 + $0x54] sm:$0xf]  ;;  %v10243_v59 = vshll.u32 %v10045_v33, 16  ;;  %8718 = vst [vmem:[#allocation3 + $0x54] sm:$0xf] %v8682_v9  ;;  %v10261_v18 = vshrl.u32 %v10047_v5, 16 }
 0x527   : > { %v10248_v31 = vshrl.u32 %v10046_v46, 16  ;;  %v10251_v52 = vshll.u32 %v10046_v46, 16  ;;  %v8229_v45 = vmax.f32 %v8175_v47, 0.0  ;;  %v10241_v56 = vrot.slane %v10240_v24, 4  ;;  %v7769_v47 = vpop.f32.mrf.mxu0  ;;  %v17805_v17 = vld [vmem:[#allocation11 + $0x98] sm:$0xff]  }
 0x528   : > { %v10245_v55 = vrot.slane %v10243_v59, 5  ;;  %v10259_v37 = vrot.slane %v10257_v50, 5  ;;  %v10263_v29 = vrot.slane %v10261_v18, 4  ;;  %v14690_v3 = vrot.slane %v11951_v26, 9  ;;  %v11953_v23 = vld [vmem:[#allocation2 + $0x50] sm:$0x1]  ;;  %17178 = vmatpush3.bf16.msra.mxu0 %v17804_v10 }
 0x529   : > { %v10250_v27 = vrot.slane %v10248_v31, 4  ;;  %v10253_v1 = vrot.slane %v10251_v52, 5  ;;  %v8571_v9 = vld [vmem:[#allocation2 + $0x60] sm:$0x1]  ;;  %v14969_v33 = vpack.c.bf16 %v8229_v45, %v8228_v34  ;;  %v12085_v46 = vrot.slane %v11952_v48, 5  ;;  %v16837_v26 = vpop.f32.mrf.mxu0  ;;  %17179 = vmatprep.subr.bf16.mxu0 %v17805_v17 }
 0x52a   : > { %v10246_v49 = vsel %vm18429_vm3, %v10241_v56, %v10245_v55  ;;  %v8572_v60 = vsel %vm20276_vm9, 0, %v8571_v9  ;;  %v8115_v24 = vmul.f32 %v20511_v16, %v7946_v36  ;;  %v20559_v34 = vld [vmem:[#allocation2 + $0x54] sm:$0xe]  ;;  %v10264_v31 = vor.u32 %v10263_v29, %v10259_v37  ;;  %v10050_v52 = vld [vmem:[#allocation2 + $0x64] sm:$0xf] }
 0x52b   : > { %v10254_v5 = vor.u32 %v10253_v1, %v10250_v27  ;;  %15192 = vst [vmem:[#allocation2 + $0x68] sm:$0xff] %v14969_v33   ;;  %10560 = vst [vmem:[#allocation3 + $0x4c] sm:$0xf] %v10246_v49  ;;  %v7947_v48 = vadd.f32 %v7764_v11, %v20148_v0  ;;  %v12086_v18 = vsel %vm18555_vm6, %v14690_v3, %v12085_v46  ;;  %v12088_v45 = vrot.slane %v11953_v23, 5  ;;  %v20566_v55 = vld [vmem:[#allocation2 + $0x58] sm:$0xf]  ;;  %v7772_v27 = vpop.f32.mrf.mxu0 }
 0x52c   : > { %8573 = vst [vmem:[#allocation2 + $0x60] sm:$0x1] %v8572_v60  ;;  %v10048_v56 = vld [vmem:[#allocation2 + $0x5c] sm:$0x1]  ;;  %v12087_v1 = vrot.slane %v12085_v46, 4  ;;  %v8176_v10 = vadd.f32 %v20505_v19, %v8115_v24  ;;  %v17799_v9 = vld [vmem:[#allocation11 + $0x1b8] sm:$0xff]   ;;  %17180 = vmatpush3.bf16.msra.mxu0 %v17805_v17  ;;  %v7949_v46 = vadd.f32 %v7772_v27, %v20156_v51 }
 0x52d   : > { %v10255_v59 = vrot.slane %v10254_v5, 4  ;;  %v17772_v50 = vld [vmem:[#allocation3 + $0x54] sm:$0xff]   ;;  %v10267_v8 = vshll.u32 %v10048_v56, 16  ;;  %v8116_v29 = vmul.f32 %v20511_v16, %v7947_v48  ;;  %v10281_v3 = vshll.u32 %v10050_v52, 16  ;;  %v16838_v49 = vpop.f32.mrf.mxu0  ;;  %v17807_v5 = vld [vmem:[#allocation11 + $0x90] sm:$0xff]   ;;  %16979 = vmatprep.subr.bf16.mxu1 %v17799_v9 }
 0x52e   : > { %16912 = vmatmul.mubr.bf16.gmra.mxu1 %v17772_v50  ;;  %v20570_v0 = vld [vmem:[#allocation3 + $0x54] sm:$0xff]   ;;  %v10265_v23 = vrot.slane %v10264_v31, 4  ;;  %v10285_v24 = vshrl.u32 %v10050_v52, 16  ;;  %v12089_v17 = vsel %vm18555_vm6, %v12087_v1, %v12088_v45  ;;  %v12092_v48 = vrot.slane %v20566_v55, 5  ;;  %17181 = vmatprep.subr.bf16.mxu0 %v17807_v5 }
 0x52f   : > { %v10260_v36 = vsel %vm18429_vm3, %v10255_v59, %v10259_v37  ;;  %v20572_v11 = vld [vmem:[#allocation3 + $0x54] sm:$0xff]   ;;  %v7948_v37 = vadd.f32 %v7769_v47, %v20153_v41  ;;  %v10269_v60 = vrot.slane %v10267_v8, 5  ;;  %v8177_v59 = vadd.f32 %v20505_v19, %v8116_v29  ;;  %v7777_v47 = vpop.f32.mrf.mxu0 }
 0x530   : > { %10561 = vst [vmem:[#allocation3 + $0x54] sm:$0xf] %v10260_v36  ;;  %v17809_v26 = vld [vmem:[#allocation11 + $0x88] sm:$0xff]   ;;  %v8118_v51 = vmul.f32 %v20511_v16, %v7949_v46  ;;  %v8230_v1 = vmax.f32 %v8176_v10, 0.0  ;;  %17182 = vmatpush3.bf16.msra.mxu0 %v17807_v5  ;;  %v10287_v10 = vrot.slane %v10285_v24, 4 }
 0x531   : > { %v8117_v41 = vmul.f32 %v20511_v16, %v7948_v37  ;;  %v10270_v31 = vsel %vm18429_vm3, %v10265_v23, %v10269_v60  ;;  %v8231_v46 = vmax.f32 %v8177_v59, 0.0  ;;  %v16841_v60 = vpop.f32.mrf.mxu0  ;;  %17183 = vmatprep.subr.bf16.mxu0 %v17809_v26 }
 0x532   : > { %v8574_v50 = vld [vmem:[#allocation2 + $0x6c] sm:$0x1]  ;;  %v8627_v56 = vld [vmem:[#allocation2 + $0x68] sm:$0x1]  ;;  %v20589_v9 = vld [vmem:[#allocation3 + $0x48] sm:$0xff]   ;;  %v8179_v5 = vadd.f32 %v20505_v19, %v8118_v51 }
 0x533   : > { %v8684_v52 = vld [vmem:[#allocation2 + $0x60] sm:$0xff]   ;;  %v8575_v27 = vsel %vm20276_vm9, 0, %v8574_v50  ;;  %v8628_v45 = vsel %vm20289_vm11, 0, %v8627_v56  ;;  %v8178_v49 = vadd.f32 %v20505_v19, %v8117_v41  ;;  %10562 = vst [vmem:[#allocation3 + $0x58] sm:$0xf] %v10270_v31  ;;  %v20594_v50 = vrot.slane %v10281_v3, 5  ;;  %v7780_v41 = vpop.f32.mrf.mxu0 }
 0x534   : > { %v10049_v36 = vld [vmem:[#allocation2 + $0x60] sm:$0xf]  ;;  %8720 = vst [vmem:[#allocation3 + $0x60] sm:$0xff] %v8684_v52   ;;  %8576 = vst [vmem:[#allocation2 + $0x6c] sm:$0x1] %v8575_v27  ;;  %v7950_v56 = vadd.f32 %v7777_v47, %v20161_v2  ;;  %v17811_v52 = vld [vmem:[#allocation11 + $0x80] sm:$0xff]   ;;  %v14974_v59 = vpack.c.bf16 %v8231_v46, %v8230_v1  ;;  %v7951_v3 = vadd.f32 %v7780_v41, %v20164_v20  ;;  %17184 = vmatpush3.bf16.msra.mxu0 %v17809_v26 }
 0x535   : > { %v10272_v8 = vshrl.u32 %v10049_v36, 16  ;;  %v10275_v29 = vshll.u32 %v10049_v36, 16  ;;  %8629 = vst [vmem:[#allocation2 + $0x68] sm:$0x1] %v8628_v45  ;;  %v20591_v37 = vld [vmem:[#allocation3 + $0x48] sm:$0xff]   ;;  %v8232_v31 = vmax.f32 %v8178_v49, 0.0  ;;  %17185 = vmatprep.subr.bf16.mxu0 %v17811_v52  ;;  %v10288_v2 = vor.u32 %v10287_v10, %v20594_v50 }
 0x536   : > { %22259 = vst [vmem:[#allocation62_spill] sm:$0xff] %v20591_v37  ;;  %v17773_v23 = vld [vmem:[#allocation3 + $0x48] sm:$0xff]   ;;  %v11956_v36 = vld [vmem:[#allocation2 + $0x5c] sm:$0x1]  ;;  %v8233_v33 = vmax.f32 %v8179_v5, 0.0  ;;  %v8119_v60 = vmul.f32 %v20511_v16, %v7950_v56  ;;  %15193 = vst [vmem:[#allocation2 + $0x70] sm:$0xff] %v14974_v59   ;;  %v8120_v47 = vmul.f32 %v20511_v16, %v7951_v3 }
 0x537   : > { %12215 = vst [vmem:[#allocation3 + $0x48] sm:$0xf] %v12086_v18  ;;  %12216 = vst [vmem:[#allocation3 + $0x4c] sm:$0xf] %v12089_v17  ;;  %v10274_v27 = vrot.slane %v10272_v8, 4  ;;  %v10277_v45 = vrot.slane %v10275_v29, 5  ;;  %17100 = vmatmul.mubr.bf16.gmra.mxu0 %v17773_v23  ;;  %v16842_v18 = vpop.f32.mrf.mxu0 }
 0x538   : > { %v14979_v17 = vpack.c.bf16 %v8233_v33, %v8232_v31  ;;  %v8180_v51 = vadd.f32 %v20505_v19, %v8119_v60  ;;  %v12095_v1 = vrot.slane %v11956_v36, 5  ;;  %v8181_v20 = vadd.f32 %v20505_v19, %v8120_v47  ;;  %17186 = vmatpush3.bf16.msra.mxu0 %v17811_v52  ;;  %v11958_v52 = vld [vmem:[#allocation2 + $0x64] sm:$0xf] }
 0x539   : > { %v10278_v24 = vor.u32 %v10277_v45, %v10274_v27  ;;  %v7785_v29 = vpop.f32.mrf.mxu0  ;;  %v12094_v10 = vrot.slane %v12092_v48, 4  ;;  %v22260_v45 = vrot.slane %v20559_v34, 9  ;;  %v10289_v41 = vrot.slane %v10288_v2, 4 }
 0x53a   : > { %15194 = vst [vmem:[#allocation2 + $0x78] sm:$0xff] %v14979_v17   ;;  %v7952_v26 = vadd.f32 %v7785_v29, %v20169_v53  ;;  %v20607_v27 = vld [vmem:[#allocation3 + $0x54] sm:$0xff]   ;;  %v11957_v53 = vld [vmem:[#allocation2 + $0x60] sm:$0xe]  ;;  %v8234_v60 = vmax.f32 %v8180_v51, 0.0  ;;  %v8235_v3 = vmax.f32 %v8181_v20, 0.0 }
 0x53b   : > { %v10279_v8 = vrot.slane %v10278_v24, 4  ;;  %v8686_v46 = vld [vmem:[#allocation2 + $0x6c] sm:$0xf]  ;;  %v16845_v36 = vpop.f32.mrf.mxu0  ;;  %v12093_v59 = vsel %vm18555_vm6, %v22260_v45, %v12092_v48  ;;  %v12096_v24 = vsel %vm18555_vm6, %v12094_v10, %v12095_v1  ;;  %v12099_v45 = vrot.slane %v11958_v52, 5 }
 0x53c   : > { %v10051_v49 = vld [vmem:[#allocation2 + $0x68] sm:$0x1]  ;;  %v10052_v23 = vld [vmem:[#allocation2 + $0x6c] sm:$0xf]  ;;  %8722 = vst [vmem:[#allocation3 + $0x6c] sm:$0xf] %v8686_v46  ;;  %v8121_v51 = vmul.f32 %v20511_v16, %v7952_v26 }
 0x53d   : > { %v10291_v33 = vshll.u32 %v10051_v49, 16  ;;  %v10296_v5 = vshrl.u32 %v10052_v23, 16  ;;  %v10299_v56 = vshll.u32 %v10052_v23, 16  ;;  %v20615_v31 = vld [vmem:[#allocation3 + $0x54] sm:$0xff]   ;;  %v7788_v55 = vpop.f32.mrf.mxu0  ;;  %v10284_v34 = vsel %vm18429_vm3, %v10279_v8, %v20594_v50  ;;  %v8630_v48 = vld [vmem:[#allocation2 + $0x74] sm:$0x1] }
 0x53e   : > { %22261 = vst [vmem:[#allocation63_spill] sm:$0xff] %v20615_v31  ;;  %v17774_v29 = vld [vmem:[#allocation3 + $0x54] sm:$0xff]   ;;  %v14984_v49 = vpack.c.bf16 %v8235_v3, %v8234_v60  ;;  %v7953_v23 = vadd.f32 %v7788_v55, %v20172_v43  ;;  %v8631_v20 = vsel %vm20289_vm11, 0, %v8630_v48  ;;  %v20630_v26 = vld [vmem:[#allocation3 + $0x60] sm:$0xff]   ;;  %v14692_v36 = vrot.slane %v11957_v53, 9 }
 0x53f   : > { %v10293_v18 = vrot.slane %v10291_v33, 5  ;;  %v10298_v17 = vrot.slane %v10296_v5, 4  ;;  %v10301_v47 = vrot.slane %v10299_v56, 5  ;;  %v8687_v2 = vld [vmem:[#allocation2 + $0x70] sm:$0xf]  ;;  %17103 = vmatprep.mubr.bf16.mxu0 %v17774_v29  ;;  %v16846_v50 = vpop.f32.mrf.mxu0  ;;  %v17775_v5 = vld [vmem:[#allocation3 + $0x60] sm:$0xff]  }
 0x540   : > { %v10053_v46 = vld [vmem:[#allocation2 + $0x70] sm:$0xf]  ;;  %12217 = vst [vmem:[#allocation3 + $0x54] sm:$0xf] %v12093_v59  ;;  %12218 = vst [vmem:[#allocation3 + $0x58] sm:$0xf] %v12096_v24  ;;  %v8122_v43 = vmul.f32 %v20511_v16, %v7953_v23  ;;  %16915 = vmatprep.mubr.bf16.mxu1 %v17775_v5 }
 0x541   : > { %v10294_v1 = vsel %vm18429_vm3, %v10289_v41, %v10293_v18  ;;  %v10305_v10 = vshll.u32 %v10053_v46, 16  ;;  %8723 = vst [vmem:[#allocation3 + $0x70] sm:$0xf] %v8687_v2  ;;  %v10302_v8 = vor.u32 %v10301_v47, %v10298_v17  ;;  %8632 = vst [vmem:[#allocation2 + $0x74] sm:$0x1] %v8631_v20  ;;  %v10309_v33 = vshrl.u32 %v10053_v46, 16  ;;  %v7793_v41 = vpop.f32.mrf.mxu0 }
 0x542   : > { %15195 = vst [vmem:[#allocation2 + $0x80] sm:$0xff] %v14984_v49   ;;  %v20628_v56 = vld [vmem:[#allocation3 + $0x60] sm:$0xff]   ;;  %v8182_v17 = vadd.f32 %v20505_v19, %v8121_v51  ;;  %v11959_v47 = vld [vmem:[#allocation2 + $0x68] sm:$0x1]  ;;  %v8183_v53 = vadd.f32 %v20505_v19, %v8122_v43  ;;  %v7954_v52 = vadd.f32 %v7793_v41, %v20177_v4  ;;  %v12101_v51 = vrot.slane %v12099_v45, 4 }
 0x543   : > { %v8577_v59 = vld [vmem:[#allocation2 + $0x78] sm:$0x1]  ;;  %10563 = vst [vmem:[#allocation3 + $0x60] sm:$0xf] %v10284_v34  ;;  %10564 = vst [vmem:[#allocation3 + $0x64] sm:$0xf] %v10294_v1  ;;  %v16849_v29 = vpop.f32.mrf.mxu0  ;;  %v12100_v34 = vsel %vm18555_vm6, %v14692_v36, %v12099_v45 }
 0x544   : > { %v10307_v60 = vrot.slane %v10305_v10, 5  ;;  %v10311_v3 = vrot.slane %v10309_v33, 4  ;;  %v8578_v24 = vsel %vm20276_vm9, 0, %v8577_v59  ;;  %v10056_v18 = vld [vmem:[#allocation2 + $0x7c] sm:$0xf]  ;;  %v10303_v55 = vrot.slane %v10302_v8, 4 }
 0x545   : > { %8579 = vst [vmem:[#allocation2 + $0x78] sm:$0x1] %v8578_v24  ;;  %v10329_v48 = vshll.u32 %v10056_v18, 16  ;;  %v7796_v2 = vpop.f32.mrf.mxu0  ;;  %v12102_v46 = vrot.slane %v11959_v47, 5  ;;  %v8236_v23 = vmax.f32 %v8182_v17, 0.0  ;;  %v8237_v1 = vmax.f32 %v8183_v53, 0.0 }
 0x546   : > { %v10312_v49 = vor.u32 %v10311_v3, %v10307_v60  ;;  %v10333_v50 = vshrl.u32 %v10056_v18, 16  ;;  %v8123_v8 = vmul.f32 %v20511_v16, %v7954_v52  ;;  %v7955_v5 = vadd.f32 %v7796_v2, %v20180_v35 }
 0x547   : > { %v16850_v43 = vpop.f32.mrf.mxu0  ;;  %v10308_v4 = vsel %vm18429_vm3, %v10303_v55, %v10307_v60  ;;  %v14989_v3 = vpack.c.bf16 %v8237_v1, %v8236_v23  ;;  %v20646_v24 = vrot.slane %v10329_v48, 5  ;;  %v12103_v55 = vsel %vm18555_vm6, %v12101_v51, %v12102_v46  ;;  %v11961_v48 = vld [vmem:[#allocation2 + $0x70] sm:$0xf] }
 0x548   : > { %v17776_v20 = vld [vmem:[#allocation3 + $0x6c] sm:$0xff]   ;;  %v10054_v10 = vld [vmem:[#allocation2 + $0x74] sm:$0x1]  ;;  %v8184_v17 = vadd.f32 %v20505_v19, %v8123_v8  ;;  %v8124_v47 = vmul.f32 %v20511_v16, %v7955_v5  ;;  %v10313_v53 = vrot.slane %v10312_v49, 4  ;;  %v10335_v43 = vrot.slane %v10333_v50, 4 }
 0x549   : > { %v8580_v33 = vld [vmem:[#allocation2 + $0x84] sm:$0x1]  ;;  %v10315_v36 = vshll.u32 %v10054_v10, 16  ;;  %v8633_v41 = vld [vmem:[#allocation2 + $0x80] sm:$0x1]  ;;  %16916 = vmatmul.mubr.bf16.gmra.mxu1 %v17776_v20  ;;  %v7801_v29 = vpop.f32.mrf.mxu0  ;;  %15196 = vst [vmem:[#allocation2 + $0x88] sm:$0xff] %v14989_v3  }
 0x54a   : > { %v8581_v59 = vsel %vm20276_vm9, 0, %v8580_v33  ;;  %v8634_v45 = vsel %vm20289_vm11, 0, %v8633_v41  ;;  %v20650_v18 = vld [vmem:[#allocation3 + $0x60] sm:$0xff]   ;;  %v20655_v60 = vld [vmem:[#allocation3 + $0x6c] sm:$0xff]   ;;  %v7956_v20 = vadd.f32 %v7801_v29, %v20185_v14  ;;  %v11960_v10 = vld [vmem:[#allocation2 + $0x6c] sm:$0xe]  ;;  %v8185_v5 = vadd.f32 %v20505_v19, %v8124_v47 }
 0x54b   : > { %8582 = vst [vmem:[#allocation2 + $0x84] sm:$0x1] %v8581_v59  ;;  %v20652_v35 = vld [vmem:[#allocation3 + $0x60] sm:$0xff]   ;;  %v10317_v52 = vrot.slane %v10315_v36, 5  ;;  %8635 = vst [vmem:[#allocation2 + $0x80] sm:$0x1] %v8634_v45  ;;  %v16853_v49 = vpop.f32.mrf.mxu0 }
 0x54c   : > { %22262 = vst [vmem:[#allocation64_spill] sm:$0xff] %v20652_v35  ;;  %v8688_v2 = vld [vmem:[#allocation2 + $0x78] sm:$0xff]   ;;  %v20660_v1 = vld [vmem:[#allocation3 + $0x6c] sm:$0xff]   ;;  %v11962_v36 = vld [vmem:[#allocation2 + $0x74] sm:$0x1]  ;;  %v8238_v3 = vmax.f32 %v8184_v17, 0.0  ;;  %v8125_v50 = vmul.f32 %v20511_v16, %v7956_v20 }
 0x54d   : > { %v10055_v23 = vld [vmem:[#allocation2 + $0x78] sm:$0xf]  ;;  %8724 = vst [vmem:[#allocation3 + $0x78] sm:$0xff] %v8688_v2   ;;  %10565 = vst [vmem:[#allocation3 + $0x6c] sm:$0xf] %v10308_v4  ;;  %v10318_v51 = vsel %vm18429_vm3, %v10313_v53, %v10317_v52  ;;  %v8239_v14 = vmax.f32 %v8185_v5, 0.0  ;;  %v7804_v45 = vpop.f32.mrf.mxu0  ;;  %v10336_v53 = vor.u32 %v10335_v43, %v20646_v24 }
 0x54e   : > { %v10320_v33 = vshrl.u32 %v10055_v23, 16  ;;  %v10323_v8 = vshll.u32 %v10055_v23, 16  ;;  %v17777_v46 = vld [vmem:[#allocation3 + $0x60] sm:$0xff]   ;;  %10566 = vst [vmem:[#allocation3 + $0x70] sm:$0xf] %v10318_v51  ;;  %v7957_v4 = vadd.f32 %v7804_v45, %v20188_v38  ;;  %v12106_v47 = vrot.slane %v11961_v48, 5 }
 0x54f   : > { %12219 = vst [vmem:[#allocation3 + $0x60] sm:$0xf] %v12100_v34  ;;  %12220 = vst [vmem:[#allocation3 + $0x64] sm:$0xf] %v12103_v55  ;;  %17104 = vmatmul.mubr.bf16.gmra.mxu0 %v17777_v46  ;;  %v14994_v2 = vpack.c.bf16 %v8239_v14, %v8238_v3  ;;  %v16854_v23 = vpop.f32.mrf.mxu0  ;;  %v14693_v49 = vrot.slane %v11960_v10, 9  ;;  %v12109_v17 = vrot.slane %v11962_v36, 5  ;;  %v8186_v51 = vadd.f32 %v20505_v19, %v8125_v50 }
 0x550   : > { %v10322_v59 = vrot.slane %v10320_v33, 4  ;;  %v10325_v41 = vrot.slane %v10323_v8, 5  ;;  %v8126_v52 = vmul.f32 %v20511_v16, %v7957_v4  ;;  %v8636_v48 = vld [vmem:[#allocation2 + $0x8c] sm:$0x1]  ;;  %v12108_v36 = vrot.slane %v12106_v47, 4 }
 0x551   : > { %15197 = vst [vmem:[#allocation2 + $0x90] sm:$0xff] %v14994_v2   ;;  %v7809_v20 = vpop.f32.mrf.mxu0  ;;  %v8691_v45 = vld [vmem:[#allocation2 + $0x88] sm:$0xf]  ;;  %v10337_v2 = vrot.slane %v10336_v53, 4  ;;  %v20678_v23 = vld [vmem:[#allocation2 + $0x7c] sm:$0xf] }
 0x552   : > { %v10326_v29 = vor.u32 %v10325_v41, %v10322_v59  ;;  %v8690_v34 = vld [vmem:[#allocation2 + $0x84] sm:$0xf]  ;;  %v10057_v8 = vld [vmem:[#allocation2 + $0x80] sm:$0x1]  ;;  %v8187_v10 = vadd.f32 %v20505_v19, %v8126_v52  ;;  %v7958_v43 = vadd.f32 %v7809_v20, %v20193_v40  ;;  %v12107_v41 = vsel %vm18555_vm6, %v14693_v49, %v12106_v47  ;;  %8727 = vst [vmem:[#allocation3 + $0x88] sm:$0xf] %v8691_v45 }
 0x553   : > { %v10058_v55 = vld [vmem:[#allocation2 + $0x84] sm:$0xf]  ;;  %8726 = vst [vmem:[#allocation3 + $0x84] sm:$0xf] %v8690_v34  ;;  %v10339_v38 = vshll.u32 %v10057_v8, 16  ;;  %v16857_v4 = vpop.f32.mrf.mxu0  ;;  %v8637_v40 = vsel %vm20289_vm11, 0, %v8636_v48 }
 0x554   : > { %v10327_v33 = vrot.slane %v10326_v29, 4  ;;  %v10344_v5 = vshrl.u32 %v10058_v55, 16  ;;  %v10347_v46 = vshll.u32 %v10058_v55, 16  ;;  %v17779_v59 = vld [vmem:[#allocation3 + $0x78] sm:$0xff]   ;;  %v10059_v34 = vld [vmem:[#allocation2 + $0x88] sm:$0xf] }
 0x555   : > { %v10341_v50 = vrot.slane %v10339_v38, 5  ;;  %16919 = vmatprep.mubr.bf16.mxu1 %v17779_v59  ;;  %v20682_v49 = vld [vmem:[#allocation3 + $0x78] sm:$0xff]   ;;  %8638 = vst [vmem:[#allocation2 + $0x8c] sm:$0x1] %v8637_v40  ;;  %v10353_v55 = vshll.u32 %v10059_v34, 16  ;;  %v10357_v52 = vshrl.u32 %v10059_v34, 16  ;;  %v7812_v53 = vpop.f32.mrf.mxu0 }
 0x556   : > { %v10346_v3 = vrot.slane %v10344_v5, 4  ;;  %v10349_v14 = vrot.slane %v10347_v46, 5  ;;  %v10332_v29 = vsel %vm18429_vm3, %v10327_v33, %v20646_v24  ;;  %v20684_v8 = vld [vmem:[#allocation3 + $0x6c] sm:$0xff]   ;;  %v8127_v24 = vmul.f32 %v20511_v16, %v7958_v43  ;;  %v20693_v59 = vld [vmem:[#allocation3 + $0x78] sm:$0xff]   ;;  %v11963_v40 = vld [vmem:[#allocation2 + $0x78] sm:$0xe] }
 0x557   : > { %v20686_v5 = vld [vmem:[#allocation3 + $0x6c] sm:$0xff]   ;;  %v12110_v33 = vsel %vm18555_vm6, %v12108_v36, %v12109_v17  ;;  %v10342_v46 = vsel %vm18429_vm3, %v10337_v2, %v10341_v50  ;;  %v8240_v20 = vmax.f32 %v8186_v51, 0.0  ;;  %v8241_v38 = vmax.f32 %v8187_v10, 0.0  ;;  %10567 = vst [vmem:[#allocation3 + $0x78] sm:$0xf] %v10332_v29  ;;  %v16858_v4 = vpop.f32.mrf.mxu0 }
 0x558   : > { %v10350_v47 = vor.u32 %v10349_v14, %v10346_v3  ;;  %22263 = vst [vmem:[#allocation65_spill] sm:$0xff] %v20686_v5  ;;  %v17778_v48 = vld [vmem:[#allocation3 + $0x6c] sm:$0xff]   ;;  %v10355_v14 = vrot.slane %v10353_v55, 5  ;;  %v10359_v45 = vrot.slane %v10357_v52, 4  ;;  %10568 = vst [vmem:[#allocation3 + $0x7c] sm:$0xf] %v10342_v46  ;;  %v7959_v43 = vadd.f32 %v7812_v53, %v20196_v44 }
 0x559   : > { %12221 = vst [vmem:[#allocation3 + $0x6c] sm:$0xf] %v12107_v41  ;;  %12222 = vst [vmem:[#allocation3 + $0x70] sm:$0xf] %v12110_v33  ;;  %v11965_v17 = vld [vmem:[#allocation2 + $0x80] sm:$0x1]  ;;  %v14999_v34 = vpack.c.bf16 %v8241_v38, %v8240_v20  ;;  %17107 = vmatprep.mubr.bf16.mxu0 %v17778_v48  ;;  %v8188_v2 = vadd.f32 %v20505_v19, %v8127_v24  ;;  %v7817_v50 = vpop.f32.mrf.mxu0 }
 0x55a   : > { %v10351_v3 = vrot.slane %v10350_v47, 4  ;;  %v8583_v36 = vld [vmem:[#allocation2 + $0x90] sm:$0x1]  ;;  %v12113_v51 = vrot.slane %v20678_v23, 5  ;;  %v10360_v41 = vor.u32 %v10359_v45, %v10355_v14  ;;  %v8128_v29 = vmul.f32 %v20511_v16, %v7959_v43  ;;  %v17826_v44 = vld [vmem:[#allocation11 + $0x238] sm:$0xff]  }
 0x55b   : > { %v8584_v10 = vsel %vm20276_vm9, 0, %v8583_v36  ;;  %15198 = vst [vmem:[#allocation2 + $0x98] sm:$0xff] %v14999_v34   ;;  %v14694_v47 = vrot.slane %v11963_v40, 9  ;;  %v12116_v55 = vrot.slane %v11965_v17, 5  ;;  %v7960_v53 = vadd.f32 %v7817_v50, %v20201_v30  ;;  %v16861_v23 = vpop.f32.mrf.mxu0  ;;  %17267 = vmatprep.subr.bf16.mxu0 %v17826_v44  ;;  %v17781_v45 = vld [vmem:[#allocation3 + $0x84] sm:$0xff]  }
 0x55c   : > { %8585 = vst [vmem:[#allocation2 + $0x90] sm:$0x1] %v8584_v10  ;;  %v10356_v52 = vsel %vm18429_vm3, %v10351_v3, %v10355_v14  ;;  %v10060_v33 = vld [vmem:[#allocation2 + $0x8c] sm:$0x1]  ;;  %v8189_v46 = vadd.f32 %v20505_v19, %v8128_v29  ;;  %v12115_v24 = vrot.slane %v12113_v51, 4  ;;  %v8242_v38 = vmax.f32 %v8188_v2, 0.0  ;;  %16920 = vmatmul.mubr.bf16.gmra.mxu1 %v17781_v45 }
 0x55d   : > { %v10363_v20 = vshll.u32 %v10060_v33, 16  ;;  %v8129_v48 = vmul.f32 %v20511_v16, %v7960_v53  ;;  %v20706_v43 = vld [vmem:[#allocation3 + $0x84] sm:$0xff]   ;;  %v7820_v40 = vpop.f32.mrf.mxu0  ;;  %v10361_v17 = vrot.slane %v10360_v41, 4  ;;  %v12114_v34 = vsel %vm18555_vm6, %v14694_v47, %v12113_v51  ;;  %v20719_v50 = vld [vmem:[#allocation2 + $0x88] sm:$0xf] }
 0x55e   : > { %v20708_v4 = vld [vmem:[#allocation3 + $0x84] sm:$0xff]   ;;  %v8243_v14 = vmax.f32 %v8189_v46, 0.0  ;;  %v7961_v36 = vadd.f32 %v7820_v40, %v20204_v22  ;;  %v12117_v10 = vsel %vm18555_vm6, %v12115_v24, %v12116_v55  ;;  %v10062_v44 = vld [vmem:[#allocation2 + $0x94] sm:$0xf]  ;;  %v11966_v22 = vld [vmem:[#allocation2 + $0x84] sm:$0xe] }
 0x55f   : > { %v20710_v3 = vld [vmem:[#allocation3 + $0x78] sm:$0xff]   ;;  %10569 = vst [vmem:[#allocation3 + $0x84] sm:$0xf] %v10356_v52  ;;  %v10365_v2 = vrot.slane %v10363_v20, 5  ;;  %v16862_v29 = vpop.f32.mrf.mxu0  ;;  %v8190_v23 = vadd.f32 %v20505_v19, %v8129_v48  ;;  %v10377_v45 = vshll.u32 %v10062_v44, 16  ;;  %v10381_v40 = vshrl.u32 %v10062_v44, 16 }
 0x560   : > { %22264 = vst [vmem:[#allocation66_spill] sm:$0xff] %v20710_v3  ;;  %v20712_v30 = vld [vmem:[#allocation3 + $0x78] sm:$0xff]   ;;  %v15004_v53 = vpack.c.bf16 %v8243_v14, %v8242_v38  ;;  %v8130_v52 = vmul.f32 %v20511_v16, %v7961_v36  ;;  %v20730_v16 = vld [vmem:[%s22055_s5] ss:$0 sm:$0xff]  ;;  %v12120_v36 = vrot.slane %v20719_v50, 5 }
 0x561   : > { %22265 = vst [vmem:[#allocation67_spill] sm:$0xff] %v20712_v30  ;;  %v17783_v41 = vld [vmem:[#allocation3 + $0x78] sm:$0xff]   ;;  %v10366_v51 = vsel %vm18429_vm3, %v10361_v17, %v10365_v2  ;;  %v7825_v46 = vpop.f32.mrf.mxu0  ;;  %v11968_v29 = vld [vmem:[#allocation2 + $0x8c] sm:$0x1]  ;;  %v20743_v50 = vld [vmem:[%s22054_s4] ss:$0 sm:$0xff] }
 0x562   : > { %12223 = vst [vmem:[#allocation3 + $0x78] sm:$0xf] %v12114_v34  ;;  %12224 = vst [vmem:[#allocation3 + $0x7c] sm:$0xf] %v12117_v10  ;;  %v8586_v33 = vld [vmem:[#allocation2 + $0x9c] sm:$0x1]  ;;  %17108 = vmatmul.mubr.bf16.gmra.mxu0 %v17783_v41  ;;  %v8191_v48 = vadd.f32 %v20730_v16, %v8130_v52  ;;  %v7962_v2 = vadd.f32 %v7825_v46, %v20209_v39 }
 0x563   : > { %v8692_v47 = vld [vmem:[#allocation2 + $0x90] sm:$0xff]   ;;  %v8587_v38 = vsel %vm20276_vm9, 0, %v8586_v33  ;;  %v8639_v19 = vld [vmem:[#allocation2 + $0x98] sm:$0x1]  ;;  %15199 = vst [vmem:[#allocation2 + $0xa0] sm:$0xff] %v15004_v53   ;;  %v16865_v14 = vpop.f32.mrf.mxu0  ;;  %v8244_v34 = vmax.f32 %v8190_v23, 0.0 }
 0x564   : > { %v10061_v55 = vld [vmem:[#allocation2 + $0x90] sm:$0xf]  ;;  %8728 = vst [vmem:[#allocation3 + $0x90] sm:$0xff] %v8692_v47   ;;  %10570 = vst [vmem:[#allocation3 + $0x88] sm:$0xf] %v10366_v51  ;;  %v8640_v17 = vsel %vm20289_vm11, 0, %v8639_v19  ;;  %v8131_v39 = vmul.f32 %v20743_v50, %v7962_v2 }
 0x565   : > { %v10368_v24 = vshrl.u32 %v10061_v55, 16  ;;  %v10371_v20 = vshll.u32 %v10061_v55, 16  ;;  %8588 = vst [vmem:[#allocation2 + $0x9c] sm:$0x1] %v8587_v38  ;;  %8641 = vst [vmem:[#allocation2 + $0x98] sm:$0x1] %v8640_v17  ;;  %v7828_v51 = vpop.f32.mrf.mxu0 }
 0x566   : > { %v8245_v10 = vmax.f32 %v8191_v48, 0.0  ;;  %v14695_v47 = vrot.slane %v11966_v22, 9  ;;  %v7963_v44 = vadd.f32 %v7828_v51, %v20212_v21  ;;  %v20738_v55 = vrot.slane %v10377_v45, 5 }
 0x567   : > { %v10370_v41 = vrot.slane %v10368_v24, 4  ;;  %v10373_v53 = vrot.slane %v10371_v20, 5  ;;  %v10383_v33 = vrot.slane %v10381_v40, 4  ;;  %v16866_v38 = vpop.f32.mrf.mxu0  ;;  %v12122_v19 = vrot.slane %v12120_v36, 4 }
 0x568   : > { %v15009_v52 = vpack.c.bf16 %v8245_v10, %v8244_v34  ;;  %v12123_v14 = vrot.slane %v11968_v29, 5  ;;  %v8132_v23 = vmul.f32 %v20743_v50, %v7963_v44  ;;  %v12121_v10 = vsel %vm18555_vm6, %v14695_v47, %v12120_v36  ;;  %v20755_v44 = vld [vmem:[#allocation2 + $0x94] sm:$0xf] }
 0x569   : > { %v10374_v22 = vor.u32 %v10373_v53, %v10370_v41  ;;  %v7833_v20 = vpop.f32.mrf.mxu0  ;;  %v10384_v2 = vor.u32 %v10383_v33, %v20738_v55 }
 0x56a   : > { %15200 = vst [vmem:[#allocation2 + $0xa8] sm:$0xff] %v15009_v52   ;;  %v8642_v46 = vld [vmem:[#allocation2 + $0xa4] sm:$0x1]  ;;  %v8695_v24 = vld [vmem:[#allocation2 + $0xa0] sm:$0xf]  ;;  %v8193_v34 = vadd.f32 %v20730_v16, %v8132_v23  ;;  %v12124_v52 = vsel %vm18555_vm6, %v12122_v19, %v12123_v14  ;;  %v8192_v23 = vadd.f32 %v20730_v16, %v8131_v39  ;;  %v7964_v19 = vadd.f32 %v7833_v20, %v20217_v13 }
 0x56b   : > { %v10065_v21 = vld [vmem:[#allocation2 + $0xa0] sm:$0xf]  ;;  %v8643_v40 = vsel %vm20289_vm11, 0, %v8642_v46  ;;  %8731 = vst [vmem:[#allocation3 + $0xa0] sm:$0xf] %v8695_v24  ;;  %v16869_v51 = vpop.f32.mrf.mxu0  ;;  %v10375_v24 = vrot.slane %v10374_v22, 4 }
 0x56c   : > { %v8694_v48 = vld [vmem:[#allocation2 + $0x9c] sm:$0xf]  ;;  %v10401_v17 = vshll.u32 %v10065_v21, 16  ;;  %v10063_v29 = vld [vmem:[#allocation2 + $0x98] sm:$0x1]  ;;  %v10405_v46 = vshrl.u32 %v10065_v21, 16 }
 0x56d   : > { %v10064_v45 = vld [vmem:[#allocation2 + $0x9c] sm:$0xf]  ;;  %8730 = vst [vmem:[#allocation3 + $0x9c] sm:$0xf] %v8694_v48  ;;  %8644 = vst [vmem:[#allocation2 + $0xa4] sm:$0x1] %v8643_v40  ;;  %v7836_v48 = vpop.f32.mrf.mxu0 }
 0x56e   : > { %v10392_v41 = vshrl.u32 %v10064_v45, 16  ;;  %v10395_v53 = vshll.u32 %v10064_v45, 16  ;;  %v10387_v38 = vshll.u32 %v10063_v29, 16  ;;  %v10403_v47 = vrot.slane %v10401_v17, 5  ;;  %v20758_v33 = vld [vmem:[#allocation3 + $0x84] sm:$0xff]   ;;  %v17786_v39 = vld [vmem:[#allocation3 + $0x90] sm:$0xff]  }
 0x56f   : > { %22266 = vst [vmem:[#allocation68_spill] sm:$0xff] %v20758_v33  ;;  %v20760_v5 = vld [vmem:[#allocation3 + $0x84] sm:$0xff]   ;;  %v10407_v40 = vrot.slane %v10405_v46, 4  ;;  %v8247_v51 = vmax.f32 %v8193_v34, 0.0  ;;  %v20763_v14 = vld [vmem:[#allocation2 + $0x90] sm:$0xe]  ;;  %v16870_v22 = vpop.f32.mrf.mxu0  ;;  %16923 = vmatprep.mubr.bf16.mxu1 %v17786_v39 }
 0x570   : > { %v10394_v30 = vrot.slane %v10392_v41, 4  ;;  %v10397_v36 = vrot.slane %v10395_v53, 5  ;;  %22267 = vst [vmem:[#allocation69_spill] sm:$0xff] %v20760_v5  ;;  %v10389_v45 = vrot.slane %v10387_v38, 5  ;;  %v17785_v35 = vld [vmem:[#allocation3 + $0x84] sm:$0xff]   ;;  %v10385_v17 = vrot.slane %v10384_v2, 4 }
 0x571   : > { %v8589_v29 = vld [vmem:[#allocation2 + $0xa8] sm:$0x1]  ;;  %12225 = vst [vmem:[#allocation3 + $0x84] sm:$0xf] %v12121_v10  ;;  %12226 = vst [vmem:[#allocation3 + $0x88] sm:$0xf] %v12124_v52  ;;  %17111 = vmatprep.mubr.bf16.mxu0 %v17785_v35  ;;  %v10408_v13 = vor.u32 %v10407_v40, %v10403_v47  ;;  %v10380_v10 = vsel %vm18429_vm3, %v10375_v24, %v20738_v55  ;;  %v8133_v35 = vmul.f32 %v20743_v50, %v7964_v19 }
 0x572   : > { %v10398_v21 = vor.u32 %v10397_v36, %v10394_v30  ;;  %v22079_v41 = vrot.slane %v20755_v44, 5  ;;  %v20766_v53 = vld [vmem:[#allocation2 + $0xa0] sm:$0xf]  ;;  %v8590_v38 = vsel %vm20276_vm9, 0, %v8589_v29  ;;  %v8246_v34 = vmax.f32 %v8192_v23, 0.0  ;;  %v7841_v30 = vpop.f32.mrf.mxu0  ;;  %v22268_v19 = vld [vmem:[#allocation39_spill] sm:$0xff] }
 0x573   : > { %8591 = vst [vmem:[#allocation2 + $0xa8] sm:$0x1] %v8590_v38  ;;  %v20770_v20 = vld [vmem:[#allocation2 + $0xac] sm:$0xf]  ;;  %v10390_v2 = vsel %vm18429_vm3, %v10385_v17, %v10389_v45  ;;  %v11971_v52 = vld [vmem:[#allocation2 + $0x98] sm:$0x1]  ;;  %v7965_v17 = vadd.f32 %v7836_v48, %v22268_v19 }
 0x574   : > { %v10399_v46 = vrot.slane %v10398_v21, 4  ;;  %v20777_v36 = vld [vmem:[#allocation2 + $0x9c] sm:$0xe]  ;;  %v10066_v29 = vld [vmem:[#allocation2 + $0xa4] sm:$0x1]  ;;  %v15014_v23 = vpack.c.bf16 %v8247_v51, %v8246_v34  ;;  %v14696_v40 = vrot.slane %v20763_v14, 9  ;;  %v16873_v55 = vpop.f32.mrf.mxu0 }
 0x575   : > { %v10411_v39 = vshll.u32 %v10066_v29, 16  ;;  %v20784_v38 = vld [vmem:[#allocation3 + $0x90] sm:$0xff]   ;;  %v12129_v24 = vrot.slane %v22079_v41, 4  ;;  %v10425_v45 = vshll.u32 %v20770_v20, 16  ;;  %v17788_v14 = vld [vmem:[#allocation3 + $0x9c] sm:$0xff]   ;;  %v10409_v34 = vrot.slane %v10408_v13, 4 }
 0x576   : > { %v10404_v21 = vsel %vm18429_vm3, %v10399_v46, %v10403_v47  ;;  %15201 = vst [vmem:[#allocation2 + $0xb0] sm:$0xff] %v15014_v23   ;;  %v20789_v51 = vld [vmem:[#allocation3 + $0x90] sm:$0xff]   ;;  %v22269_v47 = vld [vmem:[#allocation40_spill] sm:$0xff]  ;;  %v20793_v29 = vld [vmem:[#allocation3 + $0x9c] sm:$0xff]   ;;  %v7844_v22 = vpop.f32.mrf.mxu0  ;;  %v14697_v41 = vrot.slane %v20777_v36, 9  ;;  %v8194_v23 = vadd.f32 %v20730_v16, %v8133_v35  ;;  %v8134_v31 = vmul.f32 %v20743_v50, %v7965_v17  ;;  %16924 = vmatmul.mubr.bf16.gmra.mxu1 %v17788_v14 }
 0x577   : > { %v10413_v5 = vrot.slane %v10411_v39, 5  ;;  %10571 = vst [vmem:[#allocation3 + $0x90] sm:$0xf] %v10380_v10  ;;  %10572 = vst [vmem:[#allocation3 + $0x94] sm:$0xf] %v10390_v2  ;;  %v7966_v46 = vadd.f32 %v7841_v30, %v22269_v47  ;;  %v20795_v55 = vld [vmem:[#allocation3 + $0x9c] sm:$0xff]  }
 0x578   : > { %10573 = vst [vmem:[#allocation3 + $0x9c] sm:$0xf] %v10404_v21  ;;  %v22270_v48 = vld [vmem:[#allocation41_spill] sm:$0xff]  ;;  %v12130_v39 = vrot.slane %v11971_v52, 5  ;;  %v22271_v30 = vrot.slane %v20766_v53, 5  ;;  %v16874_v47 = vpop.f32.mrf.mxu0  ;;  %v10429_v35 = vshrl.u32 %v20770_v20, 16  ;;  %v8195_v17 = vadd.f32 %v20730_v16, %v8134_v31 }
 0x579   : > { %v7967_v13 = vadd.f32 %v7844_v22, %v22270_v48  ;;  %v10414_v10 = vsel %vm18429_vm3, %v10409_v34, %v10413_v5  ;;  %v8135_v19 = vmul.f32 %v20743_v50, %v7966_v46  ;;  %v11974_v37 = vld [vmem:[#allocation2 + $0xa4] sm:$0x1]  ;;  %v20809_v14 = vrot.slane %v10425_v45, 5  ;;  %v22272_v47 = vld [vmem:[#allocation42_spill] sm:$0xff] }
 0x57a   : > { %v12136_v2 = vrot.slane %v22271_v30, 4  ;;  %v8696_v36 = vld [vmem:[#allocation2 + $0xa8] sm:$0xff]   ;;  %10574 = vst [vmem:[#allocation3 + $0xa0] sm:$0xf] %v10414_v10  ;;  %v7849_v34 = vpop.f32.mrf.mxu0  ;;  %v8248_v46 = vmax.f32 %v8194_v23, 0.0  ;;  %v8249_v48 = vmax.f32 %v8195_v17, 0.0 }
 0x57b   : > { %v10067_v62 = vld [vmem:[#allocation2 + $0xa8] sm:$0xf]  ;;  %v8136_v21 = vmul.f32 %v20743_v50, %v7967_v13  ;;  %8732 = vst [vmem:[#allocation3 + $0xa8] sm:$0xff] %v8696_v36   ;;  %v8196_v5 = vadd.f32 %v20730_v16, %v8135_v19  ;;  %v7968_v33 = vadd.f32 %v7849_v34, %v22272_v47  ;;  %v22273_v20 = vrot.slane %v20755_v44, 5 }
 0x57c   : > { %v10416_v52 = vshrl.u32 %v10067_v62, 16  ;;  %v10419_v22 = vshll.u32 %v10067_v62, 16  ;;  %v12131_v62 = vsel %vm18555_vm6, %v12129_v24, %v12130_v39  ;;  %v16877_v19 = vpop.f32.mrf.mxu0  ;;  %v12137_v3 = vrot.slane %v11974_v37, 5 }
 0x57d   : > { %v8197_v30 = vadd.f32 %v20730_v16, %v8136_v21  ;;  %v12128_v31 = vsel %vm18555_vm6, %v14696_v40, %v22273_v20  ;;  %v8592_v10 = vld [vmem:[#allocation2 + $0xb4] sm:$0x1]  ;;  %v8645_v36 = vld [vmem:[#allocation2 + $0xb0] sm:$0x1]  ;;  %v15019_v40 = vpack.c.bf16 %v8249_v48, %v8248_v46  ;;  %v10431_v47 = vrot.slane %v10429_v35, 4  ;;  %v22275_v20 = vld [vmem:[#allocation43_spill] sm:$0xff] }
 0x57e   : > { %v10418_v45 = vrot.slane %v10416_v52, 4  ;;  %v10421_v13 = vrot.slane %v10419_v22, 5  ;;  %v8593_v23 = vsel %vm20276_vm9, 0, %v8592_v10  ;;  %v8646_v17 = vsel %vm20289_vm11, 0, %v8645_v36  ;;  %v20824_v21 = vld [vmem:[#allocation3 + $0x90] sm:$0xff]   ;;  %v7852_v22 = vpop.f32.mrf.mxu0 }
 0x57f   : > { %v20826_v44 = vld [vmem:[#allocation3 + $0x90] sm:$0xff]   ;;  %8594 = vst [vmem:[#allocation2 + $0xb4] sm:$0x1] %v8593_v23  ;;  %8647 = vst [vmem:[#allocation2 + $0xb0] sm:$0x1] %v8646_v17  ;;  %v8250_v24 = vmax.f32 %v8196_v5, 0.0  ;;  %v8137_v37 = vmul.f32 %v20743_v50, %v7968_v33  ;;  %v7969_v10 = vadd.f32 %v7852_v22, %v22275_v20 }
 0x580   : > { %22274 = vst [vmem:[#allocation70_spill] sm:$0xff] %v20826_v44  ;;  %v10422_v34 = vor.u32 %v10421_v13, %v10418_v45  ;;  %v8251_v39 = vmax.f32 %v8197_v30, 0.0  ;;  %v17790_v52 = vld [vmem:[#allocation3 + $0x90] sm:$0xff]   ;;  %15202 = vst [vmem:[#allocation2 + $0xb8] sm:$0xff] %v15019_v40   ;;  %v16878_v35 = vpop.f32.mrf.mxu0  ;;  %v22276_v5 = vrot.slane %v20766_v53, 5  ;;  %v12138_v30 = vsel %vm18555_vm6, %v12136_v2, %v12137_v3 }
 0x581   : > { %12227 = vst [vmem:[#allocation3 + $0x90] sm:$0xf] %v12128_v31  ;;  %12228 = vst [vmem:[#allocation3 + $0x94] sm:$0xf] %v12131_v62  ;;  %v20830_v19 = vld [vmem:[#allocation3 + $0x9c] sm:$0xff]   ;;  %17112 = vmatmul.mubr.bf16.gmra.mxu0 %v17790_v52  ;;  %v8138_v33 = vmul.f32 %v20743_v50, %v7969_v10  ;;  %v8198_v3 = vadd.f32 %v20730_v16, %v8137_v37 }
 0x582   : > { %v10423_v36 = vrot.slane %v10422_v34, 4  ;;  %v20832_v44 = vld [vmem:[#allocation3 + $0x9c] sm:$0xff]   ;;  %v15024_v46 = vpack.c.bf16 %v8251_v39, %v8250_v24  ;;  %v12135_v48 = vsel %vm18555_vm6, %v14697_v41, %v22276_v5  ;;  %v7857_v45 = vpop.f32.mrf.mxu0  ;;  %v17793_v13 = vld [vmem:[#allocation3 + $0xa8] sm:$0xff]   ;;  %v10432_v41 = vor.u32 %v10431_v47, %v20809_v14 }
 0x583   : > { %v17792_v31 = vld [vmem:[#allocation3 + $0x9c] sm:$0xff]   ;;  %v20844_v23 = vld [vmem:[#allocation3 + $0xa8] sm:$0xff]   ;;  %v8199_v2 = vadd.f32 %v20730_v16, %v8138_v33  ;;  %16927 = vmatprep.mubr.bf16.mxu1 %v17793_v13  ;;  %v8252_v35 = vmax.f32 %v8198_v3, 0.0 }
 0x584   : > { %v10428_v62 = vsel %vm18429_vm3, %v10423_v36, %v20809_v14  ;;  %15203 = vst [vmem:[#allocation2 + $0xc0] sm:$0xff] %v15024_v46   ;;  %12229 = vst [vmem:[#allocation3 + $0x9c] sm:$0xf] %v12135_v48  ;;  %v20846_v53 = vld [vmem:[#allocation3 + $0xa8] sm:$0xff]   ;;  %17115 = vmatprep.mubr.bf16.mxu0 %v17792_v31  ;;  %v16881_v17 = vpop.f32.mrf.mxu0  ;;  %v10433_v14 = vrot.slane %v10432_v41, 4 }
 0x585   : > { %12230 = vst [vmem:[#allocation3 + $0xa0] sm:$0xf] %v12138_v30  ;;  %10575 = vst [vmem:[#allocation3 + $0xa8] sm:$0xf] %v10428_v62  ;;  %v22277_v39 = vld [vmem:[#allocation44_spill] sm:$0xff]  ;;  %v8253_v36 = vmax.f32 %v8199_v2, 0.0 }
 0x586   : > { %v8698_v40 = vld [vmem:[#allocation2 + $0xb4] sm:$0xf]  ;;  %v10069_v34 = vld [vmem:[#allocation2 + $0xb0] sm:$0x1]  ;;  %v7970_v52 = vadd.f32 %v7857_v45, %v22277_v39  ;;  %v7860_v46 = vpop.f32.mrf.mxu0  ;;  %v11976_v45 = vld [vmem:[#allocation2 + $0xac] sm:$0xf] }
 0x587   : > { %v10070_v24 = vld [vmem:[#allocation2 + $0xb4] sm:$0xf]  ;;  %v10435_v22 = vshll.u32 %v10069_v34, 16  ;;  %8734 = vst [vmem:[#allocation3 + $0xb4] sm:$0xf] %v8698_v40  ;;  %v15029_v2 = vpack.c.bf16 %v8253_v36, %v8252_v35  ;;  %v22278_v39 = vld [vmem:[#allocation45_spill] sm:$0xff] }
 0x588   : > { %v10440_v20 = vshrl.u32 %v10070_v24, 16  ;;  %v10443_v10 = vshll.u32 %v10070_v24, 16  ;;  %v8648_v47 = vld [vmem:[#allocation2 + $0xbc] sm:$0x1]  ;;  %v8699_v37 = vld [vmem:[#allocation2 + $0xb8] sm:$0xf]  ;;  %v16882_v62 = vpop.f32.mrf.mxu0  ;;  %v8139_v41 = vmul.f32 %v20743_v50, %v7970_v52 }
 0x589   : > { %v10437_v5 = vrot.slane %v10435_v22, 5  ;;  %v8649_v33 = vsel %vm20289_vm11, 0, %v8648_v47  ;;  %v10071_v31 = vld [vmem:[#allocation2 + $0xb8] sm:$0xf]  ;;  %8735 = vst [vmem:[#allocation3 + $0xb8] sm:$0xf] %v8699_v37  ;;  %v7971_v22 = vadd.f32 %v7860_v46, %v22278_v39 }
 0x58a   : > { %v10442_v48 = vrot.slane %v10440_v20, 4  ;;  %v10445_v30 = vrot.slane %v10443_v10, 5  ;;  %8650 = vst [vmem:[#allocation2 + $0xbc] sm:$0x1] %v8649_v33  ;;  %v10449_v13 = vshll.u32 %v10071_v31, 16  ;;  %v10453_v17 = vshrl.u32 %v10071_v31, 16 }
 0x58b   : > { %v8595_v40 = vld [vmem:[#allocation2 + $0xc0] sm:$0x1]  ;;  %v10438_v3 = vsel %vm18429_vm3, %v10433_v14, %v10437_v5  ;;  %15204 = vst [vmem:[#allocation2 + $0xc8] sm:$0xff] %v15029_v2   ;;  %v11975_v47 = vld [vmem:[#allocation2 + $0xa8] sm:$0xe]  ;;  %v12141_v37 = vrot.slane %v11976_v45, 5  ;;  %v8200_v31 = vadd.f32 %v20730_v16, %v8139_v41  ;;  %v8140_v5 = vmul.f32 %v20743_v50, %v7971_v22 }
 0x58c   : > { %v10446_v34 = vor.u32 %v10445_v30, %v10442_v48  ;;  %v8596_v24 = vsel %vm20276_vm9, 0, %v8595_v40  ;;  %v10451_v20 = vrot.slane %v10449_v13, 5  ;;  %v10455_v10 = vrot.slane %v10453_v17, 4  ;;  %10576 = vst [vmem:[#allocation3 + $0xac] sm:$0xf] %v10438_v3 }
 0x58d   : > { %8597 = vst [vmem:[#allocation2 + $0xc0] sm:$0x1] %v8596_v24  ;;  %v11977_v36 = vld [vmem:[#allocation2 + $0xb0] sm:$0x1]  ;;  %v10074_v52 = vld [vmem:[#allocation2 + $0xc4] sm:$0xf]  ;;  %v8201_v45 = vadd.f32 %v20730_v16, %v8140_v5 }
 0x58e   : > { %v10447_v33 = vrot.slane %v10446_v34, 4  ;;  %v10456_v35 = vor.u32 %v10455_v10, %v10451_v20  ;;  %v14698_v48 = vrot.slane %v11975_v47, 9  ;;  %v12143_v62 = vrot.slane %v12141_v37, 4 }
 0x58f   : > { %v12144_v13 = vrot.slane %v11977_v36, 5  ;;  %v10473_v40 = vshll.u32 %v10074_v52, 16  ;;  %v10477_v41 = vshrl.u32 %v10074_v52, 16  ;;  %v8254_v24 = vmax.f32 %v8200_v31, 0.0 }
 0x590   : > { %v10452_v14 = vsel %vm18429_vm3, %v10447_v33, %v10451_v20  ;;  %v17795_v46 = vld [vmem:[#allocation3 + $0xb4] sm:$0xff]   ;;  %v10457_v3 = vrot.slane %v10456_v35, 4  ;;  %v8255_v20 = vmax.f32 %v8201_v45, 0.0  ;;  %v12142_v10 = vsel %vm18555_vm6, %v14698_v48, %v12141_v37 }
 0x591   : > { %v20864_v30 = vld [vmem:[#allocation3 + $0xb4] sm:$0xff]   ;;  %v10072_v17 = vld [vmem:[#allocation2 + $0xbc] sm:$0x1]  ;;  %16928 = vmatmul.mubr.bf16.gmra.mxu1 %v17795_v46  ;;  %v12145_v52 = vsel %vm18555_vm6, %v12143_v62, %v12144_v13  ;;  %v22279_v62 = vmov 0   ;;  %v10475_v13 = vrot.slane %v10473_v40, 5  ;;  %v10479_v45 = vrot.slane %v10477_v41, 4 }
 0x592   : > { %v20867_v2 = vld [vmem:[#allocation3 + $0xb4] sm:$0xff]   ;;  %v10459_v34 = vshll.u32 %v10072_v17, 16  ;;  %16947 = vmatprep.mubr.bf16.mxu1 %v20331_v61  ;;  %v8651_v36 = vld [vmem:[#allocation2 + $0xc8] sm:$0x1]  ;;  %v15034_v5 = vpack.c.bf16 %v8255_v20, %v8254_v24  ;;  %v11979_v24 = vld [vmem:[#allocation2 + $0xb8] sm:$0xf] }
 0x593   : > { %10577 = vst [vmem:[#allocation3 + $0xb4] sm:$0xf] %v10452_v14  ;;  %v8598_v22 = vld [vmem:[#allocation2 + $0xcc] sm:$0x1]  ;;  %v20872_v35 = vld [vmem:[#allocation3 + $0xa8] sm:$0xff]   ;;  %v8652_v14 = vsel %vm20289_vm11, 0, %v8651_v36  ;;  %v10480_v41 = vor.u32 %v10479_v45, %v10475_v13 }
 0x594   : > { %v8700_v39 = vld [vmem:[#allocation2 + $0xc0] sm:$0xff]   ;;  %v10461_v47 = vrot.slane %v10459_v34, 5  ;;  %v8599_v31 = vsel %vm20276_vm9, 0, %v8598_v22  ;;  %8653 = vst [vmem:[#allocation2 + $0xc8] sm:$0x1] %v8652_v14  ;;  %15205 = vst [vmem:[#allocation2 + $0xd0] sm:$0xff] %v15034_v5  }
 0x595   : > { %v10073_v50 = vld [vmem:[#allocation2 + $0xc0] sm:$0xf]  ;;  %8736 = vst [vmem:[#allocation3 + $0xc0] sm:$0xff] %v8700_v39   ;;  %8600 = vst [vmem:[#allocation2 + $0xcc] sm:$0x1] %v8599_v31  ;;  %v17803_v34 = vld [vmem:[#allocation11 + $0x1b0] sm:$0xff]  }
 0x596   : > { %v10464_v16 = vshrl.u32 %v10073_v50, 16  ;;  %v10467_v33 = vshll.u32 %v10073_v50, 16  ;;  %v20880_v61 = vld [vmem:[#allocation3 + $0xa8] sm:$0xff]   ;;  %v10462_v48 = vsel %vm18429_vm3, %v10457_v3, %v10461_v47  ;;  %8665 = vst [vmem:[#allocation2 + $0xcc] sm:$0xf] %v22279_v62  ;;  %v17806_v3 = vld [vmem:[#allocation11 + $0x1a8] sm:$0xff]  }
 0x597   : > { %v17797_v37 = vld [vmem:[#allocation3 + $0xa8] sm:$0xff]   ;;  %10578 = vst [vmem:[#allocation3 + $0xb8] sm:$0xf] %v10462_v48  ;;  %8666 = vst [vmem:[#allocation2 + $0xd0] sm:$0xf] %v22279_v62 }
 0x598   : > { %v10466_v46 = vrot.slane %v10464_v16, 4  ;;  %v10469_v17 = vrot.slane %v10467_v33, 5  ;;  %12231 = vst [vmem:[#allocation3 + $0xa8] sm:$0xf] %v12142_v10  ;;  %12232 = vst [vmem:[#allocation3 + $0xac] sm:$0xf] %v12145_v52  ;;  %17116 = vmatmul.mubr.bf16.gmra.mxu0 %v17797_v37 }
 0x599   : > { %16948 = vmatmul.mubr.bf16.vlgmr.msra.gmra.mxu1 %v20375_v54  ;;  %v11978_v50 = vld [vmem:[#allocation2 + $0xb4] sm:$0xe]  ;;  %v17964_v22 = vld [vmem:[#allocation11 + $0x1b8] sm:$0xff]   ;;  %v11980_v47 = vld [vmem:[#allocation2 + $0xbc] sm:$0x1]  ;;  %v12148_v16 = vrot.slane %v11979_v24, 5 }
 0x59a   : > { %v10470_v12 = vor.u32 %v10469_v17, %v10466_v46  ;;  %16951 = vmatprep.mubr.bf16.mxu1 %v20395_v6  ;;  %16980 = vmatpush3.bf16.msra.mxu1 %v17964_v22  ;;  %v12151_v31 = vrot.slane %v11980_v47, 5  ;;  %v17810_v37 = vld [vmem:[#allocation11 + $0x1a0] sm:$0xff]   ;;  %v14699_v48 = vrot.slane %v11978_v50, 9  ;;  %v10481_v46 = vrot.slane %v10480_v41, 4 }
 0x59b   : > { %16981 = vmatprep.subr.bf16.mxu1 %v17803_v34  ;;  %v10075_v33 = vld [vmem:[#allocation2 + $0xc8] sm:$0x1]  ;;  %v8654_v5 = vld [vmem:[#allocation2 + $0xd4] sm:$0x1]  ;;  %v12150_v45 = vrot.slane %v12148_v16, 4 }
 0x59c   : > { %v10471_v39 = vrot.slane %v10470_v12, 4  ;;  %v20888_v20 = vld [vmem:[#allocation3 + $0xc0] sm:$0xff]   ;;  %v10483_v52 = vshll.u32 %v10075_v33, 16  ;;  %v8655_v12 = vsel %vm20289_vm11, 0, %v8654_v5  ;;  %v12149_v58 = vsel %vm18555_vm6, %v14699_v48, %v12148_v16  ;;  %v11983_v16 = vld [vmem:[#allocation2 + $0xc8] sm:$0x1] }
 0x59d   : > { %v20890_v10 = vld [vmem:[#allocation3 + $0xc0] sm:$0xff]   ;;  %v8702_v54 = vld [vmem:[#allocation2 + $0xcc] sm:$0xf]  ;;  %8656 = vst [vmem:[#allocation2 + $0xd4] sm:$0x1] %v8655_v12  ;;  %v12152_v33 = vsel %vm18555_vm6, %v12150_v45, %v12151_v31 }
 0x59e   : > { %v10476_v40 = vsel %vm18429_vm3, %v10471_v39, %v10475_v13  ;;  %v10076_v36 = vld [vmem:[#allocation2 + $0xcc] sm:$0xf]  ;;  %8738 = vst [vmem:[#allocation3 + $0xcc] sm:$0xf] %v8702_v54  ;;  %16982 = vmatpush3.bf16.msra.mxu1 %v17803_v34  ;;  %v10485_v17 = vrot.slane %v10483_v52, 5  ;;  %v17815_v52 = vld [vmem:[#allocation11 + $0x198] sm:$0xff]  }
 0x59f   : > { %10579 = vst [vmem:[#allocation3 + $0xc0] sm:$0xf] %v10476_v40  ;;  %v10488_v6 = vshrl.u32 %v10076_v36, 16  ;;  %v10491_v14 = vshll.u32 %v10076_v36, 16  ;;  %v8703_v13 = vld [vmem:[#allocation2 + $0xd0] sm:$0xf]  ;;  %16983 = vmatprep.subr.bf16.mxu1 %v17806_v3 }
 0x5a0   : > { %v10077_v22 = vld [vmem:[#allocation2 + $0xd0] sm:$0xf]  ;;  %8739 = vst [vmem:[#allocation3 + $0xd0] sm:$0xf] %v8703_v13  ;;  %v10486_v34 = vsel %vm18429_vm3, %v10481_v46, %v10485_v17  ;;  %8667 = vst [vmem:[#allocation2 + $0xd4] sm:$0xf] %v22279_v62 }
 0x5a1   : > { %v10490_v24 = vrot.slane %v10488_v6, 4  ;;  %v10493_v39 = vrot.slane %v10491_v14, 5  ;;  %v20896_v47 = vld [vmem:[#allocation3 + $0xb4] sm:$0xff]   ;;  %v10497_v50 = vshll.u32 %v10077_v22, 16  ;;  %v10501_v40 = vshrl.u32 %v10077_v22, 16  ;;  %16952 = vmatmul.mubr.bf16.gmra.mxu1 %v20442_v63 }
 0x5a2   : > { %v20901_v41 = vld [vmem:[#allocation3 + $0xb4] sm:$0xff]   ;;  %16955 = vmatprep.mubr.bf16.mxu1 %v20478_v15  ;;  %16984 = vmatpush3.bf16.msra.mxu1 %v17806_v3  ;;  %10580 = vst [vmem:[#allocation3 + $0xc4] sm:$0xf] %v10486_v34  ;;  %v11981_v62 = vld [vmem:[#allocation2 + $0xc0] sm:$0xe]  ;;  %v17812_v15 = vld [vmem:[#allocation3] sm:$0xff]  }
 0x5a3   : > { %v10494_v54 = vor.u32 %v10493_v39, %v10490_v24  ;;  %v17801_v36 = vld [vmem:[#allocation3 + $0xb4] sm:$0xff]   ;;  %v11982_v6 = vld [vmem:[#allocation2 + $0xc4] sm:$0xf]  ;;  %v10499_v14 = vrot.slane %v10497_v50, 5  ;;  %v10503_v5 = vrot.slane %v10501_v40, 4  ;;  %16985 = vmatprep.subr.bf16.mxu1 %v17810_v37  ;;  %v17818_v3 = vld [vmem:[#allocation11 + $0x190] sm:$0xff]  }
 0x5a4   : > { %12233 = vst [vmem:[#allocation3 + $0xb4] sm:$0xf] %v12149_v58  ;;  %12234 = vst [vmem:[#allocation3 + $0xb8] sm:$0xf] %v12152_v33  ;;  %17119 = vmatprep.mubr.bf16.mxu0 %v17801_v36  ;;  %v12155_v46 = vrot.slane %v11982_v6, 5  ;;  %v14700_v12 = vrot.slane %v11981_v62, 9 }
 0x5a5   : > { %v10495_v63 = vrot.slane %v10494_v54, 4  ;;  %v10504_v48 = vor.u32 %v10503_v5, %v10499_v14  ;;  %v12158_v13 = vrot.slane %v11983_v16, 5  ;;  %v17813_v54 = vld [vmem:[#allocation3 + $0xc] sm:$0xff]   ;;  %v20924_v36 = vld [vmem:[#allocation11 + $0x230] sm:$0xff]   ;;  %v20930_v6 = vld [vmem:[#allocation11 + $0x228] sm:$0xff]  }
 0x5a6   : > { %16986 = vmatpush3.bf16.msra.mxu1 %v17810_v37  ;;  %v12157_v34 = vrot.slane %v12155_v46, 4  ;;  %v17821_v37 = vld [vmem:[#allocation11 + $0x188] sm:$0xff]   ;;  %v12156_v40 = vsel %vm18555_vm6, %v14700_v12, %v12155_v46  ;;  %v17828_v62 = vld [vmem:[#allocation11 + $0x78] sm:$0xff]   ;;  %v17832_v12 = vld [vmem:[#allocation3 + $0x90] sm:$0xff]  }
 0x5a7   : > { %v10500_v31 = vsel %vm18429_vm3, %v10495_v63, %v10499_v14  ;;  %16987 = vmatprep.subr.bf16.mxu1 %v17815_v52  ;;  %v20911_v17 = vld [vmem:[#allocation3 + $0xcc] sm:$0xff]   ;;  %v10078_v45 = vld [vmem:[#allocation2 + $0xd4] sm:$0x1]  ;;  %v10505_v24 = vrot.slane %v10504_v48, 4  ;;  %v20946_v63 = vld [vmem:[#allocation11 + $0x210] sm:$0xff]  }
 0x5a8   : > { %10581 = vst [vmem:[#allocation3 + $0xcc] sm:$0xf] %v10500_v31  ;;  %v10507_v39 = vshll.u32 %v10078_v45, 16  ;;  %v12159_v58 = vsel %vm18555_vm6, %v12157_v34, %v12158_v13  ;;  %v17817_v14 = vld [vmem:[#allocation3 + $0x30] sm:$0xff]   ;;  %v20941_v5 = vld [vmem:[#allocation11 + $0x218] sm:$0xff]   ;;  %v20951_v16 = vld [vmem:[#allocation11 + $0x208] sm:$0xff]  }
 0x5a9   : > { %16956 = vmatmul.mubr.bf16.gmra.mxu1 %v20545_v42  ;;  %v17808_v22 = vld [vmem:[#allocation3 + $0xc0] sm:$0xff]   ;;  %v20956_v48 = vld [vmem:[#allocation11 + $0x200] sm:$0xff]   ;;  %v17838_v13 = vld [vmem:[#allocation11 + $0x68] sm:$0xff]  }
 0x5aa   : > { %16959 = vmatprep.mubr.bf16.mxu1 %v20570_v0  ;;  %16988 = vmatpush3.bf16.msra.mxu1 %v17815_v52  ;;  %v10509_v50 = vrot.slane %v10507_v39, 5  ;;  %v20919_v33 = vld [vmem:[#allocation3 + $0xc0] sm:$0xff]   ;;  %v17824_v0 = vld [vmem:[#allocation11 + $0x180] sm:$0xff]   ;;  %v17814_v52 = vld [vmem:[#allocation3 + $0x18] sm:$0xff]  }
 0x5ab   : > { %17120 = vmatmul.mubr.bf16.gmra.mxu0 %v17808_v22  ;;  %16989 = vmatprep.subr.bf16.mxu1 %v17818_v3  ;;  %12235 = vst [vmem:[#allocation3 + $0xc0] sm:$0xf] %v12156_v40  ;;  %12236 = vst [vmem:[#allocation3 + $0xc4] sm:$0xf] %v12159_v58  ;;  %v17825_v46 = vld [vmem:[#allocation3 + $0x6c] sm:$0xff]   ;;  %v17833_v31 = vld [vmem:[#allocation11 + $0x70] sm:$0xff]  }
 0x5ac   : > { %17187 = vmatprep.mubr.bf16.mxu0 %v17812_v15  ;;  %v10510_v42 = vsel %vm18429_vm3, %v10505_v24, %v10509_v50  ;;  %v22280_v15 = vld [vmem:[#allocation48_spill] sm:$0xff]  ;;  %v22282_v45 = vld [vmem:[#allocation57_spill] sm:$0xff]  ;;  %v17850_v22 = vld [vmem:[#allocation11 + $0x50] sm:$0xff]  }
 0x5ad   : > { %10582 = vst [vmem:[#allocation3 + $0xd0] sm:$0xf] %v10510_v42  ;;  %v17837_v24 = vld [vmem:[#allocation3 + $0xa8] sm:$0xff]   ;;  %v17840_v34 = vld [vmem:[#allocation3 + $0xb4] sm:$0xff]  }
 0x5ae   : > { %16990 = vmatpush3.bf16.msra.mxu1 %v17818_v3  ;;  %v22281_v3 = vld [vmem:[#allocation56_spill] sm:$0xff]  ;;  %v17842_v50 = vld [vmem:[#allocation3 + $0x18] sm:$0xff]   ;;  %v17857_v40 = vld [vmem:[#allocation11 + $0x40] sm:$0xff]  }
 0x5af   : > { %16991 = vmatprep.subr.bf16.mxu1 %v17821_v37  ;;  %v17847_v39 = vld [vmem:[#allocation11 + $0x58] sm:$0xff]  }
 0x5b0   : > { %v17845_v58 = vld [vmem:[#allocation3 + $0x24] sm:$0xff]  }
 0x5b1   : > { %16960 = vmatmul.mubr.bf16.gmra.mxu1 %v20628_v56  ;;  %v17816_v56 = vld [vmem:[#allocation3 + $0x24] sm:$0xff]  }
 0x5b2   : > { %16963 = vmatprep.mubr.bf16.mxu1 %v20655_v60  ;;  %16992 = vmatpush3.bf16.msra.mxu1 %v17821_v37  ;;  %v20936_v60 = vld [vmem:[#allocation11 + $0x220] sm:$0xff]   ;;  %v17853_v37 = vld [vmem:[#allocation11 + $0x48] sm:$0xff]  }
 0x5b3   : > { %17188 = vmatmul.mubr.bf16.vlgmr.msra.gmra.mxu0 %v17813_v54  ;;  %16993 = vmatprep.subr.bf16.mxu1 %v17824_v0  ;;  %v17848_v54 = vld [vmem:[#allocation3 + $0x3c] sm:$0xff]  }
 0x5b4   : > { %17191 = vmatprep.mubr.bf16.mxu0 %v17814_v52  ;;  %17268 = vmatpush3.bf16.msra.mxu0 %v20927_v32 }
 0x5b5   : > { %17269 = vmatprep.subr.bf16.mxu0 %v20924_v36 }
 0x5b6   : > { %16994 = vmatpush3.bf16.msra.mxu1 %v17824_v0 }
 0x5b7   : > { %17027 = vmatprep.subr.bf16.mxu1 %v17828_v62 }
 0x5b8   : > { %17270 = vmatpush3.bf16.msra.mxu0 %v20924_v36 }
 0x5b9   : > { %16964 = vmatmul.mubr.bf16.gmra.mxu1 %v20682_v49  ;;  %17271 = vmatprep.subr.bf16.mxu0 %v20930_v6  ;;  %v17819_v49 = vld [vmem:[#allocation3 + $0x3c] sm:$0xff]  }
 0x5ba   : > { %16967 = vmatprep.mubr.bf16.mxu1 %v20706_v43  ;;  %v17820_v43 = vld [vmem:[#allocation3 + $0x48] sm:$0xff]  }
 0x5bb   : > { %17192 = vmatmul.mubr.bf16.gmra.mxu0 %v17816_v56  ;;  %v17851_v56 = vld [vmem:[#allocation3 + $0x54] sm:$0xff]  }
 0x5bc   : > { %17195 = vmatprep.mubr.bf16.mxu0 %v17817_v14  ;;  %17272 = vmatpush3.bf16.msra.mxu0 %v20930_v6  ;;  %v17852_v14 = vld [vmem:[#allocation3 + $0x60] sm:$0xff]  }
 0x5bd   : > { %17273 = vmatprep.subr.bf16.mxu0 %v20936_v60 }
 0x5c0   : > { %17274 = vmatpush3.bf16.msra.mxu0 %v20936_v60 }
 0x5c1   : > { %16968 = vmatmul.mubr.bf16.gmra.mxu1 %v20784_v38  ;;  %17275 = vmatprep.subr.bf16.mxu0 %v20941_v5  ;;  %v17822_v38 = vld [vmem:[#allocation3 + $0x54] sm:$0xff]  }
 0x5c2   : > { %16971 = vmatprep.mubr.bf16.mxu1 %v20793_v29  ;;  %v17823_v29 = vld [vmem:[#allocation3 + $0x60] sm:$0xff]  }
 0x5c3   : > { %17196 = vmatmul.mubr.bf16.gmra.mxu0 %v17819_v49 }
 0x5c4   : > { %17199 = vmatprep.mubr.bf16.mxu0 %v17820_v43  ;;  %17276 = vmatpush3.bf16.msra.mxu0 %v20941_v5  ;;  %v11984_v43 = vld [vmem:[#allocation2 + $0xcc] sm:$0xe] }
 0x5c5   : > { %17277 = vmatprep.subr.bf16.mxu0 %v20946_v63 }
 0x5c8   : > { %17278 = vmatpush3.bf16.msra.mxu0 %v20946_v63 }
 0x5c9   : > { %16972 = vmatmul.mubr.bf16.gmra.mxu1 %v20844_v23  ;;  %17279 = vmatprep.subr.bf16.mxu0 %v20951_v16  ;;  %v17827_v23 = vld [vmem:[#allocation3 + $0x78] sm:$0xff]  }
 0x5ca   : > { %16975 = vmatprep.mubr.bf16.mxu1 %v20864_v30  ;;  %v17830_v30 = vld [vmem:[#allocation3 + $0x84] sm:$0xff]  }
 0x5cb   : > { %17200 = vmatmul.mubr.bf16.gmra.mxu0 %v17822_v38  ;;  %v11986_v38 = vld [vmem:[#allocation2 + $0xd4] sm:$0x1] }
 0x5cc   : > { %17203 = vmatprep.mubr.bf16.mxu0 %v17823_v29  ;;  %17280 = vmatpush3.bf16.msra.mxu0 %v20951_v16 }
 0x5cd   : > { %17281 = vmatprep.subr.bf16.mxu0 %v20956_v48 }
 0x5d0   : > { %17282 = vmatpush3.bf16.msra.mxu0 %v20956_v48 }
 0x5d1   : > { %16976 = vmatmul.mubr.bf16.gmra.mxu1 %v20888_v20  ;;  %v17843_v20 = vld [vmem:[#allocation11 + $0x60] sm:$0xff]  }
 0x5d2   : > { %16995 = vmatprep.mubr.bf16.mxu1 %v20380_v25  ;;  %v17835_v25 = vld [vmem:[#allocation3 + $0x9c] sm:$0xff]  }
 0x5d3   : > { %17204 = vmatmul.mubr.bf16.gmra.mxu0 %v17825_v46  ;;  %v17854_v46 = vld [vmem:[#allocation3 + $0x6c] sm:$0xff]  }
 0x5d4   : > { %17207 = vmatprep.mubr.bf16.mxu0 %v17827_v23 }
 0x5d9   : > { %16996 = vmatmul.mubr.bf16.vlgmr.msra.gmra.mxu1 %v22280_v15  ;;  %v12165_v15 = vrot.slane %v11986_v38, 5 }
 0x5da   : > { %16999 = vmatprep.mubr.bf16.mxu1 %v22281_v3  ;;  %17028 = vmatpush3.bf16.msra.mxu1 %v17828_v62 }
 0x5db   : > { %17208 = vmatmul.mubr.bf16.gmra.mxu0 %v17830_v30  ;;  %17029 = vmatprep.subr.bf16.mxu1 %v17833_v31 }
 0x5dc   : > { %17211 = vmatprep.mubr.bf16.mxu0 %v17832_v12 }
 0x5de   : > { %17030 = vmatpush3.bf16.msra.mxu1 %v17833_v31 }
 0x5df   : > { %17031 = vmatprep.subr.bf16.mxu1 %v17838_v13 }
 0x5e1   : > { %17000 = vmatmul.mubr.bf16.gmra.mxu1 %v22282_v45 }
 0x5e2   : > { %17003 = vmatprep.mubr.bf16.mxu1 %v20547_v28  ;;  %17032 = vmatpush3.bf16.msra.mxu1 %v17838_v13  ;;  %v20970_v28 = vpop.f32.mrf.mxu1  ;;  %v22283_v13 = vld [vmem:[#allocation47_spill] sm:$0xff] }
 0x5e3   : > { %17212 = vmatmul.mubr.bf16.gmra.mxu0 %v17835_v25  ;;  %17033 = vmatprep.subr.bf16.mxu1 %v17843_v20 }
 0x5e4   : > { %17215 = vmatprep.mubr.bf16.mxu0 %v17837_v24  ;;  %v20974_v42 = vpop.f32.mrf.mxu1  ;;  %v17863_v24 = vld [vmem:[#allocation11 + $0x1f0] sm:$0xff]  }
 0x5e6   : > { %17034 = vmatpush3.bf16.msra.mxu1 %v17843_v20  ;;  %v20976_v0 = vpop.f32.mrf.mxu1  ;;  %v21004_v20 = vld [vmem:[#allocation3 + $0xcc] sm:$0xff]  }
 0x5e7   : > { %17035 = vmatprep.subr.bf16.mxu1 %v17847_v39 }
 0x5e8   : > { %v20980_v52 = vpop.f32.mrf.mxu1 }
 0x5e9   : > { %17004 = vmatmul.mubr.bf16.gmra.mxu1 %v20572_v11  ;;  %v17846_v11 = vld [vmem:[#allocation3 + $0x30] sm:$0xff]  }
 0x5ea   : > { %17007 = vmatprep.mubr.bf16.mxu1 %v20630_v26  ;;  %17036 = vmatpush3.bf16.msra.mxu1 %v17847_v39  ;;  %v17860_v26 = vld [vmem:[#allocation11 + $0x1f8] sm:$0xff]  }
 0x5eb   : > { %17216 = vmatmul.mubr.bf16.gmra.mxu0 %v17840_v34  ;;  %17037 = vmatprep.subr.bf16.mxu1 %v17850_v22  ;;  %v17862_v34 = vld [vmem:[#allocation3 + $0xa8] sm:$0xff]  }
 0x5ec   : > { %17283 = vmatprep.mubr.bf16.mxu0 %v17842_v50  ;;  %v17865_v50 = vld [vmem:[#allocation11 + $0x1e8] sm:$0xff]  }
 0x5ee   : > { %17038 = vmatpush3.bf16.msra.mxu1 %v17850_v22  ;;  %v22285_v22 = vld [vmem:[#allocation49_spill] sm:$0xff] }
 0x5ef   : > { %17039 = vmatprep.subr.bf16.mxu1 %v17853_v37 }
 0x5f1   : > { %17008 = vmatmul.mubr.bf16.gmra.mxu1 %v20660_v1  ;;  %v17849_v1 = vld [vmem:[#allocation3 + $0x48] sm:$0xff]  }
 0x5f2   : > { %17011 = vmatprep.mubr.bf16.mxu1 %v20693_v59  ;;  %17040 = vmatpush3.bf16.msra.mxu1 %v17853_v37  ;;  %v20982_v59 = vpop.f32.mrf.mxu1 }
 0x5f3   : > { %17284 = vmatmul.mubr.bf16.vlgmr.msra.gmra.mxu0 %v17845_v58  ;;  %17041 = vmatprep.subr.bf16.mxu1 %v17857_v40 }
 0x5f4   : > { %17287 = vmatprep.mubr.bf16.mxu0 %v17846_v11  ;;  %v20984_v62 = vpop.f32.mrf.mxu1  ;;  %v22286_v11 = vld [vmem:[#allocation53_spill] sm:$0xff] }
 0x5f6   : > { %17042 = vmatpush3.bf16.msra.mxu1 %v17857_v40  ;;  %v20988_v49 = vpop.f32.mrf.mxu1  ;;  %v17866_v40 = vld [vmem:[#allocation11 + $0x1e0] sm:$0xff]  }
 0x5f7   : > { %17123 = vmatprep.subr.bf16.mxu1 %v17860_v26 }
 0x5f8   : > { %v20990_v29 = vpop.f32.mrf.mxu1 }
 0x5f9   : > { %17012 = vmatmul.mubr.bf16.gmra.mxu1 %v20708_v4  ;;  %v11985_v4 = vld [vmem:[#allocation2 + $0xd0] sm:$0xf] }
 0x5fa   : > { %17015 = vmatprep.mubr.bf16.mxu1 %v20789_v51  ;;  %v12162_v51 = vrot.slane %v11985_v4, 5  ;;  %v20994_v23 = vpop.f32.mrf.mxu1  ;;  %v17868_v4 = vld [vmem:[#allocation11 + $0x1d0] sm:$0xff]  }
 0x5fb   : > { %17288 = vmatmul.mubr.bf16.gmra.mxu0 %v17848_v54  ;;  %v17864_v54 = vld [vmem:[#allocation3 + $0xb4] sm:$0xff]  }
 0x5fc   : > { %17291 = vmatprep.mubr.bf16.mxu0 %v17849_v1  ;;  %v12164_v31 = vrot.slane %v12162_v51, 4  ;;  %v20996_v30 = vpop.f32.mrf.mxu1  ;;  %v22287_v1 = vld [vmem:[#allocation58_spill] sm:$0xff] }
 0x5fe   : > { %v12166_v12 = vsel %vm18555_vm6, %v12164_v31, %v12165_v15  ;;  %v21006_v45 = vpop.f32.mrf.mxu1 }
 0x5ff   : > { %12238 = vst [vmem:[#allocation3 + $0xd0] sm:$0xf] %v12166_v12 }
 0x600   : > { %v21008_v25 = vpop.f32.mrf.mxu1 }
 0x601   : > { %17016 = vmatmul.mubr.bf16.gmra.mxu1 %v20795_v55  ;;  %v17855_v55 = vld [vmem:[#allocation3 + $0x78] sm:$0xff]  }
 0x602   : > { %17019 = vmatprep.mubr.bf16.mxu1 %v20846_v53  ;;  %v14701_v53 = vrot.slane %v11984_v43, 9  ;;  %v21010_v39 = vpop.f32.mrf.mxu1  ;;  %v17869_v43 = vld [vmem:[#allocation11 + $0x1c8] sm:$0xff]  }
 0x603   : > { %17292 = vmatmul.mubr.bf16.gmra.mxu0 %v17851_v56 }
 0x604   : > { %17295 = vmatprep.mubr.bf16.mxu0 %v17852_v14  ;;  %v12163_v3 = vsel %vm18555_vm6, %v14701_v53, %v12162_v51  ;;  %v21014_v37 = vpop.f32.mrf.mxu1 }
 0x605   : > { %12237 = vst [vmem:[#allocation3 + $0xcc] sm:$0xf] %v12163_v3 }
 0x606   : > { %v21016_v58 = vpop.f32.mrf.mxu1 }
 0x608   : > { %v21020_v56 = vpop.f32.mrf.mxu1 }
 0x609   : > { %17020 = vmatmul.mubr.bf16.gmra.mxu1 %v20867_v2  ;;  %v17858_v2 = vld [vmem:[#allocation3 + $0x84] sm:$0xff]  }
 0x60a   : > { %17023 = vmatprep.mubr.bf16.mxu1 %v20890_v10  ;;  %v17859_v10 = vld [vmem:[#allocation3 + $0x90] sm:$0xff]   ;;  %v21022_v14 = vpop.f32.mrf.mxu1 }
 0x60b   : > { %17296 = vmatmul.mubr.bf16.gmra.mxu0 %v17854_v46  ;;  %v17870_v46 = vld [vmem:[#allocation11 + $0x1c0] sm:$0xff]  }
 0x60c   : > { %17299 = vmatprep.mubr.bf16.mxu0 %v17855_v55  ;;  %v21026_v51 = vpop.f32.mrf.mxu1  ;;  %v21032_v55 = vpop.f32.mrf.mxu0 }
 0x60d   : > { %22288 = vst [vmem:[#allocation71_spill] sm:$0xff] %v21032_v55 }
 0x60e   : > { %v21028_v38 = vpop.f32.mrf.mxu1  ;;  %v21038_v31 = vpop.f32.mrf.mxu0 }
 0x60f   : > { %22291 = vst [vmem:[#allocation51_spill] sm:$0xff] %v21038_v31 }
 0x611   : > { %17024 = vmatmul.mubr.bf16.gmra.mxu1 %v20911_v17  ;;  %v17861_v17 = vld [vmem:[#allocation3 + $0x9c] sm:$0xff]  }
 0x612   : > { %17043 = vmatprep.mubr.bf16.mxu1 %v22283_v13  ;;  %v22299_v13 = vld [vmem:[#allocation68_spill] sm:$0xff] }
 0x613   : > { %17300 = vmatmul.mubr.bf16.gmra.mxu0 %v17858_v2 }
 0x614   : > { %17303 = vmatprep.mubr.bf16.mxu0 %v17859_v10 }
 0x619   : > { %17044 = vmatmul.mubr.bf16.vlgmr.msra.gmra.mxu1 %v22284_v7 }
 0x61a   : > { %17047 = vmatprep.mubr.bf16.mxu1 %v22285_v22  ;;  %17124 = vmatpush3.bf16.msra.mxu1 %v17860_v26  ;;  %v17867_v26 = vld [vmem:[#allocation11 + $0x1d8] sm:$0xff]  }
 0x61b   : > { %17304 = vmatmul.mubr.bf16.gmra.mxu0 %v17861_v17  ;;  %17125 = vmatprep.subr.bf16.mxu1 %v17863_v24 }
 0x61c   : > { %17307 = vmatprep.mubr.bf16.mxu0 %v17862_v34 }
 0x61e   : > { %17126 = vmatpush3.bf16.msra.mxu1 %v17863_v24 }
 0x61f   : > { %17127 = vmatprep.subr.bf16.mxu1 %v17865_v50 }
 0x621   : > { %17048 = vmatmul.mubr.bf16.gmra.mxu1 %v22286_v11  ;;  %v22307_v11 = vld [vmem:[#allocation50_spill] sm:$0xff] }
 0x622   : > { %17051 = vmatprep.mubr.bf16.mxu1 %v22287_v1  ;;  %17128 = vmatpush3.bf16.msra.mxu1 %v17865_v50 }
 0x623   : > { %17308 = vmatmul.mubr.bf16.gmra.mxu0 %v17864_v54  ;;  %17129 = vmatprep.subr.bf16.mxu1 %v17866_v40 }
 0x626   : > { %17130 = vmatpush3.bf16.msra.mxu1 %v17866_v40 }
 0x627   : > { %17131 = vmatprep.subr.bf16.mxu1 %v17867_v26 }
 0x629   : > { %17052 = vmatmul.mubr.bf16.gmra.mxu1 %v20529_v57  ;;  %v21034_v57 = vpop.f32.mrf.mxu1 }
 0x62a   : > { %17055 = vmatprep.mubr.bf16.mxu1 %v20589_v9  ;;  %17132 = vmatpush3.bf16.msra.mxu1 %v17867_v26  ;;  %22289 = vst [vmem:[#allocation52_spill] sm:$0xff] %v21034_v57  ;;  %v17871_v9 = vld [vmem:[#allocation11 + $0x178] sm:$0xff]  }
 0x62b   : > { %17133 = vmatprep.subr.bf16.mxu1 %v17868_v4  ;;  %v21036_v53 = vpop.f32.mrf.mxu1 }
 0x62c   : > { %22290 = vst [vmem:[#allocation27_spill] sm:$0xff] %v21036_v53 }
 0x62d   : > { %v21040_v15 = vpop.f32.mrf.mxu1 }
 0x62e   : > { %17134 = vmatpush3.bf16.msra.mxu1 %v17868_v4  ;;  %22292 = vst [vmem:[#allocation28_spill] sm:$0xff] %v21040_v15  ;;  %v17872_v4 = vld [vmem:[#allocation11 + $0x170] sm:$0xff]  }
 0x62f   : > { %17135 = vmatprep.subr.bf16.mxu1 %v17869_v43  ;;  %v21046_v3 = vpop.f32.mrf.mxu1 }
 0x630   : > { %22295 = vst [vmem:[#allocation55_spill] sm:$0xff] %v21046_v3 }
 0x631   : > { %17056 = vmatmul.mubr.bf16.gmra.mxu1 %v20607_v27  ;;  %v22293_v27 = vld [vmem:[#allocation66_spill] sm:$0xff]  ;;  %v21052_v10 = vpop.f32.mrf.mxu1 }
 0x632   : > { %17059 = vmatprep.mubr.bf16.mxu1 %v20650_v18  ;;  %17136 = vmatpush3.bf16.msra.mxu1 %v17869_v43  ;;  %v21044_v18 = vpop.f32.mrf.mxu0  ;;  %22298 = vst [vmem:[#allocation32_spill] sm:$0xff] %v21052_v10 }
 0x633   : > { %17137 = vmatprep.subr.bf16.mxu1 %v17870_v46  ;;  %22294 = vst [vmem:[#allocation29_spill] sm:$0xff] %v21044_v18 }
 0x634   : > { %v21048_v12 = vpop.f32.mrf.mxu0 }
 0x635   : > { %22296 = vst [vmem:[#allocation30_spill] sm:$0xff] %v21048_v12  ;;  %v17874_v12 = vld [vmem:[#allocation11 + $0x160] sm:$0xff]  }
 0x636   : > { %17138 = vmatpush3.bf16.msra.mxu1 %v17870_v46  ;;  %v21050_v2 = vpop.f32.mrf.mxu0  ;;  %v21056_v24 = vpop.f32.mrf.mxu1  ;;  %v22310_v46 = vld [vmem:[#allocation54_spill] sm:$0xff] }
 0x637   : > { %17219 = vmatprep.subr.bf16.mxu1 %v17871_v9  ;;  %22297 = vst [vmem:[#allocation31_spill] sm:$0xff] %v21050_v2  ;;  %22300 = vst [vmem:[#allocation33_spill] sm:$0xff] %v21056_v24 }
 0x638   : > { %v21058_v7 = vpop.f32.mrf.mxu0 }
 0x639   : > { %17060 = vmatmul.mubr.bf16.gmra.mxu1 %v20684_v8  ;;  %22301 = vst [vmem:[#allocation60_spill] sm:$0xff] %v21058_v7  ;;  %v21060_v8 = vpop.f32.mrf.mxu1 }
 0x63a   : > { %17063 = vmatprep.mubr.bf16.mxu1 %v22293_v27  ;;  %22302 = vst [vmem:[#allocation25_spill] sm:$0xff] %v21060_v8  ;;  %v21062_v17 = vpop.f32.mrf.mxu0  ;;  %v22311_v27 = vld [vmem:[#allocation59_spill] sm:$0xff] }
 0x63b   : > { %22303 = vst [vmem:[#allocation26_spill] sm:$0xff] %v21062_v17  ;;  %v21066_v22 = vpop.f32.mrf.mxu1 }
 0x63c   : > { %22304 = vst [vmem:[#allocation34_spill] sm:$0xff] %v21066_v22  ;;  %v21068_v34 = vpop.f32.mrf.mxu0 }
 0x63d   : > { %22305 = vst [vmem:[#allocation35_spill] sm:$0xff] %v21068_v34  ;;  %v21072_v40 = vpop.f32.mrf.mxu1 }
 0x63e   : > { %v21070_v50 = vpop.f32.mrf.mxu0 }
 0x63f   : > { %22306 = vst [vmem:[#allocation36_spill] sm:$0xff] %v21070_v50 }
 0x640   : > { %v21078_v54 = vpop.f32.mrf.mxu0 }
 0x641   : > { %17064 = vmatmul.mubr.bf16.gmra.mxu1 %v22299_v13  ;;  %22308 = vst [vmem:[#allocation37_spill] sm:$0xff] %v21078_v54 }
 0x642   : > { %17067 = vmatprep.mubr.bf16.mxu1 %v20824_v21 }
 0x649   : > { %17068 = vmatmul.mubr.bf16.gmra.mxu1 %v20830_v19 }
 0x64a   : > { %17071 = vmatprep.mubr.bf16.mxu1 %v20872_v35  ;;  %v21084_v35 = vpop.f32.mrf.mxu0 }
 0x64b   : > { %22309 = vst [vmem:[#allocation38_spill] sm:$0xff] %v21084_v35 }
 0x651   : > { %v21074_v21 = vpop.f32.mrf.mxu1  ;;  %17072 = vmatmul.mubr.bf16.gmra.mxu1 %v20896_v47  ;;  %v21092_v47 = vpop.f32.mrf.mxu0 }
 0x652   : > { %17139 = vmatprep.mubr.bf16.mxu1 %v22307_v11  ;;  %22312 = vst [vmem:[#allocation39_spill] sm:$0xff] %v21092_v47  ;;  %v17873_v11 = vld [vmem:[#allocation11 + $0x168] sm:$0xff]  }
 0x653   : > { %v21080_v1 = vpop.f32.mrf.mxu1  ;;  %v21096_v34 = vpop.f32.mrf.mxu0 }
 0x654   : > { %22313 = vst [vmem:[#allocation40_spill] sm:$0xff] %v21096_v34  ;;  %v17875_v34 = vld [vmem:[#allocation11 + $0x158] sm:$0xff]  }
 0x655   : > { %v21082_v19 = vpop.f32.mrf.mxu1  ;;  %v21102_v18 = vpop.f32.mrf.mxu0 }
 0x656   : > { %22314 = vst [vmem:[#allocation41_spill] sm:$0xff] %v21102_v18  ;;  %v17876_v18 = vld [vmem:[#allocation11 + $0x150] sm:$0xff]  }
 0x657   : > { %v21086_v26 = vpop.f32.mrf.mxu1  ;;  %v21110_v54 = vpop.f32.mrf.mxu0 }
 0x658   : > { %22317 = vst [vmem:[#allocation42_spill] sm:$0xff] %v21110_v54  ;;  %v17877_v54 = vld [vmem:[#allocation11 + $0x148] sm:$0xff]  }
 0x659   : > { %v21088_v43 = vpop.f32.mrf.mxu1  ;;  %17140 = vmatmul.mubr.bf16.vlgmr.msra.gmra.mxu1 %v22310_v46  ;;  %v21116_v7 = vpop.f32.mrf.mxu0 }
 0x65a   : > { %17143 = vmatprep.mubr.bf16.mxu1 %v22311_v27  ;;  %17220 = vmatpush3.bf16.msra.mxu1 %v17871_v9  ;;  %v22315_v9 = vld [vmem:[#allocation61_spill] sm:$0xff]  ;;  %v22316_v27 = vld [vmem:[#allocation62_spill] sm:$0xff]  ;;  %22318 = vst [vmem:[#allocation43_spill] sm:$0xff] %v21116_v7 }
 0x65b   : > { %v21094_v13 = vpop.f32.mrf.mxu1  ;;  %17221 = vmatprep.subr.bf16.mxu1 %v17872_v4  ;;  %v17880_v7 = vld [vmem:[#allocation11 + $0x140] sm:$0xff]  }
 0x65d   : > { %v21098_v17 = vpop.f32.mrf.mxu1 }
 0x65e   : > { %17222 = vmatpush3.bf16.msra.mxu1 %v17872_v4 }
 0x65f   : > { %v21100_v35 = vpop.f32.mrf.mxu1  ;;  %17223 = vmatprep.subr.bf16.mxu1 %v17873_v11 }
 0x661   : > { %v21104_v46 = vpop.f32.mrf.mxu1  ;;  %17144 = vmatmul.mubr.bf16.gmra.mxu1 %v22315_v9  ;;  %v22319_v9 = vld [vmem:[#allocation63_spill] sm:$0xff] }
 0x662   : > { %17147 = vmatprep.mubr.bf16.mxu1 %v22316_v27  ;;  %17224 = vmatpush3.bf16.msra.mxu1 %v17873_v11  ;;  %v22320_v11 = vld [vmem:[#allocation64_spill] sm:$0xff]  ;;  %v21122_v27 = vpop.f32.mrf.mxu0 }
 0x663   : > { %v21108_v47 = vpop.f32.mrf.mxu1  ;;  %17225 = vmatprep.subr.bf16.mxu1 %v17874_v12  ;;  %22321 = vst [vmem:[#allocation44_spill] sm:$0xff] %v21122_v27 }
 0x664   : > { %v21128_v55 = vpop.f32.mrf.mxu0 }
 0x665   : > { %v21112_v4 = vpop.f32.mrf.mxu1  ;;  %22322 = vst [vmem:[#allocation45_spill] sm:$0xff] %v21128_v55 }
 0x666   : > { %17226 = vmatpush3.bf16.msra.mxu1 %v17874_v12 }
 0x667   : > { %v21114_v50 = vpop.f32.mrf.mxu1  ;;  %17227 = vmatprep.subr.bf16.mxu1 %v17875_v34 }
 0x669   : > { %v21118_v2 = vpop.f32.mrf.mxu1  ;;  %17148 = vmatmul.mubr.bf16.gmra.mxu1 %v22319_v9  ;;  %v22323_v9 = vld [vmem:[#allocation65_spill] sm:$0xff] }
 0x66a   : > { %17151 = vmatprep.mubr.bf16.mxu1 %v22320_v11  ;;  %17228 = vmatpush3.bf16.msra.mxu1 %v17875_v34  ;;  %v22324_v34 = vld [vmem:[#allocation67_spill] sm:$0xff]  ;;  %v21136_v11 = vpop.f32.mrf.mxu0 }
 0x66b   : > { %v21124_v31 = vpop.f32.mrf.mxu1  ;;  %17229 = vmatprep.subr.bf16.mxu1 %v17876_v18  ;;  %22325 = vst [vmem:[#allocation48_spill] sm:$0xff] %v21136_v11 }
 0x66d   : > { %v21126_v12 = vpop.f32.mrf.mxu1 }
 0x66e   : > { %17230 = vmatpush3.bf16.msra.mxu1 %v17876_v18  ;;  %v21142_v18 = vpop.f32.mrf.mxu0 }
 0x66f   : > { %v21130_v22 = vpop.f32.mrf.mxu1  ;;  %17231 = vmatprep.subr.bf16.mxu1 %v17877_v54  ;;  %22326 = vst [vmem:[#allocation56_spill] sm:$0xff] %v21142_v18 }
 0x670   : > { %v21147_v10 = vpop.f32.mrf.mxu0 }
 0x671   : > { %v21132_v8 = vpop.f32.mrf.mxu1  ;;  %17152 = vmatmul.mubr.bf16.gmra.mxu1 %v22323_v9  ;;  %22327 = vst [vmem:[#allocation57_spill] sm:$0xff] %v21147_v10 }
 0x672   : > { %17155 = vmatprep.mubr.bf16.mxu1 %v22324_v34  ;;  %17232 = vmatpush3.bf16.msra.mxu1 %v17877_v54  ;;  %v22328_v34 = vld [vmem:[#allocation69_spill] sm:$0xff]  ;;  %v22329_v54 = vld [vmem:[#allocation70_spill] sm:$0xff]  ;;  %v21155_v3 = vpop.f32.mrf.mxu0 }
 0x673   : > { %v21138_v27 = vpop.f32.mrf.mxu1  ;;  %17233 = vmatprep.subr.bf16.mxu1 %v17880_v7  ;;  %22330 = vst [vmem:[#allocation47_spill] sm:$0xff] %v21155_v3 }
 0x674   : > { %v21161_v18 = vpop.f32.mrf.mxu0 }
 0x675   : > { %v21140_v24 = vpop.f32.mrf.mxu1  ;;  %22332 = vst [vmem:[#allocation49_spill] sm:$0xff] %v21161_v18 }
 0x676   : > { %17234 = vmatpush3.bf16.msra.mxu1 %v17880_v7 }
 0x677   : > { %v21144_v55 = vpop.f32.mrf.mxu1  ;;  %17315 = vmatprep.subr.bf16.mxu1 %v20927_v32 }
 0x679   : > { %v21149_v9 = vpop.f32.mrf.mxu1  ;;  %17156 = vmatmul.mubr.bf16.gmra.mxu1 %v22328_v34  ;;  %v21169_v34 = vpop.f32.mrf.mxu0 }
 0x67a   : > { %17159 = vmatprep.mubr.bf16.mxu1 %v22329_v54  ;;  %22334 = vst [vmem:[#allocation58_spill] sm:$0xff] %v21169_v34 }
 0x67b   : > { %v21153_v11 = vpop.f32.mrf.mxu1  ;;  %v21173_v57 = vpop.f32.mrf.mxu0 }
 0x67c   : > { %22336 = vst [vmem:[#allocation68_spill] sm:$0xff] %v21173_v57  ;;  %v17881_v57 = vld [vmem:[#allocation3 + $0xc] sm:$0xff]  }
 0x67d   : > { %v21157_v15 = vpop.f32.mrf.mxu1  ;;  %v21181_v18 = vpop.f32.mrf.mxu0 }
 0x67e   : > { %22331 = vst [vmem:[#allocation46_spill] sm:$0xff] %v21157_v15  ;;  %22338 = vst [vmem:[#allocation54_spill] sm:$0xff] %v21181_v18 }
 0x67f   : > { %v21159_v7 = vpop.f32.mrf.mxu1 }
 0x681   : > { %v21163_v53 = vpop.f32.mrf.mxu1  ;;  %17160 = vmatmul.mubr.bf16.gmra.mxu1 %v20832_v44 }
 0x682   : > { %17163 = vmatprep.mubr.bf16.mxu1 %v20880_v61 }
 0x683   : > { %v21167_v10 = vpop.f32.mrf.mxu1 }
 0x684   : > { %22333 = vst [vmem:[#allocation53_spill] sm:$0xff] %v21167_v10  ;;  %v21187_v10 = vpop.f32.mrf.mxu0 }
 0x685   : > { %v21171_v54 = vpop.f32.mrf.mxu1  ;;  %22341 = vst [vmem:[#allocation62_spill] sm:$0xff] %v21187_v10 }
 0x686   : > { %22335 = vst [vmem:[#allocation66_spill] sm:$0xff] %v21171_v54 }
 0x687   : > { %v21175_v3 = vpop.f32.mrf.mxu1 }
 0x688   : > { %22337 = vst [vmem:[#allocation50_spill] sm:$0xff] %v21175_v3 }
 0x689   : > { %v21177_v15 = vpop.f32.mrf.mxu1  ;;  %17164 = vmatmul.mubr.bf16.gmra.mxu1 %v20901_v41 }
 0x68a   : > { %17167 = vmatprep.mubr.bf16.mxu1 %v20919_v33  ;;  %v21196_v33 = vpop.f32.mrf.mxu0 }
 0x68b   : > { %v21183_v44 = vpop.f32.mrf.mxu1  ;;  %22343 = vst [vmem:[#allocation64_spill] sm:$0xff] %v21196_v33 }
 0x68c   : > { %22339 = vst [vmem:[#allocation59_spill] sm:$0xff] %v21183_v44 }
 0x68d   : > { %v21185_v61 = vpop.f32.mrf.mxu1 }
 0x68e   : > { %22340 = vst [vmem:[#allocation61_spill] sm:$0xff] %v21185_v61  ;;  %v21201_v61 = vpop.f32.mrf.mxu0 }
 0x68f   : > { %v9451_v34 = vpop.f32.mrf.mxu1 }
 0x690   : > { %v21190_v54 = vadd.f32 %v9451_v34, %v21072_v40 }
 0x691   : > { %v16977_v3 = vpop.f32.mrf.mxu1  ;;  %17168 = vmatmul.mubr.bf16.gmra.mxu1 %v21004_v20  ;;  %v9513_v20 = vadd.f32 %v21088_v43, %v20970_v28  ;;  %v9514_v28 = vadd.f32 %v21098_v17, %v20976_v0  ;;  %v17885_v17 = vld [vmem:[#allocation3 + $0x3c] sm:$0xff]  }
 0x692   : > { %22342 = vst [vmem:[#allocation63_spill] sm:$0xff] %v21190_v54  ;;  %v21194_v41 = vadd.f32 %v16977_v3, %v21074_v21  ;;  %17235 = vmatprep.mubr.bf16.mxu1 %v17881_v57  ;;  %v17882_v54 = vld [vmem:[#allocation3 + $0x18] sm:$0xff]   ;;  %v17883_v57 = vld [vmem:[#allocation3 + $0x24] sm:$0xff]   ;;  %v21211_v21 = vpop.f32.mrf.mxu0 }
 0x693   : > { %v9464_v18 = vpop.f32.mrf.mxu1 }
 0x694   : > { %v21199_v44 = vadd.f32 %v9464_v18, %v21080_v1  ;;  %v9511_v1 = vadd.f32 %v21094_v13, %v20974_v42 }
 0x695   : > { %v16978_v10 = vpop.f32.mrf.mxu1 }
 0x696   : > { %v21204_v40 = vadd.f32 %v16978_v10, %v21082_v19 }
 0x697   : > { %v9467_v34 = vpop.f32.mrf.mxu1 }
 0x698   : > { %v21209_v3 = vadd.f32 %v9467_v34, %v21086_v26  ;;  %v21223_v26 = vpop.f32.mrf.mxu0 }
 0x699   : > { %v16997_v33 = vpop.f32.mrf.mxu1  ;;  %17236 = vmatmul.mubr.bf16.vlgmr.msra.gmra.mxu1 %v17882_v54  ;;  %v9512_v54 = vadd.f32 %v21100_v35, %v20980_v52  ;;  %v9515_v52 = vadd.f32 %v21108_v47, %v20984_v62 }
 0x69a   : > { %v21215_v18 = vadd.f32 %v16997_v33, %v9513_v20  ;;  %17239 = vmatprep.mubr.bf16.mxu1 %v17883_v57  ;;  %17323 = vmatpush3.bf16.msra.mxu1 %v20927_v32  ;;  %v17884_v32 = vld [vmem:[#allocation3 + $0x30] sm:$0xff]   ;;  %v9517_v33 = vadd.f32 %v21104_v46, %v20982_v59  ;;  %v21235_v34 = vpop.f32.mrf.mxu0  ;;  %v9518_v59 = vadd.f32 %v21112_v4, %v20988_v49 }
 0x69b   : > { %v9802_v10 = vpop.f32.mrf.mxu1  ;;  %17316 = vmatprep.subr.bf16.mxu1 %v20924_v36  ;;  %v17887_v4 = vld [vmem:[#allocation3 + $0x54] sm:$0xff]  }
 0x69c   : > { %v21221_v19 = vadd.f32 %v9802_v10, %v9511_v1  ;;  %v21247_v57 = vpop.f32.mrf.mxu0  ;;  %v9516_v10 = vadd.f32 %v21114_v50, %v20990_v29  ;;  %v9519_v29 = vadd.f32 %v21124_v31, %v20996_v30 }
 0x69d   : > { %v16998_v43 = vpop.f32.mrf.mxu1 }
 0x69e   : > { %v21227_v42 = vadd.f32 %v16998_v43, %v9514_v28  ;;  %17324 = vmatpush3.bf16.msra.mxu1 %v20924_v36  ;;  %v9521_v28 = vadd.f32 %v21118_v2, %v20994_v23  ;;  %v21259_v43 = vpop.f32.mrf.mxu0  ;;  %v9522_v23 = vadd.f32 %v21126_v12, %v21006_v45  ;;  %v17889_v12 = vld [vmem:[#allocation3 + $0x6c] sm:$0xff]  }
 0x69f   : > { %v9805_v13 = vpop.f32.mrf.mxu1  ;;  %17317 = vmatprep.subr.bf16.mxu1 %v20930_v6 }
 0x6a0   : > { %v21233_v0 = vadd.f32 %v9805_v13, %v9512_v54  ;;  %v21271_v13 = vpop.f32.mrf.mxu0 }
 0x6a1   : > { %v17001_v20 = vpop.f32.mrf.mxu1  ;;  %17240 = vmatmul.mubr.bf16.gmra.mxu1 %v17884_v32 }
 0x6a2   : > { %v21239_v35 = vadd.f32 %v17001_v20, %v9517_v33  ;;  %17243 = vmatprep.mubr.bf16.mxu1 %v17885_v17  ;;  %17325 = vmatpush3.bf16.msra.mxu1 %v20930_v6  ;;  %v17886_v6 = vld [vmem:[#allocation3 + $0x48] sm:$0xff]   ;;  %v9520_v33 = vadd.f32 %v21130_v22, %v21008_v25  ;;  %v9525_v17 = vadd.f32 %v21132_v8, %v21010_v39  ;;  %v21283_v20 = vpop.f32.mrf.mxu0 }
 0x6a3   : > { %v9818_v36 = vpop.f32.mrf.mxu1  ;;  %17318 = vmatprep.subr.bf16.mxu1 %v20936_v60  ;;  %v9523_v25 = vadd.f32 %v21138_v27, %v21014_v37  ;;  %v9526_v39 = vadd.f32 %v21140_v24, %v21016_v58  ;;  %v17891_v58 = vld [vmem:[#allocation3 + $0x84] sm:$0xff]  }
 0x6a4   : > { %v21245_v46 = vadd.f32 %v9818_v36, %v9515_v52  ;;  %v21295_v36 = vpop.f32.mrf.mxu0 }
 0x6a5   : > { %v17002_v1 = vpop.f32.mrf.mxu1 }
 0x6a6   : > { %v21251_v62 = vadd.f32 %v17002_v1, %v9518_v59  ;;  %17326 = vmatpush3.bf16.msra.mxu1 %v20936_v60  ;;  %v9524_v1 = vadd.f32 %v21144_v55, %v21020_v56  ;;  %v21306_v24 = vpop.f32.mrf.mxu0 }
 0x6a7   : > { %v9821_v47 = vpop.f32.mrf.mxu1  ;;  %17319 = vmatprep.subr.bf16.mxu1 %v20941_v5 }
 0x6a8   : > { %v21257_v49 = vadd.f32 %v9821_v47, %v9516_v10  ;;  %v9529_v10 = vadd.f32 %v21149_v9, %v21022_v14  ;;  %v21316_v14 = vpop.f32.mrf.mxu0 }
 0x6a9   : > { %v17005_v54 = vpop.f32.mrf.mxu1  ;;  %17244 = vmatmul.mubr.bf16.gmra.mxu1 %v17886_v6 }
 0x6aa   : > { %v21263_v50 = vadd.f32 %v17005_v54, %v9521_v28  ;;  %17247 = vmatprep.mubr.bf16.mxu1 %v17887_v4  ;;  %17327 = vmatpush3.bf16.msra.mxu1 %v20941_v5  ;;  %v17888_v5 = vld [vmem:[#allocation3 + $0x60] sm:$0xff]   ;;  %v9527_v28 = vadd.f32 %v21153_v11, %v21026_v51 }
 0x6ab   : > { %v9834_v60 = vpop.f32.mrf.mxu1  ;;  %17320 = vmatprep.subr.bf16.mxu1 %v20946_v63  ;;  %v22346_v51 = vld [vmem:[#allocation27_spill] sm:$0xff] }
 0x6ac   : > { %v21269_v2 = vadd.f32 %v9834_v60, %v9519_v29  ;;  %v22345_v29 = vld [vmem:[#allocation52_spill] sm:$0xff]  ;;  %v9533_v11 = vadd.f32 %v21163_v53, %v22346_v51  ;;  %v22354_v51 = vld [vmem:[#allocation25_spill] sm:$0xff] }
 0x6ad   : > { %v17006_v32 = vpop.f32.mrf.mxu1  ;;  %v9528_v60 = vadd.f32 %v21159_v7, %v22345_v29 }
 0x6ae   : > { %v21275_v30 = vadd.f32 %v17006_v32, %v9522_v23  ;;  %17328 = vmatpush3.bf16.msra.mxu1 %v20946_v63 }
 0x6af   : > { %v9837_v31 = vpop.f32.mrf.mxu1  ;;  %17321 = vmatprep.subr.bf16.mxu1 %v20951_v16 }
 0x6b0   : > { %v21281_v45 = vadd.f32 %v9837_v31, %v9520_v33  ;;  %v17892_v33 = vld [vmem:[#allocation3 + $0x90] sm:$0xff]  }
 0x6b1   : > { %v17009_v52 = vpop.f32.mrf.mxu1  ;;  %17248 = vmatmul.mubr.bf16.gmra.mxu1 %v17888_v5  ;;  %v17893_v5 = vld [vmem:[#allocation3 + $0x9c] sm:$0xff]  }
 0x6b2   : > { %v21287_v22 = vadd.f32 %v17009_v52, %v9525_v17  ;;  %17251 = vmatprep.mubr.bf16.mxu1 %v17889_v12  ;;  %17329 = vmatpush3.bf16.msra.mxu1 %v20951_v16  ;;  %v17890_v16 = vld [vmem:[#allocation3 + $0x78] sm:$0xff]   ;;  %v21326_v17 = vpop.f32.mrf.mxu0  ;;  %v22347_v12 = vld [vmem:[#allocation28_spill] sm:$0xff]  ;;  %v22348_v52 = vld [vmem:[#allocation53_spill] sm:$0xff] }
 0x6b3   : > { %v9850_v63 = vpop.f32.mrf.mxu1  ;;  %17322 = vmatprep.subr.bf16.mxu1 %v20956_v48 }
 0x6b4   : > { %v21293_v8 = vadd.f32 %v9850_v63, %v9523_v25  ;;  %v9531_v25 = vadd.f32 %v22348_v52, %v22347_v12  ;;  %v21336_v53 = vpop.f32.mrf.mxu0  ;;  %v22356_v52 = vld [vmem:[#allocation34_spill] sm:$0xff] }
 0x6b5   : > { %v17010_v59 = vpop.f32.mrf.mxu1 }
 0x6b6   : > { %v21299_v37 = vadd.f32 %v17010_v59, %v9526_v39  ;;  %17330 = vmatpush3.bf16.msra.mxu1 %v20956_v48  ;;  %v22344_v48 = vld [vmem:[#allocation46_spill] sm:$0xff]  ;;  %v22349_v39 = vld [vmem:[#allocation55_spill] sm:$0xff] }
 0x6b7   : > { %v9853_v27 = vpop.f32.mrf.mxu1  ;;  %v9530_v4 = vadd.f32 %v22344_v48, %v21028_v38  ;;  %v22350_v59 = vld [vmem:[#allocation66_spill] sm:$0xff]  ;;  %v17894_v48 = vld [vmem:[#allocation3 + $0xa8] sm:$0xff]  }
 0x6b8   : > { %v21304_v47 = vadd.f32 %v9853_v27, %v9524_v1  ;;  %v9534_v1 = vadd.f32 %v22350_v59, %v22349_v39 }
 0x6b9   : > { %v17013_v6 = vpop.f32.mrf.mxu1  ;;  %17252 = vmatmul.mubr.bf16.gmra.mxu1 %v17890_v16 }
 0x6ba   : > { %v21310_v56 = vadd.f32 %v17013_v6, %v9529_v10  ;;  %17255 = vmatprep.mubr.bf16.mxu1 %v17891_v58  ;;  %v22351_v10 = vld [vmem:[#allocation32_spill] sm:$0xff]  ;;  %v22352_v58 = vld [vmem:[#allocation50_spill] sm:$0xff] }
 0x6bb   : > { %v9866_v55 = vpop.f32.mrf.mxu1  ;;  %v9532_v6 = vadd.f32 %v22352_v58, %v22351_v10  ;;  %v17896_v10 = vld [vmem:[#allocation3 + $0xc0] sm:$0xff]  }
 0x6bc   : > { %v21314_v54 = vadd.f32 %v9866_v55, %v9527_v28  ;;  %v22359_v58 = vld [vmem:[#allocation63_spill] sm:$0xff] }
 0x6bd   : > { %v17014_v9 = vpop.f32.mrf.mxu1 }
 0x6be   : > { %v21320_v23 = vadd.f32 %v17014_v9, %v9530_v4  ;;  %v22353_v4 = vld [vmem:[#allocation33_spill] sm:$0xff] }
 0x6bf   : > { %v9869_v32 = vpop.f32.mrf.mxu1  ;;  %v9537_v9 = vadd.f32 %v21177_v15, %v22353_v4 }
 0x6c0   : > { %v21324_v31 = vadd.f32 %v9869_v32, %v9528_v60  ;;  %v17895_v60 = vld [vmem:[#allocation3 + $0xb4] sm:$0xff]   ;;  %v21346_v32 = vpop.f32.mrf.mxu0 }
 0x6c1   : > { %v17017_v38 = vpop.f32.mrf.mxu1  ;;  %17256 = vmatmul.mubr.bf16.gmra.mxu1 %v17892_v33 }
 0x6c2   : > { %v21330_v63 = vadd.f32 %v17017_v38, %v9533_v11  ;;  %17259 = vmatprep.mubr.bf16.mxu1 %v17893_v5  ;;  %v22355_v11 = vld [vmem:[#allocation59_spill] sm:$0xff]  ;;  %v21356_v15 = vpop.f32.mrf.mxu0 }
 0x6c3   : > { %v9882_v7 = vpop.f32.mrf.mxu1  ;;  %v9535_v5 = vadd.f32 %v22355_v11, %v22354_v51  ;;  %22358 = vst [vmem:[#allocation65_spill] sm:$0xff] %v21356_v15 }
 0x6c4   : > { %v21334_v27 = vadd.f32 %v9882_v7, %v9531_v25  ;;  %v22357_v25 = vld [vmem:[#allocation61_spill] sm:$0xff] }
 0x6c5   : > { %v17018_v16 = vpop.f32.mrf.mxu1  ;;  %v9538_v7 = vadd.f32 %v22357_v25, %v22356_v52 }
 0x6c6   : > { %v21340_v28 = vadd.f32 %v17018_v16, %v9534_v1 }
 0x6c7   : > { %v9885_v55 = vpop.f32.mrf.mxu1 }
 0x6c8   : > { %v21344_v29 = vadd.f32 %v9885_v55, %v9532_v6  ;;  %v17897_v55 = vld [vmem:[#allocation3 + $0xc0] sm:$0xff]  }
 0x6c9   : > { %v17021_v33 = vpop.f32.mrf.mxu1  ;;  %17260 = vmatmul.mubr.bf16.gmra.mxu1 %v17894_v48  ;;  %v21363_v48 = vpop.f32.mrf.mxu0 }
 0x6ca   : > { %v21350_v38 = vadd.f32 %v17021_v33, %v9537_v9  ;;  %17263 = vmatprep.mubr.bf16.mxu1 %v17895_v60  ;;  %22360 = vst [vmem:[#allocation67_spill] sm:$0xff] %v21363_v48 }
 0x6cb   : > { %v9898_v12 = vpop.f32.mrf.mxu1  ;;  %v21371_v51 = vpop.f32.mrf.mxu0 }
 0x6cc   : > { %v21354_v39 = vadd.f32 %v9898_v12, %v9535_v5  ;;  %v17898_v5 = vld [vmem:[#allocation3 + $0xcc] sm:$0xff]  }
 0x6cd   : > { %v17022_v59 = vpop.f32.mrf.mxu1 }
 0x6ce   : > { %v21358_v1 = vadd.f32 %v17022_v59, %v9538_v7  ;;  %v21379_v7 = vpop.f32.mrf.mxu0 }
 0x6cf   : > { %v9901_v16 = vpop.f32.mrf.mxu1 }
 0x6d0   : > { %v21361_v6 = vadd.f32 %v9901_v16, %v22359_v58 }
 0x6d1   : > { %v17025_v4 = vpop.f32.mrf.mxu1  ;;  %17264 = vmatmul.mubr.bf16.gmra.mxu1 %v17896_v10  ;;  %v21387_v10 = vpop.f32.mrf.mxu0 }
 0x6d2   : > { %v21366_v9 = vadd.f32 %v17025_v4, %v21194_v41  ;;  %17311 = vmatprep.mubr.bf16.mxu1 %v17897_v55  ;;  %22361 = vst [vmem:[#allocation69_spill] sm:$0xff] %v21387_v10 }
 0x6d3   : > { %v9914_v60 = vpop.f32.mrf.mxu1  ;;  %v21395_v4 = vpop.f32.mrf.mxu0 }
 0x6d4   : > { %v21369_v33 = vadd.f32 %v9914_v60, %v21199_v44  ;;  %22362 = vst [vmem:[#allocation70_spill] sm:$0xff] %v21395_v4 }
 0x6d5   : > { %v17026_v11 = vpop.f32.mrf.mxu1 }
 0x6d6   : > { %v21374_v12 = vadd.f32 %v17026_v11, %v21204_v40 }
 0x6d7   : > { %v9917_v52 = vpop.f32.mrf.mxu1 }
 0x6d8   : > { %v21377_v25 = vadd.f32 %v9917_v52, %v21209_v3 }
 0x6d9   : > { %v17045_v41 = vpop.f32.mrf.mxu1  ;;  %17312 = vmatmul.mubr.bf16.vlgmr.msra.gmra.mxu1 %v17898_v5  ;;  %v21403_v5 = vpop.f32.mrf.mxu0 }
 0x6da   : > { %v21382_v59 = vadd.f32 %v17045_v41, %v21215_v18 }
 0x6db   : > { %v10810_v44 = vpop.f32.mrf.mxu1 }
 0x6dc   : > { %v21385_v16 = vadd.f32 %v10810_v44, %v21221_v19  ;;  %v21411_v44 = vpop.f32.mrf.mxu0 }
 0x6dd   : > { %v17046_v58 = vpop.f32.mrf.mxu1 }
 0x6de   : > { %v21390_v40 = vadd.f32 %v17046_v58, %v21227_v42 }
 0x6df   : > { %v10813_v55 = vpop.f32.mrf.mxu1 }
 0x6e0   : > { %v21393_v3 = vadd.f32 %v10813_v55, %v21233_v0 }
 0x6e1   : > { %v17049_v60 = vpop.f32.mrf.mxu1 }
 0x6e2   : > { %v21398_v18 = vadd.f32 %v17049_v60, %v21239_v35  ;;  %v21419_v60 = vpop.f32.mrf.mxu0 }
 0x6e3   : > { %v10826_v11 = vpop.f32.mrf.mxu1  ;;  %22363 = vst [vmem:[#allocation46_spill] sm:$0xff] %v21419_v60 }
 0x6e4   : > { %v21401_v19 = vadd.f32 %v10826_v11, %v21245_v46 }
 0x6e5   : > { %v17050_v52 = vpop.f32.mrf.mxu1 }
 0x6e6   : > { %v21406_v42 = vadd.f32 %v17050_v52, %v21251_v62 }
 0x6e7   : > { %v10829_v41 = vpop.f32.mrf.mxu1 }
 0x6e8   : > { %v21409_v0 = vadd.f32 %v10829_v41, %v21257_v49  ;;  %v21427_v41 = vpop.f32.mrf.mxu0 }
 0x6e9   : > { %v17053_v58 = vpop.f32.mrf.mxu1  ;;  %22364 = vst [vmem:[#allocation52_spill] sm:$0xff] %v21427_v41 }
 0x6ea   : > { %v21414_v35 = vadd.f32 %v17053_v58, %v21263_v50 }
 0x6eb   : > { %v10842_v55 = vpop.f32.mrf.mxu1 }
 0x6ec   : > { %v21417_v46 = vadd.f32 %v10842_v55, %v21269_v2  ;;  %v21435_v55 = vpop.f32.mrf.mxu0 }
 0x6ed   : > { %v17054_v11 = vpop.f32.mrf.mxu1 }
 0x6ee   : > { %v21422_v62 = vadd.f32 %v17054_v11, %v21275_v30 }
 0x6ef   : > { %v10845_v52 = vpop.f32.mrf.mxu1 }
 0x6f0   : > { %v21425_v49 = vadd.f32 %v10845_v52, %v21281_v45  ;;  %v21443_v52 = vpop.f32.mrf.mxu0 }
 0x6f1   : > { %v17057_v4 = vpop.f32.mrf.mxu1 }
 0x6f2   : > { %v21430_v50 = vadd.f32 %v17057_v4, %v21287_v22 }
 0x6f3   : > { %v10858_v58 = vpop.f32.mrf.mxu1 }
 0x6f4   : > { %v21433_v2 = vadd.f32 %v10858_v58, %v21293_v8  ;;  %v21451_v58 = vpop.f32.mrf.mxu0 }
 0x6f5   : > { %v17058_v60 = vpop.f32.mrf.mxu1  ;;  %22365 = vst [vmem:[#allocation27_spill] sm:$0xff] %v21451_v58 }
 0x6f6   : > { %v21438_v30 = vadd.f32 %v17058_v60, %v21299_v37 }
 0x6f7   : > { %v10861_v11 = vpop.f32.mrf.mxu1 }
 0x6f8   : > { %v21441_v45 = vadd.f32 %v10861_v11, %v21304_v47  ;;  %v21459_v11 = vpop.f32.mrf.mxu0 }
 0x6f9   : > { %v17061_v41 = vpop.f32.mrf.mxu1  ;;  %22366 = vst [vmem:[#allocation28_spill] sm:$0xff] %v21459_v11 }
 0x6fa   : > { %v21446_v22 = vadd.f32 %v17061_v41, %v21310_v56 }
 0x6fb   : > { %v10874_v4 = vpop.f32.mrf.mxu1 }
 0x6fc   : > { %v21449_v8 = vadd.f32 %v10874_v4, %v21314_v54  ;;  %v21467_v4 = vpop.f32.mrf.mxu0 }
 0x6fd   : > { %v17062_v10 = vpop.f32.mrf.mxu1 }
 0x6fe   : > { %v21454_v37 = vadd.f32 %v17062_v10, %v21320_v23 }
 0x6ff   : > { %v10877_v60 = vpop.f32.mrf.mxu1 }
 0x700   : > { %v21457_v47 = vadd.f32 %v10877_v60, %v21324_v31  ;;  %v21475_v60 = vpop.f32.mrf.mxu0 }
 0x701   : > { %v17065_v48 = vpop.f32.mrf.mxu1 }
 0x702   : > { %v21462_v56 = vadd.f32 %v17065_v48, %v21330_v63 }
 0x703   : > { %v10890_v41 = vpop.f32.mrf.mxu1 }
 0x704   : > { %v21465_v54 = vadd.f32 %v10890_v41, %v21334_v27  ;;  %v21483_v41 = vpop.f32.mrf.mxu0 }
 0x705   : > { %v17066_v58 = vpop.f32.mrf.mxu1  ;;  %22369 = vst [vmem:[#allocation66_spill] sm:$0xff] %v21483_v41 }
 0x706   : > { %v21470_v23 = vadd.f32 %v17066_v58, %v21340_v28 }
 0x707   : > { %v10893_v10 = vpop.f32.mrf.mxu1 }
 0x708   : > { %22367 = vst [vmem:[#allocation53_spill] sm:$0xff] %v21470_v23  ;;  %v21473_v31 = vadd.f32 %v10893_v10, %v21344_v29  ;;  %v21491_v10 = vpop.f32.mrf.mxu0 }
 0x709   : > { %v17069_v11 = vpop.f32.mrf.mxu1  ;;  %22372 = vst [vmem:[#allocation33_spill] sm:$0xff] %v21491_v10 }
 0x70a   : > { %22368 = vst [vmem:[#allocation55_spill] sm:$0xff] %v21473_v31  ;;  %v21478_v63 = vadd.f32 %v17069_v11, %v21350_v38 }
 0x70b   : > { %v10906_v48 = vpop.f32.mrf.mxu1 }
 0x70c   : > { %v21481_v27 = vadd.f32 %v10906_v48, %v21354_v39  ;;  %v21499_v48 = vpop.f32.mrf.mxu0 }
 0x70d   : > { %v17070_v15 = vpop.f32.mrf.mxu1  ;;  %22373 = vst [vmem:[#allocation25_spill] sm:$0xff] %v21499_v48 }
 0x70e   : > { %v21486_v28 = vadd.f32 %v17070_v15, %v21358_v1 }
 0x70f   : > { %v10909_v58 = vpop.f32.mrf.mxu1 }
 0x710   : > { %22370 = vst [vmem:[#allocation32_spill] sm:$0xff] %v21486_v28  ;;  %v21489_v29 = vadd.f32 %v10909_v58, %v21361_v6  ;;  %v22374_v58 = vld [vmem:[#allocation71_spill] sm:$0xff] }
 0x711   : > { %v17073_v31 = vpop.f32.mrf.mxu1  ;;  %v11421_v10 = vadd.f32 %v22374_v58, %v21382_v59 }
 0x712   : > { %22371 = vst [vmem:[#allocation50_spill] sm:$0xff] %v21489_v29  ;;  %v21494_v38 = vadd.f32 %v17073_v31, %v21366_v9  ;;  %v21509_v29 = vpop.f32.mrf.mxu0 }
 0x713   : > { %v10922_v11 = vpop.f32.mrf.mxu1  ;;  %22375 = vst [vmem:[#allocation59_spill] sm:$0xff] %v21509_v29 }
 0x714   : > { %v21497_v39 = vadd.f32 %v10922_v11, %v21369_v33  ;;  %v22376_v33 = vld [vmem:[#allocation51_spill] sm:$0xff] }
 0x715   : > { %v17074_v41 = vpop.f32.mrf.mxu1  ;;  %v11419_v11 = vadd.f32 %v22376_v33, %v21385_v16 }
 0x716   : > { %v21502_v15 = vadd.f32 %v17074_v41, %v21374_v12  ;;  %v21516_v12 = vpop.f32.mrf.mxu0 }
 0x717   : > { %v10925_v1 = vpop.f32.mrf.mxu1  ;;  %22377 = vst [vmem:[#allocation34_spill] sm:$0xff] %v21516_v12 }
 0x718   : > { %v21505_v6 = vadd.f32 %v10925_v1, %v21377_v25  ;;  %v22378_v1 = vld [vmem:[#allocation31_spill] sm:$0xff]  ;;  %v21527_v58 = vpop.f32.mrf.mxu0 }
 0x719   : > { %v17141_v9 = vpop.f32.mrf.mxu1  ;;  %22379 = vst [vmem:[#allocation61_spill] sm:$0xff] %v21527_v58 }
 0x71a   : > { %v11871_v31 = vadd.f32 %v17141_v9, %v11421_v10  ;;  %v11425_v10 = vadd.f32 %v22378_v1, %v21398_v18  ;;  %v21534_v12 = vpop.f32.mrf.mxu0  ;;  %v22381_v1 = vld [vmem:[#allocation36_spill] sm:$0xff] }
 0x71b   : > { %v11710_v28 = vpop.f32.mrf.mxu1 }
 0x71c   : > { %v11869_v48 = vadd.f32 %v11710_v28, %v11419_v11  ;;  %v21514_v23 = vadd.f32 %v21247_v57, %v11871_v31  ;;  %v22380_v28 = vld [vmem:[#allocation60_spill] sm:$0xff] }
 0x71d   : > { %v21518_v41 = vpop.f32.mrf.mxu1  ;;  %v11423_v57 = vadd.f32 %v22380_v28, %v21401_v19 }
 0x71e   : > { %v21521_v25 = vadd.f32 %v21259_v43, %v11869_v48 }
 0x71f   : > { %v21523_v59 = vpop.f32.mrf.mxu1 }
 0x721   : > { %v17145_v16 = vpop.f32.mrf.mxu1 }
 0x722   : > { %v11875_v9 = vadd.f32 %v17145_v16, %v11425_v10  ;;  %v11429_v10 = vadd.f32 %v22381_v1, %v21414_v35  ;;  %v21545_v16 = vpop.f32.mrf.mxu0  ;;  %v22385_v1 = vld [vmem:[#allocation40_spill] sm:$0xff] }
 0x723   : > { %v11726_v31 = vpop.f32.mrf.mxu1 }
 0x724   : > { %v11873_v33 = vadd.f32 %v11726_v31, %v11423_v57  ;;  %v21532_v11 = vadd.f32 %v21295_v36, %v11875_v9  ;;  %v22382_v57 = vld [vmem:[#allocation37_spill] sm:$0xff]  ;;  %v21552_v29 = vpop.f32.mrf.mxu0 }
 0x725   : > { %v21536_v43 = vpop.f32.mrf.mxu1  ;;  %v11427_v36 = vadd.f32 %v22382_v57, %v21417_v46 }
 0x726   : > { %v21539_v48 = vadd.f32 %v21306_v24, %v11873_v33 }
 0x727   : > { %v21541_v18 = vpop.f32.mrf.mxu1 }
 0x729   : > { %v17149_v19 = vpop.f32.mrf.mxu1 }
 0x72a   : > { %v11879_v28 = vadd.f32 %v17149_v19, %v11429_v10  ;;  %v11433_v10 = vadd.f32 %v22385_v1, %v21430_v50  ;;  %v21563_v19 = vpop.f32.mrf.mxu0  ;;  %v22389_v1 = vld [vmem:[#allocation44_spill] sm:$0xff] }
 0x72b   : > { %v11742_v9 = vpop.f32.mrf.mxu1 }
 0x72c   : > { %v11877_v31 = vadd.f32 %v11742_v9, %v11427_v36  ;;  %v21550_v58 = vadd.f32 %v21336_v53, %v11879_v28  ;;  %v22386_v36 = vld [vmem:[#allocation41_spill] sm:$0xff] }
 0x72d   : > { %v21554_v24 = vpop.f32.mrf.mxu1  ;;  %v11431_v53 = vadd.f32 %v22386_v36, %v21433_v2 }
 0x72e   : > { %22383 = vst [vmem:[#allocation63_spill] sm:$0xff] %v21550_v58  ;;  %22384 = vst [vmem:[#allocation71_spill] sm:$0xff] %v21554_v24  ;;  %v21557_v33 = vadd.f32 %v21346_v32, %v11877_v31  ;;  %v21570_v24 = vpop.f32.mrf.mxu0 }
 0x72f   : > { %v21559_v35 = vpop.f32.mrf.mxu1 }
 0x731   : > { %v17153_v46 = vpop.f32.mrf.mxu1 }
 0x732   : > { %v11883_v57 = vadd.f32 %v17153_v46, %v11433_v10  ;;  %v11437_v10 = vadd.f32 %v22389_v1, %v21446_v22  ;;  %v21581_v46 = vpop.f32.mrf.mxu0  ;;  %v22393_v1 = vld [vmem:[#allocation57_spill] sm:$0xff] }
 0x733   : > { %v11758_v28 = vpop.f32.mrf.mxu1 }
 0x734   : > { %v11881_v9 = vadd.f32 %v11758_v28, %v11431_v53  ;;  %v21568_v58 = vadd.f32 %v21371_v51, %v11883_v57  ;;  %v22390_v53 = vld [vmem:[#allocation45_spill] sm:$0xff] }
 0x735   : > { %v21572_v32 = vpop.f32.mrf.mxu1  ;;  %v11435_v51 = vadd.f32 %v22390_v53, %v21449_v8 }
 0x736   : > { %22387 = vst [vmem:[#allocation51_spill] sm:$0xff] %v21568_v58  ;;  %22388 = vst [vmem:[#allocation31_spill] sm:$0xff] %v21572_v32  ;;  %v21575_v31 = vadd.f32 %v21379_v7, %v11881_v9  ;;  %v21588_v32 = vpop.f32.mrf.mxu0 }
 0x737   : > { %v21577_v50 = vpop.f32.mrf.mxu1 }
 0x739   : > { %v17157_v2 = vpop.f32.mrf.mxu1 }
 0x73a   : > { %v11887_v36 = vadd.f32 %v17157_v2, %v11437_v10  ;;  %v11441_v10 = vadd.f32 %v22393_v1, %v21462_v56  ;;  %v21599_v2 = vpop.f32.mrf.mxu0  ;;  %v22397_v1 = vld [vmem:[#allocation68_spill] sm:$0xff] }
 0x73b   : > { %v11774_v57 = vpop.f32.mrf.mxu1 }
 0x73c   : > { %v11885_v28 = vadd.f32 %v11774_v57, %v11435_v51  ;;  %v21586_v58 = vadd.f32 %v21403_v5, %v11887_v36  ;;  %v22394_v51 = vld [vmem:[#allocation47_spill] sm:$0xff] }
 0x73d   : > { %v21590_v7 = vpop.f32.mrf.mxu1  ;;  %v11439_v5 = vadd.f32 %v22394_v51, %v21465_v54 }
 0x73e   : > { %22391 = vst [vmem:[#allocation60_spill] sm:$0xff] %v21586_v58  ;;  %22392 = vst [vmem:[#allocation36_spill] sm:$0xff] %v21590_v7  ;;  %v21593_v9 = vadd.f32 %v21411_v44, %v11885_v28  ;;  %v21606_v7 = vpop.f32.mrf.mxu0 }
 0x73f   : > { %v21595_v22 = vpop.f32.mrf.mxu1 }
 0x741   : > { %v17161_v8 = vpop.f32.mrf.mxu1 }
 0x742   : > { %v11891_v53 = vadd.f32 %v17161_v8, %v11441_v10  ;;  %v11445_v10 = vadd.f32 %v22397_v1, %v21478_v63  ;;  %v21617_v8 = vpop.f32.mrf.mxu0  ;;  %v11449_v1 = vadd.f32 %v21201_v61, %v21494_v38  ;;  %v21648_v61 = vld [vmem:[%s18385_s19 + $0x8] sm:$0xff]   ;;  %v22405_v38 = vld [vmem:[#allocation29_spill] sm:$0xff] }
 0x743   : > { %v11790_v36 = vpop.f32.mrf.mxu1 }
 0x744   : > { %v11889_v57 = vadd.f32 %v11790_v36, %v11439_v5  ;;  %v21604_v58 = vadd.f32 %v21435_v55, %v11891_v53  ;;  %v22398_v5 = vld [vmem:[#allocation54_spill] sm:$0xff] }
 0x745   : > { %v21608_v44 = vpop.f32.mrf.mxu1  ;;  %v11443_v55 = vadd.f32 %v22398_v5, %v21481_v27 }
 0x746   : > { %22395 = vst [vmem:[#allocation37_spill] sm:$0xff] %v21604_v58  ;;  %v21611_v28 = vadd.f32 %v21443_v52, %v11889_v57  ;;  %v21624_v52 = vpop.f32.mrf.mxu0 }
 0x747   : > { %v21613_v56 = vpop.f32.mrf.mxu1 }
 0x748   : > { %22396 = vst [vmem:[#allocation40_spill] sm:$0xff] %v21611_v28  ;;  %v21635_v27 = vpop.f32.mrf.mxu0 }
 0x749   : > { %v17165_v54 = vpop.f32.mrf.mxu1 }
 0x74a   : > { %v11895_v51 = vadd.f32 %v17165_v54, %v11445_v10 }
 0x74b   : > { %v11806_v53 = vpop.f32.mrf.mxu1 }
 0x74c   : > { %v11893_v36 = vadd.f32 %v11806_v53, %v11443_v55  ;;  %v21622_v58 = vadd.f32 %v21467_v4, %v11895_v51  ;;  %v11447_v4 = vadd.f32 %v21211_v21, %v21497_v39  ;;  %v21645_v55 = vpop.f32.mrf.mxu0  ;;  %v11448_v21 = vadd.f32 %v21235_v34, %v21505_v6  ;;  %v21657_v39 = vld [vmem:[%s18385_s19] sm:$0xff]   ;;  %v22409_v34 = vld [vmem:[#allocation26_spill] sm:$0xff] }
 0x74d   : > { %v21626_v57 = vpop.f32.mrf.mxu1  ;;  %v11426_v6 = vadd.f32 %v22409_v34, %v21406_v42  ;;  %v22411_v42 = vld [vmem:[#allocation38_spill] sm:$0xff]  ;;  %v22412_v34 = vld [vmem:[#allocation39_spill] sm:$0xff] }
 0x74e   : > { %22399 = vst [vmem:[#allocation41_spill] sm:$0xff] %v21622_v58  ;;  %22400 = vst [vmem:[#allocation44_spill] sm:$0xff] %v21626_v57  ;;  %v21629_v28 = vadd.f32 %v21475_v60, %v11893_v36  ;;  %v11450_v60 = vadd.f32 %v21223_v26, %v21502_v15  ;;  %v11422_v36 = vadd.f32 %v22405_v38, %v21390_v40  ;;  %v22407_v15 = vld [vmem:[#allocation30_spill] sm:$0xff]  ;;  %v15042_v40 = vunpack.c.l.bf16 %v21648_v61  ;;  %v22410_v38 = vld [vmem:[#allocation35_spill] sm:$0xff] }
 0x74f   : > { %v21631_v63 = vpop.f32.mrf.mxu1  ;;  %v11876_v58 = vadd.f32 %v21536_v43, %v11426_v6  ;;  %v21745_v43 = vld [vmem:[%s18385_s19 + $0x48] sm:$0xff]  }
 0x750   : > { %22401 = vst [vmem:[#allocation45_spill] sm:$0xff] %v21629_v28  ;;  %22402 = vst [vmem:[#allocation57_spill] sm:$0xff] %v21631_v63  ;;  %v11872_v26 = vadd.f32 %v21518_v41, %v11422_v36  ;;  %v15038_v41 = vunpack.c.l.bf16 %v21657_v39  ;;  %v21687_v28 = vld [vmem:[%s18385_s19 + $0x20] sm:$0xff]  }
 0x751   : > { %v17169_v10 = vpop.f32.mrf.mxu1 }
 0x752   : > { %v21637_v54 = vadd.f32 %v17169_v10, %v11449_v1 }
 0x753   : > { %v11822_v51 = vpop.f32.mrf.mxu1 }
 0x754   : > { %22403 = vst [vmem:[#allocation47_spill] sm:$0xff] %v21637_v54  ;;  %v21641_v5 = vadd.f32 %v11822_v51, %v11447_v4  ;;  %v21660_v4 = vld [vmem:[%s18385_s19 + $0x18] sm:$0xff]   ;;  %v11420_v51 = vadd.f32 %v22407_v15, %v21393_v3 }
 0x755   : > { %v17170_v53 = vpop.f32.mrf.mxu1 }
 0x756   : > { %22404 = vst [vmem:[#allocation68_spill] sm:$0xff] %v21641_v5  ;;  %v21652_v1 = vadd.f32 %v17170_v53, %v11450_v60  ;;  %v21669_v60 = vld [vmem:[%s18385_s19 + $0x10] sm:$0xff]   ;;  %v21671_v53 = vpop.f32.mrf.mxu0  ;;  %v11870_v3 = vadd.f32 %v21523_v59, %v11420_v51  ;;  %v21717_v51 = vld [vmem:[%s22057_s7] ss:$0 sm:$0xff] }
 0x757   : > { %v11825_v10 = vpop.f32.mrf.mxu1 }
 0x758   : > { %22406 = vst [vmem:[#allocation54_spill] sm:$0xff] %v21652_v1  ;;  %v21665_v5 = vadd.f32 %v11825_v10, %v11448_v21  ;;  %v11424_v1 = vadd.f32 %v22410_v38, %v21409_v0  ;;  %v21691_v0 = vadd.f32 %v22411_v42, %v21422_v62  ;;  %v21695_v38 = vadd.f32 %v22412_v34, %v21425_v49  ;;  %v21708_v34 = vpop.f32.mrf.mxu0  ;;  %v22413_v10 = vld [vmem:[#allocation42_spill] sm:$0xff]  ;;  %v21729_v49 = vld [vmem:[%s18385_s19 + $0x30] sm:$0xff]  }
 0x759   : > { %v17237_v54 = vpop.f32.mrf.mxu1  ;;  %v12628_v42 = vadd.f32 %v21271_v13, %v11872_v26  ;;  %v21712_v36 = vadd.f32 %v22413_v10, %v21438_v30  ;;  %v12626_v30 = vadd.f32 %v21283_v20, %v11870_v3  ;;  %v21726_v10 = vld [vmem:[%s18385_s19 + $0x38] sm:$0xff]  }
 0x75a   : > { %22408 = vst [vmem:[#allocation29_spill] sm:$0xff] %v21665_v5  ;;  %v13077_v21 = vadd.f32 %v17237_v54, %v21514_v23  ;;  %v21684_v5 = vld [vmem:[%s18385_s19 + $0x28] sm:$0xff]   ;;  %v21700_v23 = vld [vmem:[%s22056_s6] ss:$0 sm:$0xff]  ;;  %v21747_v6 = vpop.f32.mrf.mxu0 }
 0x75b   : > { %v12916_v59 = vpop.f32.mrf.mxu1  ;;  %v22415_v13 = vld [vmem:[#allocation48_spill] sm:$0xff] }
 0x75c   : > { %v13527_v15 = vadd.f32 %v21534_v12, %v13077_v21  ;;  %v13075_v62 = vadd.f32 %v12916_v59, %v21521_v25  ;;  %v22414_v12 = vld [vmem:[#allocation43_spill] sm:$0xff]  ;;  %v21738_v63 = vadd.f32 %v22415_v13, %v21454_v37 }
 0x75d   : > { %v17238_v54 = vpop.f32.mrf.mxu1  ;;  %v21734_v25 = vadd.f32 %v22414_v12, %v21441_v45  ;;  %v22416_v45 = vld [vmem:[#allocation56_spill] sm:$0xff]  ;;  %v15063_v12 = vunpack.c.h.bf16 %v21729_v49 }
 0x75e   : > { %v13630_v26 = vmul.f32 %v21700_v23, %v13527_v15  ;;  %v13525_v21 = vadd.f32 %v21545_v16, %v13075_v62  ;;  %v13078_v59 = vadd.f32 %v17238_v54, %v12628_v42  ;;  %v21751_v42 = vadd.f32 %v22416_v45, %v21457_v47  ;;  %v21757_v16 = vld [vmem:[%s18385_s19 + $0x40] sm:$0xff]  }
 0x75f   : > { %v12919_v15 = vpop.f32.mrf.mxu1 }
 0x760   : > { %v13669_v20 = vadd.f32 %v21717_v51, %v13630_v26  ;;  %v13628_v3 = vmul.f32 %v21700_v23, %v13525_v21  ;;  %v13528_v54 = vadd.f32 %v21552_v29, %v13078_v59  ;;  %v13076_v62 = vadd.f32 %v12919_v15, %v12626_v30 }
 0x761   : > { %v17241_v37 = vpop.f32.mrf.mxu1  ;;  %v11874_v29 = vadd.f32 %v21541_v18, %v11424_v1  ;;  %v12632_v18 = vadd.f32 %v21316_v14, %v11876_v58  ;;  %v22418_v58 = vld [vmem:[#allocation71_spill] sm:$0xff] }
 0x762   : > { %v13667_v21 = vadd.f32 %v21717_v51, %v13628_v3  ;;  %v13631_v59 = vmul.f32 %v21700_v23, %v13528_v54  ;;  %v13526_v30 = vadd.f32 %v21563_v19, %v13076_v62  ;;  %v13765_v15 = vadd.f32 %v15042_v40, %v13669_v20  ;;  %v21770_v3 = vpop.f32.mrf.mxu0 }
 0x763   : > { %v13081_v47 = vadd.f32 %v17241_v37, %v21532_v11  ;;  %v12932_v45 = vpop.f32.mrf.mxu1  ;;  %v15075_v20 = vunpack.c.h.bf16 %v21745_v43  ;;  %v22417_v62 = vunpack.c.h.bf16 %v21648_v61  ;;  %v12630_v14 = vadd.f32 %v21326_v17, %v11874_v29 }
 0x764   : > { %v13670_v26 = vadd.f32 %v21717_v51, %v13631_v59  ;;  %v13629_v57 = vmul.f32 %v21700_v23, %v13526_v30  ;;  %v13763_v54 = vadd.f32 %v15038_v41, %v13667_v21  ;;  %v13079_v11 = vadd.f32 %v12932_v45, %v21539_v48 }
 0x765   : > { %v13531_v19 = vadd.f32 %v21570_v24, %v13081_v47  ;;  %v17242_v40 = vpop.f32.mrf.mxu1  ;;  %v11880_v1 = vadd.f32 %v22418_v58, %v21691_v0  ;;  %v13797_v13 = vmax.f32 %v13765_v15, 0.0  ;;  %v22419_v47 = vunpack.c.h.bf16 %v21657_v39 }
 0x766   : > { %v13766_v37 = vadd.f32 %v22417_v62, %v13670_v26  ;;  %v13668_v59 = vadd.f32 %v21717_v51, %v13629_v57  ;;  %v13082_v30 = vadd.f32 %v17242_v40, %v12632_v18  ;;  %v13529_v24 = vadd.f32 %v21581_v46, %v13079_v11  ;;  %v21786_v57 = vpop.f32.mrf.mxu0 }
 0x767   : > { %v13634_v41 = vmul.f32 %v21700_v23, %v13531_v19  ;;  %v12935_v48 = vpop.f32.mrf.mxu1  ;;  %v11878_v17 = vadd.f32 %v21559_v35, %v21695_v38  ;;  %v13795_v0 = vmax.f32 %v13763_v54, 0.0  ;;  %v22422_v38 = vld [vmem:[#allocation65_spill] sm:$0xff] }
 0x768   : > { %v13798_v21 = vmax.f32 %v13766_v37, 0.0  ;;  %v13764_v45 = vadd.f32 %v22419_v47, %v13668_v59  ;;  %v13532_v61 = vadd.f32 %v21588_v32, %v13082_v30  ;;  %v13080_v26 = vadd.f32 %v12935_v48, %v12630_v14  ;;  %v22421_v37 = vld [vmem:[#allocation63_spill] sm:$0xff]  ;;  %v21807_v58 = vpop.f32.mrf.mxu0 }
 0x769   : > { %v13673_v29 = vadd.f32 %v21717_v51, %v13634_v41  ;;  %v13632_v15 = vmul.f32 %v21700_v23, %v13529_v24  ;;  %v17245_v46 = vpop.f32.mrf.mxu1  ;;  %v22420_v32 = vunpack.c.l.bf16 %v21660_v4  ;;  %v12636_v54 = vadd.f32 %v22422_v38, %v11880_v1  ;;  %v22423_v41 = vld [vmem:[#allocation53_spill] sm:$0xff]  ;;  %v22425_v1 = vld [vmem:[#allocation55_spill] sm:$0xff] }
 0x76a   : > { %v15108_v18 = vpack.c.bf16 %v13798_v21, %v13797_v13  ;;  %v13796_v19 = vmax.f32 %v13764_v45, 0.0  ;;  %v13635_v39 = vmul.f32 %v21700_v23, %v13532_v61  ;;  %v13530_v11 = vadd.f32 %v21599_v2, %v13080_v26  ;;  %v22424_v24 = vld [vmem:[#allocation49_spill] sm:$0xff]  ;;  %v22426_v21 = vld [vmem:[#allocation58_spill] sm:$0xff] }
 0x76b   : > { %v13769_v40 = vadd.f32 %v22420_v32, %v13673_v29  ;;  %v13671_v62 = vadd.f32 %v21717_v51, %v13632_v15  ;;  %v13085_v59 = vadd.f32 %v17245_v46, %v22421_v37  ;;  %v12948_v35 = vpop.f32.mrf.mxu1  ;;  %v21811_v48 = vadd.f32 %v22424_v24, %v22423_v41  ;;  %v22430_v37 = vld [vmem:[#allocation67_spill] sm:$0xff]  ;;  %v21841_v24 = vld [vmem:[%s18385_s19 + $0x58] sm:$0xff]  }
 0x76c   : > { %15221 = vst [vmem:[%s21801_s17 + $0x8] sm:$0xff] %v15108_v18   ;;  %v15103_v13 = vpack.c.bf16 %v13796_v19, %v13795_v0  ;;  %v13674_v30 = vadd.f32 %v21717_v51, %v13635_v39  ;;  %v13633_v2 = vmul.f32 %v21700_v23, %v13530_v11  ;;  %v13083_v14 = vadd.f32 %v12948_v35, %v21557_v33  ;;  %v22429_v19 = vld [vmem:[#allocation31_spill] sm:$0xff] }
 0x76d   : > { %v21815_v47 = vadd.f32 %v22426_v21, %v22425_v1  ;;  %v22427_v45 = vunpack.c.l.bf16 %v21669_v60  ;;  %v13535_v26 = vadd.f32 %v21606_v7, %v13085_v59  ;;  %v17246_v0 = vpop.f32.mrf.mxu1  ;;  %v22428_v29 = vunpack.c.h.bf16 %v21660_v4 }
 0x76e   : > { %15104 = vst [vmem:[%s21801_s17] sm:$0xff] %v15103_v13   ;;  %v13672_v15 = vadd.f32 %v21717_v51, %v13633_v2  ;;  %v13533_v46 = vadd.f32 %v21617_v8, %v13083_v14  ;;  %v13086_v18 = vadd.f32 %v17246_v0, %v12636_v54  ;;  %v11884_v39 = vadd.f32 %v22429_v19, %v21712_v36  ;;  %v21833_v54 = vpop.f32.mrf.mxu0 }
 0x76f   : > { %v13767_v61 = vadd.f32 %v22427_v45, %v13671_v62  ;;  %v13770_v33 = vadd.f32 %v22428_v29, %v13674_v30  ;;  %v13801_v11 = vmax.f32 %v13769_v40, 0.0  ;;  %v13638_v32 = vmul.f32 %v21700_v23, %v13535_v26  ;;  %v12951_v7 = vpop.f32.mrf.mxu1  ;;  %v22433_v45 = vld [vmem:[#allocation51_spill] sm:$0xff] }
 0x770   : > { %v12634_v62 = vadd.f32 %v22430_v37, %v11878_v17  ;;  %v22431_v4 = vunpack.c.h.bf16 %v21669_v60  ;;  %v13636_v38 = vmul.f32 %v21700_v23, %v13533_v46  ;;  %v13536_v8 = vadd.f32 %v21624_v52, %v13086_v18  ;;  %v21844_v52 = vld [vmem:[%s18385_s19 + $0x50] sm:$0xff]   ;;  %v21855_v18 = vpop.f32.mrf.mxu0 }
 0x771   : > { %v13802_v59 = vmax.f32 %v13770_v33, 0.0  ;;  %v11882_v36 = vadd.f32 %v21577_v50, %v21734_v25  ;;  %v13677_v40 = vadd.f32 %v21717_v51, %v13638_v32  ;;  %v17249_v13 = vpop.f32.mrf.mxu1  ;;  %v15071_v30 = vunpack.c.h.bf16 %v21757_v16 }
 0x772   : > { %v13768_v35 = vadd.f32 %v22431_v4, %v13672_v15  ;;  %v13084_v17 = vadd.f32 %v12951_v7, %v12634_v62  ;;  %v13799_v2 = vmax.f32 %v13767_v61, 0.0  ;;  %v13639_v41 = vmul.f32 %v21700_v23, %v13536_v8  ;;  %v22434_v15 = vld [vmem:[#allocation69_spill] sm:$0xff]  ;;  %v22436_v4 = vld [vmem:[#allocation70_spill] sm:$0xff] }
 0x773   : > { %v15118_v14 = vpack.c.bf16 %v13802_v59, %v13801_v11  ;;  %v22432_v1 = vunpack.c.l.bf16 %v21684_v5  ;;  %v13675_v50 = vadd.f32 %v21717_v51, %v13636_v38  ;;  %v13089_v26 = vadd.f32 %v17249_v13, %v22433_v45  ;;  %v12964_v0 = vpop.f32.mrf.mxu1 }
 0x774   : > { %v13800_v60 = vmax.f32 %v13768_v35, 0.0  ;;  %v13534_v25 = vadd.f32 %v21635_v27, %v13084_v17  ;;  %v13678_v29 = vadd.f32 %v21717_v51, %v13639_v41  ;;  %v13087_v33 = vadd.f32 %v12964_v0, %v21575_v31 }
 0x775   : > { %v13773_v21 = vadd.f32 %v22432_v1, %v13677_v40  ;;  %15223 = vst [vmem:[%s21801_s17 + $0x18] sm:$0xff] %v15118_v14   ;;  %v12640_v46 = vadd.f32 %v22434_v15, %v11884_v39  ;;  %v13539_v11 = vadd.f32 %v21645_v55, %v13089_v26  ;;  %v17250_v32 = vpop.f32.mrf.mxu1  ;;  %v15082_v27 = vunpack.c.l.bf16 %v21841_v24  ;;  %v22441_v15 = vld [vmem:[#allocation60_spill] sm:$0xff] }
 0x776   : > { %v15113_v61 = vpack.c.bf16 %v13800_v60, %v13799_v2  ;;  %v13637_v19 = vmul.f32 %v21700_v23, %v13534_v25  ;;  %v15078_v37 = vunpack.c.l.bf16 %v21844_v52  ;;  %v22435_v62 = vunpack.c.h.bf16 %v21684_v5 }
 0x777   : > { %v13537_v59 = vadd.f32 %v21671_v53, %v13087_v33  ;;  %v13090_v31 = vadd.f32 %v17250_v32, %v12640_v46  ;;  %v12638_v39 = vadd.f32 %v22436_v4, %v11882_v36  ;;  %v13805_v35 = vmax.f32 %v13773_v21, 0.0  ;;  %v12967_v17 = vpop.f32.mrf.mxu1  ;;  %v21872_v53 = vpop.f32.mrf.mxu0  ;;  %v22438_v36 = vld [vmem:[#allocation36_spill] sm:$0xff] }
 0x778   : > { %15222 = vst [vmem:[%s21801_s17 + $0x10] sm:$0xff] %v15113_v61   ;;  %v13774_v7 = vadd.f32 %v22435_v62, %v13678_v29  ;;  %v22437_v38 = vunpack.c.l.bf16 %v21687_v28  ;;  %v13676_v55 = vadd.f32 %v21717_v51, %v13637_v19  ;;  %v13642_v40 = vmul.f32 %v21700_v23, %v13539_v11 }
 0x779   : > { %v13640_v2 = vmul.f32 %v21700_v23, %v13537_v59  ;;  %v13540_v5 = vadd.f32 %v21708_v34, %v13090_v31  ;;  %v13088_v14 = vadd.f32 %v12967_v17, %v12638_v39  ;;  %v11888_v60 = vadd.f32 %v22438_v36, %v21738_v63  ;;  %v17253_v25 = vpop.f32.mrf.mxu1  ;;  %v17306_v32 = vpop.f32.mrf.mxu0  ;;  %v22443_v31 = vld [vmem:[#allocation46_spill] sm:$0xff] }
 0x77a   : > { %v13771_v8 = vadd.f32 %v22437_v38, %v13675_v50  ;;  %v13806_v13 = vmax.f32 %v13774_v7, 0.0  ;;  %v11886_v41 = vadd.f32 %v21595_v22, %v21751_v42  ;;  %v22439_v1 = vunpack.c.h.bf16 %v21687_v28 }
 0x77b   : > { %v13681_v50 = vadd.f32 %v21717_v51, %v13642_v40  ;;  %v13679_v26 = vadd.f32 %v21717_v51, %v13640_v2  ;;  %v13643_v34 = vmul.f32 %v21700_v23, %v13540_v5  ;;  %v13538_v0 = vadd.f32 %v21747_v6, %v13088_v14  ;;  %v12980_v42 = vpop.f32.mrf.mxu1 }
 0x77c   : > { %v13772_v21 = vadd.f32 %v22439_v1, %v13676_v55  ;;  %v15128_v45 = vpack.c.bf16 %v13806_v13, %v13805_v35  ;;  %v13803_v61 = vmax.f32 %v13771_v8, 0.0  ;;  %v22440_v63 = vunpack.c.l.bf16 %v21726_v10 }
 0x77d   : > { %v13093_v22 = vadd.f32 %v17253_v25, %v22441_v15  ;;  %v13682_v28 = vadd.f32 %v21717_v51, %v13643_v34  ;;  %v13641_v46 = vmul.f32 %v21700_v23, %v13538_v0  ;;  %v13091_v19 = vadd.f32 %v12980_v42, %v21593_v9  ;;  %v17254_v39 = vpop.f32.mrf.mxu1  ;;  %v22445_v9 = vld [vmem:[#allocation52_spill] sm:$0xff]  ;;  %v22448_v0 = vld [vmem:[#allocation50_spill] sm:$0xff] }
 0x77e   : > { %v13804_v29 = vmax.f32 %v13772_v21, 0.0  ;;  %v13777_v33 = vadd.f32 %v22440_v63, %v13681_v50  ;;  %15225 = vst [vmem:[%s21801_s17 + $0x28] sm:$0xff] %v15128_v45   ;;  %v15083_v11 = vunpack.c.h.bf16 %v21841_v24  ;;  %v22442_v62 = vunpack.c.l.bf16 %v21729_v49 }
 0x77f   : > { %v13543_v59 = vadd.f32 %v21770_v3, %v13093_v22  ;;  %v12644_v4 = vadd.f32 %v22443_v31, %v11888_v60  ;;  %v22444_v35 = vunpack.c.h.bf16 %v21726_v10  ;;  %v13680_v8 = vadd.f32 %v21717_v51, %v13641_v46  ;;  %v12983_v5 = vpop.f32.mrf.mxu1  ;;  %v22451_v22 = vld [vmem:[#allocation40_spill] sm:$0xff] }
 0x780   : > { %v15123_v6 = vpack.c.bf16 %v13804_v29, %v13803_v61  ;;  %v13775_v7 = vadd.f32 %v22442_v62, %v13679_v26  ;;  %v13541_v55 = vadd.f32 %v21786_v57, %v13091_v19  ;;  %v12642_v40 = vadd.f32 %v22445_v9, %v11886_v41  ;;  %v13449_v57 = vpop.f32.mrf.mxu0  ;;  %v22447_v26 = vld [vmem:[#allocation62_spill] sm:$0xff]  ;;  %v22449_v61 = vld [vmem:[#allocation64_spill] sm:$0xff] }
 0x781   : > { %v13778_v38 = vadd.f32 %v22444_v35, %v13682_v28  ;;  %v11892_v17 = vadd.f32 %v21608_v44, %v21811_v48  ;;  %v13809_v13 = vmax.f32 %v13777_v33, 0.0  ;;  %v13646_v2 = vmul.f32 %v21700_v23, %v13543_v59  ;;  %v17257_v21 = vpop.f32.mrf.mxu1  ;;  %v22452_v28 = vld [vmem:[#allocation27_spill] sm:$0xff]  ;;  %v22456_v9 = vld [vmem:[#allocation44_spill] sm:$0xff] }
 0x782   : > { %15224 = vst [vmem:[%s21801_s17 + $0x20] sm:$0xff] %v15123_v6   ;;  %v13094_v3 = vadd.f32 %v17254_v39, %v12644_v4  ;;  %v13776_v10 = vadd.f32 %v15063_v12, %v13680_v8  ;;  %v13644_v36 = vmul.f32 %v21700_v23, %v13541_v55  ;;  %v13092_v60 = vadd.f32 %v12983_v5, %v12642_v40  ;;  %v22446_v12 = vld [vmem:[#allocation32_spill] sm:$0xff]  ;;  %v17309_v46 = vpop.f32.mrf.mxu0 }
 0x783   : > { %v13810_v14 = vmax.f32 %v13778_v38, 0.0  ;;  %v11890_v41 = vadd.f32 %v21613_v56, %v21815_v47  ;;  %v13807_v1 = vmax.f32 %v13775_v7, 0.0  ;;  %v13685_v44 = vadd.f32 %v21717_v51, %v13646_v2  ;;  %v22450_v47 = vld [vmem:[#allocation37_spill] sm:$0xff]  ;;  %v12996_v33 = vpop.f32.mrf.mxu1  ;;  %v22455_v8 = vld [vmem:[#allocation28_spill] sm:$0xff] }
 0x784   : > { %v13544_v48 = vadd.f32 %v21807_v58, %v13094_v3  ;;  %v13808_v25 = vmax.f32 %v13776_v10, 0.0  ;;  %v13683_v45 = vadd.f32 %v21717_v51, %v13644_v36  ;;  %v13542_v49 = vadd.f32 %v21833_v54, %v13092_v60  ;;  %v13462_v36 = vpop.f32.mrf.mxu0 }
 0x785   : > { %v15138_v50 = vpack.c.bf16 %v13810_v14, %v13809_v13  ;;  %v11446_v34 = vadd.f32 %v22447_v26, %v22446_v12  ;;  %v11444_v29 = vadd.f32 %v22449_v61, %v22448_v0  ;;  %v13097_v63 = vadd.f32 %v17257_v21, %v22450_v47  ;;  %v17258_v4 = vpop.f32.mrf.mxu1  ;;  %v15217_v61 = vld [vmem:[%s18385_s19 + $0x60] sm:$0xff]  }
 0x786   : > { %v13647_v56 = vmul.f32 %v21700_v23, %v13544_v48  ;;  %v15133_v58 = vpack.c.bf16 %v13808_v25, %v13807_v1  ;;  %v13645_v15 = vmul.f32 %v21700_v23, %v13542_v49  ;;  %v13095_v42 = vadd.f32 %v12996_v33, %v22451_v22  ;;  %v22460_v33 = vld [vmem:[#allocation45_spill] sm:$0xff] }
 0x787   : > { %15227 = vst [vmem:[%s21801_s17 + $0x38] sm:$0xff] %v15138_v50   ;;  %v12648_v54 = vadd.f32 %v22452_v28, %v11892_v17  ;;  %v22453_v19 = vunpack.c.l.bf16 %v21745_v43  ;;  %v22454_v62 = vunpack.c.l.bf16 %v21757_v16  ;;  %v13547_v31 = vadd.f32 %v21855_v18, %v13097_v63  ;;  %v22457_v17 = vld [vmem:[#allocation57_spill] sm:$0xff]  ;;  %v12999_v18 = vpop.f32.mrf.mxu1 }
 0x788   : > { %v13686_v59 = vadd.f32 %v21717_v51, %v13647_v56  ;;  %15226 = vst [vmem:[%s21801_s17 + $0x30] sm:$0xff] %v15133_v58   ;;  %v13684_v39 = vadd.f32 %v21717_v51, %v13645_v15  ;;  %v13545_v35 = vadd.f32 %v21872_v53, %v13095_v42  ;;  %v12646_v55 = vadd.f32 %v22455_v8, %v11890_v41 }
 0x789   : > { %v13781_v6 = vadd.f32 %v22453_v19, %v13685_v44  ;;  %v13779_v7 = vadd.f32 %v22454_v62, %v13683_v45  ;;  %v13098_v38 = vadd.f32 %v17258_v4, %v12648_v54  ;;  %v11896_v40 = vadd.f32 %v22456_v9, %v11446_v34  ;;  %v17261_v43 = vpop.f32.mrf.mxu1  ;;  %v22458_v45 = vld [vmem:[#allocation41_spill] sm:$0xff] }
 0x78a   : > { %v11894_v13 = vadd.f32 %v22457_v17, %v11444_v29  ;;  %v13782_v2 = vadd.f32 %v15075_v20, %v13686_v59  ;;  %v13650_v3 = vmul.f32 %v21700_v23, %v13547_v31  ;;  %v13780_v5 = vadd.f32 %v15071_v30, %v13684_v39  ;;  %v15218_v30 = vld [vmem:[%s18385_s19 + $0x68] sm:$0xff]   ;;  %v22461_v54 = vld [vmem:[#allocation33_spill] sm:$0xff] }
 0x78b   : > { %v13648_v14 = vmul.f32 %v21700_v23, %v13545_v35  ;;  %v13548_v53 = vadd.f32 %v17306_v32, %v13098_v38  ;;  %v13096_v10 = vadd.f32 %v12999_v18, %v12646_v55  ;;  %v13813_v60 = vmax.f32 %v13781_v6, 0.0  ;;  %v13012_v12 = vpop.f32.mrf.mxu1  ;;  %v22459_v29 = vld [vmem:[#allocation66_spill] sm:$0xff] }
 0x78c   : > { %v13811_v41 = vmax.f32 %v13779_v7, 0.0  ;;  %v13814_v1 = vmax.f32 %v13782_v2, 0.0  ;;  %v13689_v44 = vadd.f32 %v21717_v51, %v13650_v3  ;;  %v13812_v20 = vmax.f32 %v13780_v5, 0.0 }
 0x78d   : > { %v13687_v48 = vadd.f32 %v21717_v51, %v13648_v14  ;;  %v13651_v21 = vmul.f32 %v21700_v23, %v13548_v53  ;;  %v13546_v16 = vadd.f32 %v13449_v57, %v13096_v10  ;;  %v15079_v25 = vunpack.c.h.bf16 %v21844_v52  ;;  %v17310_v57 = vpop.f32.mrf.mxu0  ;;  %v17262_v15 = vpop.f32.mrf.mxu1 }
 0x78e   : > { %v15148_v50 = vpack.c.bf16 %v13814_v1, %v13813_v60  ;;  %v13785_v32 = vadd.f32 %v15082_v27, %v13689_v44  ;;  %v13101_v49 = vadd.f32 %v17261_v43, %v22458_v45  ;;  %v15143_v26 = vpack.c.bf16 %v13812_v20, %v13811_v41  ;;  %v22462_v1 = vld [vmem:[#allocation47_spill] sm:$0xff]  ;;  %v22463_v44 = vld [vmem:[#allocation25_spill] sm:$0xff]  ;;  %v22464_v20 = vld [vmem:[#allocation68_spill] sm:$0xff] }
 0x78f   : > { %v13690_v34 = vadd.f32 %v21717_v51, %v13651_v21  ;;  %v13649_v0 = vmul.f32 %v21700_v23, %v13546_v16  ;;  %v12652_v56 = vadd.f32 %v22459_v29, %v11896_v40  ;;  %v13783_v47 = vadd.f32 %v15078_v37, %v13687_v48  ;;  %v13015_v37 = vpop.f32.mrf.mxu1  ;;  %v13465_v39 = vpop.f32.mrf.mxu0  ;;  %v22465_v48 = vld [vmem:[#allocation59_spill] sm:$0xff] }
 0x790   : > { %15229 = vst [vmem:[%s21801_s17 + $0x48] sm:$0xff] %v15148_v50   ;;  %v13551_v27 = vadd.f32 %v17309_v46, %v13101_v49  ;;  %v15090_v63 = vunpack.c.l.bf16 %v15218_v30  ;;  %v13099_v58 = vadd.f32 %v13012_v12, %v22460_v33  ;;  %15228 = vst [vmem:[%s21801_s17 + $0x40] sm:$0xff] %v15143_v26   ;;  %v12650_v19 = vadd.f32 %v22461_v54, %v11894_v13  ;;  %v22466_v49 = vld [vmem:[#allocation54_spill] sm:$0xff] }
 0x791   : > { %v13786_v22 = vadd.f32 %v15083_v11, %v13690_v34  ;;  %v13688_v42 = vadd.f32 %v21717_v51, %v13649_v0  ;;  %v13102_v28 = vadd.f32 %v17262_v15, %v12652_v56  ;;  %v13817_v6 = vmax.f32 %v13785_v32, 0.0  ;;  %v17265_v8 = vpop.f32.mrf.mxu1  ;;  %v22467_v12 = vld [vmem:[#allocation34_spill] sm:$0xff] }
 0x792   : > { %v13654_v62 = vmul.f32 %v21700_v23, %v13551_v27  ;;  %v13549_v7 = vadd.f32 %v13462_v36, %v13099_v58  ;;  %v15086_v52 = vunpack.c.l.bf16 %v15217_v61  ;;  %v13100_v4 = vadd.f32 %v13015_v37, %v12650_v19  ;;  %v22469_v27 = vld [vmem:[#allocation61_spill] sm:$0xff] }
 0x793   : > { %v13818_v46 = vmax.f32 %v13786_v22, 0.0  ;;  %v13784_v59 = vadd.f32 %v15079_v25, %v13688_v42  ;;  %v13552_v31 = vadd.f32 %v17310_v57, %v13102_v28  ;;  %v13815_v35 = vmax.f32 %v13783_v47, 0.0  ;;  %v13028_v3 = vpop.f32.mrf.mxu1  ;;  %v15220_v57 = vld [vmem:[%s18385_s19 + $0x78] sm:$0xff]   ;;  %v22468_v47 = vld [vmem:[#allocation29_spill] sm:$0xff]  ;;  %v15219_v28 = vld [vmem:[%s18385_s19 + $0x70] sm:$0xff]  }
 0x794   : > { %v13693_v24 = vadd.f32 %v21717_v51, %v13654_v62  ;;  %v13652_v11 = vmul.f32 %v21700_v23, %v13549_v7  ;;  %v15091_v38 = vunpack.c.h.bf16 %v15218_v30  ;;  %v13550_v17 = vadd.f32 %v13465_v39, %v13100_v4 }
 0x795   : > { %v15158_v55 = vpack.c.bf16 %v13818_v46, %v13817_v6  ;;  %v13816_v9 = vmax.f32 %v13784_v59, 0.0  ;;  %v13655_v40 = vmul.f32 %v21700_v23, %v13552_v31  ;;  %v15087_v2 = vunpack.c.h.bf16 %v15217_v61  ;;  %v17266_v10 = vpop.f32.mrf.mxu1 }
 0x796   : > { %v13691_v13 = vadd.f32 %v21717_v51, %v13652_v11  ;;  %v13789_v5 = vadd.f32 %v15090_v63, %v13693_v24  ;;  %v13653_v53 = vmul.f32 %v21700_v23, %v13550_v17  ;;  %v12655_v43 = vadd.f32 %v22463_v44, %v22462_v1 }
 0x797   : > { %15231 = vst [vmem:[%s21801_s17 + $0x58] sm:$0xff] %v15158_v55   ;;  %v15153_v18 = vpack.c.bf16 %v13816_v9, %v13815_v35  ;;  %v13694_v14 = vadd.f32 %v21717_v51, %v13655_v40  ;;  %v12653_v21 = vadd.f32 %v22465_v48, %v22464_v20  ;;  %v13031_v16 = vpop.f32.mrf.mxu1  ;;  %v12656_v26 = vadd.f32 %v22467_v12, %v22466_v49 }
 0x798   : > { %v13787_v36 = vadd.f32 %v15086_v52, %v13691_v13  ;;  %v13692_v41 = vadd.f32 %v21717_v51, %v13653_v53  ;;  %v13821_v30 = vmax.f32 %v13789_v5, 0.0  ;;  %v13105_v25 = vadd.f32 %v17265_v8, %v12655_v43 }
 0x799   : > { %15230 = vst [vmem:[%s21801_s17 + $0x50] sm:$0xff] %v15153_v18   ;;  %v13790_v60 = vadd.f32 %v15091_v38, %v13694_v14  ;;  %v13103_v45 = vadd.f32 %v13028_v3, %v12653_v21  ;;  %v17313_v34 = vpop.f32.mrf.mxu1  ;;  %v12654_v63 = vadd.f32 %v22469_v27, %v22468_v47  ;;  %v13106_v15 = vadd.f32 %v17266_v10, %v12656_v26 }
 0x79a   : > { %v13788_v32 = vadd.f32 %v15087_v2, %v13692_v41  ;;  %v13819_v0 = vmax.f32 %v13787_v36, 0.0  ;;  %v13555_v56 = vadd.f32 %v17313_v34, %v13105_v25  ;;  %v15098_v54 = vunpack.c.l.bf16 %v15220_v57 }
 0x79b   : > { %v13822_v50 = vmax.f32 %v13790_v60, 0.0  ;;  %v13478_v33 = vpop.f32.mrf.mxu1  ;;  %v13104_v6 = vadd.f32 %v13031_v16, %v12654_v63  ;;  %v15094_v37 = vunpack.c.l.bf16 %v15219_v28  ;;  %v15099_v4 = vunpack.c.h.bf16 %v15220_v57 }
 0x79c   : > { %v13820_v29 = vmax.f32 %v13788_v32, 0.0  ;;  %v13658_v22 = vmul.f32 %v21700_v23, %v13555_v56  ;;  %v13553_v42 = vadd.f32 %v13478_v33, %v13103_v45  ;;  %v15095_v38 = vunpack.c.h.bf16 %v15219_v28 }
 0x79d   : > { %v15168_v61 = vpack.c.bf16 %v13822_v50, %v13821_v30  ;;  %v17314_v19 = vpop.f32.mrf.mxu1 }
 0x79e   : > { %v15163_v58 = vpack.c.bf16 %v13820_v29, %v13819_v0  ;;  %v13697_v62 = vadd.f32 %v21717_v51, %v13658_v22  ;;  %v13656_v7 = vmul.f32 %v21700_v23, %v13553_v42  ;;  %v13556_v52 = vadd.f32 %v17314_v19, %v13106_v15 }
 0x79f   : > { %15233 = vst [vmem:[%s21801_s17 + $0x68] sm:$0xff] %v15168_v61   ;;  %v13481_v46 = vpop.f32.mrf.mxu1 }
 0x7a0   : > { %15232 = vst [vmem:[%s21801_s17 + $0x60] sm:$0xff] %v15163_v58   ;;  %v13695_v59 = vadd.f32 %v21717_v51, %v13656_v7  ;;  %v13659_v31 = vmul.f32 %v21700_v23, %v13556_v52  ;;  %v13554_v39 = vadd.f32 %v13481_v46, %v13104_v6  ;;  %v13793_v35 = vadd.f32 %v15098_v54, %v13697_v62 }
 0x7a2   : > { %v13698_v24 = vadd.f32 %v21717_v51, %v13659_v31  ;;  %v13657_v11 = vmul.f32 %v21700_v23, %v13554_v39  ;;  %v13791_v8 = vadd.f32 %v15094_v37, %v13695_v59  ;;  %v13825_v40 = vmax.f32 %v13793_v35, 0.0 }
 0x7a4   : > { %v13794_v55 = vadd.f32 %v15099_v4, %v13698_v24  ;;  %v13696_v9 = vadd.f32 %v21717_v51, %v13657_v11  ;;  %v13823_v2 = vmax.f32 %v13791_v8, 0.0 }
 0x7a6   : > { %v13826_v17 = vmax.f32 %v13794_v55, 0.0  ;;  %v13792_v13 = vadd.f32 %v15095_v38, %v13696_v9 }
 0x7a8   : > { %v15178_v3 = vpack.c.bf16 %v13826_v17, %v13825_v40  ;;  %v13824_v18 = vmax.f32 %v13792_v13, 0.0 }
 0x7aa   : > { %15235 = vst [vmem:[%s21801_s17 + $0x78] sm:$0xff] %v15178_v3   ;;  %v15173_v23 = vpack.c.bf16 %v13824_v18, %v13823_v2 }
 0x7ac   : > { %15234 = vst [vmem:[%s21801_s17 + $0x70] sm:$0xff] %v15173_v23  }
 0x7ad   : > { %18087 = shalt.err (!%p18084_p12)
}
 0x7ae   : > { %s18088_s12 = scalar_lea.hbm %s21998_s24, 2048  ;;  %s18092_s18 = scalar_lea.hbm %s22471_s13, 4096 }
 0x7af   : > { %p18089_p13 = scmp.ne.s32.totalorder %s21998_s24, %s18088_s12  ;;  %p18093_p10 = scmp.lt.s32.totalorder %s21998_s24, %s22471_s13 }
 0x7b0   : > { %p18094_p11 = scmp.lt.s32.totalorder %s18092_s18, %s18088_s12 }
 0x7b1   : > { %p18090_p0 = pnand %p18089_p13, %p18322_p3 }
 0x7b2   : > { %p18095_p1 = por %p18094_p11, %p18093_p10 }
 0x7b3   : > { %p18091_p5 = pneg %p18090_p0 }
 0x7b5   : > { %p18096_p4 = pnand %p18095_p1, %p18091_p5 }
 0x7b7   : > { %18099 = shalt.err (!%p18096_p4)
}
 0x7b8   : > { %s18178_s3 = smov 64   ;;  %s18179_s8 = smov 4  }
 0x7b9   : > { %17346 = dma.vmem_to_hbm [thread:$0]  (%p18322_p3), %s22000_s15, 2048, %s21998_s24, %s13988_s25, %s18178_s3, %s18178_s3, %s18179_s8  }
 0x7ba PF: > { %s22472_s27 = sld [smem:[#allocation19_spill]]  ;;  %p22474_p8 = scmp.ge.s32.totalorder %s18166_s10, 2 }
 0x7bc   : > { %p17363_p7 = pnand %p22474_p8, %p18270_p6 }
 0x7be   : > { %p17364_p2 = pneg %p17363_p7 }
 0x7c0   : > { %s14019_s29 = sand.u32 1, %s22472_s27  }
 0x7c1   : > { %s14020_s19 = scalar_lea.sflag [#allocation7], %s14019_s29 }
 0x7c2   : > { %18141 = dma.done.wait (%p17364_p2), %s14020_s19, 2048  }
 0x7c3   : > { %18143 = vsyncadd (%p17364_p2), %s14020_s19, 4294965248  ;;  %s28_s10 = sadd.s32 1, %s18166_s10   ;;  %s22475_s11 = sld [smem:[#allocation20_spill]] }
 0x7c4   : > { %p25_p9 = scmp.ge.s32.totalorder %s28_s10, 4   ;;  %s22476_s29 = sld [smem:[#allocation24_spill]] }
 0x7c5   : > { %s22477_s22 = sld [smem:[#allocation22_spill]]  ;;  %s22478_s27 = smov %s18150_s28 }
 0x7c6   : > { %s22480_s30 = smov %s18162_s9 }
 0x7c7   :  { %27 = sbr.rel (!%p25_p9) target bundleno = 14 (0xe), region = 141 }
 0x7c9   : > { %s22479_s28 = smov %s22475_s11 }
 0x7cb   : > { %s22481_s9 = smov %s22477_s22 }
 0x7cc   :  { %14025 = vsyncpa [#allocation6], 1 }
 0x7cd   :  { %14027 = vsyncpa [#allocation6 + $0x1], 1 }
 0x7ce   :  { %14028 = vsyncpa [#allocation9], 1 }
 0x7cf   :  { %14030 = vsyncpa [#allocation9 + $0x1], 1 }
 0x7d0   :  { %14031 = vsyncpa [#allocation12], 1 }
 0x7d1   :  { %14032 = vsyncpa [#allocation7], 1 }
 0x7d2   :  { %14034 = vsyncpa [#allocation7 + $0x1], 1 }

</bundles_post_ra>
